<compile_context>
chip_gen: v6e
topology: v6e:2x2x1
jax: 0.10.0
libtpu: 0.0.40
codegen_flags: <defaults>
</compile_context>

<pallas_src>
import math

import jax
import jax.numpy as jnp
from jax.experimental import pallas as pl
from jax.experimental.pallas import tpu as pltpu

BN_EPS = 1e-5
# <= 48 MiB so tile choices remain valid on v7x (64 MiB VMEM/TC) with headroom.
_VMEM_LIMIT = 48 * 1024 * 1024


def _round_up(v, m):
    return ((v + m - 1) // m) * m


def _pick_tile(padded_dim, candidates):
    """Largest candidate tile that evenly divides the padded dimension."""
    for t in candidates:
        if padded_dim % t == 0:
            return t
    return candidates[-1]


# ----------------------------------------------------------------------------
# Pallas kernels
# ----------------------------------------------------------------------------
def _make_conv_kernel(do_relu: bool, has_residual: bool):
    """Tiled matmul + BN-affine (+ residual) (+ ReLU) with f32 accumulator."""
    if has_residual:
        def kernel(p_ref, w_ref, s_ref, b_ref, r_ref, o_ref, acc_ref):
            @pl.when(pl.program_id(2) == 0)
            def _():
                acc_ref[...] = jnp.zeros_like(acc_ref)

            acc_ref[...] += jnp.dot(p_ref[...], w_ref[...],
                                    preferred_element_type=jnp.float32)

            @pl.when(pl.program_id(2) == pl.num_programs(2) - 1)
            def _():
                out = acc_ref[...] * s_ref[...] + b_ref[...] + r_ref[...]
                if do_relu:
                    out = jnp.maximum(out, 0.0)
                o_ref[...] = out
    else:
        def kernel(p_ref, w_ref, s_ref, b_ref, o_ref, acc_ref):
            @pl.when(pl.program_id(2) == 0)
            def _():
                acc_ref[...] = jnp.zeros_like(acc_ref)

            acc_ref[...] += jnp.dot(p_ref[...], w_ref[...],
                                    preferred_element_type=jnp.float32)

            @pl.when(pl.program_id(2) == pl.num_programs(2) - 1)
            def _():
                out = acc_ref[...] * s_ref[...] + b_ref[...]
                if do_relu:
                    out = jnp.maximum(out, 0.0)
                o_ref[...] = out
    return kernel


def _maxpool_kernel(ee_ref, eo_ref, oe_ref, oo_ref, o_ref):
    """9-tap 3x3/stride-2 max from 4 parity planes (unit-stride slices only)."""
    Ho, Wo = o_ref.shape[1], o_ref.shape[2]
    ee = ee_ref[0]   # rows even, cols even  -> taps (i,j) in {0,2}x{0,2}
    eo = eo_ref[0]   # rows even, cols odd   -> taps (i,j) in {0,2}x{1}
    oe = oe_ref[0]   # rows odd,  cols even  -> taps (i,j) in {1}x{0,2}
    oo = oo_ref[0]   # rows odd,  cols odd   -> tap  (1,1)
    m = ee[0:Ho, 0:Wo, :]
    m = jnp.maximum(m, ee[0:Ho, 1:Wo + 1, :])
    m = jnp.maximum(m, ee[1:Ho + 1, 0:Wo, :])
    m = jnp.maximum(m, ee[1:Ho + 1, 1:Wo + 1, :])
    m = jnp.maximum(m, eo[0:Ho, 0:Wo, :])
    m = jnp.maximum(m, eo[1:Ho + 1, 0:Wo, :])
    m = jnp.maximum(m, oe[0:Ho, 0:Wo, :])
    m = jnp.maximum(m, oe[0:Ho, 1:Wo + 1, :])
    m = jnp.maximum(m, oo[0:Ho, 0:Wo, :])
    o_ref[0] = m


# ----------------------------------------------------------------------------
# Pallas call wrappers
# ----------------------------------------------------------------------------
def _fused_conv_matmul(patches, w2d, scale, bias, residual=None, relu=True):
    """patches:(M,K) bf16, w2d:(K,N) bf16, scale/bias:(N,) f32, residual:(M,N)."""
    M, K = patches.shape
    N = w2d.shape[1]
    Mp = _round_up(M, 16)
    Kp = _round_up(K, 128)
    Np = _round_up(N, 128)
    TM = _pick_tile(Mp, (256, 128, 64, 32, 16))
    TK = _pick_tile(Kp, (512, 256, 128))
    TN = _pick_tile(Np, (256, 128))

    p = jnp.pad(patches.astype(jnp.bfloat16), ((0, Mp - M), (0, Kp - K)))
    w = jnp.pad(w2d.astype(jnp.bfloat16), ((0, Kp - K), (0, Np - N)))
    s = jnp.pad(scale.astype(jnp.float32).reshape(1, -1),
                ((0, 0), (0, Np - N)))
    b = jnp.pad(bias.astype(jnp.float32).reshape(1, -1),
                ((0, 0), (0, Np - N)))

    args = [p, w, s, b]
    in_specs = [
        pl.BlockSpec((TM, TK), lambda i, j, k: (i, k)),
        pl.BlockSpec((TK, TN), lambda i, j, k: (k, j)),
        pl.BlockSpec((1, TN), lambda i, j, k: (0, j)),
        pl.BlockSpec((1, TN), lambda i, j, k: (0, j)),
    ]
    bytes_accessed = Mp * Kp * 2 + Kp * Np * 2 + Mp * Np * 4 + 2 * Np * 4
    if residual is not None:
        r = jnp.pad(residual.astype(jnp.float32), ((0, Mp - M), (0, Np - N)))
        args.append(r)
        in_specs.append(pl.BlockSpec((TM, TN), lambda i, j, k: (i, j)))
        bytes_accessed += Mp * Np * 4

    kernel = _make_conv_kernel(relu, residual is not None)
    out = pl.pallas_call(
        kernel,
        grid=(Mp // TM, Np // TN, Kp // TK),
        in_specs=in_specs,
        out_specs=pl.BlockSpec((TM, TN), lambda i, j, k: (i, j)),
        out_shape=jax.ShapeDtypeStruct((Mp, Np), jnp.float32),
        scratch_shapes=[pltpu.VMEM((TM, TN), jnp.float32)],
        compiler_params=pltpu.CompilerParams(
            dimension_semantics=("parallel", "parallel", "arbitrary"),
            vmem_limit_bytes=_VMEM_LIMIT),
        cost_estimate=pl.CostEstimate(
            flops=2 * Mp * Kp * Np,
            transcendentals=0,
            bytes_accessed=bytes_accessed),
    )(*args)
    return out[:M, :N]


def _maxpool_3x3_s2(x):
    """PyTorch nn.MaxPool2d(kernel_size=3, stride=2, padding=1) on NHWC."""
    N, H, W, C = x.shape
    Ho = (H + 2 - 3) // 2 + 1
    Wo = (W + 2 - 3) // 2 + 1
    # -inf pad by 1 on each side; pad one extra row/col if needed so the
    # padded extents are even (required by the parity split).
    xpad = jnp.pad(x, ((0, 0), (1, 1 + (H % 2)), (1, 1 + (W % 2)), (0, 0)),
                   constant_values=-jnp.inf)
    Hp, Wp = xpad.shape[1], xpad.shape[2]
    xr = xpad.reshape(N, Hp // 2, 2, Wp // 2, 2, C)
    ee = xr[:, :, 0, :, 0, :]
    eo = xr[:, :, 0, :, 1, :]
    oe = xr[:, :, 1, :, 0, :]
    oo = xr[:, :, 1, :, 1, :]

    plane_spec = pl.BlockSpec((1, Hp // 2, Wp // 2, C),
                              lambda n: (n, 0, 0, 0))
    out = pl.pallas_call(
        _maxpool_kernel,
        grid=(N,),
        in_specs=[plane_spec, plane_spec, plane_spec, plane_spec],
        out_specs=pl.BlockSpec((1, Ho, Wo, C), lambda n: (n, 0, 0, 0)),
        out_shape=jax.ShapeDtypeStruct((N, Ho, Wo, C), jnp.float32),
        compiler_params=pltpu.CompilerParams(
            dimension_semantics=("parallel",),
            vmem_limit_bytes=_VMEM_LIMIT),
    )(ee, eo, oe, oo)
    return out


# ----------------------------------------------------------------------------
# Glue: im2col, conv+bn(+relu)(+residual), basic block
# ----------------------------------------------------------------------------
def _extract_patches(x, kh, kw, stride, pad):
    """x: (N,H,W,C) f32 -> bf16 patches (N*Ho*Wo, kh*kw*C), ordered (ki,kj,c)."""
    N, H, W, C = x.shape
    xb = x.astype(jnp.bfloat16)
    if pad:
        xb = jnp.pad(xb, ((0, 0), (pad, pad), (pad, pad), (0, 0)))
    Ho = (H + 2 * pad - kh) // stride + 1
    Wo = (W + 2 * pad - kw) // stride + 1
    cols = []
    for i in range(kh):
        for j in range(kw):
            cols.append(xb[:, i:i + stride * Ho:stride,
                           j:j + stride * Wo:stride, :])
    patches = jnp.concatenate(cols, axis=-1)  # (N, Ho, Wo, kh*kw*C)
    return patches.reshape(N * Ho * Wo, kh * kw * C), Ho, Wo


def _conv_bn(x, w2d, bn, k, stride, pad, relu, residual=None):
    """x: NHWC f32.  w2d: (k*k*Cin, O) bf16 (precomputed).  bn: (scale, bias)."""
    N = x.shape[0]
    O = w2d.shape[1]
    patches, Ho, Wo = _extract_patches(x, k, k, stride, pad)
    scale, bias = bn
    res2d = None if residual is None else residual.reshape(-1, O)
    out2d = _fused_conv_matmul(patches, w2d, scale, bias, res2d, relu)
    return out2d.reshape(N, Ho, Wo, O)


def _basic_block(x, blk, stride):
    identity = x
    out = _conv_bn(x, blk['conv1'], blk['bn1'], k=3, stride=stride, pad=1,
                   relu=True)
    if 'dsconv' in blk:
        identity = _conv_bn(x, blk['dsconv'], blk['dsbn'], k=1, stride=stride,
                            pad=0, relu=False)
    # relu(bn2(conv2(out)) + identity): residual add fused into kernel epilogue
    out = _conv_bn(out, blk['conv2'], blk['bn2'], k=3, stride=1, pad=1,
                   relu=True, residual=identity)
    return out


# ----------------------------------------------------------------------------
# Parameters (deterministic, ResNet-18, 3 input channels, eval-mode BN folded)
# ----------------------------------------------------------------------------
def _conv_w2d(key, cin, cout, k):
    # kaiming_normal_(mode='fan_out', nonlinearity='relu'), then pre-transpose
    # to (kh, kw, cin, cout) -> (k*k*cin, cout) and cast to bf16 once.
    std = math.sqrt(2.0 / (cout * k * k))
    w = jax.random.normal(key, (cout, cin, k, k), jnp.float32) * std
    w2d = jnp.transpose(w, (2, 3, 1, 0)).reshape(k * k * cin, cout)
    return w2d.astype(jnp.bfloat16)


def _bn_params(c):
    # gamma=1, beta=0, running_mean=0, running_var=1 -> folded affine
    scale = jnp.full((c,), 1.0 / math.sqrt(1.0 + BN_EPS), jnp.float32)
    bias = jnp.zeros((c,), jnp.float32)
    return (scale, bias)


def build_resnet18_params(key):
    keys = iter(jax.random.split(key, 64))
    params = {'conv1': _conv_w2d(next(keys), 3, 64, 7), 'bn1': _bn_params(64)}
    layers = []
    inplanes = 64
    for planes, stride, nblocks in [(64, 1, 2), (128, 2, 2),
                                    (256, 2, 2), (512, 2, 2)]:
        blocks = []
        for b in range(nblocks):
            s = stride if b == 0 else 1
            blk = {
                'conv1': _conv_w2d(next(keys), inplanes, planes, 3),
                'bn1': _bn_params(planes),
                'conv2': _conv_w2d(next(keys), planes, planes, 3),
                'bn2': _bn_params(planes),
            }
            if s != 1 or inplanes != planes:
                blk['dsconv'] = _conv_w2d(next(keys), inplanes, planes, 1)
                blk['dsbn'] = _bn_params(planes)
            blocks.append(blk)
            inplanes = planes
        layers.append(blocks)
    params['layers'] = layers
    return params


# ----------------------------------------------------------------------------
# Forward pass (ResnetEncoder_BaseLine.forward)
# ----------------------------------------------------------------------------
@jax.jit
def resnet_encoder_forward(input_image_nchw, params):
    # x = (input - 0.45) / 0.225  (trivial elementwise glue)
    x = jnp.transpose(input_image_nchw, (0, 2, 3, 1)).astype(jnp.float32)
    x = (x - 0.45) / 0.225

    # conv1 7x7/s2 + bn1 + relu
    x = _conv_bn(x, params['conv1'], params['bn1'], k=7, stride=2, pad=3,
                 relu=True)
    features = [x]

    # maxpool 3x3/s2 (Pallas parity-plane kernel)
    x = _maxpool_3x3_s2(x)

    for layer_blocks, stride in zip(params['layers'], [1, 2, 2, 2]):
        for bi, blk in enumerate(layer_blocks):
            s = stride if bi == 0 else 1
            x = _basic_block(x, blk, s)
        features.append(x)

    # return NCHW features, matching PyTorch
    return [jnp.transpose(f, (0, 3, 1, 2)) for f in features]


# ----------------------------------------------------------------------------
if __name__ == "__main__":
    root = jax.random.PRNGKey(0)
    k_params, k_input = jax.random.split(root)

    params = build_resnet18_params(k_params)
    x = jax.random.uniform(k_input, (2, 3, 32, 32), dtype=jnp.float32)

    feats = resnet_encoder_forward(x, params)
    feats = jax.block_until_ready(feats)

    expected = [(2, 64, 16, 16), (2, 64, 8, 8), (2, 128, 4, 4),
                (2, 256, 2, 2), (2, 512, 1, 1)]
    assert [tuple(f.shape) for f in feats] == expected, \
        [tuple(f.shape) for f in feats]
    assert all(jnp.isfinite(f).all() for f in feats)

    print("KERNEL_OK")
</pallas_src>

<mosaic_0001>
module attributes {stable_mosaic.version = 11 : i64} {
  func.func @kernel(%arg0: i32, %arg1: i32, %arg2: i32, %arg3: memref<256x256xbf16, #tpu.memory_space<vmem>>, %arg4: memref<256x128xbf16, #tpu.memory_space<vmem>>, %arg5: memref<1x128xf32, #tpu.memory_space<vmem>>, %arg6: memref<1x128xf32, #tpu.memory_space<vmem>>, %arg7: memref<256x128xf32, #tpu.memory_space<vmem>>, %arg8: memref<256x128xf32, #tpu.memory_space<vmem>>) attributes {dimension_semantics = [#tpu.dimension_semantics<parallel>, #tpu.dimension_semantics<parallel>, #tpu.dimension_semantics<arbitrary>], iteration_bounds = array<i64: 2, 1, 1>, scalar_prefetch = 0 : i64, scratch_operands = 1 : i64, tpu.core_type = #tpu.core_type<tc>, window_params = [{transform_indices = @transform_0, window_bounds = array<i64: 256, 256>}, {transform_indices = @transform_1, window_bounds = array<i64: 256, 128>}, {transform_indices = @transform_2, window_bounds = array<i64: 1, 128>}, {transform_indices = @transform_3, window_bounds = array<i64: 1, 128>}, {transform_indices = @transform_4, window_bounds = array<i64: 256, 128>}]} {
    %c0_i32 = arith.constant 0 : i32
    %0 = arith.cmpi eq, %arg2, %c0_i32 : i32
    %1 = arith.extui %0 : i1 to i32
    %c0_i32_0 = arith.constant 0 : i32
    %2 = arith.cmpi ne, %1, %c0_i32_0 : i32
    scf.if %2 {
      %cst_10 = arith.constant 0.000000e+00 : f32
      %12 = vector.broadcast %cst_10 : f32 to vector<256x128xf32>
      %c0_11 = arith.constant 0 : index
      %c0_12 = arith.constant 0 : index
      %13 = vector.load %arg8[%c0_11, %c0_12] : memref<256x128xf32, #tpu.memory_space<vmem>>, vector<256x128xf32>
      tpu.vector_store %arg8[%c0_11, %c0_12], %12 {strides = array<i32>} : memref<256x128xf32, #tpu.memory_space<vmem>>, vector<256x128xf32>,
    } else {
    }
    %c0 = arith.constant 0 : index
    %c0_1 = arith.constant 0 : index
    %3 = vector.load %arg8[%c0, %c0_1] : memref<256x128xf32, #tpu.memory_space<vmem>>, vector<256x128xf32>
    %c0_2 = arith.constant 0 : index
    %c0_3 = arith.constant 0 : index
    %4 = vector.load %arg3[%c0_2, %c0_3] : memref<256x256xbf16, #tpu.memory_space<vmem>>, vector<256x256xbf16>
    %c0_4 = arith.constant 0 : index
    %c0_5 = arith.constant 0 : index
    %5 = vector.load %arg4[%c0_4, %c0_5] : memref<256x128xbf16, #tpu.memory_space<vmem>>, vector<256x128xbf16>
    %cst = arith.constant dense<0.000000e+00> : vector<256x128xf32>
    %6 = tpu.matmul %4, %5, %cst {dimension_numbers = #tpu.dot_dimension_numbers<[1], [0], [0], [1], [0, 0, 1, 1], [], []>} : vector<256x256xbf16>, vector<256x128xbf16>, vector<256x128xf32> -> vector<256x128xf32>
    %7 = arith.addf %3, %6 : vector<256x128xf32>
    %c0_6 = arith.constant 0 : index
    %c0_7 = arith.constant 0 : index
    %8 = vector.load %arg8[%c0_6, %c0_7] : memref<256x128xf32, #tpu.memory_space<vmem>>, vector<256x128xf32>
    tpu.vector_store %arg8[%c0_6, %c0_7], %7 {strides = array<i32>} : memref<256x128xf32, #tpu.memory_space<vmem>>, vector<256x128xf32>,
    %c0_i32_8 = arith.constant 0 : i32
    %9 = arith.cmpi eq, %arg2, %c0_i32_8 : i32
    %10 = arith.extui %9 : i1 to i32
    %c0_i32_9 = arith.constant 0 : i32
    %11 = arith.cmpi ne, %10, %c0_i32_9 : i32
    scf.if %11 {
      %c0_10 = arith.constant 0 : index
      %c0_11 = arith.constant 0 : index
      %12 = vector.load %arg8[%c0_10, %c0_11] : memref<256x128xf32, #tpu.memory_space<vmem>>, vector<256x128xf32>
      %c0_12 = arith.constant 0 : index
      %c0_13 = arith.constant 0 : index
      %13 = vector.load %arg5[%c0_12, %c0_13] : memref<1x128xf32, #tpu.memory_space<vmem>>, vector<1x128xf32>
      %14 = vector.broadcast %13 : vector<1x128xf32> to vector<256x128xf32>
      %15 = arith.mulf %12, %14 : vector<256x128xf32>
      %c0_14 = arith.constant 0 : index
      %c0_15 = arith.constant 0 : index
      %16 = vector.load %arg6[%c0_14, %c0_15] : memref<1x128xf32, #tpu.memory_space<vmem>>, vector<1x128xf32>
      %17 = vector.broadcast %16 : vector<1x128xf32> to vector<256x128xf32>
      %18 = arith.addf %15, %17 : vector<256x128xf32>
      %cst_16 = arith.constant 0.000000e+00 : f32
      %19 = vector.broadcast %cst_16 : f32 to vector<256x128xf32>
      %20 = arith.maximumf %18, %19 : vector<256x128xf32>
      %c0_17 = arith.constant 0 : index
      %c0_18 = arith.constant 0 : index
      %21 = vector.load %arg7[%c0_17, %c0_18] : memref<256x128xf32, #tpu.memory_space<vmem>>, vector<256x128xf32>
      tpu.vector_store %arg7[%c0_17, %c0_18], %20 {strides = array<i32>} : memref<256x128xf32, #tpu.memory_space<vmem>>, vector<256x128xf32>,
    } else {
    }
    return
  }
  func.func @transform_0(%arg0: i32, %arg1: i32, %arg2: i32) -> (i32, i32) {
    %c0_i32 = arith.constant 0 : i32
    return %arg0, %arg2 : i32, i32
  }
  func.func @transform_1(%arg0: i32, %arg1: i32, %arg2: i32) -> (i32, i32) {
    %c0_i32 = arith.constant 0 : i32
    return %arg2, %arg1 : i32, i32
  }
  func.func @transform_2(%arg0: i32, %arg1: i32, %arg2: i32) -> (i32, i32) {
    %c0_i32 = arith.constant 0 : i32
    %c0_i32_0 = arith.constant 0 : i32
    return %c0_i32, %arg1 : i32, i32
  }
  func.func @transform_3(%arg0: i32, %arg1: i32, %arg2: i32) -> (i32, i32) {
    %c0_i32 = arith.constant 0 : i32
    %c0_i32_0 = arith.constant 0 : i32
    return %c0_i32, %arg1 : i32, i32
  }
  func.func @transform_4(%arg0: i32, %arg1: i32, %arg2: i32) -> (i32, i32) {
    %c0_i32 = arith.constant 0 : i32
    return %arg0, %arg1 : i32, i32
  }
}

module attributes {stable_mosaic.version = 11 : i64} {
  func.func @_maxpool_kernel(%arg0: i32, %arg1: memref<1x9x9x64xf32, #tpu.memory_space<vmem>>, %arg2: memref<1x9x9x64xf32, #tpu.memory_space<vmem>>, %arg3: memref<1x9x9x64xf32, #tpu.memory_space<vmem>>, %arg4: memref<1x9x9x64xf32, #tpu.memory_space<vmem>>, %arg5: memref<1x8x8x64xf32, #tpu.memory_space<vmem>>) attributes {dimension_semantics = [#tpu.dimension_semantics<parallel>], iteration_bounds = array<i64: 2>, scalar_prefetch = 0 : i64, scratch_operands = 0 : i64, tpu.core_type = #tpu.core_type<tc>, window_params = [{transform_indices = @transform_0, window_bounds = array<i64: 1, 9, 9, 64>}, {transform_indices = @transform_1, window_bounds = array<i64: 1, 9, 9, 64>}, {transform_indices = @transform_2, window_bounds = array<i64: 1, 9, 9, 64>}, {transform_indices = @transform_3, window_bounds = array<i64: 1, 9, 9, 64>}, {transform_indices = @transform_4, window_bounds = array<i64: 1, 8, 8, 64>}]} {
    %c0 = arith.constant 0 : index
    %c0_0 = arith.constant 0 : index
    %c0_1 = arith.constant 0 : index
    %c0_2 = arith.constant 0 : index
    %0 = vector.load %arg1[%c0, %c0_0, %c0_1, %c0_2] : memref<1x9x9x64xf32, #tpu.memory_space<vmem>>, vector<1x9x9x64xf32>
    %1 = vector.shape_cast %0 : vector<1x9x9x64xf32> to vector<9x9x64xf32>
    %c0_3 = arith.constant 0 : index
    %c0_4 = arith.constant 0 : index
    %c0_5 = arith.constant 0 : index
    %c0_6 = arith.constant 0 : index
    %2 = vector.load %arg2[%c0_3, %c0_4, %c0_5, %c0_6] : memref<1x9x9x64xf32, #tpu.memory_space<vmem>>, vector<1x9x9x64xf32>
    %3 = vector.shape_cast %2 : vector<1x9x9x64xf32> to vector<9x9x64xf32>
    %c0_7 = arith.constant 0 : index
    %c0_8 = arith.constant 0 : index
    %c0_9 = arith.constant 0 : index
    %c0_10 = arith.constant 0 : index
    %4 = vector.load %arg3[%c0_7, %c0_8, %c0_9, %c0_10] : memref<1x9x9x64xf32, #tpu.memory_space<vmem>>, vector<1x9x9x64xf32>
    %5 = vector.shape_cast %4 : vector<1x9x9x64xf32> to vector<9x9x64xf32>
    %c0_11 = arith.constant 0 : index
    %c0_12 = arith.constant 0 : index
    %c0_13 = arith.constant 0 : index
    %c0_14 = arith.constant 0 : index
    %6 = vector.load %arg4[%c0_11, %c0_12, %c0_13, %c0_14] : memref<1x9x9x64xf32, #tpu.memory_space<vmem>>, vector<1x9x9x64xf32>
    %7 = vector.shape_cast %6 : vector<1x9x9x64xf32> to vector<9x9x64xf32>
    %8 = vector.extract_strided_slice %1 {offsets = [0, 0, 0], sizes = [8, 8, 64], strides = [1, 1, 1]} : vector<9x9x64xf32> to vector<8x8x64xf32>
    %9 = vector.extract_strided_slice %1 {offsets = [0, 1, 0], sizes = [8, 8, 64], strides = [1, 1, 1]} : vector<9x9x64xf32> to vector<8x8x64xf32>
    %10 = arith.maximumf %8, %9 : vector<8x8x64xf32>
    %11 = vector.extract_strided_slice %1 {offsets = [1, 0, 0], sizes = [8, 8, 64], strides = [1, 1, 1]} : vector<9x9x64xf32> to vector<8x8x64xf32>
    %12 = arith.maximumf %10, %11 : vector<8x8x64xf32>
    %13 = vector.extract_strided_slice %1 {offsets = [1, 1, 0], sizes = [8, 8, 64], strides = [1, 1, 1]} : vector<9x9x64xf32> to vector<8x8x64xf32>
    %14 = arith.maximumf %12, %13 : vector<8x8x64xf32>
    %15 = vector.extract_strided_slice %3 {offsets = [0, 0, 0], sizes = [8, 8, 64], strides = [1, 1, 1]} : vector<9x9x64xf32> to vector<8x8x64xf32>
    %16 = arith.maximumf %14, %15 : vector<8x8x64xf32>
    %17 = vector.extract_strided_slice %3 {offsets = [1, 0, 0], sizes = [8, 8, 64], strides = [1, 1, 1]} : vector<9x9x64xf32> to vector<8x8x64xf32>
    %18 = arith.maximumf %16, %17 : vector<8x8x64xf32>
    %19 = vector.extract_strided_slice %5 {offsets = [0, 0, 0], sizes = [8, 8, 64], strides = [1, 1, 1]} : vector<9x9x64xf32> to vector<8x8x64xf32>
    %20 = arith.maximumf %18, %19 : vector<8x8x64xf32>
    %21 = vector.extract_strided_slice %5 {offsets = [0, 1, 0], sizes = [8, 8, 64], strides = [1, 1, 1]} : vector<9x9x64xf32> to vector<8x8x64xf32>
    %22 = arith.maximumf %20, %21 : vector<8x8x64xf32>
    %23 = vector.extract_strided_slice %7 {offsets = [0, 0, 0], sizes = [8, 8, 64], strides = [1, 1, 1]} : vector<9x9x64xf32> to vector<8x8x64xf32>
    %24 = arith.maximumf %22, %23 : vector<8x8x64xf32>
    %c0_15 = arith.constant 0 : index
    %c0_16 = arith.constant 0 : index
    %c0_17 = arith.constant 0 : index
    %c0_18 = arith.constant 0 : index
    %25 = vector.load %arg5[%c0_15, %c0_16, %c0_17, %c0_18] : memref<1x8x8x64xf32, #tpu.memory_space<vmem>>, vector<1x8x8x64xf32>
    %26 = vector.shape_cast %25 : vector<1x8x8x64xf32> to vector<8x8x64xf32>
    %27 = vector.shape_cast %24 : vector<8x8x64xf32> to vector<1x8x8x64xf32>
    tpu.vector_store %arg5[%c0_15, %c0_16, %c0_17, %c0_18], %27 {strides = array<i32>} : memref<1x8x8x64xf32, #tpu.memory_space<vmem>>, vector<1x8x8x64xf32>,
    return
  }
  func.func @transform_0(%arg0: i32) -> (i32, i32, i32, i32) {
    %c0_i32 = arith.constant 0 : i32
    %c0_i32_0 = arith.constant 0 : i32
    %c0_i32_1 = arith.constant 0 : i32
    %c0_i32_2 = arith.constant 0 : i32
    return %arg0, %c0_i32, %c0_i32_0, %c0_i32_1 : i32, i32, i32, i32
  }
  func.func @transform_1(%arg0: i32) -> (i32, i32, i32, i32) {
    %c0_i32 = arith.constant 0 : i32
    %c0_i32_0 = arith.constant 0 : i32
    %c0_i32_1 = arith.constant 0 : i32
    %c0_i32_2 = arith.constant 0 : i32
    return %arg0, %c0_i32, %c0_i32_0, %c0_i32_1 : i32, i32, i32, i32
  }
  func.func @transform_2(%arg0: i32) -> (i32, i32, i32, i32) {
    %c0_i32 = arith.constant 0 : i32
    %c0_i32_0 = arith.constant 0 : i32
    %c0_i32_1 = arith.constant 0 : i32
    %c0_i32_2 = arith.constant 0 : i32
    return %arg0, %c0_i32, %c0_i32_0, %c0_i32_1 : i32, i32, i32, i32
  }
  func.func @transform_3(%arg0: i32) -> (i32, i32, i32, i32) {
    %c0_i32 = arith.constant 0 : i32
    %c0_i32_0 = arith.constant 0 : i32
    %c0_i32_1 = arith.constant 0 : i32
    %c0_i32_2 = arith.constant 0 : i32
    return %arg0, %c0_i32, %c0_i32_0, %c0_i32_1 : i32, i32, i32, i32
  }
  func.func @transform_4(%arg0: i32) -> (i32, i32, i32, i32) {
    %c0_i32 = arith.constant 0 : i32
    %c0_i32_0 = arith.constant 0 : i32
    %c0_i32_1 = arith.constant 0 : i32
    %c0_i32_2 = arith.constant 0 : i32
    return %arg0, %c0_i32, %c0_i32_0, %c0_i32_1 : i32, i32, i32, i32
  }
}

module attributes {stable_mosaic.version = 11 : i64} {
  func.func @kernel(%arg0: i32, %arg1: i32, %arg2: i32, %arg3: memref<128x128xbf16, #tpu.memory_space<vmem>>, %arg4: memref<128x128xbf16, #tpu.memory_space<vmem>>, %arg5: memref<1x128xf32, #tpu.memory_space<vmem>>, %arg6: memref<1x128xf32, #tpu.memory_space<vmem>>, %arg7: memref<128x128xf32, #tpu.memory_space<vmem>>, %arg8: memref<128x128xf32, #tpu.memory_space<vmem>>) attributes {dimension_semantics = [#tpu.dimension_semantics<parallel>, #tpu.dimension_semantics<parallel>, #tpu.dimension_semantics<arbitrary>], iteration_bounds = array<i64: 1, 1, 5>, scalar_prefetch = 0 : i64, scratch_operands = 1 : i64, tpu.core_type = #tpu.core_type<tc>, window_params = [{transform_indices = @transform_0, window_bounds = array<i64: 128, 128>}, {transform_indices = @transform_1, window_bounds = array<i64: 128, 128>}, {transform_indices = @transform_2, window_bounds = array<i64: 1, 128>}, {transform_indices = @transform_3, window_bounds = array<i64: 1, 128>}, {transform_indices = @transform_4, window_bounds = array<i64: 128, 128>}]} {
    %c0_i32 = arith.constant 0 : i32
    %0 = arith.cmpi eq, %arg2, %c0_i32 : i32
    %1 = arith.extui %0 : i1 to i32
    %c0_i32_0 = arith.constant 0 : i32
    %2 = arith.cmpi ne, %1, %c0_i32_0 : i32
    scf.if %2 {
      %cst_9 = arith.constant 0.000000e+00 : f32
      %12 = vector.broadcast %cst_9 : f32 to vector<128x128xf32>
      %c0_10 = arith.constant 0 : index
      %c0_11 = arith.constant 0 : index
      %13 = vector.load %arg8[%c0_10, %c0_11] : memref<128x128xf32, #tpu.memory_space<vmem>>, vector<128x128xf32>
      tpu.vector_store %arg8[%c0_10, %c0_11], %12 {strides = array<i32>} : memref<128x128xf32, #tpu.memory_space<vmem>>, vector<128x128xf32>,
    } else {
    }
    %c0 = arith.constant 0 : index
    %c0_1 = arith.constant 0 : index
    %3 = vector.load %arg8[%c0, %c0_1] : memref<128x128xf32, #tpu.memory_space<vmem>>, vector<128x128xf32>
    %c0_2 = arith.constant 0 : index
    %c0_3 = arith.constant 0 : index
    %4 = vector.load %arg3[%c0_2, %c0_3] : memref<128x128xbf16, #tpu.memory_space<vmem>>, vector<128x128xbf16>
    %c0_4 = arith.constant 0 : index
    %c0_5 = arith.constant 0 : index
    %5 = vector.load %arg4[%c0_4, %c0_5] : memref<128x128xbf16, #tpu.memory_space<vmem>>, vector<128x128xbf16>
    %cst = arith.constant dense<0.000000e+00> : vector<128x128xf32>
    %6 = tpu.matmul %4, %5, %cst {dimension_numbers = #tpu.dot_dimension_numbers<[1], [0], [0], [1], [0, 0, 1, 1], [], []>} : vector<128x128xbf16>, vector<128x128xbf16>, vector<128x128xf32> -> vector<128x128xf32>
    %7 = arith.addf %3, %6 : vector<128x128xf32>
    %c0_6 = arith.constant 0 : index
    %c0_7 = arith.constant 0 : index
    %8 = vector.load %arg8[%c0_6, %c0_7] : memref<128x128xf32, #tpu.memory_space<vmem>>, vector<128x128xf32>
    tpu.vector_store %arg8[%c0_6, %c0_7], %7 {strides = array<i32>} : memref<128x128xf32, #tpu.memory_space<vmem>>, vector<128x128xf32>,
    %c4_i32 = arith.constant 4 : i32
    %9 = arith.cmpi eq, %arg2, %c4_i32 : i32
    %10 = arith.extui %9 : i1 to i32
    %c0_i32_8 = arith.constant 0 : i32
    %11 = arith.cmpi ne, %10, %c0_i32_8 : i32
    scf.if %11 {
      %c0_9 = arith.constant 0 : index
      %c0_10 = arith.constant 0 : index
      %12 = vector.load %arg8[%c0_9, %c0_10] : memref<128x128xf32, #tpu.memory_space<vmem>>, vector<128x128xf32>
      %c0_11 = arith.constant 0 : index
      %c0_12 = arith.constant 0 : index
      %13 = vector.load %arg5[%c0_11, %c0_12] : memref<1x128xf32, #tpu.memory_space<vmem>>, vector<1x128xf32>
      %14 = vector.broadcast %13 : vector<1x128xf32> to vector<128x128xf32>
      %15 = arith.mulf %12, %14 : vector<128x128xf32>
      %c0_13 = arith.constant 0 : index
      %c0_14 = arith.constant 0 : index
      %16 = vector.load %arg6[%c0_13, %c0_14] : memref<1x128xf32, #tpu.memory_space<vmem>>, vector<1x128xf32>
      %17 = vector.broadcast %16 : vector<1x128xf32> to vector<128x128xf32>
      %18 = arith.addf %15, %17 : vector<128x128xf32>
      %cst_15 = arith.constant 0.000000e+00 : f32
      %19 = vector.broadcast %cst_15 : f32 to vector<128x128xf32>
      %20 = arith.maximumf %18, %19 : vector<128x128xf32>
      %c0_16 = arith.constant 0 : index
      %c0_17 = arith.constant 0 : index
      %21 = vector.load %arg7[%c0_16, %c0_17] : memref<128x128xf32, #tpu.memory_space<vmem>>, vector<128x128xf32>
      tpu.vector_store %arg7[%c0_16, %c0_17], %20 {strides = array<i32>} : memref<128x128xf32, #tpu.memory_space<vmem>>, vector<128x128xf32>,
    } else {
    }
    return
  }
  func.func @transform_0(%arg0: i32, %arg1: i32, %arg2: i32) -> (i32, i32) {
    %c0_i32 = arith.constant 0 : i32
    return %arg0, %arg2 : i32, i32
  }
  func.func @transform_1(%arg0: i32, %arg1: i32, %arg2: i32) -> (i32, i32) {
    %c0_i32 = arith.constant 0 : i32
    return %arg2, %arg1 : i32, i32
  }
  func.func @transform_2(%arg0: i32, %arg1: i32, %arg2: i32) -> (i32, i32) {
    %c0_i32 = arith.constant 0 : i32
    %c0_i32_0 = arith.constant 0 : i32
    return %c0_i32, %arg1 : i32, i32
  }
  func.func @transform_3(%arg0: i32, %arg1: i32, %arg2: i32) -> (i32, i32) {
    %c0_i32 = arith.constant 0 : i32
    %c0_i32_0 = arith.constant 0 : i32
    return %c0_i32, %arg1 : i32, i32
  }
  func.func @transform_4(%arg0: i32, %arg1: i32, %arg2: i32) -> (i32, i32) {
    %c0_i32 = arith.constant 0 : i32
    return %arg0, %arg1 : i32, i32
  }
}

module attributes {stable_mosaic.version = 11 : i64} {
  func.func @kernel(%arg0: i32, %arg1: i32, %arg2: i32, %arg3: memref<128x128xbf16, #tpu.memory_space<vmem>>, %arg4: memref<128x128xbf16, #tpu.memory_space<vmem>>, %arg5: memref<1x128xf32, #tpu.memory_space<vmem>>, %arg6: memref<1x128xf32, #tpu.memory_space<vmem>>, %arg7: memref<128x128xf32, #tpu.memory_space<vmem>>, %arg8: memref<128x128xf32, #tpu.memory_space<vmem>>, %arg9: memref<128x128xf32, #tpu.memory_space<vmem>>) attributes {dimension_semantics = [#tpu.dimension_semantics<parallel>, #tpu.dimension_semantics<parallel>, #tpu.dimension_semantics<arbitrary>], iteration_bounds = array<i64: 1, 1, 5>, scalar_prefetch = 0 : i64, scratch_operands = 1 : i64, tpu.core_type = #tpu.core_type<tc>, window_params = [{transform_indices = @transform_0, window_bounds = array<i64: 128, 128>}, {transform_indices = @transform_1, window_bounds = array<i64: 128, 128>}, {transform_indices = @transform_2, window_bounds = array<i64: 1, 128>}, {transform_indices = @transform_3, window_bounds = array<i64: 1, 128>}, {transform_indices = @transform_4, window_bounds = array<i64: 128, 128>}, {transform_indices = @transform_5, window_bounds = array<i64: 128, 128>}]} {
    %c0_i32 = arith.constant 0 : i32
    %0 = arith.cmpi eq, %arg2, %c0_i32 : i32
    %1 = arith.extui %0 : i1 to i32
    %c0_i32_0 = arith.constant 0 : i32
    %2 = arith.cmpi ne, %1, %c0_i32_0 : i32
    scf.if %2 {
      %cst_9 = arith.constant 0.000000e+00 : f32
      %12 = vector.broadcast %cst_9 : f32 to vector<128x128xf32>
      %c0_10 = arith.constant 0 : index
      %c0_11 = arith.constant 0 : index
      %13 = vector.load %arg9[%c0_10, %c0_11] : memref<128x128xf32, #tpu.memory_space<vmem>>, vector<128x128xf32>
      tpu.vector_store %arg9[%c0_10, %c0_11], %12 {strides = array<i32>} : memref<128x128xf32, #tpu.memory_space<vmem>>, vector<128x128xf32>,
    } else {
    }
    %c0 = arith.constant 0 : index
    %c0_1 = arith.constant 0 : index
    %3 = vector.load %arg9[%c0, %c0_1] : memref<128x128xf32, #tpu.memory_space<vmem>>, vector<128x128xf32>
    %c0_2 = arith.constant 0 : index
    %c0_3 = arith.constant 0 : index
    %4 = vector.load %arg3[%c0_2, %c0_3] : memref<128x128xbf16, #tpu.memory_space<vmem>>, vector<128x128xbf16>
    %c0_4 = arith.constant 0 : index
    %c0_5 = arith.constant 0 : index
    %5 = vector.load %arg4[%c0_4, %c0_5] : memref<128x128xbf16, #tpu.memory_space<vmem>>, vector<128x128xbf16>
    %cst = arith.constant dense<0.000000e+00> : vector<128x128xf32>
    %6 = tpu.matmul %4, %5, %cst {dimension_numbers = #tpu.dot_dimension_numbers<[1], [0], [0], [1], [0, 0, 1, 1], [], []>} : vector<128x128xbf16>, vector<128x128xbf16>, vector<128x128xf32> -> vector<128x128xf32>
    %7 = arith.addf %3, %6 : vector<128x128xf32>
    %c0_6 = arith.constant 0 : index
    %c0_7 = arith.constant 0 : index
    %8 = vector.load %arg9[%c0_6, %c0_7] : memref<128x128xf32, #tpu.memory_space<vmem>>, vector<128x128xf32>
    tpu.vector_store %arg9[%c0_6, %c0_7], %7 {strides = array<i32>} : memref<128x128xf32, #tpu.memory_space<vmem>>, vector<128x128xf32>,
    %c4_i32 = arith.constant 4 : i32
    %9 = arith.cmpi eq, %arg2, %c4_i32 : i32
    %10 = arith.extui %9 : i1 to i32
    %c0_i32_8 = arith.constant 0 : i32
    %11 = arith.cmpi ne, %10, %c0_i32_8 : i32
    scf.if %11 {
      %c0_9 = arith.constant 0 : index
      %c0_10 = arith.constant 0 : index
      %12 = vector.load %arg9[%c0_9, %c0_10] : memref<128x128xf32, #tpu.memory_space<vmem>>, vector<128x128xf32>
      %c0_11 = arith.constant 0 : index
      %c0_12 = arith.constant 0 : index
      %13 = vector.load %arg5[%c0_11, %c0_12] : memref<1x128xf32, #tpu.memory_space<vmem>>, vector<1x128xf32>
      %14 = vector.broadcast %13 : vector<1x128xf32> to vector<128x128xf32>
      %15 = arith.mulf %12, %14 : vector<128x128xf32>
      %c0_13 = arith.constant 0 : index
      %c0_14 = arith.constant 0 : index
      %16 = vector.load %arg6[%c0_13, %c0_14] : memref<1x128xf32, #tpu.memory_space<vmem>>, vector<1x128xf32>
      %17 = vector.broadcast %16 : vector<1x128xf32> to vector<128x128xf32>
      %18 = arith.addf %15, %17 : vector<128x128xf32>
      %c0_15 = arith.constant 0 : index
      %c0_16 = arith.constant 0 : index
      %19 = vector.load %arg7[%c0_15, %c0_16] : memref<128x128xf32, #tpu.memory_space<vmem>>, vector<128x128xf32>
      %20 = arith.addf %18, %19 : vector<128x128xf32>
      %cst_17 = arith.constant 0.000000e+00 : f32
      %21 = vector.broadcast %cst_17 : f32 to vector<128x128xf32>
      %22 = arith.maximumf %20, %21 : vector<128x128xf32>
      %c0_18 = arith.constant 0 : index
      %c0_19 = arith.constant 0 : index
      %23 = vector.load %arg8[%c0_18, %c0_19] : memref<128x128xf32, #tpu.memory_space<vmem>>, vector<128x128xf32>
      tpu.vector_store %arg8[%c0_18, %c0_19], %22 {strides = array<i32>} : memref<128x128xf32, #tpu.memory_space<vmem>>, vector<128x128xf32>,
    } else {
    }
    return
  }
  func.func @transform_0(%arg0: i32, %arg1: i32, %arg2: i32) -> (i32, i32) {
    %c0_i32 = arith.constant 0 : i32
    return %arg0, %arg2 : i32, i32
  }
  func.func @transform_1(%arg0: i32, %arg1: i32, %arg2: i32) -> (i32, i32) {
    %c0_i32 = arith.constant 0 : i32
    return %arg2, %arg1 : i32, i32
  }
  func.func @transform_2(%arg0: i32, %arg1: i32, %arg2: i32) -> (i32, i32) {
    %c0_i32 = arith.constant 0 : i32
    %c0_i32_0 = arith.constant 0 : i32
    return %c0_i32, %arg1 : i32, i32
  }
  func.func @transform_3(%arg0: i32, %arg1: i32, %arg2: i32) -> (i32, i32) {
    %c0_i32 = arith.constant 0 : i32
    %c0_i32_0 = arith.constant 0 : i32
    return %c0_i32, %arg1 : i32, i32
  }
  func.func @transform_4(%arg0: i32, %arg1: i32, %arg2: i32) -> (i32, i32) {
    %c0_i32 = arith.constant 0 : i32
    return %arg0, %arg1 : i32, i32
  }
  func.func @transform_5(%arg0: i32, %arg1: i32, %arg2: i32) -> (i32, i32) {
    %c0_i32 = arith.constant 0 : i32
    return %arg0, %arg1 : i32, i32
  }
}

module attributes {stable_mosaic.version = 11 : i64} {
  func.func @kernel(%arg0: i32, %arg1: i32, %arg2: i32, %arg3: memref<32x128xbf16, #tpu.memory_space<vmem>>, %arg4: memref<128x128xbf16, #tpu.memory_space<vmem>>, %arg5: memref<1x128xf32, #tpu.memory_space<vmem>>, %arg6: memref<1x128xf32, #tpu.memory_space<vmem>>, %arg7: memref<32x128xf32, #tpu.memory_space<vmem>>, %arg8: memref<32x128xf32, #tpu.memory_space<vmem>>) attributes {dimension_semantics = [#tpu.dimension_semantics<parallel>, #tpu.dimension_semantics<parallel>, #tpu.dimension_semantics<arbitrary>], iteration_bounds = array<i64: 1, 1, 5>, scalar_prefetch = 0 : i64, scratch_operands = 1 : i64, tpu.core_type = #tpu.core_type<tc>, window_params = [{transform_indices = @transform_0, window_bounds = array<i64: 32, 128>}, {transform_indices = @transform_1, window_bounds = array<i64: 128, 128>}, {transform_indices = @transform_2, window_bounds = array<i64: 1, 128>}, {transform_indices = @transform_3, window_bounds = array<i64: 1, 128>}, {transform_indices = @transform_4, window_bounds = array<i64: 32, 128>}]} {
    %c0_i32 = arith.constant 0 : i32
    %0 = arith.cmpi eq, %arg2, %c0_i32 : i32
    %1 = arith.extui %0 : i1 to i32
    %c0_i32_0 = arith.constant 0 : i32
    %2 = arith.cmpi ne, %1, %c0_i32_0 : i32
    scf.if %2 {
      %cst_9 = arith.constant 0.000000e+00 : f32
      %12 = vector.broadcast %cst_9 : f32 to vector<32x128xf32>
      %c0_10 = arith.constant 0 : index
      %c0_11 = arith.constant 0 : index
      %13 = vector.load %arg8[%c0_10, %c0_11] : memref<32x128xf32, #tpu.memory_space<vmem>>, vector<32x128xf32>
      tpu.vector_store %arg8[%c0_10, %c0_11], %12 {strides = array<i32>} : memref<32x128xf32, #tpu.memory_space<vmem>>, vector<32x128xf32>,
    } else {
    }
    %c0 = arith.constant 0 : index
    %c0_1 = arith.constant 0 : index
    %3 = vector.load %arg8[%c0, %c0_1] : memref<32x128xf32, #tpu.memory_space<vmem>>, vector<32x128xf32>
    %c0_2 = arith.constant 0 : index
    %c0_3 = arith.constant 0 : index
    %4 = vector.load %arg3[%c0_2, %c0_3] : memref<32x128xbf16, #tpu.memory_space<vmem>>, vector<32x128xbf16>
    %c0_4 = arith.constant 0 : index
    %c0_5 = arith.constant 0 : index
    %5 = vector.load %arg4[%c0_4, %c0_5] : memref<128x128xbf16, #tpu.memory_space<vmem>>, vector<128x128xbf16>
    %cst = arith.constant dense<0.000000e+00> : vector<32x128xf32>
    %6 = tpu.matmul %4, %5, %cst {dimension_numbers = #tpu.dot_dimension_numbers<[1], [0], [0], [1], [0, 0, 1, 1], [], []>} : vector<32x128xbf16>, vector<128x128xbf16>, vector<32x128xf32> -> vector<32x128xf32>
    %7 = arith.addf %3, %6 : vector<32x128xf32>
    %c0_6 = arith.constant 0 : index
    %c0_7 = arith.constant 0 : index
    %8 = vector.load %arg8[%c0_6, %c0_7] : memref<32x128xf32, #tpu.memory_space<vmem>>, vector<32x128xf32>
    tpu.vector_store %arg8[%c0_6, %c0_7], %7 {strides = array<i32>} : memref<32x128xf32, #tpu.memory_space<vmem>>, vector<32x128xf32>,
    %c4_i32 = arith.constant 4 : i32
    %9 = arith.cmpi eq, %arg2, %c4_i32 : i32
    %10 = arith.extui %9 : i1 to i32
    %c0_i32_8 = arith.constant 0 : i32
    %11 = arith.cmpi ne, %10, %c0_i32_8 : i32
    scf.if %11 {
      %c0_9 = arith.constant 0 : index
      %c0_10 = arith.constant 0 : index
      %12 = vector.load %arg8[%c0_9, %c0_10] : memref<32x128xf32, #tpu.memory_space<vmem>>, vector<32x128xf32>
      %c0_11 = arith.constant 0 : index
      %c0_12 = arith.constant 0 : index
      %13 = vector.load %arg5[%c0_11, %c0_12] : memref<1x128xf32, #tpu.memory_space<vmem>>, vector<1x128xf32>
      %14 = vector.broadcast %13 : vector<1x128xf32> to vector<32x128xf32>
      %15 = arith.mulf %12, %14 : vector<32x128xf32>
      %c0_13 = arith.constant 0 : index
      %c0_14 = arith.constant 0 : index
      %16 = vector.load %arg6[%c0_13, %c0_14] : memref<1x128xf32, #tpu.memory_space<vmem>>, vector<1x128xf32>
      %17 = vector.broadcast %16 : vector<1x128xf32> to vector<32x128xf32>
      %18 = arith.addf %15, %17 : vector<32x128xf32>
      %cst_15 = arith.constant 0.000000e+00 : f32
      %19 = vector.broadcast %cst_15 : f32 to vector<32x128xf32>
      %20 = arith.maximumf %18, %19 : vector<32x128xf32>
      %c0_16 = arith.constant 0 : index
      %c0_17 = arith.constant 0 : index
      %21 = vector.load %arg7[%c0_16, %c0_17] : memref<32x128xf32, #tpu.memory_space<vmem>>, vector<32x128xf32>
      tpu.vector_store %arg7[%c0_16, %c0_17], %20 {strides = array<i32>} : memref<32x128xf32, #tpu.memory_space<vmem>>, vector<32x128xf32>,
    } else {
    }
    return
  }
  func.func @transform_0(%arg0: i32, %arg1: i32, %arg2: i32) -> (i32, i32) {
    %c0_i32 = arith.constant 0 : i32
    return %arg0, %arg2 : i32, i32
  }
  func.func @transform_1(%arg0: i32, %arg1: i32, %arg2: i32) -> (i32, i32) {
    %c0_i32 = arith.constant 0 : i32
    return %arg2, %arg1 : i32, i32
  }
  func.func @transform_2(%arg0: i32, %arg1: i32, %arg2: i32) -> (i32, i32) {
    %c0_i32 = arith.constant 0 : i32
    %c0_i32_0 = arith.constant 0 : i32
    return %c0_i32, %arg1 : i32, i32
  }
  func.func @transform_3(%arg0: i32, %arg1: i32, %arg2: i32) -> (i32, i32) {
    %c0_i32 = arith.constant 0 : i32
    %c0_i32_0 = arith.constant 0 : i32
    return %c0_i32, %arg1 : i32, i32
  }
  func.func @transform_4(%arg0: i32, %arg1: i32, %arg2: i32) -> (i32, i32) {
    %c0_i32 = arith.constant 0 : i32
    return %arg0, %arg1 : i32, i32
  }
}

module attributes {stable_mosaic.version = 11 : i64} {
  func.func @kernel(%arg0: i32, %arg1: i32, %arg2: i32, %arg3: memref<32x128xbf16, #tpu.memory_space<vmem>>, %arg4: memref<128x128xbf16, #tpu.memory_space<vmem>>, %arg5: memref<1x128xf32, #tpu.memory_space<vmem>>, %arg6: memref<1x128xf32, #tpu.memory_space<vmem>>, %arg7: memref<32x128xf32, #tpu.memory_space<vmem>>, %arg8: memref<32x128xf32, #tpu.memory_space<vmem>>) attributes {dimension_semantics = [#tpu.dimension_semantics<parallel>, #tpu.dimension_semantics<parallel>, #tpu.dimension_semantics<arbitrary>], iteration_bounds = array<i64: 1, 1, 1>, scalar_prefetch = 0 : i64, scratch_operands = 1 : i64, tpu.core_type = #tpu.core_type<tc>, window_params = [{transform_indices = @transform_0, window_bounds = array<i64: 32, 128>}, {transform_indices = @transform_1, window_bounds = array<i64: 128, 128>}, {transform_indices = @transform_2, window_bounds = array<i64: 1, 128>}, {transform_indices = @transform_3, window_bounds = array<i64: 1, 128>}, {transform_indices = @transform_4, window_bounds = array<i64: 32, 128>}]} {
    %c0_i32 = arith.constant 0 : i32
    %0 = arith.cmpi eq, %arg2, %c0_i32 : i32
    %1 = arith.extui %0 : i1 to i32
    %c0_i32_0 = arith.constant 0 : i32
    %2 = arith.cmpi ne, %1, %c0_i32_0 : i32
    scf.if %2 {
      %cst_10 = arith.constant 0.000000e+00 : f32
      %12 = vector.broadcast %cst_10 : f32 to vector<32x128xf32>
      %c0_11 = arith.constant 0 : index
      %c0_12 = arith.constant 0 : index
      %13 = vector.load %arg8[%c0_11, %c0_12] : memref<32x128xf32, #tpu.memory_space<vmem>>, vector<32x128xf32>
      tpu.vector_store %arg8[%c0_11, %c0_12], %12 {strides = array<i32>} : memref<32x128xf32, #tpu.memory_space<vmem>>, vector<32x128xf32>,
    } else {
    }
    %c0 = arith.constant 0 : index
    %c0_1 = arith.constant 0 : index
    %3 = vector.load %arg8[%c0, %c0_1] : memref<32x128xf32, #tpu.memory_space<vmem>>, vector<32x128xf32>
    %c0_2 = arith.constant 0 : index
    %c0_3 = arith.constant 0 : index
    %4 = vector.load %arg3[%c0_2, %c0_3] : memref<32x128xbf16, #tpu.memory_space<vmem>>, vector<32x128xbf16>
    %c0_4 = arith.constant 0 : index
    %c0_5 = arith.constant 0 : index
    %5 = vector.load %arg4[%c0_4, %c0_5] : memref<128x128xbf16, #tpu.memory_space<vmem>>, vector<128x128xbf16>
    %cst = arith.constant dense<0.000000e+00> : vector<32x128xf32>
    %6 = tpu.matmul %4, %5, %cst {dimension_numbers = #tpu.dot_dimension_numbers<[1], [0], [0], [1], [0, 0, 1, 1], [], []>} : vector<32x128xbf16>, vector<128x128xbf16>, vector<32x128xf32> -> vector<32x128xf32>
    %7 = arith.addf %3, %6 : vector<32x128xf32>
    %c0_6 = arith.constant 0 : index
    %c0_7 = arith.constant 0 : index
    %8 = vector.load %arg8[%c0_6, %c0_7] : memref<32x128xf32, #tpu.memory_space<vmem>>, vector<32x128xf32>
    tpu.vector_store %arg8[%c0_6, %c0_7], %7 {strides = array<i32>} : memref<32x128xf32, #tpu.memory_space<vmem>>, vector<32x128xf32>,
    %c0_i32_8 = arith.constant 0 : i32
    %9 = arith.cmpi eq, %arg2, %c0_i32_8 : i32
    %10 = arith.extui %9 : i1 to i32
    %c0_i32_9 = arith.constant 0 : i32
    %11 = arith.cmpi ne, %10, %c0_i32_9 : i32
    scf.if %11 {
      %c0_10 = arith.constant 0 : index
      %c0_11 = arith.constant 0 : index
      %12 = vector.load %arg8[%c0_10, %c0_11] : memref<32x128xf32, #tpu.memory_space<vmem>>, vector<32x128xf32>
      %c0_12 = arith.constant 0 : index
      %c0_13 = arith.constant 0 : index
      %13 = vector.load %arg5[%c0_12, %c0_13] : memref<1x128xf32, #tpu.memory_space<vmem>>, vector<1x128xf32>
      %14 = vector.broadcast %13 : vector<1x128xf32> to vector<32x128xf32>
      %15 = arith.mulf %12, %14 : vector<32x128xf32>
      %c0_14 = arith.constant 0 : index
      %c0_15 = arith.constant 0 : index
      %16 = vector.load %arg6[%c0_14, %c0_15] : memref<1x128xf32, #tpu.memory_space<vmem>>, vector<1x128xf32>
      %17 = vector.broadcast %16 : vector<1x128xf32> to vector<32x128xf32>
      %18 = arith.addf %15, %17 : vector<32x128xf32>
      %c0_16 = arith.constant 0 : index
      %c0_17 = arith.constant 0 : index
      %19 = vector.load %arg7[%c0_16, %c0_17] : memref<32x128xf32, #tpu.memory_space<vmem>>, vector<32x128xf32>
      tpu.vector_store %arg7[%c0_16, %c0_17], %18 {strides = array<i32>} : memref<32x128xf32, #tpu.memory_space<vmem>>, vector<32x128xf32>,
    } else {
    }
    return
  }
  func.func @transform_0(%arg0: i32, %arg1: i32, %arg2: i32) -> (i32, i32) {
    %c0_i32 = arith.constant 0 : i32
    return %arg0, %arg2 : i32, i32
  }
  func.func @transform_1(%arg0: i32, %arg1: i32, %arg2: i32) -> (i32, i32) {
    %c0_i32 = arith.constant 0 : i32
    return %arg2, %arg1 : i32, i32
  }
  func.func @transform_2(%arg0: i32, %arg1: i32, %arg2: i32) -> (i32, i32) {
    %c0_i32 = arith.constant 0 : i32
    %c0_i32_0 = arith.constant 0 : i32
    return %c0_i32, %arg1 : i32, i32
  }
  func.func @transform_3(%arg0: i32, %arg1: i32, %arg2: i32) -> (i32, i32) {
    %c0_i32 = arith.constant 0 : i32
    %c0_i32_0 = arith.constant 0 : i32
    return %c0_i32, %arg1 : i32, i32
  }
  func.func @transform_4(%arg0: i32, %arg1: i32, %arg2: i32) -> (i32, i32) {
    %c0_i32 = arith.constant 0 : i32
    return %arg0, %arg1 : i32, i32
  }
}

module attributes {stable_mosaic.version = 11 : i64} {
  func.func @kernel(%arg0: i32, %arg1: i32, %arg2: i32, %arg3: memref<32x128xbf16, #tpu.memory_space<vmem>>, %arg4: memref<128x128xbf16, #tpu.memory_space<vmem>>, %arg5: memref<1x128xf32, #tpu.memory_space<vmem>>, %arg6: memref<1x128xf32, #tpu.memory_space<vmem>>, %arg7: memref<32x128xf32, #tpu.memory_space<vmem>>, %arg8: memref<32x128xf32, #tpu.memory_space<vmem>>, %arg9: memref<32x128xf32, #tpu.memory_space<vmem>>) attributes {dimension_semantics = [#tpu.dimension_semantics<parallel>, #tpu.dimension_semantics<parallel>, #tpu.dimension_semantics<arbitrary>], iteration_bounds = array<i64: 1, 1, 9>, scalar_prefetch = 0 : i64, scratch_operands = 1 : i64, tpu.core_type = #tpu.core_type<tc>, window_params = [{transform_indices = @transform_0, window_bounds = array<i64: 32, 128>}, {transform_indices = @transform_1, window_bounds = array<i64: 128, 128>}, {transform_indices = @transform_2, window_bounds = array<i64: 1, 128>}, {transform_indices = @transform_3, window_bounds = array<i64: 1, 128>}, {transform_indices = @transform_4, window_bounds = array<i64: 32, 128>}, {transform_indices = @transform_5, window_bounds = array<i64: 32, 128>}]} {
    %c0_i32 = arith.constant 0 : i32
    %0 = arith.cmpi eq, %arg2, %c0_i32 : i32
    %1 = arith.extui %0 : i1 to i32
    %c0_i32_0 = arith.constant 0 : i32
    %2 = arith.cmpi ne, %1, %c0_i32_0 : i32
    scf.if %2 {
      %cst_9 = arith.constant 0.000000e+00 : f32
      %12 = vector.broadcast %cst_9 : f32 to vector<32x128xf32>
      %c0_10 = arith.constant 0 : index
      %c0_11 = arith.constant 0 : index
      %13 = vector.load %arg9[%c0_10, %c0_11] : memref<32x128xf32, #tpu.memory_space<vmem>>, vector<32x128xf32>
      tpu.vector_store %arg9[%c0_10, %c0_11], %12 {strides = array<i32>} : memref<32x128xf32, #tpu.memory_space<vmem>>, vector<32x128xf32>,
    } else {
    }
    %c0 = arith.constant 0 : index
    %c0_1 = arith.constant 0 : index
    %3 = vector.load %arg9[%c0, %c0_1] : memref<32x128xf32, #tpu.memory_space<vmem>>, vector<32x128xf32>
    %c0_2 = arith.constant 0 : index
    %c0_3 = arith.constant 0 : index
    %4 = vector.load %arg3[%c0_2, %c0_3] : memref<32x128xbf16, #tpu.memory_space<vmem>>, vector<32x128xbf16>
    %c0_4 = arith.constant 0 : index
    %c0_5 = arith.constant 0 : index
    %5 = vector.load %arg4[%c0_4, %c0_5] : memref<128x128xbf16, #tpu.memory_space<vmem>>, vector<128x128xbf16>
    %cst = arith.constant dense<0.000000e+00> : vector<32x128xf32>
    %6 = tpu.matmul %4, %5, %cst {dimension_numbers = #tpu.dot_dimension_numbers<[1], [0], [0], [1], [0, 0, 1, 1], [], []>} : vector<32x128xbf16>, vector<128x128xbf16>, vector<32x128xf32> -> vector<32x128xf32>
    %7 = arith.addf %3, %6 : vector<32x128xf32>
    %c0_6 = arith.constant 0 : index
    %c0_7 = arith.constant 0 : index
    %8 = vector.load %arg9[%c0_6, %c0_7] : memref<32x128xf32, #tpu.memory_space<vmem>>, vector<32x128xf32>
    tpu.vector_store %arg9[%c0_6, %c0_7], %7 {strides = array<i32>} : memref<32x128xf32, #tpu.memory_space<vmem>>, vector<32x128xf32>,
    %c8_i32 = arith.constant 8 : i32
    %9 = arith.cmpi eq, %arg2, %c8_i32 : i32
    %10 = arith.extui %9 : i1 to i32
    %c0_i32_8 = arith.constant 0 : i32
    %11 = arith.cmpi ne, %10, %c0_i32_8 : i32
    scf.if %11 {
      %c0_9 = arith.constant 0 : index
      %c0_10 = arith.constant 0 : index
      %12 = vector.load %arg9[%c0_9, %c0_10] : memref<32x128xf32, #tpu.memory_space<vmem>>, vector<32x128xf32>
      %c0_11 = arith.constant 0 : index
      %c0_12 = arith.constant 0 : index
      %13 = vector.load %arg5[%c0_11, %c0_12] : memref<1x128xf32, #tpu.memory_space<vmem>>, vector<1x128xf32>
      %14 = vector.broadcast %13 : vector<1x128xf32> to vector<32x128xf32>
      %15 = arith.mulf %12, %14 : vector<32x128xf32>
      %c0_13 = arith.constant 0 : index
      %c0_14 = arith.constant 0 : index
      %16 = vector.load %arg6[%c0_13, %c0_14] : memref<1x128xf32, #tpu.memory_space<vmem>>, vector<1x128xf32>
      %17 = vector.broadcast %16 : vector<1x128xf32> to vector<32x128xf32>
      %18 = arith.addf %15, %17 : vector<32x128xf32>
      %c0_15 = arith.constant 0 : index
      %c0_16 = arith.constant 0 : index
      %19 = vector.load %arg7[%c0_15, %c0_16] : memref<32x128xf32, #tpu.memory_space<vmem>>, vector<32x128xf32>
      %20 = arith.addf %18, %19 : vector<32x128xf32>
      %cst_17 = arith.constant 0.000000e+00 : f32
      %21 = vector.broadcast %cst_17 : f32 to vector<32x128xf32>
      %22 = arith.maximumf %20, %21 : vector<32x128xf32>
      %c0_18 = arith.constant 0 : index
      %c0_19 = arith.constant 0 : index
      %23 = vector.load %arg8[%c0_18, %c0_19] : memref<32x128xf32, #tpu.memory_space<vmem>>, vector<32x128xf32>
      tpu.vector_store %arg8[%c0_18, %c0_19], %22 {strides = array<i32>} : memref<32x128xf32, #tpu.memory_space<vmem>>, vector<32x128xf32>,
    } else {
    }
    return
  }
  func.func @transform_0(%arg0: i32, %arg1: i32, %arg2: i32) -> (i32, i32) {
    %c0_i32 = arith.constant 0 : i32
    return %arg0, %arg2 : i32, i32
  }
  func.func @transform_1(%arg0: i32, %arg1: i32, %arg2: i32) -> (i32, i32) {
    %c0_i32 = arith.constant 0 : i32
    return %arg2, %arg1 : i32, i32
  }
  func.func @transform_2(%arg0: i32, %arg1: i32, %arg2: i32) -> (i32, i32) {
    %c0_i32 = arith.constant 0 : i32
    %c0_i32_0 = arith.constant 0 : i32
    return %c0_i32, %arg1 : i32, i32
  }
  func.func @transform_3(%arg0: i32, %arg1: i32, %arg2: i32) -> (i32, i32) {
    %c0_i32 = arith.constant 0 : i32
    %c0_i32_0 = arith.constant 0 : i32
    return %c0_i32, %arg1 : i32, i32
  }
  func.func @transform_4(%arg0: i32, %arg1: i32, %arg2: i32) -> (i32, i32) {
    %c0_i32 = arith.constant 0 : i32
    return %arg0, %arg1 : i32, i32
  }
  func.func @transform_5(%arg0: i32, %arg1: i32, %arg2: i32) -> (i32, i32) {
    %c0_i32 = arith.constant 0 : i32
    return %arg0, %arg1 : i32, i32
  }
}

module attributes {stable_mosaic.version = 11 : i64} {
  func.func @kernel(%arg0: i32, %arg1: i32, %arg2: i32, %arg3: memref<32x128xbf16, #tpu.memory_space<vmem>>, %arg4: memref<128x128xbf16, #tpu.memory_space<vmem>>, %arg5: memref<1x128xf32, #tpu.memory_space<vmem>>, %arg6: memref<1x128xf32, #tpu.memory_space<vmem>>, %arg7: memref<32x128xf32, #tpu.memory_space<vmem>>, %arg8: memref<32x128xf32, #tpu.memory_space<vmem>>) attributes {dimension_semantics = [#tpu.dimension_semantics<parallel>, #tpu.dimension_semantics<parallel>, #tpu.dimension_semantics<arbitrary>], iteration_bounds = array<i64: 1, 1, 9>, scalar_prefetch = 0 : i64, scratch_operands = 1 : i64, tpu.core_type = #tpu.core_type<tc>, window_params = [{transform_indices = @transform_0, window_bounds = array<i64: 32, 128>}, {transform_indices = @transform_1, window_bounds = array<i64: 128, 128>}, {transform_indices = @transform_2, window_bounds = array<i64: 1, 128>}, {transform_indices = @transform_3, window_bounds = array<i64: 1, 128>}, {transform_indices = @transform_4, window_bounds = array<i64: 32, 128>}]} {
    %c0_i32 = arith.constant 0 : i32
    %0 = arith.cmpi eq, %arg2, %c0_i32 : i32
    %1 = arith.extui %0 : i1 to i32
    %c0_i32_0 = arith.constant 0 : i32
    %2 = arith.cmpi ne, %1, %c0_i32_0 : i32
    scf.if %2 {
      %cst_9 = arith.constant 0.000000e+00 : f32
      %12 = vector.broadcast %cst_9 : f32 to vector<32x128xf32>
      %c0_10 = arith.constant 0 : index
      %c0_11 = arith.constant 0 : index
      %13 = vector.load %arg8[%c0_10, %c0_11] : memref<32x128xf32, #tpu.memory_space<vmem>>, vector<32x128xf32>
      tpu.vector_store %arg8[%c0_10, %c0_11], %12 {strides = array<i32>} : memref<32x128xf32, #tpu.memory_space<vmem>>, vector<32x128xf32>,
    } else {
    }
    %c0 = arith.constant 0 : index
    %c0_1 = arith.constant 0 : index
    %3 = vector.load %arg8[%c0, %c0_1] : memref<32x128xf32, #tpu.memory_space<vmem>>, vector<32x128xf32>
    %c0_2 = arith.constant 0 : index
    %c0_3 = arith.constant 0 : index
    %4 = vector.load %arg3[%c0_2, %c0_3] : memref<32x128xbf16, #tpu.memory_space<vmem>>, vector<32x128xbf16>
    %c0_4 = arith.constant 0 : index
    %c0_5 = arith.constant 0 : index
    %5 = vector.load %arg4[%c0_4, %c0_5] : memref<128x128xbf16, #tpu.memory_space<vmem>>, vector<128x128xbf16>
    %cst = arith.constant dense<0.000000e+00> : vector<32x128xf32>
    %6 = tpu.matmul %4, %5, %cst {dimension_numbers = #tpu.dot_dimension_numbers<[1], [0], [0], [1], [0, 0, 1, 1], [], []>} : vector<32x128xbf16>, vector<128x128xbf16>, vector<32x128xf32> -> vector<32x128xf32>
    %7 = arith.addf %3, %6 : vector<32x128xf32>
    %c0_6 = arith.constant 0 : index
    %c0_7 = arith.constant 0 : index
    %8 = vector.load %arg8[%c0_6, %c0_7] : memref<32x128xf32, #tpu.memory_space<vmem>>, vector<32x128xf32>
    tpu.vector_store %arg8[%c0_6, %c0_7], %7 {strides = array<i32>} : memref<32x128xf32, #tpu.memory_space<vmem>>, vector<32x128xf32>,
    %c8_i32 = arith.constant 8 : i32
    %9 = arith.cmpi eq, %arg2, %c8_i32 : i32
    %10 = arith.extui %9 : i1 to i32
    %c0_i32_8 = arith.constant 0 : i32
    %11 = arith.cmpi ne, %10, %c0_i32_8 : i32
    scf.if %11 {
      %c0_9 = arith.constant 0 : index
      %c0_10 = arith.constant 0 : index
      %12 = vector.load %arg8[%c0_9, %c0_10] : memref<32x128xf32, #tpu.memory_space<vmem>>, vector<32x128xf32>
      %c0_11 = arith.constant 0 : index
      %c0_12 = arith.constant 0 : index
      %13 = vector.load %arg5[%c0_11, %c0_12] : memref<1x128xf32, #tpu.memory_space<vmem>>, vector<1x128xf32>
      %14 = vector.broadcast %13 : vector<1x128xf32> to vector<32x128xf32>
      %15 = arith.mulf %12, %14 : vector<32x128xf32>
      %c0_13 = arith.constant 0 : index
      %c0_14 = arith.constant 0 : index
      %16 = vector.load %arg6[%c0_13, %c0_14] : memref<1x128xf32, #tpu.memory_space<vmem>>, vector<1x128xf32>
      %17 = vector.broadcast %16 : vector<1x128xf32> to vector<32x128xf32>
      %18 = arith.addf %15, %17 : vector<32x128xf32>
      %cst_15 = arith.constant 0.000000e+00 : f32
      %19 = vector.broadcast %cst_15 : f32 to vector<32x128xf32>
      %20 = arith.maximumf %18, %19 : vector<32x128xf32>
      %c0_16 = arith.constant 0 : index
      %c0_17 = arith.constant 0 : index
      %21 = vector.load %arg7[%c0_16, %c0_17] : memref<32x128xf32, #tpu.memory_space<vmem>>, vector<32x128xf32>
      tpu.vector_store %arg7[%c0_16, %c0_17], %20 {strides = array<i32>} : memref<32x128xf32, #tpu.memory_space<vmem>>, vector<32x128xf32>,
    } else {
    }
    return
  }
  func.func @transform_0(%arg0: i32, %arg1: i32, %arg2: i32) -> (i32, i32) {
    %c0_i32 = arith.constant 0 : i32
    return %arg0, %arg2 : i32, i32
  }
  func.func @transform_1(%arg0: i32, %arg1: i32, %arg2: i32) -> (i32, i32) {
    %c0_i32 = arith.constant 0 : i32
    return %arg2, %arg1 : i32, i32
  }
  func.func @transform_2(%arg0: i32, %arg1: i32, %arg2: i32) -> (i32, i32) {
    %c0_i32 = arith.constant 0 : i32
    %c0_i32_0 = arith.constant 0 : i32
    return %c0_i32, %arg1 : i32, i32
  }
  func.func @transform_3(%arg0: i32, %arg1: i32, %arg2: i32) -> (i32, i32) {
    %c0_i32 = arith.constant 0 : i32
    %c0_i32_0 = arith.constant 0 : i32
    return %c0_i32, %arg1 : i32, i32
  }
  func.func @transform_4(%arg0: i32, %arg1: i32, %arg2: i32) -> (i32, i32) {
    %c0_i32 = arith.constant 0 : i32
    return %arg0, %arg1 : i32, i32
  }
}

module attributes {stable_mosaic.version = 11 : i64} {
  func.func @kernel(%arg0: i32, %arg1: i32, %arg2: i32, %arg3: memref<16x128xbf16, #tpu.memory_space<vmem>>, %arg4: memref<128x256xbf16, #tpu.memory_space<vmem>>, %arg5: memref<1x256xf32, #tpu.memory_space<vmem>>, %arg6: memref<1x256xf32, #tpu.memory_space<vmem>>, %arg7: memref<16x256xf32, #tpu.memory_space<vmem>>, %arg8: memref<16x256xf32, #tpu.memory_space<vmem>>) attributes {dimension_semantics = [#tpu.dimension_semantics<parallel>, #tpu.dimension_semantics<parallel>, #tpu.dimension_semantics<arbitrary>], iteration_bounds = array<i64: 1, 1, 9>, scalar_prefetch = 0 : i64, scratch_operands = 1 : i64, tpu.core_type = #tpu.core_type<tc>, window_params = [{transform_indices = @transform_0, window_bounds = array<i64: 16, 128>}, {transform_indices = @transform_1, window_bounds = array<i64: 128, 256>}, {transform_indices = @transform_2, window_bounds = array<i64: 1, 256>}, {transform_indices = @transform_3, window_bounds = array<i64: 1, 256>}, {transform_indices = @transform_4, window_bounds = array<i64: 16, 256>}]} {
    %c0_i32 = arith.constant 0 : i32
    %0 = arith.cmpi eq, %arg2, %c0_i32 : i32
    %1 = arith.extui %0 : i1 to i32
    %c0_i32_0 = arith.constant 0 : i32
    %2 = arith.cmpi ne, %1, %c0_i32_0 : i32
    scf.if %2 {
      %cst_9 = arith.constant 0.000000e+00 : f32
      %12 = vector.broadcast %cst_9 : f32 to vector<16x256xf32>
      %c0_10 = arith.constant 0 : index
      %c0_11 = arith.constant 0 : index
      %13 = vector.load %arg8[%c0_10, %c0_11] : memref<16x256xf32, #tpu.memory_space<vmem>>, vector<16x256xf32>
      tpu.vector_store %arg8[%c0_10, %c0_11], %12 {strides = array<i32>} : memref<16x256xf32, #tpu.memory_space<vmem>>, vector<16x256xf32>,
    } else {
    }
    %c0 = arith.constant 0 : index
    %c0_1 = arith.constant 0 : index
    %3 = vector.load %arg8[%c0, %c0_1] : memref<16x256xf32, #tpu.memory_space<vmem>>, vector<16x256xf32>
    %c0_2 = arith.constant 0 : index
    %c0_3 = arith.constant 0 : index
    %4 = vector.load %arg3[%c0_2, %c0_3] : memref<16x128xbf16, #tpu.memory_space<vmem>>, vector<16x128xbf16>
    %c0_4 = arith.constant 0 : index
    %c0_5 = arith.constant 0 : index
    %5 = vector.load %arg4[%c0_4, %c0_5] : memref<128x256xbf16, #tpu.memory_space<vmem>>, vector<128x256xbf16>
    %cst = arith.constant dense<0.000000e+00> : vector<16x256xf32>
    %6 = tpu.matmul %4, %5, %cst {dimension_numbers = #tpu.dot_dimension_numbers<[1], [0], [0], [1], [0, 0, 1, 1], [], []>} : vector<16x128xbf16>, vector<128x256xbf16>, vector<16x256xf32> -> vector<16x256xf32>
    %7 = arith.addf %3, %6 : vector<16x256xf32>
    %c0_6 = arith.constant 0 : index
    %c0_7 = arith.constant 0 : index
    %8 = vector.load %arg8[%c0_6, %c0_7] : memref<16x256xf32, #tpu.memory_space<vmem>>, vector<16x256xf32>
    tpu.vector_store %arg8[%c0_6, %c0_7], %7 {strides = array<i32>} : memref<16x256xf32, #tpu.memory_space<vmem>>, vector<16x256xf32>,
    %c8_i32 = arith.constant 8 : i32
    %9 = arith.cmpi eq, %arg2, %c8_i32 : i32
    %10 = arith.extui %9 : i1 to i32
    %c0_i32_8 = arith.constant 0 : i32
    %11 = arith.cmpi ne, %10, %c0_i32_8 : i32
    scf.if %11 {
      %c0_9 = arith.constant 0 : index
      %c0_10 = arith.constant 0 : index
      %12 = vector.load %arg8[%c0_9, %c0_10] : memref<16x256xf32, #tpu.memory_space<vmem>>, vector<16x256xf32>
      %c0_11 = arith.constant 0 : index
      %c0_12 = arith.constant 0 : index
      %13 = vector.load %arg5[%c0_11, %c0_12] : memref<1x256xf32, #tpu.memory_space<vmem>>, vector<1x256xf32>
      %14 = vector.broadcast %13 : vector<1x256xf32> to vector<16x256xf32>
      %15 = arith.mulf %12, %14 : vector<16x256xf32>
      %c0_13 = arith.constant 0 : index
      %c0_14 = arith.constant 0 : index
      %16 = vector.load %arg6[%c0_13, %c0_14] : memref<1x256xf32, #tpu.memory_space<vmem>>, vector<1x256xf32>
      %17 = vector.broadcast %16 : vector<1x256xf32> to vector<16x256xf32>
      %18 = arith.addf %15, %17 : vector<16x256xf32>
      %cst_15 = arith.constant 0.000000e+00 : f32
      %19 = vector.broadcast %cst_15 : f32 to vector<16x256xf32>
      %20 = arith.maximumf %18, %19 : vector<16x256xf32>
      %c0_16 = arith.constant 0 : index
      %c0_17 = arith.constant 0 : index
      %21 = vector.load %arg7[%c0_16, %c0_17] : memref<16x256xf32, #tpu.memory_space<vmem>>, vector<16x256xf32>
      tpu.vector_store %arg7[%c0_16, %c0_17], %20 {strides = array<i32>} : memref<16x256xf32, #tpu.memory_space<vmem>>, vector<16x256xf32>,
    } else {
    }
    return
  }
  func.func @transform_0(%arg0: i32, %arg1: i32, %arg2: i32) -> (i32, i32) {
    %c0_i32 = arith.constant 0 : i32
    return %arg0, %arg2 : i32, i32
  }
  func.func @transform_1(%arg0: i32, %arg1: i32, %arg2: i32) -> (i32, i32) {
    %c0_i32 = arith.constant 0 : i32
    return %arg2, %arg1 : i32, i32
  }
  func.func @transform_2(%arg0: i32, %arg1: i32, %arg2: i32) -> (i32, i32) {
    %c0_i32 = arith.constant 0 : i32
    %c0_i32_0 = arith.constant 0 : i32
    return %c0_i32, %arg1 : i32, i32
  }
  func.func @transform_3(%arg0: i32, %arg1: i32, %arg2: i32) -> (i32, i32) {
    %c0_i32 = arith.constant 0 : i32
    %c0_i32_0 = arith.constant 0 : i32
    return %c0_i32, %arg1 : i32, i32
  }
  func.func @transform_4(%arg0: i32, %arg1: i32, %arg2: i32) -> (i32, i32) {
    %c0_i32 = arith.constant 0 : i32
    return %arg0, %arg1 : i32, i32
  }
}

module attributes {stable_mosaic.version = 11 : i64} {
  func.func @kernel(%arg0: i32, %arg1: i32, %arg2: i32, %arg3: memref<16x128xbf16, #tpu.memory_space<vmem>>, %arg4: memref<128x256xbf16, #tpu.memory_space<vmem>>, %arg5: memref<1x256xf32, #tpu.memory_space<vmem>>, %arg6: memref<1x256xf32, #tpu.memory_space<vmem>>, %arg7: memref<16x256xf32, #tpu.memory_space<vmem>>, %arg8: memref<16x256xf32, #tpu.memory_space<vmem>>) attributes {dimension_semantics = [#tpu.dimension_semantics<parallel>, #tpu.dimension_semantics<parallel>, #tpu.dimension_semantics<arbitrary>], iteration_bounds = array<i64: 1, 1, 1>, scalar_prefetch = 0 : i64, scratch_operands = 1 : i64, tpu.core_type = #tpu.core_type<tc>, window_params = [{transform_indices = @transform_0, window_bounds = array<i64: 16, 128>}, {transform_indices = @transform_1, window_bounds = array<i64: 128, 256>}, {transform_indices = @transform_2, window_bounds = array<i64: 1, 256>}, {transform_indices = @transform_3, window_bounds = array<i64: 1, 256>}, {transform_indices = @transform_4, window_bounds = array<i64: 16, 256>}]} {
    %c0_i32 = arith.constant 0 : i32
    %0 = arith.cmpi eq, %arg2, %c0_i32 : i32
    %1 = arith.extui %0 : i1 to i32
    %c0_i32_0 = arith.constant 0 : i32
    %2 = arith.cmpi ne, %1, %c0_i32_0 : i32
    scf.if %2 {
      %cst_10 = arith.constant 0.000000e+00 : f32
      %12 = vector.broadcast %cst_10 : f32 to vector<16x256xf32>
      %c0_11 = arith.constant 0 : index
      %c0_12 = arith.constant 0 : index
      %13 = vector.load %arg8[%c0_11, %c0_12] : memref<16x256xf32, #tpu.memory_space<vmem>>, vector<16x256xf32>
      tpu.vector_store %arg8[%c0_11, %c0_12], %12 {strides = array<i32>} : memref<16x256xf32, #tpu.memory_space<vmem>>, vector<16x256xf32>,
    } else {
    }
    %c0 = arith.constant 0 : index
    %c0_1 = arith.constant 0 : index
    %3 = vector.load %arg8[%c0, %c0_1] : memref<16x256xf32, #tpu.memory_space<vmem>>, vector<16x256xf32>
    %c0_2 = arith.constant 0 : index
    %c0_3 = arith.constant 0 : index
    %4 = vector.load %arg3[%c0_2, %c0_3] : memref<16x128xbf16, #tpu.memory_space<vmem>>, vector<16x128xbf16>
    %c0_4 = arith.constant 0 : index
    %c0_5 = arith.constant 0 : index
    %5 = vector.load %arg4[%c0_4, %c0_5] : memref<128x256xbf16, #tpu.memory_space<vmem>>, vector<128x256xbf16>
    %cst = arith.constant dense<0.000000e+00> : vector<16x256xf32>
    %6 = tpu.matmul %4, %5, %cst {dimension_numbers = #tpu.dot_dimension_numbers<[1], [0], [0], [1], [0, 0, 1, 1], [], []>} : vector<16x128xbf16>, vector<128x256xbf16>, vector<16x256xf32> -> vector<16x256xf32>
    %7 = arith.addf %3, %6 : vector<16x256xf32>
    %c0_6 = arith.constant 0 : index
    %c0_7 = arith.constant 0 : index
    %8 = vector.load %arg8[%c0_6, %c0_7] : memref<16x256xf32, #tpu.memory_space<vmem>>, vector<16x256xf32>
    tpu.vector_store %arg8[%c0_6, %c0_7], %7 {strides = array<i32>} : memref<16x256xf32, #tpu.memory_space<vmem>>, vector<16x256xf32>,
    %c0_i32_8 = arith.constant 0 : i32
    %9 = arith.cmpi eq, %arg2, %c0_i32_8 : i32
    %10 = arith.extui %9 : i1 to i32
    %c0_i32_9 = arith.constant 0 : i32
    %11 = arith.cmpi ne, %10, %c0_i32_9 : i32
    scf.if %11 {
      %c0_10 = arith.constant 0 : index
      %c0_11 = arith.constant 0 : index
      %12 = vector.load %arg8[%c0_10, %c0_11] : memref<16x256xf32, #tpu.memory_space<vmem>>, vector<16x256xf32>
      %c0_12 = arith.constant 0 : index
      %c0_13 = arith.constant 0 : index
      %13 = vector.load %arg5[%c0_12, %c0_13] : memref<1x256xf32, #tpu.memory_space<vmem>>, vector<1x256xf32>
      %14 = vector.broadcast %13 : vector<1x256xf32> to vector<16x256xf32>
      %15 = arith.mulf %12, %14 : vector<16x256xf32>
      %c0_14 = arith.constant 0 : index
      %c0_15 = arith.constant 0 : index
      %16 = vector.load %arg6[%c0_14, %c0_15] : memref<1x256xf32, #tpu.memory_space<vmem>>, vector<1x256xf32>
      %17 = vector.broadcast %16 : vector<1x256xf32> to vector<16x256xf32>
      %18 = arith.addf %15, %17 : vector<16x256xf32>
      %c0_16 = arith.constant 0 : index
      %c0_17 = arith.constant 0 : index
      %19 = vector.load %arg7[%c0_16, %c0_17] : memref<16x256xf32, #tpu.memory_space<vmem>>, vector<16x256xf32>
      tpu.vector_store %arg7[%c0_16, %c0_17], %18 {strides = array<i32>} : memref<16x256xf32, #tpu.memory_space<vmem>>, vector<16x256xf32>,
    } else {
    }
    return
  }
  func.func @transform_0(%arg0: i32, %arg1: i32, %arg2: i32) -> (i32, i32) {
    %c0_i32 = arith.constant 0 : i32
    return %arg0, %arg2 : i32, i32
  }
  func.func @transform_1(%arg0: i32, %arg1: i32, %arg2: i32) -> (i32, i32) {
    %c0_i32 = arith.constant 0 : i32
    return %arg2, %arg1 : i32, i32
  }
  func.func @transform_2(%arg0: i32, %arg1: i32, %arg2: i32) -> (i32, i32) {
    %c0_i32 = arith.constant 0 : i32
    %c0_i32_0 = arith.constant 0 : i32
    return %c0_i32, %arg1 : i32, i32
  }
  func.func @transform_3(%arg0: i32, %arg1: i32, %arg2: i32) -> (i32, i32) {
    %c0_i32 = arith.constant 0 : i32
    %c0_i32_0 = arith.constant 0 : i32
    return %c0_i32, %arg1 : i32, i32
  }
  func.func @transform_4(%arg0: i32, %arg1: i32, %arg2: i32) -> (i32, i32) {
    %c0_i32 = arith.constant 0 : i32
    return %arg0, %arg1 : i32, i32
  }
}

module attributes {stable_mosaic.version = 11 : i64} {
  func.func @kernel(%arg0: i32, %arg1: i32, %arg2: i32, %arg3: memref<16x256xbf16, #tpu.memory_space<vmem>>, %arg4: memref<256x256xbf16, #tpu.memory_space<vmem>>, %arg5: memref<1x256xf32, #tpu.memory_space<vmem>>, %arg6: memref<1x256xf32, #tpu.memory_space<vmem>>, %arg7: memref<16x256xf32, #tpu.memory_space<vmem>>, %arg8: memref<16x256xf32, #tpu.memory_space<vmem>>, %arg9: memref<16x256xf32, #tpu.memory_space<vmem>>) attributes {dimension_semantics = [#tpu.dimension_semantics<parallel>, #tpu.dimension_semantics<parallel>, #tpu.dimension_semantics<arbitrary>], iteration_bounds = array<i64: 1, 1, 9>, scalar_prefetch = 0 : i64, scratch_operands = 1 : i64, tpu.core_type = #tpu.core_type<tc>, window_params = [{transform_indices = @transform_0, window_bounds = array<i64: 16, 256>}, {transform_indices = @transform_1, window_bounds = array<i64: 256, 256>}, {transform_indices = @transform_2, window_bounds = array<i64: 1, 256>}, {transform_indices = @transform_3, window_bounds = array<i64: 1, 256>}, {transform_indices = @transform_4, window_bounds = array<i64: 16, 256>}, {transform_indices = @transform_5, window_bounds = array<i64: 16, 256>}]} {
    %c0_i32 = arith.constant 0 : i32
    %0 = arith.cmpi eq, %arg2, %c0_i32 : i32
    %1 = arith.extui %0 : i1 to i32
    %c0_i32_0 = arith.constant 0 : i32
    %2 = arith.cmpi ne, %1, %c0_i32_0 : i32
    scf.if %2 {
      %cst_9 = arith.constant 0.000000e+00 : f32
      %12 = vector.broadcast %cst_9 : f32 to vector<16x256xf32>
      %c0_10 = arith.constant 0 : index
      %c0_11 = arith.constant 0 : index
      %13 = vector.load %arg9[%c0_10, %c0_11] : memref<16x256xf32, #tpu.memory_space<vmem>>, vector<16x256xf32>
      tpu.vector_store %arg9[%c0_10, %c0_11], %12 {strides = array<i32>} : memref<16x256xf32, #tpu.memory_space<vmem>>, vector<16x256xf32>,
    } else {
    }
    %c0 = arith.constant 0 : index
    %c0_1 = arith.constant 0 : index
    %3 = vector.load %arg9[%c0, %c0_1] : memref<16x256xf32, #tpu.memory_space<vmem>>, vector<16x256xf32>
    %c0_2 = arith.constant 0 : index
    %c0_3 = arith.constant 0 : index
    %4 = vector.load %arg3[%c0_2, %c0_3] : memref<16x256xbf16, #tpu.memory_space<vmem>>, vector<16x256xbf16>
    %c0_4 = arith.constant 0 : index
    %c0_5 = arith.constant 0 : index
    %5 = vector.load %arg4[%c0_4, %c0_5] : memref<256x256xbf16, #tpu.memory_space<vmem>>, vector<256x256xbf16>
    %cst = arith.constant dense<0.000000e+00> : vector<16x256xf32>
    %6 = tpu.matmul %4, %5, %cst {dimension_numbers = #tpu.dot_dimension_numbers<[1], [0], [0], [1], [0, 0, 1, 1], [], []>} : vector<16x256xbf16>, vector<256x256xbf16>, vector<16x256xf32> -> vector<16x256xf32>
    %7 = arith.addf %3, %6 : vector<16x256xf32>
    %c0_6 = arith.constant 0 : index
    %c0_7 = arith.constant 0 : index
    %8 = vector.load %arg9[%c0_6, %c0_7] : memref<16x256xf32, #tpu.memory_space<vmem>>, vector<16x256xf32>
    tpu.vector_store %arg9[%c0_6, %c0_7], %7 {strides = array<i32>} : memref<16x256xf32, #tpu.memory_space<vmem>>, vector<16x256xf32>,
    %c8_i32 = arith.constant 8 : i32
    %9 = arith.cmpi eq, %arg2, %c8_i32 : i32
    %10 = arith.extui %9 : i1 to i32
    %c0_i32_8 = arith.constant 0 : i32
    %11 = arith.cmpi ne, %10, %c0_i32_8 : i32
    scf.if %11 {
      %c0_9 = arith.constant 0 : index
      %c0_10 = arith.constant 0 : index
      %12 = vector.load %arg9[%c0_9, %c0_10] : memref<16x256xf32, #tpu.memory_space<vmem>>, vector<16x256xf32>
      %c0_11 = arith.constant 0 : index
      %c0_12 = arith.constant 0 : index
      %13 = vector.load %arg5[%c0_11, %c0_12] : memref<1x256xf32, #tpu.memory_space<vmem>>, vector<1x256xf32>
      %14 = vector.broadcast %13 : vector<1x256xf32> to vector<16x256xf32>
      %15 = arith.mulf %12, %14 : vector<16x256xf32>
      %c0_13 = arith.constant 0 : index
      %c0_14 = arith.constant 0 : index
      %16 = vector.load %arg6[%c0_13, %c0_14] : memref<1x256xf32, #tpu.memory_space<vmem>>, vector<1x256xf32>
      %17 = vector.broadcast %16 : vector<1x256xf32> to vector<16x256xf32>
      %18 = arith.addf %15, %17 : vector<16x256xf32>
      %c0_15 = arith.constant 0 : index
      %c0_16 = arith.constant 0 : index
      %19 = vector.load %arg7[%c0_15, %c0_16] : memref<16x256xf32, #tpu.memory_space<vmem>>, vector<16x256xf32>
      %20 = arith.addf %18, %19 : vector<16x256xf32>
      %cst_17 = arith.constant 0.000000e+00 : f32
      %21 = vector.broadcast %cst_17 : f32 to vector<16x256xf32>
      %22 = arith.maximumf %20, %21 : vector<16x256xf32>
      %c0_18 = arith.constant 0 : index
      %c0_19 = arith.constant 0 : index
      %23 = vector.load %arg8[%c0_18, %c0_19] : memref<16x256xf32, #tpu.memory_space<vmem>>, vector<16x256xf32>
      tpu.vector_store %arg8[%c0_18, %c0_19], %22 {strides = array<i32>} : memref<16x256xf32, #tpu.memory_space<vmem>>, vector<16x256xf32>,
    } else {
    }
    return
  }
  func.func @transform_0(%arg0: i32, %arg1: i32, %arg2: i32) -> (i32, i32) {
    %c0_i32 = arith.constant 0 : i32
    return %arg0, %arg2 : i32, i32
  }
  func.func @transform_1(%arg0: i32, %arg1: i32, %arg2: i32) -> (i32, i32) {
    %c0_i32 = arith.constant 0 : i32
    return %arg2, %arg1 : i32, i32
  }
  func.func @transform_2(%arg0: i32, %arg1: i32, %arg2: i32) -> (i32, i32) {
    %c0_i32 = arith.constant 0 : i32
    %c0_i32_0 = arith.constant 0 : i32
    return %c0_i32, %arg1 : i32, i32
  }
  func.func @transform_3(%arg0: i32, %arg1: i32, %arg2: i32) -> (i32, i32) {
    %c0_i32 = arith.constant 0 : i32
    %c0_i32_0 = arith.constant 0 : i32
    return %c0_i32, %arg1 : i32, i32
  }
  func.func @transform_4(%arg0: i32, %arg1: i32, %arg2: i32) -> (i32, i32) {
    %c0_i32 = arith.constant 0 : i32
    return %arg0, %arg1 : i32, i32
  }
  func.func @transform_5(%arg0: i32, %arg1: i32, %arg2: i32) -> (i32, i32) {
    %c0_i32 = arith.constant 0 : i32
    return %arg0, %arg1 : i32, i32
  }
}

module attributes {stable_mosaic.version = 11 : i64} {
  func.func @kernel(%arg0: i32, %arg1: i32, %arg2: i32, %arg3: memref<16x256xbf16, #tpu.memory_space<vmem>>, %arg4: memref<256x256xbf16, #tpu.memory_space<vmem>>, %arg5: memref<1x256xf32, #tpu.memory_space<vmem>>, %arg6: memref<1x256xf32, #tpu.memory_space<vmem>>, %arg7: memref<16x256xf32, #tpu.memory_space<vmem>>, %arg8: memref<16x256xf32, #tpu.memory_space<vmem>>) attributes {dimension_semantics = [#tpu.dimension_semantics<parallel>, #tpu.dimension_semantics<parallel>, #tpu.dimension_semantics<arbitrary>], iteration_bounds = array<i64: 1, 1, 9>, scalar_prefetch = 0 : i64, scratch_operands = 1 : i64, tpu.core_type = #tpu.core_type<tc>, window_params = [{transform_indices = @transform_0, window_bounds = array<i64: 16, 256>}, {transform_indices = @transform_1, window_bounds = array<i64: 256, 256>}, {transform_indices = @transform_2, window_bounds = array<i64: 1, 256>}, {transform_indices = @transform_3, window_bounds = array<i64: 1, 256>}, {transform_indices = @transform_4, window_bounds = array<i64: 16, 256>}]} {
    %c0_i32 = arith.constant 0 : i32
    %0 = arith.cmpi eq, %arg2, %c0_i32 : i32
    %1 = arith.extui %0 : i1 to i32
    %c0_i32_0 = arith.constant 0 : i32
    %2 = arith.cmpi ne, %1, %c0_i32_0 : i32
    scf.if %2 {
      %cst_9 = arith.constant 0.000000e+00 : f32
      %12 = vector.broadcast %cst_9 : f32 to vector<16x256xf32>
      %c0_10 = arith.constant 0 : index
      %c0_11 = arith.constant 0 : index
      %13 = vector.load %arg8[%c0_10, %c0_11] : memref<16x256xf32, #tpu.memory_space<vmem>>, vector<16x256xf32>
      tpu.vector_store %arg8[%c0_10, %c0_11], %12 {strides = array<i32>} : memref<16x256xf32, #tpu.memory_space<vmem>>, vector<16x256xf32>,
    } else {
    }
    %c0 = arith.constant 0 : index
    %c0_1 = arith.constant 0 : index
    %3 = vector.load %arg8[%c0, %c0_1] : memref<16x256xf32, #tpu.memory_space<vmem>>, vector<16x256xf32>
    %c0_2 = arith.constant 0 : index
    %c0_3 = arith.constant 0 : index
    %4 = vector.load %arg3[%c0_2, %c0_3] : memref<16x256xbf16, #tpu.memory_space<vmem>>, vector<16x256xbf16>
    %c0_4 = arith.constant 0 : index
    %c0_5 = arith.constant 0 : index
    %5 = vector.load %arg4[%c0_4, %c0_5] : memref<256x256xbf16, #tpu.memory_space<vmem>>, vector<256x256xbf16>
    %cst = arith.constant dense<0.000000e+00> : vector<16x256xf32>
    %6 = tpu.matmul %4, %5, %cst {dimension_numbers = #tpu.dot_dimension_numbers<[1], [0], [0], [1], [0, 0, 1, 1], [], []>} : vector<16x256xbf16>, vector<256x256xbf16>, vector<16x256xf32> -> vector<16x256xf32>
    %7 = arith.addf %3, %6 : vector<16x256xf32>
    %c0_6 = arith.constant 0 : index
    %c0_7 = arith.constant 0 : index
    %8 = vector.load %arg8[%c0_6, %c0_7] : memref<16x256xf32, #tpu.memory_space<vmem>>, vector<16x256xf32>
    tpu.vector_store %arg8[%c0_6, %c0_7], %7 {strides = array<i32>} : memref<16x256xf32, #tpu.memory_space<vmem>>, vector<16x256xf32>,
    %c8_i32 = arith.constant 8 : i32
    %9 = arith.cmpi eq, %arg2, %c8_i32 : i32
    %10 = arith.extui %9 : i1 to i32
    %c0_i32_8 = arith.constant 0 : i32
    %11 = arith.cmpi ne, %10, %c0_i32_8 : i32
    scf.if %11 {
      %c0_9 = arith.constant 0 : index
      %c0_10 = arith.constant 0 : index
      %12 = vector.load %arg8[%c0_9, %c0_10] : memref<16x256xf32, #tpu.memory_space<vmem>>, vector<16x256xf32>
      %c0_11 = arith.constant 0 : index
      %c0_12 = arith.constant 0 : index
      %13 = vector.load %arg5[%c0_11, %c0_12] : memref<1x256xf32, #tpu.memory_space<vmem>>, vector<1x256xf32>
      %14 = vector.broadcast %13 : vector<1x256xf32> to vector<16x256xf32>
      %15 = arith.mulf %12, %14 : vector<16x256xf32>
      %c0_13 = arith.constant 0 : index
      %c0_14 = arith.constant 0 : index
      %16 = vector.load %arg6[%c0_13, %c0_14] : memref<1x256xf32, #tpu.memory_space<vmem>>, vector<1x256xf32>
      %17 = vector.broadcast %16 : vector<1x256xf32> to vector<16x256xf32>
      %18 = arith.addf %15, %17 : vector<16x256xf32>
      %cst_15 = arith.constant 0.000000e+00 : f32
      %19 = vector.broadcast %cst_15 : f32 to vector<16x256xf32>
      %20 = arith.maximumf %18, %19 : vector<16x256xf32>
      %c0_16 = arith.constant 0 : index
      %c0_17 = arith.constant 0 : index
      %21 = vector.load %arg7[%c0_16, %c0_17] : memref<16x256xf32, #tpu.memory_space<vmem>>, vector<16x256xf32>
      tpu.vector_store %arg7[%c0_16, %c0_17], %20 {strides = array<i32>} : memref<16x256xf32, #tpu.memory_space<vmem>>, vector<16x256xf32>,
    } else {
    }
    return
  }
  func.func @transform_0(%arg0: i32, %arg1: i32, %arg2: i32) -> (i32, i32) {
    %c0_i32 = arith.constant 0 : i32
    return %arg0, %arg2 : i32, i32
  }
  func.func @transform_1(%arg0: i32, %arg1: i32, %arg2: i32) -> (i32, i32) {
    %c0_i32 = arith.constant 0 : i32
    return %arg2, %arg1 : i32, i32
  }
  func.func @transform_2(%arg0: i32, %arg1: i32, %arg2: i32) -> (i32, i32) {
    %c0_i32 = arith.constant 0 : i32
    %c0_i32_0 = arith.constant 0 : i32
    return %c0_i32, %arg1 : i32, i32
  }
  func.func @transform_3(%arg0: i32, %arg1: i32, %arg2: i32) -> (i32, i32) {
    %c0_i32 = arith.constant 0 : i32
    %c0_i32_0 = arith.constant 0 : i32
    return %c0_i32, %arg1 : i32, i32
  }
  func.func @transform_4(%arg0: i32, %arg1: i32, %arg2: i32) -> (i32, i32) {
    %c0_i32 = arith.constant 0 : i32
    return %arg0, %arg1 : i32, i32
  }
}

module attributes {stable_mosaic.version = 11 : i64} {
  func.func @kernel(%arg0: i32, %arg1: i32, %arg2: i32, %arg3: memref<16x256xbf16, #tpu.memory_space<vmem>>, %arg4: memref<256x256xbf16, #tpu.memory_space<vmem>>, %arg5: memref<1x256xf32, #tpu.memory_space<vmem>>, %arg6: memref<1x256xf32, #tpu.memory_space<vmem>>, %arg7: memref<16x256xf32, #tpu.memory_space<vmem>>, %arg8: memref<16x256xf32, #tpu.memory_space<vmem>>) attributes {dimension_semantics = [#tpu.dimension_semantics<parallel>, #tpu.dimension_semantics<parallel>, #tpu.dimension_semantics<arbitrary>], iteration_bounds = array<i64: 1, 2, 9>, scalar_prefetch = 0 : i64, scratch_operands = 1 : i64, tpu.core_type = #tpu.core_type<tc>, window_params = [{transform_indices = @transform_0, window_bounds = array<i64: 16, 256>}, {transform_indices = @transform_1, window_bounds = array<i64: 256, 256>}, {transform_indices = @transform_2, window_bounds = array<i64: 1, 256>}, {transform_indices = @transform_3, window_bounds = array<i64: 1, 256>}, {transform_indices = @transform_4, window_bounds = array<i64: 16, 256>}]} {
    %c0_i32 = arith.constant 0 : i32
    %0 = arith.cmpi eq, %arg2, %c0_i32 : i32
    %1 = arith.extui %0 : i1 to i32
    %c0_i32_0 = arith.constant 0 : i32
    %2 = arith.cmpi ne, %1, %c0_i32_0 : i32
    scf.if %2 {
      %cst_9 = arith.constant 0.000000e+00 : f32
      %12 = vector.broadcast %cst_9 : f32 to vector<16x256xf32>
      %c0_10 = arith.constant 0 : index
      %c0_11 = arith.constant 0 : index
      %13 = vector.load %arg8[%c0_10, %c0_11] : memref<16x256xf32, #tpu.memory_space<vmem>>, vector<16x256xf32>
      tpu.vector_store %arg8[%c0_10, %c0_11], %12 {strides = array<i32>} : memref<16x256xf32, #tpu.memory_space<vmem>>, vector<16x256xf32>,
    } else {
    }
    %c0 = arith.constant 0 : index
    %c0_1 = arith.constant 0 : index
    %3 = vector.load %arg8[%c0, %c0_1] : memref<16x256xf32, #tpu.memory_space<vmem>>, vector<16x256xf32>
    %c0_2 = arith.constant 0 : index
    %c0_3 = arith.constant 0 : index
    %4 = vector.load %arg3[%c0_2, %c0_3] : memref<16x256xbf16, #tpu.memory_space<vmem>>, vector<16x256xbf16>
    %c0_4 = arith.constant 0 : index
    %c0_5 = arith.constant 0 : index
    %5 = vector.load %arg4[%c0_4, %c0_5] : memref<256x256xbf16, #tpu.memory_space<vmem>>, vector<256x256xbf16>
    %cst = arith.constant dense<0.000000e+00> : vector<16x256xf32>
    %6 = tpu.matmul %4, %5, %cst {dimension_numbers = #tpu.dot_dimension_numbers<[1], [0], [0], [1], [0, 0, 1, 1], [], []>} : vector<16x256xbf16>, vector<256x256xbf16>, vector<16x256xf32> -> vector<16x256xf32>
    %7 = arith.addf %3, %6 : vector<16x256xf32>
    %c0_6 = arith.constant 0 : index
    %c0_7 = arith.constant 0 : index
    %8 = vector.load %arg8[%c0_6, %c0_7] : memref<16x256xf32, #tpu.memory_space<vmem>>, vector<16x256xf32>
    tpu.vector_store %arg8[%c0_6, %c0_7], %7 {strides = array<i32>} : memref<16x256xf32, #tpu.memory_space<vmem>>, vector<16x256xf32>,
    %c8_i32 = arith.constant 8 : i32
    %9 = arith.cmpi eq, %arg2, %c8_i32 : i32
    %10 = arith.extui %9 : i1 to i32
    %c0_i32_8 = arith.constant 0 : i32
    %11 = arith.cmpi ne, %10, %c0_i32_8 : i32
    scf.if %11 {
      %c0_9 = arith.constant 0 : index
      %c0_10 = arith.constant 0 : index
      %12 = vector.load %arg8[%c0_9, %c0_10] : memref<16x256xf32, #tpu.memory_space<vmem>>, vector<16x256xf32>
      %c0_11 = arith.constant 0 : index
      %c0_12 = arith.constant 0 : index
      %13 = vector.load %arg5[%c0_11, %c0_12] : memref<1x256xf32, #tpu.memory_space<vmem>>, vector<1x256xf32>
      %14 = vector.broadcast %13 : vector<1x256xf32> to vector<16x256xf32>
      %15 = arith.mulf %12, %14 : vector<16x256xf32>
      %c0_13 = arith.constant 0 : index
      %c0_14 = arith.constant 0 : index
      %16 = vector.load %arg6[%c0_13, %c0_14] : memref<1x256xf32, #tpu.memory_space<vmem>>, vector<1x256xf32>
      %17 = vector.broadcast %16 : vector<1x256xf32> to vector<16x256xf32>
      %18 = arith.addf %15, %17 : vector<16x256xf32>
      %cst_15 = arith.constant 0.000000e+00 : f32
      %19 = vector.broadcast %cst_15 : f32 to vector<16x256xf32>
      %20 = arith.maximumf %18, %19 : vector<16x256xf32>
      %c0_16 = arith.constant 0 : index
      %c0_17 = arith.constant 0 : index
      %21 = vector.load %arg7[%c0_16, %c0_17] : memref<16x256xf32, #tpu.memory_space<vmem>>, vector<16x256xf32>
      tpu.vector_store %arg7[%c0_16, %c0_17], %20 {strides = array<i32>} : memref<16x256xf32, #tpu.memory_space<vmem>>, vector<16x256xf32>,
    } else {
    }
    return
  }
  func.func @transform_0(%arg0: i32, %arg1: i32, %arg2: i32) -> (i32, i32) {
    %c0_i32 = arith.constant 0 : i32
    return %arg0, %arg2 : i32, i32
  }
  func.func @transform_1(%arg0: i32, %arg1: i32, %arg2: i32) -> (i32, i32) {
    %c0_i32 = arith.constant 0 : i32
    return %arg2, %arg1 : i32, i32
  }
  func.func @transform_2(%arg0: i32, %arg1: i32, %arg2: i32) -> (i32, i32) {
    %c0_i32 = arith.constant 0 : i32
    %c0_i32_0 = arith.constant 0 : i32
    return %c0_i32, %arg1 : i32, i32
  }
  func.func @transform_3(%arg0: i32, %arg1: i32, %arg2: i32) -> (i32, i32) {
    %c0_i32 = arith.constant 0 : i32
    %c0_i32_0 = arith.constant 0 : i32
    return %c0_i32, %arg1 : i32, i32
  }
  func.func @transform_4(%arg0: i32, %arg1: i32, %arg2: i32) -> (i32, i32) {
    %c0_i32 = arith.constant 0 : i32
    return %arg0, %arg1 : i32, i32
  }
}

module attributes {stable_mosaic.version = 11 : i64} {
  func.func @kernel(%arg0: i32, %arg1: i32, %arg2: i32, %arg3: memref<16x512xbf16, #tpu.memory_space<vmem>>, %arg4: memref<512x256xbf16, #tpu.memory_space<vmem>>, %arg5: memref<1x256xf32, #tpu.memory_space<vmem>>, %arg6: memref<1x256xf32, #tpu.memory_space<vmem>>, %arg7: memref<16x256xf32, #tpu.memory_space<vmem>>, %arg8: memref<16x256xf32, #tpu.memory_space<vmem>>, %arg9: memref<16x256xf32, #tpu.memory_space<vmem>>) attributes {dimension_semantics = [#tpu.dimension_semantics<parallel>, #tpu.dimension_semantics<parallel>, #tpu.dimension_semantics<arbitrary>], iteration_bounds = array<i64: 1, 2, 9>, scalar_prefetch = 0 : i64, scratch_operands = 1 : i64, tpu.core_type = #tpu.core_type<tc>, window_params = [{transform_indices = @transform_0, window_bounds = array<i64: 16, 512>}, {transform_indices = @transform_1, window_bounds = array<i64: 512, 256>}, {transform_indices = @transform_2, window_bounds = array<i64: 1, 256>}, {transform_indices = @transform_3, window_bounds = array<i64: 1, 256>}, {transform_indices = @transform_4, window_bounds = array<i64: 16, 256>}, {transform_indices = @transform_5, window_bounds = array<i64: 16, 256>}]} {
    %c0_i32 = arith.constant 0 : i32
    %0 = arith.cmpi eq, %arg2, %c0_i32 : i32
    %1 = arith.extui %0 : i1 to i32
    %c0_i32_0 = arith.constant 0 : i32
    %2 = arith.cmpi ne, %1, %c0_i32_0 : i32
    scf.if %2 {
      %cst_9 = arith.constant 0.000000e+00 : f32
      %12 = vector.broadcast %cst_9 : f32 to vector<16x256xf32>
      %c0_10 = arith.constant 0 : index
      %c0_11 = arith.constant 0 : index
      %13 = vector.load %arg9[%c0_10, %c0_11] : memref<16x256xf32, #tpu.memory_space<vmem>>, vector<16x256xf32>
      tpu.vector_store %arg9[%c0_10, %c0_11], %12 {strides = array<i32>} : memref<16x256xf32, #tpu.memory_space<vmem>>, vector<16x256xf32>,
    } else {
    }
    %c0 = arith.constant 0 : index
    %c0_1 = arith.constant 0 : index
    %3 = vector.load %arg9[%c0, %c0_1] : memref<16x256xf32, #tpu.memory_space<vmem>>, vector<16x256xf32>
    %c0_2 = arith.constant 0 : index
    %c0_3 = arith.constant 0 : index
    %4 = vector.load %arg3[%c0_2, %c0_3] : memref<16x512xbf16, #tpu.memory_space<vmem>>, vector<16x512xbf16>
    %c0_4 = arith.constant 0 : index
    %c0_5 = arith.constant 0 : index
    %5 = vector.load %arg4[%c0_4, %c0_5] : memref<512x256xbf16, #tpu.memory_space<vmem>>, vector<512x256xbf16>
    %cst = arith.constant dense<0.000000e+00> : vector<16x256xf32>
    %6 = tpu.matmul %4, %5, %cst {dimension_numbers = #tpu.dot_dimension_numbers<[1], [0], [0], [1], [0, 0, 1, 1], [], []>} : vector<16x512xbf16>, vector<512x256xbf16>, vector<16x256xf32> -> vector<16x256xf32>
    %7 = arith.addf %3, %6 : vector<16x256xf32>
    %c0_6 = arith.constant 0 : index
    %c0_7 = arith.constant 0 : index
    %8 = vector.load %arg9[%c0_6, %c0_7] : memref<16x256xf32, #tpu.memory_space<vmem>>, vector<16x256xf32>
    tpu.vector_store %arg9[%c0_6, %c0_7], %7 {strides = array<i32>} : memref<16x256xf32, #tpu.memory_space<vmem>>, vector<16x256xf32>,
    %c8_i32 = arith.constant 8 : i32
    %9 = arith.cmpi eq, %arg2, %c8_i32 : i32
    %10 = arith.extui %9 : i1 to i32
    %c0_i32_8 = arith.constant 0 : i32
    %11 = arith.cmpi ne, %10, %c0_i32_8 : i32
    scf.if %11 {
      %c0_9 = arith.constant 0 : index
      %c0_10 = arith.constant 0 : index
      %12 = vector.load %arg9[%c0_9, %c0_10] : memref<16x256xf32, #tpu.memory_space<vmem>>, vector<16x256xf32>
      %c0_11 = arith.constant 0 : index
      %c0_12 = arith.constant 0 : index
      %13 = vector.load %arg5[%c0_11, %c0_12] : memref<1x256xf32, #tpu.memory_space<vmem>>, vector<1x256xf32>
      %14 = vector.broadcast %13 : vector<1x256xf32> to vector<16x256xf32>
      %15 = arith.mulf %12, %14 : vector<16x256xf32>
      %c0_13 = arith.constant 0 : index
      %c0_14 = arith.constant 0 : index
      %16 = vector.load %arg6[%c0_13, %c0_14] : memref<1x256xf32, #tpu.memory_space<vmem>>, vector<1x256xf32>
      %17 = vector.broadcast %16 : vector<1x256xf32> to vector<16x256xf32>
      %18 = arith.addf %15, %17 : vector<16x256xf32>
      %c0_15 = arith.constant 0 : index
      %c0_16 = arith.constant 0 : index
      %19 = vector.load %arg7[%c0_15, %c0_16] : memref<16x256xf32, #tpu.memory_space<vmem>>, vector<16x256xf32>
      %20 = arith.addf %18, %19 : vector<16x256xf32>
      %cst_17 = arith.constant 0.000000e+00 : f32
      %21 = vector.broadcast %cst_17 : f32 to vector<16x256xf32>
      %22 = arith.maximumf %20, %21 : vector<16x256xf32>
      %c0_18 = arith.constant 0 : index
      %c0_19 = arith.constant 0 : index
      %23 = vector.load %arg8[%c0_18, %c0_19] : memref<16x256xf32, #tpu.memory_space<vmem>>, vector<16x256xf32>
      tpu.vector_store %arg8[%c0_18, %c0_19], %22 {strides = array<i32>} : memref<16x256xf32, #tpu.memory_space<vmem>>, vector<16x256xf32>,
    } else {
    }
    return
  }
  func.func @transform_0(%arg0: i32, %arg1: i32, %arg2: i32) -> (i32, i32) {
    %c0_i32 = arith.constant 0 : i32
    return %arg0, %arg2 : i32, i32
  }
  func.func @transform_1(%arg0: i32, %arg1: i32, %arg2: i32) -> (i32, i32) {
    %c0_i32 = arith.constant 0 : i32
    return %arg2, %arg1 : i32, i32
  }
  func.func @transform_2(%arg0: i32, %arg1: i32, %arg2: i32) -> (i32, i32) {
    %c0_i32 = arith.constant 0 : i32
    %c0_i32_0 = arith.constant 0 : i32
    return %c0_i32, %arg1 : i32, i32
  }
  func.func @transform_3(%arg0: i32, %arg1: i32, %arg2: i32) -> (i32, i32) {
    %c0_i32 = arith.constant 0 : i32
    %c0_i32_0 = arith.constant 0 : i32
    return %c0_i32, %arg1 : i32, i32
  }
  func.func @transform_4(%arg0: i32, %arg1: i32, %arg2: i32) -> (i32, i32) {
    %c0_i32 = arith.constant 0 : i32
    return %arg0, %arg1 : i32, i32
  }
  func.func @transform_5(%arg0: i32, %arg1: i32, %arg2: i32) -> (i32, i32) {
    %c0_i32 = arith.constant 0 : i32
    return %arg0, %arg1 : i32, i32
  }
}

module attributes {stable_mosaic.version = 11 : i64} {
  func.func @kernel(%arg0: i32, %arg1: i32, %arg2: i32, %arg3: memref<16x256xbf16, #tpu.memory_space<vmem>>, %arg4: memref<256x256xbf16, #tpu.memory_space<vmem>>, %arg5: memref<1x256xf32, #tpu.memory_space<vmem>>, %arg6: memref<1x256xf32, #tpu.memory_space<vmem>>, %arg7: memref<16x256xf32, #tpu.memory_space<vmem>>, %arg8: memref<16x256xf32, #tpu.memory_space<vmem>>) attributes {dimension_semantics = [#tpu.dimension_semantics<parallel>, #tpu.dimension_semantics<parallel>, #tpu.dimension_semantics<arbitrary>], iteration_bounds = array<i64: 1, 2, 1>, scalar_prefetch = 0 : i64, scratch_operands = 1 : i64, tpu.core_type = #tpu.core_type<tc>, window_params = [{transform_indices = @transform_0, window_bounds = array<i64: 16, 256>}, {transform_indices = @transform_1, window_bounds = array<i64: 256, 256>}, {transform_indices = @transform_2, window_bounds = array<i64: 1, 256>}, {transform_indices = @transform_3, window_bounds = array<i64: 1, 256>}, {transform_indices = @transform_4, window_bounds = array<i64: 16, 256>}]} {
    %c0_i32 = arith.constant 0 : i32
    %0 = arith.cmpi eq, %arg2, %c0_i32 : i32
    %1 = arith.extui %0 : i1 to i32
    %c0_i32_0 = arith.constant 0 : i32
    %2 = arith.cmpi ne, %1, %c0_i32_0 : i32
    scf.if %2 {
      %cst_10 = arith.constant 0.000000e+00 : f32
      %12 = vector.broadcast %cst_10 : f32 to vector<16x256xf32>
      %c0_11 = arith.constant 0 : index
      %c0_12 = arith.constant 0 : index
      %13 = vector.load %arg8[%c0_11, %c0_12] : memref<16x256xf32, #tpu.memory_space<vmem>>, vector<16x256xf32>
      tpu.vector_store %arg8[%c0_11, %c0_12], %12 {strides = array<i32>} : memref<16x256xf32, #tpu.memory_space<vmem>>, vector<16x256xf32>,
    } else {
    }
    %c0 = arith.constant 0 : index
    %c0_1 = arith.constant 0 : index
    %3 = vector.load %arg8[%c0, %c0_1] : memref<16x256xf32, #tpu.memory_space<vmem>>, vector<16x256xf32>
    %c0_2 = arith.constant 0 : index
    %c0_3 = arith.constant 0 : index
    %4 = vector.load %arg3[%c0_2, %c0_3] : memref<16x256xbf16, #tpu.memory_space<vmem>>, vector<16x256xbf16>
    %c0_4 = arith.constant 0 : index
    %c0_5 = arith.constant 0 : index
    %5 = vector.load %arg4[%c0_4, %c0_5] : memref<256x256xbf16, #tpu.memory_space<vmem>>, vector<256x256xbf16>
    %cst = arith.constant dense<0.000000e+00> : vector<16x256xf32>
    %6 = tpu.matmul %4, %5, %cst {dimension_numbers = #tpu.dot_dimension_numbers<[1], [0], [0], [1], [0, 0, 1, 1], [], []>} : vector<16x256xbf16>, vector<256x256xbf16>, vector<16x256xf32> -> vector<16x256xf32>
    %7 = arith.addf %3, %6 : vector<16x256xf32>
    %c0_6 = arith.constant 0 : index
    %c0_7 = arith.constant 0 : index
    %8 = vector.load %arg8[%c0_6, %c0_7] : memref<16x256xf32, #tpu.memory_space<vmem>>, vector<16x256xf32>
    tpu.vector_store %arg8[%c0_6, %c0_7], %7 {strides = array<i32>} : memref<16x256xf32, #tpu.memory_space<vmem>>, vector<16x256xf32>,
    %c0_i32_8 = arith.constant 0 : i32
    %9 = arith.cmpi eq, %arg2, %c0_i32_8 : i32
    %10 = arith.extui %9 : i1 to i32
    %c0_i32_9 = arith.constant 0 : i32
    %11 = arith.cmpi ne, %10, %c0_i32_9 : i32
    scf.if %11 {
      %c0_10 = arith.constant 0 : index
      %c0_11 = arith.constant 0 : index
      %12 = vector.load %arg8[%c0_10, %c0_11] : memref<16x256xf32, #tpu.memory_space<vmem>>, vector<16x256xf32>
      %c0_12 = arith.constant 0 : index
      %c0_13 = arith.constant 0 : index
      %13 = vector.load %arg5[%c0_12, %c0_13] : memref<1x256xf32, #tpu.memory_space<vmem>>, vector<1x256xf32>
      %14 = vector.broadcast %13 : vector<1x256xf32> to vector<16x256xf32>
      %15 = arith.mulf %12, %14 : vector<16x256xf32>
      %c0_14 = arith.constant 0 : index
      %c0_15 = arith.constant 0 : index
      %16 = vector.load %arg6[%c0_14, %c0_15] : memref<1x256xf32, #tpu.memory_space<vmem>>, vector<1x256xf32>
      %17 = vector.broadcast %16 : vector<1x256xf32> to vector<16x256xf32>
      %18 = arith.addf %15, %17 : vector<16x256xf32>
      %c0_16 = arith.constant 0 : index
      %c0_17 = arith.constant 0 : index
      %19 = vector.load %arg7[%c0_16, %c0_17] : memref<16x256xf32, #tpu.memory_space<vmem>>, vector<16x256xf32>
      tpu.vector_store %arg7[%c0_16, %c0_17], %18 {strides = array<i32>} : memref<16x256xf32, #tpu.memory_space<vmem>>, vector<16x256xf32>,
    } else {
    }
    return
  }
  func.func @transform_0(%arg0: i32, %arg1: i32, %arg2: i32) -> (i32, i32) {
    %c0_i32 = arith.constant 0 : i32
    return %arg0, %arg2 : i32, i32
  }
  func.func @transform_1(%arg0: i32, %arg1: i32, %arg2: i32) -> (i32, i32) {
    %c0_i32 = arith.constant 0 : i32
    return %arg2, %arg1 : i32, i32
  }
  func.func @transform_2(%arg0: i32, %arg1: i32, %arg2: i32) -> (i32, i32) {
    %c0_i32 = arith.constant 0 : i32
    %c0_i32_0 = arith.constant 0 : i32
    return %c0_i32, %arg1 : i32, i32
  }
  func.func @transform_3(%arg0: i32, %arg1: i32, %arg2: i32) -> (i32, i32) {
    %c0_i32 = arith.constant 0 : i32
    %c0_i32_0 = arith.constant 0 : i32
    return %c0_i32, %arg1 : i32, i32
  }
  func.func @transform_4(%arg0: i32, %arg1: i32, %arg2: i32) -> (i32, i32) {
    %c0_i32 = arith.constant 0 : i32
    return %arg0, %arg1 : i32, i32
  }
}

module attributes {stable_mosaic.version = 11 : i64} {
  func.func @kernel(%arg0: i32, %arg1: i32, %arg2: i32, %arg3: memref<16x512xbf16, #tpu.memory_space<vmem>>, %arg4: memref<512x256xbf16, #tpu.memory_space<vmem>>, %arg5: memref<1x256xf32, #tpu.memory_space<vmem>>, %arg6: memref<1x256xf32, #tpu.memory_space<vmem>>, %arg7: memref<16x256xf32, #tpu.memory_space<vmem>>, %arg8: memref<16x256xf32, #tpu.memory_space<vmem>>) attributes {dimension_semantics = [#tpu.dimension_semantics<parallel>, #tpu.dimension_semantics<parallel>, #tpu.dimension_semantics<arbitrary>], iteration_bounds = array<i64: 1, 2, 9>, scalar_prefetch = 0 : i64, scratch_operands = 1 : i64, tpu.core_type = #tpu.core_type<tc>, window_params = [{transform_indices = @transform_0, window_bounds = array<i64: 16, 512>}, {transform_indices = @transform_1, window_bounds = array<i64: 512, 256>}, {transform_indices = @transform_2, window_bounds = array<i64: 1, 256>}, {transform_indices = @transform_3, window_bounds = array<i64: 1, 256>}, {transform_indices = @transform_4, window_bounds = array<i64: 16, 256>}]} {
    %c0_i32 = arith.constant 0 : i32
    %0 = arith.cmpi eq, %arg2, %c0_i32 : i32
    %1 = arith.extui %0 : i1 to i32
    %c0_i32_0 = arith.constant 0 : i32
    %2 = arith.cmpi ne, %1, %c0_i32_0 : i32
    scf.if %2 {
      %cst_9 = arith.constant 0.000000e+00 : f32
      %12 = vector.broadcast %cst_9 : f32 to vector<16x256xf32>
      %c0_10 = arith.constant 0 : index
      %c0_11 = arith.constant 0 : index
      %13 = vector.load %arg8[%c0_10, %c0_11] : memref<16x256xf32, #tpu.memory_space<vmem>>, vector<16x256xf32>
      tpu.vector_store %arg8[%c0_10, %c0_11], %12 {strides = array<i32>} : memref<16x256xf32, #tpu.memory_space<vmem>>, vector<16x256xf32>,
    } else {
    }
    %c0 = arith.constant 0 : index
    %c0_1 = arith.constant 0 : index
    %3 = vector.load %arg8[%c0, %c0_1] : memref<16x256xf32, #tpu.memory_space<vmem>>, vector<16x256xf32>
    %c0_2 = arith.constant 0 : index
    %c0_3 = arith.constant 0 : index
    %4 = vector.load %arg3[%c0_2, %c0_3] : memref<16x512xbf16, #tpu.memory_space<vmem>>, vector<16x512xbf16>
    %c0_4 = arith.constant 0 : index
    %c0_5 = arith.constant 0 : index
    %5 = vector.load %arg4[%c0_4, %c0_5] : memref<512x256xbf16, #tpu.memory_space<vmem>>, vector<512x256xbf16>
    %cst = arith.constant dense<0.000000e+00> : vector<16x256xf32>
    %6 = tpu.matmul %4, %5, %cst {dimension_numbers = #tpu.dot_dimension_numbers<[1], [0], [0], [1], [0, 0, 1, 1], [], []>} : vector<16x512xbf16>, vector<512x256xbf16>, vector<16x256xf32> -> vector<16x256xf32>
    %7 = arith.addf %3, %6 : vector<16x256xf32>
    %c0_6 = arith.constant 0 : index
    %c0_7 = arith.constant 0 : index
    %8 = vector.load %arg8[%c0_6, %c0_7] : memref<16x256xf32, #tpu.memory_space<vmem>>, vector<16x256xf32>
    tpu.vector_store %arg8[%c0_6, %c0_7], %7 {strides = array<i32>} : memref<16x256xf32, #tpu.memory_space<vmem>>, vector<16x256xf32>,
    %c8_i32 = arith.constant 8 : i32
    %9 = arith.cmpi eq, %arg2, %c8_i32 : i32
    %10 = arith.extui %9 : i1 to i32
    %c0_i32_8 = arith.constant 0 : i32
    %11 = arith.cmpi ne, %10, %c0_i32_8 : i32
    scf.if %11 {
      %c0_9 = arith.constant 0 : index
      %c0_10 = arith.constant 0 : index
      %12 = vector.load %arg8[%c0_9, %c0_10] : memref<16x256xf32, #tpu.memory_space<vmem>>, vector<16x256xf32>
      %c0_11 = arith.constant 0 : index
      %c0_12 = arith.constant 0 : index
      %13 = vector.load %arg5[%c0_11, %c0_12] : memref<1x256xf32, #tpu.memory_space<vmem>>, vector<1x256xf32>
      %14 = vector.broadcast %13 : vector<1x256xf32> to vector<16x256xf32>
      %15 = arith.mulf %12, %14 : vector<16x256xf32>
      %c0_13 = arith.constant 0 : index
      %c0_14 = arith.constant 0 : index
      %16 = vector.load %arg6[%c0_13, %c0_14] : memref<1x256xf32, #tpu.memory_space<vmem>>, vector<1x256xf32>
      %17 = vector.broadcast %16 : vector<1x256xf32> to vector<16x256xf32>
      %18 = arith.addf %15, %17 : vector<16x256xf32>
      %cst_15 = arith.constant 0.000000e+00 : f32
      %19 = vector.broadcast %cst_15 : f32 to vector<16x256xf32>
      %20 = arith.maximumf %18, %19 : vector<16x256xf32>
      %c0_16 = arith.constant 0 : index
      %c0_17 = arith.constant 0 : index
      %21 = vector.load %arg7[%c0_16, %c0_17] : memref<16x256xf32, #tpu.memory_space<vmem>>, vector<16x256xf32>
      tpu.vector_store %arg7[%c0_16, %c0_17], %20 {strides = array<i32>} : memref<16x256xf32, #tpu.memory_space<vmem>>, vector<16x256xf32>,
    } else {
    }
    return
  }
  func.func @transform_0(%arg0: i32, %arg1: i32, %arg2: i32) -> (i32, i32) {
    %c0_i32 = arith.constant 0 : i32
    return %arg0, %arg2 : i32, i32
  }
  func.func @transform_1(%arg0: i32, %arg1: i32, %arg2: i32) -> (i32, i32) {
    %c0_i32 = arith.constant 0 : i32
    return %arg2, %arg1 : i32, i32
  }
  func.func @transform_2(%arg0: i32, %arg1: i32, %arg2: i32) -> (i32, i32) {
    %c0_i32 = arith.constant 0 : i32
    %c0_i32_0 = arith.constant 0 : i32
    return %c0_i32, %arg1 : i32, i32
  }
  func.func @transform_3(%arg0: i32, %arg1: i32, %arg2: i32) -> (i32, i32) {
    %c0_i32 = arith.constant 0 : i32
    %c0_i32_0 = arith.constant 0 : i32
    return %c0_i32, %arg1 : i32, i32
  }
  func.func @transform_4(%arg0: i32, %arg1: i32, %arg2: i32) -> (i32, i32) {
    %c0_i32 = arith.constant 0 : i32
    return %arg0, %arg1 : i32, i32
  }
}

</mosaic_0001>

<bundles_post_ra>
// kernel: resnet_encoder_forward.21
= control target key start
LH: loop header
LB: loop body
LE: loop exit
PB: predicated region body
PF: predicated region fallthrough
CT: control target
= control target key end

     0   :  { %s1556_s15 = smov 0   ;;  %s1558_s16 = smov 0   ;;  %s1786_s0 = inlined_call_operand.vmem [shape: bf16[512,256], index: 0, kind: input, shape index: {}]   ;;  %s1787_s1 = inlined_call_operand.vmem [shape: bf16[256,128], index: 1, kind: input, shape index: {}]   ;;  %s1788_s2 = inlined_call_operand.vmem [shape: f32[1,128], index: 2, kind: input, shape index: {}]   ;;  %s1789_s3 = inlined_call_operand.vmem [shape: f32[1,128], index: 3, kind: input, shape index: {}]   ;;  %s1790_s4 = inlined_call_operand.vmem [shape: f32[512,128], index: 4, kind: output, shape index: {}]  }
   0x1   :  { %s1560_s17 = smov 0  }
   0x2 LB: > { %s33_s18 = sadd.s32 1, %s1525_s16  ;;  %p1232_p0 = scmp.ge.s32.totalorder %s1529_s17, 1  ;;  %s1529_s17 = sphi %s1560_s17, %s14_s17   ;;  %s1525_s16 = sphi %s1558_s16, %s1792_s16   ;;  %s1521_s15 = sphi %s1556_s15, %s1791_s15  }
   0x3   : > { %p35_p1 = scmp.ge.s32.totalorder %s33_s18, 2  ;;  %p224_p2 = scmp.lt.s32.totalorder %s1529_s17, 3 }
   0x5   : > { %s1794_s18 = smov (%p35_p1, %s33_s18), 0  ;;  %p225_p3 = pnand %p1232_p0, %p224_p2 }
   0x6   : > { %s1233_s21 = sshll.u32 (!%p225_p3), %s1521_s15, 5 }
   0x7   : > { %228 = sbr.rel (%p225_p3) target bundleno = 309 (0x135), region = 36  ;;  %p274_p4 = scmp.lt.s32.totalorder (!%p225_p3), %s1233_s21, 63 }
   0xc   : > { %v1443_v0 = vld [vmem:[%s1787_s1 + $0x78] sm:$0xff]   ;;  %v1445_v2 = vld [vmem:[%s1787_s1 + $0x70] sm:$0xff]   ;;  %v1447_v4 = vld [vmem:[%s1787_s1 + $0x68] sm:$0xff]   ;;  %s1796_s21 = smov (!%p274_p4, %s1233_s21), 63 }
   0xd   : > { %v1444_v1 = vld [vmem:[%s1787_s1 + $0x38] sm:$0xff]   ;;  %1291 = vmatprep.subr.bf16.mxu0 %v1443_v0  ;;  %1403 = vmatprep.subr.bf16.mxu1 %v1443_v0  ;;  %v1446_v3 = vld [vmem:[%s1787_s1 + $0x30] sm:$0xff]   ;;  %v1448_v5 = vld [vmem:[%s1787_s1 + $0x28] sm:$0xff]   ;;  %s1290_s10 = sshll.u32 %s1796_s21, 3 }
   0xe   : > { %1292 = vmatpush3.bf16.msra.mxu0 %v1444_v1  ;;  %1411 = vmatpush3.bf16.msra.mxu1 %v1444_v1  ;;  %v1449_v6 = vld [vmem:[%s1787_s1 + $0x60] sm:$0xff]   ;;  %v1451_v8 = vld [vmem:[%s1787_s1 + $0x58] sm:$0xff]   ;;  %s1609_s15 = scalar_lea.vmem %s1786_s0, %s1290_s10  ;;  %v1453_v10 = vld [vmem:[%s1787_s1 + $0x50] sm:$0xff]  }
   0xf   : > { %1293 = vmatprep.subr.bf16.mxu0 %v1445_v2  ;;  %1404 = vmatprep.subr.bf16.mxu1 %v1445_v2  ;;  %v1450_v7 = vld [vmem:[%s1787_s1 + $0x20] sm:$0xff]   ;;  %v1452_v9 = vld [vmem:[%s1787_s1 + $0x18] sm:$0xff]   ;;  %v1454_v13 = vld [vmem:[%s1787_s1 + $0x10] sm:$0xff]  }
  0x10   : > { %v1461_v11 = vld [vmem:[%s1609_s15 + $0x4] ss:$8 sps:$4 sm:$0xff]   ;;  %v1459_v18 = vld [vmem:[%s1609_s15] ss:$8 sps:$4 sm:$0xff]   ;;  %v1465_v20 = vld [vmem:[%s1609_s15 + $0x14] ss:$8 sps:$4 sm:$0xff]  }
  0x11   : > { %v1464_v12 = vld [vmem:[%s1609_s15 + $0x84] ss:$8 sps:$4 sm:$0xff]   ;;  %729 = vmatprep.mubr.bf16.mxu0 %v1461_v11  ;;  %v1462_v19 = vld [vmem:[%s1609_s15 + $0x80] ss:$8 sps:$4 sm:$0xff]   ;;  %v1467_v21 = vld [vmem:[%s1609_s15 + $0x94] ss:$8 sps:$4 sm:$0xff]  }
  0x12   : > { %1294 = vmatpush3.bf16.msra.mxu0 %v1446_v3  ;;  %1412 = vmatpush3.bf16.msra.mxu1 %v1446_v3  ;;  %v1455_v14 = vld [vmem:[%s1787_s1 + $0x48] sm:$0xff]   ;;  %v1457_v16 = vld [vmem:[%s1787_s1 + $0x40] sm:$0xff]   ;;  %v1469_v22 = vld [vmem:[%s1609_s15 + $0x10] ss:$8 sps:$4 sm:$0xff]  }
  0x13   : > { %1295 = vmatprep.subr.bf16.mxu0 %v1447_v4  ;;  %1405 = vmatprep.subr.bf16.mxu1 %v1447_v4  ;;  %v1456_v15 = vld [vmem:[%s1787_s1 + $0x8] sm:$0xff]   ;;  %v1458_v17 = vld [vmem:[%s1787_s1] sm:$0xff]   ;;  %v1470_v23 = vld [vmem:[%s1609_s15 + $0x90] ss:$8 sps:$4 sm:$0xff]  }
  0x14   : > { %793 = vmatprep.mubr.bf16.mxu1 %v1464_v12  ;;  %v1471_v24 = vld [vmem:[%s1609_s15 + $0x24] ss:$8 sps:$4 sm:$0xff]   ;;  %v1475_v26 = vld [vmem:[%s1609_s15 + $0x20] ss:$8 sps:$4 sm:$0xff]   ;;  %v1477_v28 = vld [vmem:[%s1609_s15 + $0x34] ss:$8 sps:$4 sm:$0xff]  }
  0x15   : > { %v1473_v25 = vld [vmem:[%s1609_s15 + $0xa4] ss:$8 sps:$4 sm:$0xff]   ;;  %v1476_v27 = vld [vmem:[%s1609_s15 + $0xa0] ss:$8 sps:$4 sm:$0xff]   ;;  %v1479_v29 = vld [vmem:[%s1609_s15 + $0xb4] ss:$8 sps:$4 sm:$0xff]  }
  0x16   : > { %1296 = vmatpush3.bf16.msra.mxu0 %v1448_v5  ;;  %1413 = vmatpush3.bf16.msra.mxu1 %v1448_v5  ;;  %v1481_v30 = vld [vmem:[%s1609_s15 + $0x30] ss:$8 sps:$4 sm:$0xff]   ;;  %v1483_v32 = vld [vmem:[%s1609_s15 + $0x44] ss:$8 sps:$4 sm:$0xff]   ;;  %v1487_v34 = vld [vmem:[%s1609_s15 + $0x40] ss:$8 sps:$4 sm:$0xff]  }
  0x17   : > { %1297 = vmatprep.subr.bf16.mxu0 %v1449_v6  ;;  %1406 = vmatprep.subr.bf16.mxu1 %v1449_v6  ;;  %v1482_v31 = vld [vmem:[%s1609_s15 + $0xb0] ss:$8 sps:$4 sm:$0xff]   ;;  %v1485_v33 = vld [vmem:[%s1609_s15 + $0xc4] ss:$8 sps:$4 sm:$0xff]   ;;  %v1488_v35 = vld [vmem:[%s1609_s15 + $0xc0] ss:$8 sps:$4 sm:$0xff]  }
  0x18   : > { %v1489_v36 = vld [vmem:[%s1609_s15 + $0x54] ss:$8 sps:$4 sm:$0xff]   ;;  %v1493_v38 = vld [vmem:[%s1609_s15 + $0x50] ss:$8 sps:$4 sm:$0xff]   ;;  %v1495_v40 = vld [vmem:[%s1609_s15 + $0x64] ss:$8 sps:$4 sm:$0xff]  }
  0x19   : > { %v1491_v37 = vld [vmem:[%s1609_s15 + $0xd4] ss:$8 sps:$4 sm:$0xff]   ;;  %v1494_v39 = vld [vmem:[%s1609_s15 + $0xd0] ss:$8 sps:$4 sm:$0xff]   ;;  %v1497_v41 = vld [vmem:[%s1609_s15 + $0xe4] ss:$8 sps:$4 sm:$0xff]  }
  0x1a   : > { %1298 = vmatpush3.bf16.msra.mxu0 %v1450_v7  ;;  %1414 = vmatpush3.bf16.msra.mxu1 %v1450_v7  ;;  %v1499_v42 = vld [vmem:[%s1609_s15 + $0x60] ss:$8 sps:$4 sm:$0xff]   ;;  %v1501_v44 = vld [vmem:[%s1609_s15 + $0x74] ss:$8 sps:$4 sm:$0xff]   ;;  %v1505_v46 = vld [vmem:[%s1609_s15 + $0x70] ss:$8 sps:$4 sm:$0xff]  }
  0x1b   : > { %1299 = vmatprep.subr.bf16.mxu0 %v1451_v8  ;;  %1407 = vmatprep.subr.bf16.mxu1 %v1451_v8  ;;  %v1500_v43 = vld [vmem:[%s1609_s15 + $0xe0] ss:$8 sps:$4 sm:$0xff]   ;;  %v1503_v45 = vld [vmem:[%s1609_s15 + $0xf4] ss:$8 sps:$4 sm:$0xff]   ;;  %v1506_v47 = vld [vmem:[%s1609_s15 + $0xf0] ss:$8 sps:$4 sm:$0xff]   ;;  %s1683_s15 = scalar_lea.vmem %s1790_s4, %s1290_s10 }
  0x1c   : > { %v1667_v51 = vld [vmem:[%s1788_s2] ss:$0 sm:$0xff] }
  0x1d   : > { %v1672_v55 = vld [vmem:[%s1789_s3] ss:$0 sm:$0xff] }
  0x1e   : > { %1300 = vmatpush3.bf16.msra.mxu0 %v1452_v9  ;;  %1415 = vmatpush3.bf16.msra.mxu1 %v1452_v9 }
  0x1f   : > { %1301 = vmatprep.subr.bf16.mxu0 %v1453_v10  ;;  %1408 = vmatprep.subr.bf16.mxu1 %v1453_v10 }
  0x22   : > { %1302 = vmatpush3.bf16.msra.mxu0 %v1454_v13  ;;  %1416 = vmatpush3.bf16.msra.mxu1 %v1454_v13 }
  0x23   : > { %1303 = vmatprep.subr.bf16.mxu0 %v1455_v14  ;;  %1409 = vmatprep.subr.bf16.mxu1 %v1455_v14 }
  0x26   : > { %1304 = vmatpush3.bf16.msra.mxu0 %v1456_v15  ;;  %1417 = vmatpush3.bf16.msra.mxu1 %v1456_v15 }
  0x27   : > { %1305 = vmatprep.subr.bf16.mxu0 %v1457_v16  ;;  %1410 = vmatprep.subr.bf16.mxu1 %v1457_v16 }
  0x2a   : > { %1306 = vmatpush3.bf16.msra.mxu0 %v1458_v17  ;;  %1418 = vmatpush3.bf16.msra.mxu1 %v1458_v17 }
  0x2d   : > { %730 = vmatmul.mubr.bf16.vlgmr.msra.gmra.mxu0 %v1459_v18  ;;  %794 = vmatmul.mubr.bf16.vlgmr.msra.gmra.mxu1 %v1462_v19 }
  0x2e   : > { %737 = vmatprep.mubr.bf16.mxu0 %v1465_v20  ;;  %801 = vmatprep.mubr.bf16.mxu1 %v1467_v21 }
  0x35   : > { %738 = vmatmul.mubr.bf16.gmra.mxu0 %v1469_v22  ;;  %802 = vmatmul.mubr.bf16.gmra.mxu1 %v1470_v23 }
  0x36   : > { %745 = vmatprep.mubr.bf16.mxu0 %v1471_v24  ;;  %809 = vmatprep.mubr.bf16.mxu1 %v1473_v25 }
  0x3d   : > { %746 = vmatmul.mubr.bf16.gmra.mxu0 %v1475_v26  ;;  %810 = vmatmul.mubr.bf16.gmra.mxu1 %v1476_v27 }
  0x3e   : > { %753 = vmatprep.mubr.bf16.mxu0 %v1477_v28  ;;  %817 = vmatprep.mubr.bf16.mxu1 %v1479_v29 }
  0x45   : > { %754 = vmatmul.mubr.bf16.gmra.mxu0 %v1481_v30  ;;  %818 = vmatmul.mubr.bf16.gmra.mxu1 %v1482_v31 }
  0x46   : > { %761 = vmatprep.mubr.bf16.mxu0 %v1483_v32  ;;  %825 = vmatprep.mubr.bf16.mxu1 %v1485_v33 }
  0x4d   : > { %762 = vmatmul.mubr.bf16.gmra.mxu0 %v1487_v34  ;;  %826 = vmatmul.mubr.bf16.gmra.mxu1 %v1488_v35 }
  0x4e   : > { %769 = vmatprep.mubr.bf16.mxu0 %v1489_v36  ;;  %833 = vmatprep.mubr.bf16.mxu1 %v1491_v37 }
  0x55   : > { %770 = vmatmul.mubr.bf16.gmra.mxu0 %v1493_v38  ;;  %834 = vmatmul.mubr.bf16.gmra.mxu1 %v1494_v39 }
  0x56   : > { %777 = vmatprep.mubr.bf16.mxu0 %v1495_v40  ;;  %841 = vmatprep.mubr.bf16.mxu1 %v1497_v41 }
  0x5d   : > { %778 = vmatmul.mubr.bf16.gmra.mxu0 %v1499_v42  ;;  %842 = vmatmul.mubr.bf16.gmra.mxu1 %v1500_v43 }
  0x5e   : > { %785 = vmatprep.mubr.bf16.mxu0 %v1501_v44  ;;  %849 = vmatprep.mubr.bf16.mxu1 %v1503_v45 }
  0x65   : > { %786 = vmatmul.mubr.bf16.gmra.mxu0 %v1505_v46  ;;  %850 = vmatmul.mubr.bf16.gmra.mxu1 %v1506_v47 }
  0xed   : > { %v1307_v48 = vpop.f32.mrf.mxu0  ;;  %v1355_v49 = vpop.f32.mrf.mxu1 }
  0xef   : > { %v1308_v50 = vpop.f32.mrf.mxu0  ;;  %v1356_v52 = vpop.f32.mrf.mxu1 }
  0xf0   : > { %v1309_v53 = vadd.f32 %v1308_v50, %v1307_v48  ;;  %v1357_v54 = vadd.f32 %v1356_v52, %v1355_v49 }
  0xf1   : > { %v1310_v56 = vpop.f32.mrf.mxu0  ;;  %v1358_v57 = vpop.f32.mrf.mxu1 }
  0xf2   : > { %v964_v58 = vmul.f32 %v1309_v53, %v1667_v51  ;;  %v980_v59 = vmul.f32 %v1357_v54, %v1667_v51 }
  0xf3   : > { %v1311_v60 = vpop.f32.mrf.mxu0  ;;  %v1359_v61 = vpop.f32.mrf.mxu1 }
  0xf4   : > { %v1003_v62 = vadd.f32 %v1672_v55, %v964_v58  ;;  %v1019_v63 = vadd.f32 %v1672_v55, %v980_v59  ;;  %v1312_v0 = vadd.f32 %v1311_v60, %v1310_v56  ;;  %v1360_v1 = vadd.f32 %v1359_v61, %v1358_v57 }
  0xf5   : > { %v1313_v2 = vpop.f32.mrf.mxu0  ;;  %v1361_v3 = vpop.f32.mrf.mxu1 }
  0xf6   : > { %v1035_v4 = vmax.f32 %v1003_v62, 0.0  ;;  %v1051_v5 = vmax.f32 %v1019_v63, 0.0  ;;  %v965_v6 = vmul.f32 %v1312_v0, %v1667_v51  ;;  %v981_v7 = vmul.f32 %v1360_v1, %v1667_v51 }
  0xf7   : > { %v1314_v8 = vpop.f32.mrf.mxu0  ;;  %v1362_v9 = vpop.f32.mrf.mxu1 }
  0xf8   : > { %1067 = vst [vmem:[%s1683_s15] sm:$0xff] %v1035_v4  ;;  %1083 = vst [vmem:[%s1683_s15 + $0x80] sm:$0xff] %v1051_v5  ;;  %v1004_v10 = vadd.f32 %v1672_v55, %v965_v6  ;;  %v1020_v11 = vadd.f32 %v1672_v55, %v981_v7  ;;  %v1315_v12 = vadd.f32 %v1314_v8, %v1313_v2 }
  0xf9   : > { %v1363_v13 = vadd.f32 %v1362_v9, %v1361_v3  ;;  %v1316_v14 = vpop.f32.mrf.mxu0  ;;  %v1364_v15 = vpop.f32.mrf.mxu1 }
  0xfa   : > { %v1036_v16 = vmax.f32 %v1004_v10, 0.0  ;;  %v1052_v17 = vmax.f32 %v1020_v11, 0.0  ;;  %v966_v18 = vmul.f32 %v1315_v12, %v1667_v51 }
  0xfb   : > { %v982_v19 = vmul.f32 %v1363_v13, %v1667_v51  ;;  %v1317_v20 = vpop.f32.mrf.mxu0  ;;  %v1365_v21 = vpop.f32.mrf.mxu1 }
  0xfc   : > { %1068 = vst [vmem:[%s1683_s15 + $0x8] sm:$0xff] %v1036_v16  ;;  %1084 = vst [vmem:[%s1683_s15 + $0x88] sm:$0xff] %v1052_v17  ;;  %v1005_v22 = vadd.f32 %v1672_v55, %v966_v18  ;;  %v1318_v24 = vadd.f32 %v1317_v20, %v1316_v14  ;;  %v1366_v25 = vadd.f32 %v1365_v21, %v1364_v15 }
  0xfd   : > { %v1021_v23 = vadd.f32 %v1672_v55, %v982_v19  ;;  %v1319_v26 = vpop.f32.mrf.mxu0  ;;  %v1367_v27 = vpop.f32.mrf.mxu1 }
  0xfe   : > { %v1037_v28 = vmax.f32 %v1005_v22, 0.0  ;;  %v967_v30 = vmul.f32 %v1318_v24, %v1667_v51  ;;  %v983_v31 = vmul.f32 %v1366_v25, %v1667_v51 }
  0xff   : > { %v1053_v29 = vmax.f32 %v1021_v23, 0.0  ;;  %v1320_v32 = vpop.f32.mrf.mxu0  ;;  %v1368_v33 = vpop.f32.mrf.mxu1 }
 0x100   : > { %1069 = vst [vmem:[%s1683_s15 + $0x10] sm:$0xff] %v1037_v28  ;;  %v1006_v34 = vadd.f32 %v1672_v55, %v967_v30  ;;  %v1022_v35 = vadd.f32 %v1672_v55, %v983_v31  ;;  %v1321_v36 = vadd.f32 %v1320_v32, %v1319_v26  ;;  %v1369_v37 = vadd.f32 %v1368_v33, %v1367_v27 }
 0x101   : > { %1085 = vst [vmem:[%s1683_s15 + $0x90] sm:$0xff] %v1053_v29  ;;  %v1322_v38 = vpop.f32.mrf.mxu0  ;;  %v1370_v39 = vpop.f32.mrf.mxu1 }
 0x102   : > { %v1038_v40 = vmax.f32 %v1006_v34, 0.0  ;;  %v1054_v41 = vmax.f32 %v1022_v35, 0.0  ;;  %v968_v42 = vmul.f32 %v1321_v36, %v1667_v51  ;;  %v984_v43 = vmul.f32 %v1369_v37, %v1667_v51 }
 0x103   : > { %v1323_v44 = vpop.f32.mrf.mxu0  ;;  %v1371_v45 = vpop.f32.mrf.mxu1 }
 0x104   : > { %1070 = vst [vmem:[%s1683_s15 + $0x18] sm:$0xff] %v1038_v40  ;;  %1086 = vst [vmem:[%s1683_s15 + $0x98] sm:$0xff] %v1054_v41  ;;  %v1007_v46 = vadd.f32 %v1672_v55, %v968_v42  ;;  %v1023_v47 = vadd.f32 %v1672_v55, %v984_v43  ;;  %v1324_v48 = vadd.f32 %v1323_v44, %v1322_v38 }
 0x105   : > { %v1372_v49 = vadd.f32 %v1371_v45, %v1370_v39  ;;  %v1325_v50 = vpop.f32.mrf.mxu0  ;;  %v1373_v52 = vpop.f32.mrf.mxu1 }
 0x106   : > { %v1039_v53 = vmax.f32 %v1007_v46, 0.0  ;;  %v1055_v54 = vmax.f32 %v1023_v47, 0.0  ;;  %v969_v56 = vmul.f32 %v1324_v48, %v1667_v51 }
 0x107   : > { %v985_v57 = vmul.f32 %v1372_v49, %v1667_v51  ;;  %v1326_v58 = vpop.f32.mrf.mxu0  ;;  %v1374_v59 = vpop.f32.mrf.mxu1 }
 0x108   : > { %1071 = vst [vmem:[%s1683_s15 + $0x20] sm:$0xff] %v1039_v53  ;;  %1087 = vst [vmem:[%s1683_s15 + $0xa0] sm:$0xff] %v1055_v54  ;;  %v1008_v60 = vadd.f32 %v1672_v55, %v969_v56  ;;  %v1327_v62 = vadd.f32 %v1326_v58, %v1325_v50  ;;  %v1375_v63 = vadd.f32 %v1374_v59, %v1373_v52 }
 0x109   : > { %v1024_v61 = vadd.f32 %v1672_v55, %v985_v57  ;;  %v1328_v0 = vpop.f32.mrf.mxu0  ;;  %v1376_v1 = vpop.f32.mrf.mxu1 }
 0x10a   : > { %v1040_v2 = vmax.f32 %v1008_v60, 0.0  ;;  %v970_v4 = vmul.f32 %v1327_v62, %v1667_v51  ;;  %v986_v5 = vmul.f32 %v1375_v63, %v1667_v51 }
 0x10b   : > { %v1056_v3 = vmax.f32 %v1024_v61, 0.0  ;;  %v1329_v6 = vpop.f32.mrf.mxu0  ;;  %v1377_v7 = vpop.f32.mrf.mxu1 }
 0x10c   : > { %1072 = vst [vmem:[%s1683_s15 + $0x28] sm:$0xff] %v1040_v2  ;;  %v1009_v8 = vadd.f32 %v1672_v55, %v970_v4  ;;  %v1025_v9 = vadd.f32 %v1672_v55, %v986_v5  ;;  %v1330_v10 = vadd.f32 %v1329_v6, %v1328_v0  ;;  %v1378_v11 = vadd.f32 %v1377_v7, %v1376_v1 }
 0x10d   : > { %1088 = vst [vmem:[%s1683_s15 + $0xa8] sm:$0xff] %v1056_v3  ;;  %v1331_v12 = vpop.f32.mrf.mxu0  ;;  %v1379_v13 = vpop.f32.mrf.mxu1 }
 0x10e   : > { %v1041_v14 = vmax.f32 %v1009_v8, 0.0  ;;  %v1057_v15 = vmax.f32 %v1025_v9, 0.0  ;;  %v971_v16 = vmul.f32 %v1330_v10, %v1667_v51  ;;  %v987_v17 = vmul.f32 %v1378_v11, %v1667_v51 }
 0x10f   : > { %v1332_v18 = vpop.f32.mrf.mxu0  ;;  %v1380_v19 = vpop.f32.mrf.mxu1 }
 0x110   : > { %1073 = vst [vmem:[%s1683_s15 + $0x30] sm:$0xff] %v1041_v14  ;;  %1089 = vst [vmem:[%s1683_s15 + $0xb0] sm:$0xff] %v1057_v15  ;;  %v1010_v20 = vadd.f32 %v1672_v55, %v971_v16  ;;  %v1026_v21 = vadd.f32 %v1672_v55, %v987_v17  ;;  %v1333_v22 = vadd.f32 %v1332_v18, %v1331_v12 }
 0x111   : > { %v1381_v23 = vadd.f32 %v1380_v19, %v1379_v13  ;;  %v1334_v24 = vpop.f32.mrf.mxu0  ;;  %v1382_v25 = vpop.f32.mrf.mxu1 }
 0x112   : > { %v1042_v26 = vmax.f32 %v1010_v20, 0.0  ;;  %v1058_v27 = vmax.f32 %v1026_v21, 0.0  ;;  %v972_v28 = vmul.f32 %v1333_v22, %v1667_v51 }
 0x113   : > { %v988_v29 = vmul.f32 %v1381_v23, %v1667_v51  ;;  %v1335_v30 = vpop.f32.mrf.mxu0  ;;  %v1383_v31 = vpop.f32.mrf.mxu1 }
 0x114   : > { %1074 = vst [vmem:[%s1683_s15 + $0x38] sm:$0xff] %v1042_v26  ;;  %1090 = vst [vmem:[%s1683_s15 + $0xb8] sm:$0xff] %v1058_v27  ;;  %v1011_v32 = vadd.f32 %v1672_v55, %v972_v28  ;;  %v1336_v34 = vadd.f32 %v1335_v30, %v1334_v24  ;;  %v1384_v35 = vadd.f32 %v1383_v31, %v1382_v25 }
 0x115   : > { %v1027_v33 = vadd.f32 %v1672_v55, %v988_v29  ;;  %v1337_v36 = vpop.f32.mrf.mxu0  ;;  %v1385_v37 = vpop.f32.mrf.mxu1 }
 0x116   : > { %v1043_v38 = vmax.f32 %v1011_v32, 0.0  ;;  %v973_v40 = vmul.f32 %v1336_v34, %v1667_v51  ;;  %v989_v41 = vmul.f32 %v1384_v35, %v1667_v51 }
 0x117   : > { %v1059_v39 = vmax.f32 %v1027_v33, 0.0  ;;  %v1338_v42 = vpop.f32.mrf.mxu0  ;;  %v1386_v43 = vpop.f32.mrf.mxu1 }
 0x118   : > { %1075 = vst [vmem:[%s1683_s15 + $0x40] sm:$0xff] %v1043_v38  ;;  %v1012_v44 = vadd.f32 %v1672_v55, %v973_v40  ;;  %v1028_v45 = vadd.f32 %v1672_v55, %v989_v41  ;;  %v1339_v46 = vadd.f32 %v1338_v42, %v1337_v36  ;;  %v1387_v47 = vadd.f32 %v1386_v43, %v1385_v37 }
 0x119   : > { %1091 = vst [vmem:[%s1683_s15 + $0xc0] sm:$0xff] %v1059_v39  ;;  %v1340_v48 = vpop.f32.mrf.mxu0  ;;  %v1388_v49 = vpop.f32.mrf.mxu1 }
 0x11a   : > { %v1044_v50 = vmax.f32 %v1012_v44, 0.0  ;;  %v1060_v52 = vmax.f32 %v1028_v45, 0.0  ;;  %v974_v53 = vmul.f32 %v1339_v46, %v1667_v51  ;;  %v990_v54 = vmul.f32 %v1387_v47, %v1667_v51 }
 0x11b   : > { %v1341_v56 = vpop.f32.mrf.mxu0  ;;  %v1389_v57 = vpop.f32.mrf.mxu1 }
 0x11c   : > { %1076 = vst [vmem:[%s1683_s15 + $0x48] sm:$0xff] %v1044_v50  ;;  %1092 = vst [vmem:[%s1683_s15 + $0xc8] sm:$0xff] %v1060_v52  ;;  %v1013_v58 = vadd.f32 %v1672_v55, %v974_v53  ;;  %v1029_v59 = vadd.f32 %v1672_v55, %v990_v54  ;;  %v1342_v60 = vadd.f32 %v1341_v56, %v1340_v48 }
 0x11d   : > { %v1390_v61 = vadd.f32 %v1389_v57, %v1388_v49  ;;  %v1343_v62 = vpop.f32.mrf.mxu0  ;;  %v1391_v63 = vpop.f32.mrf.mxu1 }
 0x11e   : > { %v1045_v0 = vmax.f32 %v1013_v58, 0.0  ;;  %v1061_v1 = vmax.f32 %v1029_v59, 0.0  ;;  %v975_v2 = vmul.f32 %v1342_v60, %v1667_v51 }
 0x11f   : > { %v991_v3 = vmul.f32 %v1390_v61, %v1667_v51  ;;  %v1344_v4 = vpop.f32.mrf.mxu0  ;;  %v1392_v5 = vpop.f32.mrf.mxu1 }
 0x120   : > { %1077 = vst [vmem:[%s1683_s15 + $0x50] sm:$0xff] %v1045_v0  ;;  %1093 = vst [vmem:[%s1683_s15 + $0xd0] sm:$0xff] %v1061_v1  ;;  %v1014_v6 = vadd.f32 %v1672_v55, %v975_v2  ;;  %v1345_v8 = vadd.f32 %v1344_v4, %v1343_v62  ;;  %v1393_v9 = vadd.f32 %v1392_v5, %v1391_v63 }
 0x121   : > { %v1030_v7 = vadd.f32 %v1672_v55, %v991_v3  ;;  %v1346_v10 = vpop.f32.mrf.mxu0  ;;  %v1394_v11 = vpop.f32.mrf.mxu1 }
 0x122   : > { %v1046_v12 = vmax.f32 %v1014_v6, 0.0  ;;  %v976_v14 = vmul.f32 %v1345_v8, %v1667_v51  ;;  %v992_v15 = vmul.f32 %v1393_v9, %v1667_v51 }
 0x123   : > { %v1062_v13 = vmax.f32 %v1030_v7, 0.0  ;;  %v1347_v16 = vpop.f32.mrf.mxu0  ;;  %v1395_v17 = vpop.f32.mrf.mxu1 }
 0x124   : > { %1078 = vst [vmem:[%s1683_s15 + $0x58] sm:$0xff] %v1046_v12  ;;  %v1015_v18 = vadd.f32 %v1672_v55, %v976_v14  ;;  %v1031_v19 = vadd.f32 %v1672_v55, %v992_v15  ;;  %v1348_v20 = vadd.f32 %v1347_v16, %v1346_v10  ;;  %v1396_v21 = vadd.f32 %v1395_v17, %v1394_v11 }
 0x125   : > { %1094 = vst [vmem:[%s1683_s15 + $0xd8] sm:$0xff] %v1062_v13  ;;  %v1349_v22 = vpop.f32.mrf.mxu0  ;;  %v1397_v23 = vpop.f32.mrf.mxu1 }
 0x126   : > { %v1047_v24 = vmax.f32 %v1015_v18, 0.0  ;;  %v1063_v25 = vmax.f32 %v1031_v19, 0.0  ;;  %v977_v26 = vmul.f32 %v1348_v20, %v1667_v51  ;;  %v993_v27 = vmul.f32 %v1396_v21, %v1667_v51 }
 0x127   : > { %v1350_v28 = vpop.f32.mrf.mxu0  ;;  %v1398_v29 = vpop.f32.mrf.mxu1 }
 0x128   : > { %1079 = vst [vmem:[%s1683_s15 + $0x60] sm:$0xff] %v1047_v24  ;;  %1095 = vst [vmem:[%s1683_s15 + $0xe0] sm:$0xff] %v1063_v25  ;;  %v1016_v30 = vadd.f32 %v1672_v55, %v977_v26  ;;  %v1032_v31 = vadd.f32 %v1672_v55, %v993_v27  ;;  %v1351_v32 = vadd.f32 %v1350_v28, %v1349_v22 }
 0x129   : > { %v1399_v33 = vadd.f32 %v1398_v29, %v1397_v23  ;;  %v1352_v34 = vpop.f32.mrf.mxu0  ;;  %v1400_v35 = vpop.f32.mrf.mxu1 }
 0x12a   : > { %v1048_v36 = vmax.f32 %v1016_v30, 0.0  ;;  %v1064_v37 = vmax.f32 %v1032_v31, 0.0  ;;  %v978_v38 = vmul.f32 %v1351_v32, %v1667_v51 }
 0x12b   : > { %v994_v39 = vmul.f32 %v1399_v33, %v1667_v51  ;;  %v1353_v40 = vpop.f32.mrf.mxu0  ;;  %v1401_v41 = vpop.f32.mrf.mxu1 }
 0x12c   : > { %1080 = vst [vmem:[%s1683_s15 + $0x68] sm:$0xff] %v1048_v36  ;;  %1096 = vst [vmem:[%s1683_s15 + $0xe8] sm:$0xff] %v1064_v37  ;;  %v1017_v42 = vadd.f32 %v1672_v55, %v978_v38  ;;  %v1354_v44 = vadd.f32 %v1353_v40, %v1352_v34  ;;  %v1402_v45 = vadd.f32 %v1401_v41, %v1400_v35 }
 0x12d   : > { %v1033_v43 = vadd.f32 %v1672_v55, %v994_v39 }
 0x12e   : > { %v1049_v46 = vmax.f32 %v1017_v42, 0.0  ;;  %v979_v48 = vmul.f32 %v1354_v44, %v1667_v51  ;;  %v995_v49 = vmul.f32 %v1402_v45, %v1667_v51 }
 0x12f   : > { %v1065_v47 = vmax.f32 %v1033_v43, 0.0 }
 0x130   : > { %1081 = vst [vmem:[%s1683_s15 + $0x70] sm:$0xff] %v1049_v46  ;;  %v1018_v50 = vadd.f32 %v1672_v55, %v979_v48  ;;  %v1034_v52 = vadd.f32 %v1672_v55, %v995_v49 }
 0x131   : > { %1097 = vst [vmem:[%s1683_s15 + $0xf0] sm:$0xff] %v1065_v47 }
 0x132   : > { %v1050_v53 = vmax.f32 %v1018_v50, 0.0  ;;  %v1066_v54 = vmax.f32 %v1034_v52, 0.0 }
 0x134   : > { %1082 = vst [vmem:[%s1683_s15 + $0x78] sm:$0xff] %v1050_v53  ;;  %1098 = vst [vmem:[%s1683_s15 + $0xf8] sm:$0xff] %v1066_v54 }
 0x135 PF: > { %s14_s17 = sadd.s32 1, %s1529_s17   ;;  %s1791_s15 = smov %s1525_s16 }
 0x136   : > { %p11_p5 = scmp.ge.s32.totalorder %s14_s17, 4   ;;  %s1792_s16 = smov %s1794_s18 }
 0x138   :  { %13 = sbr.rel (!%p11_p5) target bundleno = 2 (0x2), region = 83 }

// kernel: resnet_encoder_forward.22
= control target key start
LH: loop header
LB: loop body
LE: loop exit
PB: predicated region body
PF: predicated region fallthrough
CT: control target
= control target key end

     0   :  { %s632_s15 = smov 0   ;;  %s787_s0 = inlined_call_operand.vmem [shape: f32[2,9,9,64], index: 0, kind: input, shape index: {}]   ;;  %s788_s1 = inlined_call_operand.vmem [shape: f32[2,9,9,64], index: 1, kind: input, shape index: {}]   ;;  %s789_s2 = inlined_call_operand.vmem [shape: f32[2,9,9,64], index: 2, kind: input, shape index: {}]   ;;  %s790_s3 = inlined_call_operand.vmem [shape: f32[2,9,9,64], index: 3, kind: input, shape index: {}]   ;;  %s791_s4 = inlined_call_operand.vmem [shape: f32[2,8,8,64], index: 4, kind: output, shape index: {}]  }
   0x1 LB: > { %s576_s16 = sadd.s32 4294967295, %s605_s15   ;;  %p580_p0 = scmp.ge.s32.totalorder %s605_s15, 1  ;;  %s605_s15 = sphi %s632_s15, %s14_s15  }
   0x2   : > { %p192_p1 = scmp.lt.s32.totalorder %s605_s15, 3 }
   0x4   : > { %p193_p2 = pnand %p580_p0, %p192_p1 }
   0x5   : > { %p233_p3 = scmp.lt.s32.totalorder (!%p193_p2), %s576_s16, 1 }
   0x6   : > { %196 = sbr.rel (%p193_p2) target bundleno = 56 (0x38), region = 36 }
   0xb   : > { %s793_s16 = smov (!%p233_p3, %s576_s16), 1  ;;  %vm325_vm0 = vcmask 1046528   ;;  %vm476_vm1 = vcmask 523264  }
   0xc   : > { %s643_s17 = smul.u32 144, %s793_s16  ;;  %s589_s30 = sshll.u32 %s793_s16, 6 }
   0xd   : > { %s737_s7 = scalar_lea.vmem %s791_s4, %s589_s30 }
   0xe   : > { %s649_s20 = scalar_lea.vmem %s787_s0, %s643_s17  ;;  %s655_s23 = scalar_lea.vmem %s789_s2, %s643_s17 }
   0xf   : > { %v258_v0 = vld [vmem:[%s649_s20] sm:$0xff]  ;;  %v259_v1 = vld [vmem:[%s649_s20 + $0x8] sm:$0x1]  ;;  %v260_v2 = vld [vmem:[%s649_s20 + $0x10] sm:$0xff]  ;;  %s673_s26 = scalar_lea.vmem %s788_s1, %s643_s17  ;;  %s718_s29 = scalar_lea.vmem %s790_s3, %s643_s17 }
  0x10   : > { %v261_v3 = vld [vmem:[%s649_s20 + $0x18] sm:$0x1]  ;;  %v326_v4 = vrot.slane %v258_v0, 1  ;;  %v327_v5 = vrot.slane %v259_v1, 1  ;;  %v662_v6 = vld [vmem:[%s655_s23] sm:$0xff]  ;;  %v329_v8 = vrot.slane %v260_v2, 1 }
  0x11   : > { %v286_v7 = vld [vmem:[%s655_s23 + $0x8] sm:$0x1]  ;;  %v330_v9 = vrot.slane %v261_v3, 1  ;;  %v428_v11 = vrot.slane %v662_v6, 1  ;;  %v262_v13 = vld [vmem:[%s649_s20 + $0x20] sm:$0xff]  ;;  %v677_v17 = vld [vmem:[%s655_s23 + $0x10] sm:$0xff] }
  0x12   : > { %v328_v10 = vsel %vm325_vm0, %v326_v4, %v327_v5  ;;  %v429_v12 = vrot.slane %v286_v7, 1  ;;  %v263_v14 = vld [vmem:[%s649_s20 + $0x28] sm:$0x1]  ;;  %v288_v18 = vld [vmem:[%s655_s23 + $0x18] sm:$0x1]  ;;  %v332_v19 = vrot.slane %v262_v13, 1 }
  0x13   : > { %v331_v15 = vsel %vm325_vm0, %v329_v8, %v330_v9  ;;  %v358_v16 = vmax.f32 %v258_v0, %v328_v10  ;;  %v333_v20 = vrot.slane %v263_v14, 1  ;;  %v431_v23 = vrot.slane %v677_v17, 1  ;;  %v264_v25 = vld [vmem:[%s649_s20 + $0x30] sm:$0xff]  ;;  %v265_v26 = vld [vmem:[%s649_s20 + $0x38] sm:$0x1]  ;;  %v688_v29 = vld [vmem:[%s655_s23 + $0x20] sm:$0xff] }
  0x14   : > { %v359_v21 = vmax.f32 %v260_v2, %v331_v15  ;;  %v681_v22 = vsel %vm325_vm0, %v428_v11, %v429_v12  ;;  %v432_v24 = vrot.slane %v288_v18, 1  ;;  %v290_v30 = vld [vmem:[%s655_s23 + $0x28] sm:$0x1]  ;;  %v335_v31 = vrot.slane %v264_v25, 1  ;;  %v276_v33 = vld [vmem:[%s673_s26] sm:$0xff]  ;;  %v277_v40 = vld [vmem:[%s673_s26 + $0x10] sm:$0xff] }
  0x15   : > { %v366_v27 = vmax.f32 %v358_v16, %v260_v2  ;;  %v334_v28 = vsel %vm325_vm0, %v332_v19, %v333_v20  ;;  %v336_v32 = vrot.slane %v265_v26, 1  ;;  %v434_v37 = vrot.slane %v688_v29, 1  ;;  %v266_v38 = vld [vmem:[%s649_s20 + $0x40] sm:$0xff]  ;;  %v267_v39 = vld [vmem:[%s649_s20 + $0x48] sm:$0x1]  ;;  %v701_v44 = vld [vmem:[%s655_s23 + $0x30] sm:$0xff] }
  0x16   : > { %v360_v34 = vmax.f32 %v262_v13, %v334_v28  ;;  %v367_v35 = vmax.f32 %v359_v21, %v262_v13  ;;  %v693_v36 = vsel %vm325_vm0, %v431_v23, %v432_v24  ;;  %v435_v43 = vrot.slane %v290_v30, 1  ;;  %v292_v45 = vld [vmem:[%s655_s23 + $0x38] sm:$0x1]  ;;  %v268_v51 = vld [vmem:[%s649_s20 + $0x50] sm:$0xff]  ;;  %v278_v53 = vld [vmem:[%s673_s26 + $0x20] sm:$0xff] }
  0x17   : > { %v380_v41 = vmax.f32 %v366_v27, %v331_v15  ;;  %v337_v42 = vsel %vm325_vm0, %v335_v31, %v336_v32  ;;  %v338_v46 = vrot.slane %v266_v38, 1  ;;  %v339_v50 = vrot.slane %v267_v39, 1  ;;  %v269_v57 = vld [vmem:[%s649_s20 + $0x58] sm:$0x1]  ;;  %v293_v62 = vld [vmem:[%s655_s23 + $0x40] sm:$0xff]  ;;  %v279_v1 = vld [vmem:[%s673_s26 + $0x30] sm:$0xff] }
  0x18   : > { %v381_v47 = vmax.f32 %v367_v35, %v334_v28  ;;  %v361_v48 = vmax.f32 %v264_v25, %v337_v42  ;;  %v368_v49 = vmax.f32 %v360_v34, %v264_v25  ;;  %v707_v54 = vsel %vm325_vm0, %v434_v37, %v435_v43  ;;  %v294_v63 = vld [vmem:[%s655_s23 + $0x48] sm:$0x1]  ;;  %v270_v14 = vld [vmem:[%s649_s20 + $0x60] sm:$0xff]  ;;  %v295_v28 = vld [vmem:[%s655_s23 + $0x50] sm:$0xff] }
  0x19   : > { %v388_v52 = vmax.f32 %v380_v41, %v276_v33  ;;  %v437_v55 = vrot.slane %v701_v44, 1  ;;  %v438_v56 = vrot.slane %v292_v45, 1  ;;  %v340_v60 = vsel %vm325_vm0, %v338_v46, %v339_v50  ;;  %v301_v15 = vld [vmem:[%s718_s29] sm:$0xff]  ;;  %v271_v23 = vld [vmem:[%s649_s20 + $0x68] sm:$0x1]  ;;  %v272_v33 = vld [vmem:[%s649_s20 + $0x70] sm:$0xff] }
  0x1a   : > { %v389_v58 = vmax.f32 %v381_v47, %v277_v40  ;;  %v382_v59 = vmax.f32 %v368_v49, %v337_v42  ;;  %v369_v61 = vmax.f32 %v361_v48, %v266_v38  ;;  %v362_v2 = vmax.f32 %v266_v38, %v340_v60  ;;  %v280_v19 = vld [vmem:[%s673_s26 + $0x40] sm:$0xff]  ;;  %v273_v43 = vld [vmem:[%s649_s20 + $0x78] sm:$0x1]  ;;  %v304_v45 = vld [vmem:[%s718_s29 + $0x30] sm:$0xff] }
  0x1b   : > { %v396_v0 = vmax.f32 %v388_v52, %v277_v40  ;;  %v439_v3 = vsel %vm325_vm0, %v437_v55, %v438_v56  ;;  %v341_v4 = vrot.slane %v268_v51, 1  ;;  %v342_v9 = vrot.slane %v269_v57, 1  ;;  %v303_v35 = vld [vmem:[%s718_s29 + $0x20] sm:$0xff] }
  0x1c   : > { %v397_v5 = vmax.f32 %v389_v58, %v278_v53  ;;  %v390_v7 = vmax.f32 %v382_v59, %v278_v53  ;;  %v383_v8 = vmax.f32 %v369_v61, %v340_v60  ;;  %v370_v11 = vmax.f32 %v362_v2, %v268_v51  ;;  %v274_v53 = vld [vmem:[%s649_s20 + $0x80] sm:$0xff]  ;;  %v298_v61 = vld [vmem:[%s655_s23 + $0x68] sm:$0x1] }
  0x1d   : > { %v404_v10 = vmax.f32 %v396_v0, %v662_v6  ;;  %v440_v12 = vrot.slane %v293_v62, 1  ;;  %v441_v13 = vrot.slane %v294_v63, 1  ;;  %v343_v21 = vsel %vm325_vm0, %v341_v4, %v342_v9  ;;  %v302_v6 = vld [vmem:[%s718_s29 + $0x10] sm:$0xff]  ;;  %v305_v58 = vld [vmem:[%s718_s29 + $0x40] sm:$0xff] }
  0x1e   : > { %v405_v16 = vmax.f32 %v397_v5, %v677_v17  ;;  %v398_v18 = vmax.f32 %v390_v7, %v279_v1  ;;  %v391_v20 = vmax.f32 %v383_v8, %v279_v1  ;;  %v363_v25 = vmax.f32 %v268_v51, %v343_v21  ;;  %v297_v60 = vld [vmem:[%s655_s23 + $0x60] sm:$0xff] }
  0x1f   : > { %v460_v24 = vmax.f32 %v404_v10, %v681_v22  ;;  %v384_v26 = vmax.f32 %v370_v11, %v343_v21  ;;  %v442_v27 = vsel %vm325_vm0, %v440_v12, %v441_v13  ;;  %v296_v22 = vld [vmem:[%s655_s23 + $0x58] sm:$0x1]  ;;  %v344_v32 = vrot.slane %v270_v14, 1  ;;  %v282_v1 = vld [vmem:[%s673_s26 + $0x60] sm:$0xff] }
  0x20   : > { %v461_v17 = vmax.f32 %v405_v16, %v693_v36  ;;  %v406_v30 = vmax.f32 %v398_v18, %v688_v29  ;;  %v399_v31 = vmax.f32 %v391_v20, %v280_v19  ;;  %v345_v38 = vrot.slane %v271_v23, 1  ;;  %v281_v29 = vld [vmem:[%s673_s26 + $0x50] sm:$0xff]  ;;  %v300_v16 = vld [vmem:[%s655_s23 + $0x78] sm:$0x1] }
  0x21   : > { %v468_v34 = vmax.f32 %v460_v24, %v301_v15  ;;  %v392_v37 = vmax.f32 %v384_v26, %v280_v19  ;;  %v371_v39 = vmax.f32 %v363_v25, %v270_v14  ;;  %v443_v42 = vrot.slane %v295_v28, 1  ;;  %v299_v15 = vld [vmem:[%s655_s23 + $0x70] sm:$0xff]  ;;  %v284_v25 = vld [vmem:[%s673_s26 + $0x80] sm:$0xff] }
  0x22   : > { %v469_v40 = vmax.f32 %v461_v17, %v302_v6  ;;  %v462_v41 = vmax.f32 %v406_v30, %v707_v54  ;;  %v407_v36 = vmax.f32 %v399_v31, %v701_v44  ;;  %v346_v47 = vsel %vm325_vm0, %v344_v32, %v345_v38  ;;  %v275_v54 = vld [vmem:[%s649_s20 + $0x88] sm:$0x1]  ;;  %v306_v19 = vld [vmem:[%s718_s29 + $0x50] sm:$0xff]  ;;  %v307_v31 = vld [vmem:[%s718_s29 + $0x60] sm:$0xff] }
  0x23   : > { %477 = vst.msk [vmem:[%s737_s7] sm:$0xff] %vm476_vm1, %v468_v34  ;;  %v400_v46 = vmax.f32 %v392_v37, %v281_v29  ;;  %v444_v48 = vrot.slane %v296_v22, 1  ;;  %v347_v49 = vrot.slane %v272_v33, 1  ;;  %v364_v51 = vmax.f32 %v270_v14, %v346_v47  ;;  %v283_v20 = vld [vmem:[%s673_s26 + $0x70] sm:$0xff] }
  0x24   : > { %478 = vst.msk [vmem:[%s737_s7 + $0x8] sm:$0xff] %vm476_vm1, %v469_v40  ;;  %v470_v50 = vmax.f32 %v462_v41, %v303_v35  ;;  %v463_v44 = vmax.f32 %v407_v36, %v439_v3  ;;  %v385_v52 = vmax.f32 %v371_v39, %v346_v47  ;;  %v348_v56 = vrot.slane %v273_v43, 1  ;;  %v308_v37 = vld [vmem:[%s718_s29 + $0x70] sm:$0xff] }
  0x25   : > { %v408_v55 = vmax.f32 %v400_v46, %v293_v62  ;;  %v372_v63 = vmax.f32 %v364_v51, %v272_v33  ;;  %v376_v3 = vrot.slane %v274_v53, 1  ;;  %v377_v4 = vrot.slane %v275_v54, 1 }
  0x26   : > { %479 = vst.msk [vmem:[%s737_s7 + $0x10] sm:$0xff] %vm476_vm1, %v470_v50  ;;  %v471_v57 = vmax.f32 %v463_v44, %v304_v45  ;;  %v393_v59 = vmax.f32 %v385_v52, %v281_v29  ;;  %v349_v2 = vsel %vm325_vm0, %v347_v49, %v348_v56  ;;  %v445_v5 = vsel %vm325_vm0, %v443_v42, %v444_v48 }
  0x27   : > { %v464_v0 = vmax.f32 %v408_v55, %v442_v27  ;;  %v365_v7 = vmax.f32 %v272_v33, %v349_v2  ;;  %v386_v8 = vmax.f32 %v372_v63, %v349_v2  ;;  %v446_v10 = vrot.slane %v297_v60, 1 }
  0x28   : > { %480 = vst.msk [vmem:[%s737_s7 + $0x18] sm:$0xff] %vm476_vm1, %v471_v57  ;;  %v401_v62 = vmax.f32 %v393_v59, %v282_v1  ;;  %v447_v11 = vrot.slane %v298_v61, 1  ;;  %v378_v12 = vsel %vm325_vm0, %v376_v3, %v377_v4  ;;  %v449_v26 = vrot.slane %v299_v15, 1 }
  0x29   : > { %v472_v9 = vmax.f32 %v464_v0, %v305_v58  ;;  %v394_v14 = vmax.f32 %v386_v8, %v282_v1  ;;  %v373_v18 = vmax.f32 %v365_v7, %v274_v53  ;;  %v450_v27 = vrot.slane %v300_v16, 1 }
  0x2a   : > { %v409_v13 = vmax.f32 %v401_v62, %v295_v28  ;;  %v448_v6 = vsel %vm325_vm0, %v446_v10, %v447_v11 }
  0x2b   : > { %481 = vst.msk [vmem:[%s737_s7 + $0x20] sm:$0xff] %vm476_vm1, %v472_v9  ;;  %v402_v23 = vmax.f32 %v394_v14, %v283_v20  ;;  %v387_v24 = vmax.f32 %v373_v18, %v378_v12  ;;  %v451_v33 = vsel %vm325_vm0, %v449_v26, %v450_v27 }
  0x2c   : > { %v465_v21 = vmax.f32 %v409_v13, %v445_v5 }
  0x2d   : > { %v410_v17 = vmax.f32 %v402_v23, %v297_v60  ;;  %v395_v30 = vmax.f32 %v387_v24, %v283_v20 }
  0x2e   : > { %v473_v28 = vmax.f32 %v465_v21, %v306_v19 }
  0x2f   : > { %v466_v22 = vmax.f32 %v410_v17, %v448_v6  ;;  %v403_v32 = vmax.f32 %v395_v30, %v284_v25 }
  0x30   : > { %482 = vst.msk [vmem:[%s737_s7 + $0x28] sm:$0xff] %vm476_vm1, %v473_v28 }
  0x31   : > { %v474_v34 = vmax.f32 %v466_v22, %v307_v31  ;;  %v411_v35 = vmax.f32 %v403_v32, %v299_v15 }
  0x33   : > { %483 = vst.msk [vmem:[%s737_s7 + $0x30] sm:$0xff] %vm476_vm1, %v474_v34  ;;  %v467_v38 = vmax.f32 %v411_v35, %v451_v33 }
  0x35   : > { %v475_v39 = vmax.f32 %v467_v38, %v308_v37 }
  0x37   : > { %484 = vst.msk [vmem:[%s737_s7 + $0x38] sm:$0xff] %vm476_vm1, %v475_v39 }
  0x38 PF: > { %s14_s15 = sadd.s32 1, %s605_s15  }
  0x39   : > { %p11_p4 = scmp.ge.s32.totalorder %s14_s15, 4  }
  0x3b   :  { %13 = sbr.rel (!%p11_p4) target bundleno = 1 (0x1), region = 75 }

// kernel: resnet_encoder_forward.23
= control target key start
LH: loop header
LB: loop body
LE: loop exit
PB: predicated region body
PF: predicated region fallthrough
CT: control target
= control target key end

     0   :  { %s1132_s15 = smov 0   ;;  %s1134_s16 = smov 0   ;;  %s1309_s0 = inlined_call_operand.vmem [shape: bf16[128,640], index: 0, kind: input, shape index: {}]   ;;  %s1310_s1 = inlined_call_operand.vmem [shape: bf16[640,128], index: 1, kind: input, shape index: {}]   ;;  %s1311_s2 = inlined_call_operand.vmem [shape: f32[1,128], index: 2, kind: input, shape index: {}]   ;;  %s1312_s3 = inlined_call_operand.vmem [shape: f32[1,128], index: 3, kind: input, shape index: {}]   ;;  %s1313_s4 = inlined_call_operand.vmem [shape: f32[128,128], index: 4, kind: output, shape index: {}]  }
   0x1   :  { %s1136_s17 = smov 0   ;;  %s1138_s18 = smov 0  }
   0x2   :  { %s1140_s19 = smov 0  }
   0x3 LB: > { %s26_s20 = sadd.s32 1, %s1100_s18  ;;  %p49_p1 = scmp.ne.s32.totalorder %s1092_s16, %s1088_s15  ;;  %s1104_s19 = sphi %s1140_s19, %s14_s19   ;;  %s1100_s18 = sphi %s1138_s18, %s1317_s18   ;;  %s1096_s17 = sphi %s1136_s17, %s1316_s17   ;;  %s1092_s16 = sphi %s1134_s16, %s1315_s16   ;;  %s1088_s15 = sphi %s1132_s15, %s1314_s15  }
   0x4   : > { %p27_p0 = scmp.ge.s32.totalorder %s26_s20, 5  ;;  %p50_p2 = scmp.eq.s32.totalorder %s1104_s19, 0 }
   0x5   : > { %s42_s22 = sadd.s32 1, %s1092_s16  ;;  %p914_p5 = scmp.ge.s32.totalorder %s1104_s19, 5 }
   0x6   : > { %s1319_s20 = smov (%p27_p0, %s26_s20), 0  ;;  %p51_p3 = por %p50_p2, %p49_p1 }
   0x7   : > { %s38_s21 = ssub.s32 %s1100_s18, %s1319_s20  ;;  %195 = sbr.rel (%p914_p5) target bundleno = 26 (0x1a), region = 24 }
   0x8   : > { %p40_p4 = scmp.eq.s32.totalorder %s38_s21, 0 }
   0xa   : > { %s1167_s23 = scalar_select %p40_p4, %s1092_s16, %s42_s22  }
   0xc   : > { %198 = sbr.rel (!%p51_p3) target bundleno = 26 (0x1a), region = 28  ;;  %s200_s24 = sand.u32 (%p51_p3), 1, %s1092_s16  }
   0xd   : > { %s916_s25 = sshll.u32 (%p51_p3), %s1100_s18, 2  ;;  %s915_s26 = sshll.u32 (%p51_p3), %s200_s24, 6 }
   0xe   : > { %s1175_s29 = scalar_lea.vmem (%p51_p3), %s1309_s0, %s916_s25  ;;  %s202_s30 = scalar_lea.vmem (%p51_p3), [#allocation3], %s915_s26 }
   0xf   : > { %v224_v0 = vld [vmem:[%s1175_s29] sm:$0xf] (%p51_p3)  ;;  %v226_v1 = vld [vmem:[%s1175_s29 + $0x14] sm:$0xf] (%p51_p3)  ;;  %v228_v2 = vld [vmem:[%s1175_s29 + $0x28] sm:$0xf] (%p51_p3) }
  0x10   : > { %225 = vst [vmem:[%s202_s30] sm:$0xf] (%p51_p3), %v224_v0  ;;  %227 = vst [vmem:[%s202_s30 + $0x4] sm:$0xf] (%p51_p3), %v226_v1  ;;  %v230_v3 = vld [vmem:[%s1175_s29 + $0x3c] sm:$0xf] (%p51_p3) }
  0x11   : > { %v232_v4 = vld [vmem:[%s1175_s29 + $0x50] sm:$0xf]  ;;  %229 = vst [vmem:[%s202_s30 + $0x8] sm:$0xf] %v228_v2  ;;  %231 = vst [vmem:[%s202_s30 + $0xc] sm:$0xf] %v230_v3 }
  0x12   : > { %233 = vst [vmem:[%s202_s30 + $0x10] sm:$0xf] %v232_v4  ;;  %v234_v5 = vld [vmem:[%s1175_s29 + $0x64] sm:$0xf]  ;;  %v236_v6 = vld [vmem:[%s1175_s29 + $0x78] sm:$0xf] }
  0x13   : > { %v238_v7 = vld [vmem:[%s1175_s29 + $0x8c] sm:$0xf]  ;;  %235 = vst [vmem:[%s202_s30 + $0x14] sm:$0xf] %v234_v5  ;;  %237 = vst [vmem:[%s202_s30 + $0x18] sm:$0xf] %v236_v6 }
  0x14   : > { %239 = vst [vmem:[%s202_s30 + $0x1c] sm:$0xf] %v238_v7  ;;  %v240_v8 = vld [vmem:[%s1175_s29 + $0xa0] sm:$0xf]  ;;  %v242_v9 = vld [vmem:[%s1175_s29 + $0xb4] sm:$0xf] }
  0x15   : > { %v244_v10 = vld [vmem:[%s1175_s29 + $0xc8] sm:$0xf]  ;;  %241 = vst [vmem:[%s202_s30 + $0x20] sm:$0xf] %v240_v8  ;;  %243 = vst [vmem:[%s202_s30 + $0x24] sm:$0xf] %v242_v9 }
  0x16   : > { %245 = vst [vmem:[%s202_s30 + $0x28] sm:$0xf] %v244_v10  ;;  %v246_v11 = vld [vmem:[%s1175_s29 + $0xdc] sm:$0xf]  ;;  %v248_v12 = vld [vmem:[%s1175_s29 + $0xf0] sm:$0xf] }
  0x17   : > { %v250_v13 = vld [vmem:[%s1175_s29 + $0x104] sm:$0xf]  ;;  %247 = vst [vmem:[%s202_s30 + $0x2c] sm:$0xf] %v246_v11  ;;  %249 = vst [vmem:[%s202_s30 + $0x30] sm:$0xf] %v248_v12 }
  0x18   : > { %251 = vst [vmem:[%s202_s30 + $0x34] sm:$0xf] %v250_v13  ;;  %v252_v14 = vld [vmem:[%s1175_s29 + $0x118] sm:$0xf]  ;;  %v254_v15 = vld [vmem:[%s1175_s29 + $0x12c] sm:$0xf] }
  0x19   : > { %253 = vst [vmem:[%s202_s30 + $0x38] sm:$0xf] %v252_v14  ;;  %255 = vst [vmem:[%s202_s30 + $0x3c] sm:$0xf] %v254_v15 }
  0x1a PF: > { %p917_p6 = scmp.ge.s32.totalorder %s1104_s19, 1  ;;  %p322_p7 = scmp.lt.s32.totalorder %s1104_s19, 6 }
  0x1c   : > { %p323_p8 = pnand %p917_p6, %p322_p7 }
  0x1d   : > { %s329_s5 = sand.u32 (!%p323_p8), 1, %s1088_s15   ;;  %s919_s6 = sshll.u32 (!%p323_p8), %s1096_s17, 4 }
  0x1e   : > { %326 = sbr.rel (%p323_p8) target bundleno = 310 (0x136), region = 73  ;;  %s918_s7 = sshll.u32 (!%p323_p8), %s329_s5, 6 }
  0x1f   : > { %p373_p9 = scmp.lt.s32.totalorder (!%p323_p8), %s919_s6, 79  ;;  %s1202_s12 = scalar_lea.vmem (!%p323_p8), [#allocation3], %s918_s7 }
  0x20   : > { %p921_p10 = scmp.ne.s32.totalorder (!%p323_p8), %s1096_s17, 0 }
  0x23   : > { %s1321_s6 = smov (!%p373_p9, %s919_s6), 79  ;;  %400 = sbr.rel (%p921_p10) target bundleno = 49 (0x31), region = 81 }
  0x24   : > { %s920_s8 = sshll.u32 %s1321_s6, 2 }
  0x25   : > { %s1200_s11 = scalar_lea.vmem %s1310_s1, %s920_s8 }
  0x28   : > { %v1106_v16 = vmov 0.0  }
  0x29   : > { %401 = vst [vmem:[#allocation2 + $0x30] sm:$0xff] %v1106_v16  ;;  %402 = vst [vmem:[#allocation2] sm:$0xff] %v1106_v16 }
  0x2a   : > { %403 = vst [vmem:[#allocation2 + $0x58] sm:$0xff] %v1106_v16  ;;  %404 = vst [vmem:[#allocation2 + $0x18] sm:$0xff] %v1106_v16 }
  0x2b   : > { %405 = vst [vmem:[#allocation2 + $0x50] sm:$0xff] %v1106_v16  ;;  %406 = vst [vmem:[#allocation2 + $0x68] sm:$0xff] %v1106_v16 }
  0x2c   : > { %407 = vst [vmem:[#allocation2 + $0x8] sm:$0xff] %v1106_v16  ;;  %408 = vst [vmem:[#allocation2 + $0x48] sm:$0xff] %v1106_v16 }
  0x2d   : > { %409 = vst [vmem:[#allocation2 + $0x40] sm:$0xff] %v1106_v16  ;;  %410 = vst [vmem:[#allocation2 + $0x20] sm:$0xff] %v1106_v16 }
  0x2e   : > { %411 = vst [vmem:[#allocation2 + $0x10] sm:$0xff] %v1106_v16  ;;  %412 = vst [vmem:[#allocation2 + $0x38] sm:$0xff] %v1106_v16 }
  0x2f   : > { %413 = vst [vmem:[#allocation2 + $0x60] sm:$0xff] %v1106_v16  ;;  %414 = vst [vmem:[#allocation2 + $0x70] sm:$0xff] %v1106_v16 }
  0x30   : > { %415 = vst [vmem:[#allocation2 + $0x78] sm:$0xff] %v1106_v16  ;;  %416 = vst [vmem:[#allocation2 + $0x28] sm:$0xff] %v1106_v16 }
  0x31 PF: > { %v1050_v17 = vld [vmem:[%s1200_s11 + $0x38] sm:$0xff]   ;;  %v1051_v18 = vld [vmem:[%s1200_s11 + $0x30] sm:$0xff]   ;;  %v1052_v19 = vld [vmem:[%s1200_s11 + $0x28] sm:$0xff]   ;;  %p938_p11 = scmp.ne.s32.totalorder %s1096_s17, 4 }
  0x32   : > { %961 = vmatprep.subr.bf16.mxu0 %v1050_v17  ;;  %993 = vmatprep.subr.bf16.mxu1 %v1050_v17  ;;  %v1053_v20 = vld [vmem:[%s1200_s11 + $0x20] sm:$0xff]   ;;  %v1054_v23 = vld [vmem:[%s1200_s11 + $0x18] sm:$0xff]   ;;  %v1055_v24 = vld [vmem:[%s1200_s11 + $0x10] sm:$0xff]  }
  0x33   : > { %962 = vmatpush3.bf16.msra.mxu0 %v1050_v17  ;;  %1001 = vmatpush3.bf16.msra.mxu1 %v1050_v17  ;;  %v1058_v21 = vld [vmem:[%s1202_s12] sm:$0xff]   ;;  %v1056_v25 = vld [vmem:[%s1200_s11 + $0x8] sm:$0xff]   ;;  %v1062_v29 = vld [vmem:[%s1202_s12 + $0x10] sm:$0xff]  }
  0x34   : > { %963 = vmatprep.subr.bf16.mxu0 %v1051_v18  ;;  %994 = vmatprep.subr.bf16.mxu1 %v1051_v18  ;;  %v1059_v22 = vld [vmem:[%s1202_s12 + $0x20] sm:$0xff]   ;;  %v1060_v27 = vld [vmem:[%s1202_s12 + $0x8] sm:$0xff]   ;;  %v1063_v30 = vld [vmem:[%s1202_s12 + $0x30] sm:$0xff]  }
  0x35   : > { %977 = vmatprep.mubr.bf16.mxu0 %v1058_v21  ;;  %985 = vmatprep.mubr.bf16.mxu1 %v1059_v22  ;;  %v1057_v26 = vld [vmem:[%s1200_s11] sm:$0xff]   ;;  %v1061_v28 = vld [vmem:[%s1202_s12 + $0x28] sm:$0xff]   ;;  %v1064_v31 = vld [vmem:[%s1202_s12 + $0x18] sm:$0xff]  }
  0x36   : > { %v1065_v32 = vld [vmem:[%s1202_s12 + $0x38] sm:$0xff]   ;;  %v427_v34 = vld [vmem:[#allocation2 + $0x10] sm:$0xff]  ;;  %v425_v38 = vld [vmem:[#allocation2 + $0x40] sm:$0xff] }
  0x37   : > { %964 = vmatpush3.bf16.msra.mxu0 %v1051_v18  ;;  %1002 = vmatpush3.bf16.msra.mxu1 %v1051_v18  ;;  %v419_v33 = vld [vmem:[#allocation2 + $0x58] sm:$0xff]  ;;  %v417_v37 = vld [vmem:[#allocation2 + $0x30] sm:$0xff]  ;;  %v418_v49 = vld [vmem:[#allocation2] sm:$0xff] }
  0x38   : > { %965 = vmatprep.subr.bf16.mxu0 %v1052_v19  ;;  %995 = vmatprep.subr.bf16.mxu1 %v1052_v19  ;;  %v420_v43 = vld [vmem:[#allocation2 + $0x18] sm:$0xff]  ;;  %v426_v50 = vld [vmem:[#allocation2 + $0x20] sm:$0xff]  ;;  %v423_v55 = vld [vmem:[#allocation2 + $0x8] sm:$0xff] }
  0x39   : > { %v428_v44 = vld [vmem:[#allocation2 + $0x38] sm:$0xff]  ;;  %v421_v61 = vld [vmem:[#allocation2 + $0x50] sm:$0xff]  ;;  %v429_v62 = vld [vmem:[#allocation2 + $0x60] sm:$0xff] }
  0x3a   : > { %v431_v56 = vld [vmem:[#allocation2 + $0x78] sm:$0xff]  ;;  %v424_v3 = vld [vmem:[#allocation2 + $0x48] sm:$0xff]  ;;  %v430_v10 = vld [vmem:[#allocation2 + $0x70] sm:$0xff] }
  0x3b   : > { %966 = vmatpush3.bf16.msra.mxu0 %v1052_v19  ;;  %1003 = vmatpush3.bf16.msra.mxu1 %v1052_v19  ;;  %v432_v4 = vld [vmem:[#allocation2 + $0x28] sm:$0xff] }
  0x3c   : > { %967 = vmatprep.subr.bf16.mxu0 %v1053_v20  ;;  %996 = vmatprep.subr.bf16.mxu1 %v1053_v20  ;;  %v422_v9 = vld [vmem:[#allocation2 + $0x68] sm:$0xff] }
  0x3f   : > { %968 = vmatpush3.bf16.msra.mxu0 %v1053_v20  ;;  %1004 = vmatpush3.bf16.msra.mxu1 %v1053_v20 }
  0x40   : > { %969 = vmatprep.subr.bf16.mxu0 %v1054_v23  ;;  %997 = vmatprep.subr.bf16.mxu1 %v1054_v23 }
  0x43   : > { %970 = vmatpush3.bf16.msra.mxu0 %v1054_v23  ;;  %1005 = vmatpush3.bf16.msra.mxu1 %v1054_v23 }
  0x44   : > { %971 = vmatprep.subr.bf16.mxu0 %v1055_v24  ;;  %998 = vmatprep.subr.bf16.mxu1 %v1055_v24 }
  0x47   : > { %972 = vmatpush3.bf16.msra.mxu0 %v1055_v24  ;;  %1006 = vmatpush3.bf16.msra.mxu1 %v1055_v24 }
  0x48   : > { %973 = vmatprep.subr.bf16.mxu0 %v1056_v25  ;;  %999 = vmatprep.subr.bf16.mxu1 %v1056_v25 }
  0x4b   : > { %974 = vmatpush3.bf16.msra.mxu0 %v1056_v25  ;;  %1007 = vmatpush3.bf16.msra.mxu1 %v1056_v25 }
  0x4c   : > { %975 = vmatprep.subr.bf16.mxu0 %v1057_v26  ;;  %1000 = vmatprep.subr.bf16.mxu1 %v1057_v26 }
  0x4f   : > { %976 = vmatpush3.bf16.msra.mxu0 %v1057_v26  ;;  %1008 = vmatpush3.bf16.msra.mxu1 %v1057_v26 }
  0x52   : > { %978 = vmatmul.mubr.bf16.vlgmr.msra.gmra.mxu0 %v1060_v27  ;;  %986 = vmatmul.mubr.bf16.vlgmr.msra.gmra.mxu1 %v1061_v28 }
  0x53   : > { %981 = vmatprep.mubr.bf16.mxu0 %v1062_v29  ;;  %989 = vmatprep.mubr.bf16.mxu1 %v1063_v30 }
  0x5a   : > { %982 = vmatmul.mubr.bf16.gmra.mxu0 %v1064_v31  ;;  %990 = vmatmul.mubr.bf16.gmra.mxu1 %v1065_v32 }
 0x112   : > { %v979_v35 = vpop.f32.mrf.mxu0  ;;  %v987_v36 = vpop.f32.mrf.mxu1 }
 0x113   : > { %v660_v39 = vadd.f32 %v979_v35, %v419_v33  ;;  %v668_v40 = vadd.f32 %v987_v36, %v427_v34 }
 0x114   : > { %v595_v41 = vpop.f32.mrf.mxu0  ;;  %v627_v42 = vpop.f32.mrf.mxu1 }
 0x115   : > { %676 = vst [vmem:[#allocation2 + $0x58] sm:$0xff] %v660_v39  ;;  %684 = vst [vmem:[#allocation2 + $0x10] sm:$0xff] %v668_v40  ;;  %v658_v45 = vadd.f32 %v595_v41, %v417_v37  ;;  %v666_v46 = vadd.f32 %v627_v42, %v425_v38 }
 0x116   : > { %v980_v47 = vpop.f32.mrf.mxu0  ;;  %v988_v48 = vpop.f32.mrf.mxu1 }
 0x117   : > { %674 = vst [vmem:[#allocation2 + $0x30] sm:$0xff] %v658_v45  ;;  %682 = vst [vmem:[#allocation2 + $0x40] sm:$0xff] %v666_v46  ;;  %v661_v51 = vadd.f32 %v980_v47, %v420_v43  ;;  %v669_v52 = vadd.f32 %v988_v48, %v428_v44 }
 0x118   : > { %v598_v53 = vpop.f32.mrf.mxu0  ;;  %v630_v54 = vpop.f32.mrf.mxu1 }
 0x119   : > { %677 = vst [vmem:[#allocation2 + $0x18] sm:$0xff] %v661_v51  ;;  %685 = vst [vmem:[#allocation2 + $0x38] sm:$0xff] %v669_v52  ;;  %v659_v57 = vadd.f32 %v598_v53, %v418_v49  ;;  %v667_v58 = vadd.f32 %v630_v54, %v426_v50 }
 0x11a   : > { %v983_v59 = vpop.f32.mrf.mxu0  ;;  %v991_v60 = vpop.f32.mrf.mxu1 }
 0x11b   : > { %675 = vst [vmem:[#allocation2] sm:$0xff] %v659_v57  ;;  %683 = vst [vmem:[#allocation2 + $0x20] sm:$0xff] %v667_v58  ;;  %v664_v63 = vadd.f32 %v983_v59, %v423_v55  ;;  %v672_v0 = vadd.f32 %v991_v60, %v431_v56 }
 0x11c   : > { %v611_v1 = vpop.f32.mrf.mxu0  ;;  %v643_v2 = vpop.f32.mrf.mxu1 }
 0x11d   : > { %680 = vst [vmem:[#allocation2 + $0x8] sm:$0xff] %v664_v63  ;;  %688 = vst [vmem:[#allocation2 + $0x78] sm:$0xff] %v672_v0  ;;  %v662_v5 = vadd.f32 %v611_v1, %v421_v61  ;;  %v670_v6 = vadd.f32 %v643_v2, %v429_v62 }
 0x11e   : > { %v984_v7 = vpop.f32.mrf.mxu0  ;;  %v992_v8 = vpop.f32.mrf.mxu1 }
 0x11f   : > { %678 = vst [vmem:[#allocation2 + $0x50] sm:$0xff] %v662_v5  ;;  %686 = vst [vmem:[#allocation2 + $0x60] sm:$0xff] %v670_v6  ;;  %v665_v11 = vadd.f32 %v984_v7, %v424_v3  ;;  %v673_v12 = vadd.f32 %v992_v8, %v432_v4  ;;  %693 = sbr.rel (%p938_p11) target bundleno = 310 (0x136), region = 85 }
 0x120   : > { %v614_v13 = vpop.f32.mrf.mxu0  ;;  %v646_v14 = vpop.f32.mrf.mxu1 }
 0x121   : > { %681 = vst [vmem:[#allocation2 + $0x48] sm:$0xff] %v665_v11  ;;  %689 = vst [vmem:[#allocation2 + $0x28] sm:$0xff] %v673_v12  ;;  %v663_v15 = vadd.f32 %v614_v13, %v422_v9  ;;  %v671_v16 = vadd.f32 %v646_v14, %v430_v10 }
 0x123   : > { %679 = vst [vmem:[#allocation2 + $0x68] sm:$0xff] %v663_v15  ;;  %687 = vst [vmem:[#allocation2 + $0x70] sm:$0xff] %v671_v16 }
 0x124   : > { %v694_v17 = vld [vmem:[#allocation2 + $0x30] sm:$0xff]  ;;  %v939_v18 = vld [vmem:[%s1311_s2] ss:$0 sm:$0xff]  ;;  %v696_v22 = vld [vmem:[#allocation2 + $0x58] sm:$0xff] }
 0x125   : > { %v1228_v19 = vld [vmem:[%s1312_s3] ss:$0 sm:$0xff]  ;;  %v717_v20 = vmul.f32 %v939_v18, %v694_v17  ;;  %v697_v23 = vld [vmem:[#allocation2 + $0x18] sm:$0xff]  ;;  %v719_v25 = vmul.f32 %v939_v18, %v696_v22  ;;  %v700_v29 = vld [vmem:[#allocation2 + $0x8] sm:$0xff] }
 0x126   : > { %v695_v21 = vld [vmem:[#allocation2] sm:$0xff]  ;;  %v720_v26 = vmul.f32 %v939_v18, %v697_v23  ;;  %v698_v27 = vld [vmem:[#allocation2 + $0x50] sm:$0xff]  ;;  %v723_v33 = vmul.f32 %v939_v18, %v700_v29  ;;  %v705_v46 = vld [vmem:[#allocation2 + $0x38] sm:$0xff] }
 0x127   : > { %v718_v24 = vmul.f32 %v939_v18, %v695_v21  ;;  %v740_v30 = vadd.f32 %v1228_v19, %v717_v20  ;;  %v721_v31 = vmul.f32 %v939_v18, %v698_v27  ;;  %v742_v36 = vadd.f32 %v1228_v19, %v719_v25  ;;  %v702_v39 = vld [vmem:[#allocation2 + $0x40] sm:$0xff]  ;;  %v704_v45 = vld [vmem:[#allocation2 + $0x10] sm:$0xff]  ;;  %v708_v53 = vld [vmem:[#allocation2 + $0x78] sm:$0xff] }
 0x128   : > { %v701_v34 = vld [vmem:[#allocation2 + $0x48] sm:$0xff]  ;;  %v743_v37 = vadd.f32 %v1228_v19, %v720_v26  ;;  %v746_v43 = vadd.f32 %v1228_v19, %v723_v33  ;;  %v703_v44 = vld [vmem:[#allocation2 + $0x20] sm:$0xff]  ;;  %v725_v57 = vmul.f32 %v939_v18, %v702_v39  ;;  %v727_v61 = vmul.f32 %v939_v18, %v704_v45 }
 0x129   : > { %v741_v35 = vadd.f32 %v1228_v19, %v718_v24  ;;  %v724_v38 = vmul.f32 %v939_v18, %v701_v34  ;;  %v756_v40 = vmax.f32 %v740_v30, 0.0  ;;  %v744_v41 = vadd.f32 %v1228_v19, %v721_v31  ;;  %v706_v51 = vld [vmem:[#allocation2 + $0x60] sm:$0xff]  ;;  %v709_v58 = vld [vmem:[#allocation2 + $0x28] sm:$0xff] }
 0x12a   : > { %v699_v28 = vld [vmem:[#allocation2 + $0x68] sm:$0xff]  ;;  %v758_v48 = vmax.f32 %v742_v36, 0.0  ;;  %v759_v49 = vmax.f32 %v743_v37, 0.0  ;;  %v707_v52 = vld [vmem:[#allocation2 + $0x70] sm:$0xff]  ;;  %v762_v56 = vmax.f32 %v746_v43, 0.0  ;;  %v726_v60 = vmul.f32 %v939_v18, %v703_v44 }
 0x12b   : > { %v722_v32 = vmul.f32 %v939_v18, %v699_v28  ;;  %v757_v47 = vmax.f32 %v741_v35, 0.0  ;;  %v747_v50 = vadd.f32 %v1228_v19, %v724_v38  ;;  %772 = vst [vmem:[%s1313_s4] sm:$0xff] %v756_v40  ;;  %v760_v54 = vmax.f32 %v744_v41, 0.0 }
 0x12c   : > { %774 = vst [vmem:[%s1313_s4 + $0x10] sm:$0xff] %v758_v48  ;;  %775 = vst [vmem:[%s1313_s4 + $0x18] sm:$0xff] %v759_v49  ;;  %v728_v62 = vmul.f32 %v939_v18, %v705_v46  ;;  %v748_v63 = vadd.f32 %v1228_v19, %v725_v57  ;;  %v729_v0 = vmul.f32 %v939_v18, %v706_v51 }
 0x12d   : > { %v745_v42 = vadd.f32 %v1228_v19, %v722_v32  ;;  %773 = vst [vmem:[%s1313_s4 + $0x8] sm:$0xff] %v757_v47  ;;  %v763_v59 = vmax.f32 %v747_v50, 0.0  ;;  %776 = vst [vmem:[%s1313_s4 + $0x20] sm:$0xff] %v760_v54  ;;  %v730_v1 = vmul.f32 %v939_v18, %v707_v52  ;;  %v731_v2 = vmul.f32 %v939_v18, %v708_v53 }
 0x12e   : > { %778 = vst [vmem:[%s1313_s4 + $0x30] sm:$0xff] %v762_v56  ;;  %v749_v3 = vadd.f32 %v1228_v19, %v726_v60  ;;  %v750_v4 = vadd.f32 %v1228_v19, %v727_v61  ;;  %v751_v5 = vadd.f32 %v1228_v19, %v728_v62  ;;  %v732_v6 = vmul.f32 %v939_v18, %v709_v58 }
 0x12f   : > { %v761_v55 = vmax.f32 %v745_v42, 0.0  ;;  %779 = vst [vmem:[%s1313_s4 + $0x38] sm:$0xff] %v763_v59  ;;  %v764_v7 = vmax.f32 %v748_v63, 0.0  ;;  %v752_v8 = vadd.f32 %v1228_v19, %v729_v0  ;;  %v753_v9 = vadd.f32 %v1228_v19, %v730_v1 }
 0x130   : > { %v754_v10 = vadd.f32 %v1228_v19, %v731_v2  ;;  %v765_v11 = vmax.f32 %v749_v3, 0.0  ;;  %v766_v12 = vmax.f32 %v750_v4, 0.0  ;;  %v767_v13 = vmax.f32 %v751_v5, 0.0 }
 0x131   : > { %777 = vst [vmem:[%s1313_s4 + $0x28] sm:$0xff] %v761_v55  ;;  %v755_v14 = vadd.f32 %v1228_v19, %v732_v6  ;;  %780 = vst [vmem:[%s1313_s4 + $0x40] sm:$0xff] %v764_v7  ;;  %v768_v15 = vmax.f32 %v752_v8, 0.0  ;;  %v769_v16 = vmax.f32 %v753_v9, 0.0 }
 0x132   : > { %v770_v17 = vmax.f32 %v754_v10, 0.0  ;;  %781 = vst [vmem:[%s1313_s4 + $0x48] sm:$0xff] %v765_v11  ;;  %782 = vst [vmem:[%s1313_s4 + $0x50] sm:$0xff] %v766_v12 }
 0x133   : > { %783 = vst [vmem:[%s1313_s4 + $0x58] sm:$0xff] %v767_v13  ;;  %v771_v18 = vmax.f32 %v755_v14, 0.0  ;;  %784 = vst [vmem:[%s1313_s4 + $0x60] sm:$0xff] %v768_v15 }
 0x134   : > { %785 = vst [vmem:[%s1313_s4 + $0x68] sm:$0xff] %v769_v16  ;;  %786 = vst [vmem:[%s1313_s4 + $0x70] sm:$0xff] %v770_v17 }
 0x135   : > { %787 = vst [vmem:[%s1313_s4 + $0x78] sm:$0xff] %v771_v18 }
 0x136 PF: > { %s14_s19 = sadd.s32 1, %s1104_s19   ;;  %s1314_s15 = smov %s1092_s16 }
 0x137   : > { %p11_p12 = scmp.ge.s32.totalorder %s14_s19, 7   ;;  %s1315_s16 = smov %s1167_s23 }
 0x138   : > { %s1316_s17 = smov %s1100_s18  ;;  %s1317_s18 = smov %s1319_s20 }
 0x139   :  { %13 = sbr.rel (!%p11_p12) target bundleno = 3 (0x3), region = 129 }

// kernel: resnet_encoder_forward.24
= control target key start
LH: loop header
LB: loop body
LE: loop exit
PB: predicated region body
PF: predicated region fallthrough
CT: control target
= control target key end

     0   :  { %s1248_s18 = smov 0   ;;  %s1250_s19 = smov 0   ;;  %s1491_s0 = inlined_call_operand.vmem [shape: bf16[128,640], index: 0, kind: input, shape index: {}]   ;;  %s1492_s1 = inlined_call_operand.vmem [shape: bf16[640,128], index: 1, kind: input, shape index: {}]   ;;  %s1493_s2 = inlined_call_operand.vmem [shape: f32[1,128], index: 2, kind: input, shape index: {}]   ;;  %s1494_s3 = inlined_call_operand.vmem [shape: f32[1,128], index: 3, kind: input, shape index: {}]   ;;  %s1495_s4 = inlined_call_operand.vmem [shape: f32[128,128], index: 4, kind: input, shape index: {}]   ;;  %s1496_s5 = inlined_call_operand.vmem [shape: f32[128,128], index: 5, kind: output, shape index: {}]  }
   0x1   :  { %s1252_s20 = smov 0   ;;  %s1254_s21 = smov 0  }
   0x2   :  { %s1256_s22 = smov 0  }
   0x3 LB: > { %s27_s23 = sadd.s32 1, %s1211_s21  ;;  %p50_p1 = scmp.ne.s32.totalorder %s1203_s19, %s1199_s18  ;;  %s1215_s22 = sphi %s1256_s22, %s15_s22   ;;  %s1211_s21 = sphi %s1254_s21, %s1500_s21   ;;  %s1207_s20 = sphi %s1252_s20, %s1499_s20   ;;  %s1203_s19 = sphi %s1250_s19, %s1498_s19   ;;  %s1199_s18 = sphi %s1248_s18, %s1497_s18  }
   0x4   : > { %p28_p0 = scmp.ge.s32.totalorder %s27_s23, 5  ;;  %p51_p2 = scmp.eq.s32.totalorder %s1215_s22, 0 }
   0x5   : > { %s43_s25 = sadd.s32 1, %s1203_s19  ;;  %p1025_p5 = scmp.ge.s32.totalorder %s1215_s22, 5 }
   0x6   : > { %s1502_s23 = smov (%p28_p0, %s27_s23), 0  ;;  %p52_p3 = por %p51_p2, %p50_p1 }
   0x7   : > { %s39_s24 = ssub.s32 %s1211_s21, %s1502_s23  ;;  %236 = sbr.rel (%p1025_p5) target bundleno = 26 (0x1a), region = 28 }
   0x8   : > { %p41_p4 = scmp.eq.s32.totalorder %s39_s24, 0 }
   0xa   : > { %s1283_s26 = scalar_select %p41_p4, %s1203_s19, %s43_s25  }
   0xc   : > { %239 = sbr.rel (!%p52_p3) target bundleno = 26 (0x1a), region = 32  ;;  %s241_s27 = sand.u32 (%p52_p3), 1, %s1203_s19  }
   0xd   : > { %s1027_s28 = sshll.u32 (%p52_p3), %s1211_s21, 2  ;;  %s1026_s29 = sshll.u32 (%p52_p3), %s241_s27, 6 }
   0xe   : > { %s1291_s7 = scalar_lea.vmem (%p52_p3), %s1491_s0, %s1027_s28  ;;  %s243_s8 = scalar_lea.vmem (%p52_p3), [#allocation3], %s1026_s29 }
   0xf   : > { %v265_v0 = vld [vmem:[%s1291_s7] sm:$0xf] (%p52_p3)  ;;  %v267_v1 = vld [vmem:[%s1291_s7 + $0x14] sm:$0xf] (%p52_p3)  ;;  %v269_v2 = vld [vmem:[%s1291_s7 + $0x28] sm:$0xf] (%p52_p3) }
  0x10   : > { %266 = vst [vmem:[%s243_s8] sm:$0xf] (%p52_p3), %v265_v0  ;;  %268 = vst [vmem:[%s243_s8 + $0x4] sm:$0xf] (%p52_p3), %v267_v1  ;;  %v271_v3 = vld [vmem:[%s1291_s7 + $0x3c] sm:$0xf] (%p52_p3) }
  0x11   : > { %v273_v4 = vld [vmem:[%s1291_s7 + $0x50] sm:$0xf]  ;;  %270 = vst [vmem:[%s243_s8 + $0x8] sm:$0xf] %v269_v2  ;;  %272 = vst [vmem:[%s243_s8 + $0xc] sm:$0xf] %v271_v3 }
  0x12   : > { %274 = vst [vmem:[%s243_s8 + $0x10] sm:$0xf] %v273_v4  ;;  %v275_v5 = vld [vmem:[%s1291_s7 + $0x64] sm:$0xf]  ;;  %v277_v6 = vld [vmem:[%s1291_s7 + $0x78] sm:$0xf] }
  0x13   : > { %v279_v7 = vld [vmem:[%s1291_s7 + $0x8c] sm:$0xf]  ;;  %276 = vst [vmem:[%s243_s8 + $0x14] sm:$0xf] %v275_v5  ;;  %278 = vst [vmem:[%s243_s8 + $0x18] sm:$0xf] %v277_v6 }
  0x14   : > { %280 = vst [vmem:[%s243_s8 + $0x1c] sm:$0xf] %v279_v7  ;;  %v281_v8 = vld [vmem:[%s1291_s7 + $0xa0] sm:$0xf]  ;;  %v283_v9 = vld [vmem:[%s1291_s7 + $0xb4] sm:$0xf] }
  0x15   : > { %v285_v10 = vld [vmem:[%s1291_s7 + $0xc8] sm:$0xf]  ;;  %282 = vst [vmem:[%s243_s8 + $0x20] sm:$0xf] %v281_v8  ;;  %284 = vst [vmem:[%s243_s8 + $0x24] sm:$0xf] %v283_v9 }
  0x16   : > { %286 = vst [vmem:[%s243_s8 + $0x28] sm:$0xf] %v285_v10  ;;  %v287_v11 = vld [vmem:[%s1291_s7 + $0xdc] sm:$0xf]  ;;  %v289_v12 = vld [vmem:[%s1291_s7 + $0xf0] sm:$0xf] }
  0x17   : > { %v291_v13 = vld [vmem:[%s1291_s7 + $0x104] sm:$0xf]  ;;  %288 = vst [vmem:[%s243_s8 + $0x2c] sm:$0xf] %v287_v11  ;;  %290 = vst [vmem:[%s243_s8 + $0x30] sm:$0xf] %v289_v12 }
  0x18   : > { %292 = vst [vmem:[%s243_s8 + $0x34] sm:$0xf] %v291_v13  ;;  %v293_v14 = vld [vmem:[%s1291_s7 + $0x118] sm:$0xf]  ;;  %v295_v15 = vld [vmem:[%s1291_s7 + $0x12c] sm:$0xf] }
  0x19   : > { %294 = vst [vmem:[%s243_s8 + $0x38] sm:$0xf] %v293_v14  ;;  %296 = vst [vmem:[%s243_s8 + $0x3c] sm:$0xf] %v295_v15 }
  0x1a PF: > { %p1028_p6 = scmp.ge.s32.totalorder %s1215_s22, 1  ;;  %p363_p7 = scmp.lt.s32.totalorder %s1215_s22, 6 }
  0x1c   : > { %p364_p8 = pnand %p1028_p6, %p363_p7 }
  0x1d   : > { %s370_s9 = sand.u32 (!%p364_p8), 1, %s1199_s18   ;;  %s1030_s10 = sshll.u32 (!%p364_p8), %s1207_s20, 4 }
  0x1e   : > { %367 = sbr.rel (%p364_p8) target bundleno = 315 (0x13b), region = 77  ;;  %s1029_s11 = sshll.u32 (!%p364_p8), %s370_s9, 6 }
  0x1f   : > { %p424_p9 = scmp.lt.s32.totalorder (!%p364_p8), %s1030_s10, 79  ;;  %s1318_s16 = scalar_lea.vmem (!%p364_p8), [#allocation3], %s1029_s11 }
  0x20   : > { %p1032_p10 = scmp.ne.s32.totalorder (!%p364_p8), %s1207_s20, 0 }
  0x23   : > { %s1504_s10 = smov (!%p424_p9, %s1030_s10), 79  ;;  %460 = sbr.rel (%p1032_p10) target bundleno = 49 (0x31), region = 85 }
  0x24   : > { %s1031_s12 = sshll.u32 %s1504_s10, 2 }
  0x25   : > { %s1316_s15 = scalar_lea.vmem %s1492_s1, %s1031_s12 }
  0x28   : > { %v1217_v16 = vmov 0.0  }
  0x29   : > { %461 = vst [vmem:[#allocation2 + $0x30] sm:$0xff] %v1217_v16  ;;  %462 = vst [vmem:[#allocation2] sm:$0xff] %v1217_v16 }
  0x2a   : > { %463 = vst [vmem:[#allocation2 + $0x58] sm:$0xff] %v1217_v16  ;;  %464 = vst [vmem:[#allocation2 + $0x18] sm:$0xff] %v1217_v16 }
  0x2b   : > { %465 = vst [vmem:[#allocation2 + $0x50] sm:$0xff] %v1217_v16  ;;  %466 = vst [vmem:[#allocation2 + $0x68] sm:$0xff] %v1217_v16 }
  0x2c   : > { %467 = vst [vmem:[#allocation2 + $0x8] sm:$0xff] %v1217_v16  ;;  %468 = vst [vmem:[#allocation2 + $0x48] sm:$0xff] %v1217_v16 }
  0x2d   : > { %469 = vst [vmem:[#allocation2 + $0x40] sm:$0xff] %v1217_v16  ;;  %470 = vst [vmem:[#allocation2 + $0x20] sm:$0xff] %v1217_v16 }
  0x2e   : > { %471 = vst [vmem:[#allocation2 + $0x10] sm:$0xff] %v1217_v16  ;;  %472 = vst [vmem:[#allocation2 + $0x38] sm:$0xff] %v1217_v16 }
  0x2f   : > { %473 = vst [vmem:[#allocation2 + $0x60] sm:$0xff] %v1217_v16  ;;  %474 = vst [vmem:[#allocation2 + $0x70] sm:$0xff] %v1217_v16 }
  0x30   : > { %475 = vst [vmem:[#allocation2 + $0x78] sm:$0xff] %v1217_v16  ;;  %476 = vst [vmem:[#allocation2 + $0x28] sm:$0xff] %v1217_v16 }
  0x31 PF: > { %v1161_v17 = vld [vmem:[%s1316_s15 + $0x38] sm:$0xff]   ;;  %v1162_v18 = vld [vmem:[%s1316_s15 + $0x30] sm:$0xff]   ;;  %v1163_v19 = vld [vmem:[%s1316_s15 + $0x28] sm:$0xff]   ;;  %p1049_p11 = scmp.ne.s32.totalorder %s1207_s20, 4 }
  0x32   : > { %1072 = vmatprep.subr.bf16.mxu0 %v1161_v17  ;;  %1104 = vmatprep.subr.bf16.mxu1 %v1161_v17  ;;  %v1164_v20 = vld [vmem:[%s1316_s15 + $0x20] sm:$0xff]   ;;  %v1165_v23 = vld [vmem:[%s1316_s15 + $0x18] sm:$0xff]   ;;  %v1166_v24 = vld [vmem:[%s1316_s15 + $0x10] sm:$0xff]  }
  0x33   : > { %1073 = vmatpush3.bf16.msra.mxu0 %v1161_v17  ;;  %1112 = vmatpush3.bf16.msra.mxu1 %v1161_v17  ;;  %v1169_v21 = vld [vmem:[%s1318_s16] sm:$0xff]   ;;  %v1167_v25 = vld [vmem:[%s1316_s15 + $0x8] sm:$0xff]   ;;  %v1173_v29 = vld [vmem:[%s1318_s16 + $0x10] sm:$0xff]  }
  0x34   : > { %1074 = vmatprep.subr.bf16.mxu0 %v1162_v18  ;;  %1105 = vmatprep.subr.bf16.mxu1 %v1162_v18  ;;  %v1170_v22 = vld [vmem:[%s1318_s16 + $0x20] sm:$0xff]   ;;  %v1171_v27 = vld [vmem:[%s1318_s16 + $0x8] sm:$0xff]   ;;  %v1174_v30 = vld [vmem:[%s1318_s16 + $0x30] sm:$0xff]  }
  0x35   : > { %1088 = vmatprep.mubr.bf16.mxu0 %v1169_v21  ;;  %1096 = vmatprep.mubr.bf16.mxu1 %v1170_v22  ;;  %v1168_v26 = vld [vmem:[%s1316_s15] sm:$0xff]   ;;  %v1172_v28 = vld [vmem:[%s1318_s16 + $0x28] sm:$0xff]   ;;  %v1175_v31 = vld [vmem:[%s1318_s16 + $0x18] sm:$0xff]  }
  0x36   : > { %v1176_v32 = vld [vmem:[%s1318_s16 + $0x38] sm:$0xff]   ;;  %v487_v34 = vld [vmem:[#allocation2 + $0x10] sm:$0xff]  ;;  %v485_v38 = vld [vmem:[#allocation2 + $0x40] sm:$0xff] }
  0x37   : > { %1075 = vmatpush3.bf16.msra.mxu0 %v1162_v18  ;;  %1113 = vmatpush3.bf16.msra.mxu1 %v1162_v18  ;;  %v479_v33 = vld [vmem:[#allocation2 + $0x58] sm:$0xff]  ;;  %v477_v37 = vld [vmem:[#allocation2 + $0x30] sm:$0xff]  ;;  %v478_v49 = vld [vmem:[#allocation2] sm:$0xff] }
  0x38   : > { %1076 = vmatprep.subr.bf16.mxu0 %v1163_v19  ;;  %1106 = vmatprep.subr.bf16.mxu1 %v1163_v19  ;;  %v480_v43 = vld [vmem:[#allocation2 + $0x18] sm:$0xff]  ;;  %v486_v50 = vld [vmem:[#allocation2 + $0x20] sm:$0xff]  ;;  %v483_v55 = vld [vmem:[#allocation2 + $0x8] sm:$0xff] }
  0x39   : > { %v488_v44 = vld [vmem:[#allocation2 + $0x38] sm:$0xff]  ;;  %v481_v61 = vld [vmem:[#allocation2 + $0x50] sm:$0xff]  ;;  %v489_v62 = vld [vmem:[#allocation2 + $0x60] sm:$0xff] }
  0x3a   : > { %v491_v56 = vld [vmem:[#allocation2 + $0x78] sm:$0xff]  ;;  %v484_v3 = vld [vmem:[#allocation2 + $0x48] sm:$0xff]  ;;  %v490_v10 = vld [vmem:[#allocation2 + $0x70] sm:$0xff] }
  0x3b   : > { %1077 = vmatpush3.bf16.msra.mxu0 %v1163_v19  ;;  %1114 = vmatpush3.bf16.msra.mxu1 %v1163_v19  ;;  %v492_v4 = vld [vmem:[#allocation2 + $0x28] sm:$0xff] }
  0x3c   : > { %1078 = vmatprep.subr.bf16.mxu0 %v1164_v20  ;;  %1107 = vmatprep.subr.bf16.mxu1 %v1164_v20  ;;  %v482_v9 = vld [vmem:[#allocation2 + $0x68] sm:$0xff] }
  0x3f   : > { %1079 = vmatpush3.bf16.msra.mxu0 %v1164_v20  ;;  %1115 = vmatpush3.bf16.msra.mxu1 %v1164_v20 }
  0x40   : > { %1080 = vmatprep.subr.bf16.mxu0 %v1165_v23  ;;  %1108 = vmatprep.subr.bf16.mxu1 %v1165_v23 }
  0x43   : > { %1081 = vmatpush3.bf16.msra.mxu0 %v1165_v23  ;;  %1116 = vmatpush3.bf16.msra.mxu1 %v1165_v23 }
  0x44   : > { %1082 = vmatprep.subr.bf16.mxu0 %v1166_v24  ;;  %1109 = vmatprep.subr.bf16.mxu1 %v1166_v24 }
  0x47   : > { %1083 = vmatpush3.bf16.msra.mxu0 %v1166_v24  ;;  %1117 = vmatpush3.bf16.msra.mxu1 %v1166_v24 }
  0x48   : > { %1084 = vmatprep.subr.bf16.mxu0 %v1167_v25  ;;  %1110 = vmatprep.subr.bf16.mxu1 %v1167_v25 }
  0x4b   : > { %1085 = vmatpush3.bf16.msra.mxu0 %v1167_v25  ;;  %1118 = vmatpush3.bf16.msra.mxu1 %v1167_v25 }
  0x4c   : > { %1086 = vmatprep.subr.bf16.mxu0 %v1168_v26  ;;  %1111 = vmatprep.subr.bf16.mxu1 %v1168_v26 }
  0x4f   : > { %1087 = vmatpush3.bf16.msra.mxu0 %v1168_v26  ;;  %1119 = vmatpush3.bf16.msra.mxu1 %v1168_v26 }
  0x52   : > { %1089 = vmatmul.mubr.bf16.vlgmr.msra.gmra.mxu0 %v1171_v27  ;;  %1097 = vmatmul.mubr.bf16.vlgmr.msra.gmra.mxu1 %v1172_v28 }
  0x53   : > { %1092 = vmatprep.mubr.bf16.mxu0 %v1173_v29  ;;  %1100 = vmatprep.mubr.bf16.mxu1 %v1174_v30 }
  0x5a   : > { %1093 = vmatmul.mubr.bf16.gmra.mxu0 %v1175_v31  ;;  %1101 = vmatmul.mubr.bf16.gmra.mxu1 %v1176_v32 }
 0x112   : > { %v1090_v35 = vpop.f32.mrf.mxu0  ;;  %v1098_v36 = vpop.f32.mrf.mxu1 }
 0x113   : > { %v720_v39 = vadd.f32 %v1090_v35, %v479_v33  ;;  %v728_v40 = vadd.f32 %v1098_v36, %v487_v34 }
 0x114   : > { %v655_v41 = vpop.f32.mrf.mxu0  ;;  %v687_v42 = vpop.f32.mrf.mxu1 }
 0x115   : > { %736 = vst [vmem:[#allocation2 + $0x58] sm:$0xff] %v720_v39  ;;  %744 = vst [vmem:[#allocation2 + $0x10] sm:$0xff] %v728_v40  ;;  %v718_v45 = vadd.f32 %v655_v41, %v477_v37  ;;  %v726_v46 = vadd.f32 %v687_v42, %v485_v38 }
 0x116   : > { %v1091_v47 = vpop.f32.mrf.mxu0  ;;  %v1099_v48 = vpop.f32.mrf.mxu1 }
 0x117   : > { %734 = vst [vmem:[#allocation2 + $0x30] sm:$0xff] %v718_v45  ;;  %742 = vst [vmem:[#allocation2 + $0x40] sm:$0xff] %v726_v46  ;;  %v721_v51 = vadd.f32 %v1091_v47, %v480_v43  ;;  %v729_v52 = vadd.f32 %v1099_v48, %v488_v44 }
 0x118   : > { %v658_v53 = vpop.f32.mrf.mxu0  ;;  %v690_v54 = vpop.f32.mrf.mxu1 }
 0x119   : > { %737 = vst [vmem:[#allocation2 + $0x18] sm:$0xff] %v721_v51  ;;  %745 = vst [vmem:[#allocation2 + $0x38] sm:$0xff] %v729_v52  ;;  %v719_v57 = vadd.f32 %v658_v53, %v478_v49  ;;  %v727_v58 = vadd.f32 %v690_v54, %v486_v50 }
 0x11a   : > { %v1094_v59 = vpop.f32.mrf.mxu0  ;;  %v1102_v60 = vpop.f32.mrf.mxu1 }
 0x11b   : > { %735 = vst [vmem:[#allocation2] sm:$0xff] %v719_v57  ;;  %743 = vst [vmem:[#allocation2 + $0x20] sm:$0xff] %v727_v58  ;;  %v724_v63 = vadd.f32 %v1094_v59, %v483_v55  ;;  %v732_v0 = vadd.f32 %v1102_v60, %v491_v56 }
 0x11c   : > { %v671_v1 = vpop.f32.mrf.mxu0  ;;  %v703_v2 = vpop.f32.mrf.mxu1 }
 0x11d   : > { %740 = vst [vmem:[#allocation2 + $0x8] sm:$0xff] %v724_v63  ;;  %748 = vst [vmem:[#allocation2 + $0x78] sm:$0xff] %v732_v0  ;;  %v722_v5 = vadd.f32 %v671_v1, %v481_v61  ;;  %v730_v6 = vadd.f32 %v703_v2, %v489_v62 }
 0x11e   : > { %v1095_v7 = vpop.f32.mrf.mxu0  ;;  %v1103_v8 = vpop.f32.mrf.mxu1 }
 0x11f   : > { %738 = vst [vmem:[#allocation2 + $0x50] sm:$0xff] %v722_v5  ;;  %746 = vst [vmem:[#allocation2 + $0x60] sm:$0xff] %v730_v6  ;;  %v725_v11 = vadd.f32 %v1095_v7, %v484_v3  ;;  %v733_v12 = vadd.f32 %v1103_v8, %v492_v4  ;;  %753 = sbr.rel (%p1049_p11) target bundleno = 315 (0x13b), region = 89 }
 0x120   : > { %v674_v13 = vpop.f32.mrf.mxu0  ;;  %v706_v14 = vpop.f32.mrf.mxu1 }
 0x121   : > { %741 = vst [vmem:[#allocation2 + $0x48] sm:$0xff] %v725_v11  ;;  %749 = vst [vmem:[#allocation2 + $0x28] sm:$0xff] %v733_v12  ;;  %v723_v15 = vadd.f32 %v674_v13, %v482_v9  ;;  %v731_v16 = vadd.f32 %v706_v14, %v490_v10 }
 0x123   : > { %739 = vst [vmem:[#allocation2 + $0x68] sm:$0xff] %v723_v15  ;;  %747 = vst [vmem:[#allocation2 + $0x70] sm:$0xff] %v731_v16 }
 0x124   : > { %v754_v17 = vld [vmem:[#allocation2 + $0x30] sm:$0xff]  ;;  %v1341_v18 = vld [vmem:[%s1493_s2] ss:$0 sm:$0xff]  ;;  %v756_v24 = vld [vmem:[#allocation2 + $0x58] sm:$0xff] }
 0x125   : > { %v1346_v19 = vld [vmem:[%s1494_s3] ss:$0 sm:$0xff]  ;;  %v777_v20 = vmul.f32 %v1341_v18, %v754_v17  ;;  %v757_v25 = vld [vmem:[#allocation2 + $0x18] sm:$0xff]  ;;  %v817_v27 = vld [vmem:[%s1495_s4 + $0x8] sm:$0xff]  ;;  %v779_v28 = vmul.f32 %v1341_v18, %v756_v24 }
 0x126   : > { %v755_v21 = vld [vmem:[#allocation2] sm:$0xff]  ;;  %v818_v29 = vld [vmem:[%s1495_s4 + $0x10] sm:$0xff]  ;;  %v780_v30 = vmul.f32 %v1341_v18, %v757_v25  ;;  %v819_v33 = vld [vmem:[%s1495_s4 + $0x18] sm:$0xff] }
 0x127   : > { %v816_v22 = vld [vmem:[%s1495_s4] sm:$0xff]  ;;  %v778_v23 = vmul.f32 %v1341_v18, %v755_v21  ;;  %v800_v26 = vadd.f32 %v1346_v19, %v777_v20  ;;  %v758_v31 = vld [vmem:[#allocation2 + $0x50] sm:$0xff]  ;;  %v760_v36 = vld [vmem:[#allocation2 + $0x8] sm:$0xff]  ;;  %v802_v38 = vadd.f32 %v1346_v19, %v779_v28 }
 0x128   : > { %v781_v34 = vmul.f32 %v1341_v18, %v758_v31  ;;  %v803_v39 = vadd.f32 %v1346_v19, %v780_v30  ;;  %v820_v40 = vld [vmem:[%s1495_s4 + $0x20] sm:$0xff]  ;;  %v761_v42 = vld [vmem:[#allocation2 + $0x48] sm:$0xff]  ;;  %v783_v46 = vmul.f32 %v1341_v18, %v760_v36  ;;  %v822_v53 = vld [vmem:[%s1495_s4 + $0x30] sm:$0xff] }
 0x129   : > { %v801_v32 = vadd.f32 %v1346_v19, %v778_v23  ;;  %v832_v37 = vadd.f32 %v816_v22, %v800_v26  ;;  %v821_v45 = vld [vmem:[%s1495_s4 + $0x28] sm:$0xff]  ;;  %v784_v47 = vmul.f32 %v1341_v18, %v761_v42  ;;  %v762_v48 = vld [vmem:[#allocation2 + $0x40] sm:$0xff]  ;;  %v834_v50 = vadd.f32 %v818_v29, %v802_v38  ;;  %v823_v54 = vld [vmem:[%s1495_s4 + $0x38] sm:$0xff] }
 0x12a   : > { %v759_v35 = vld [vmem:[#allocation2 + $0x68] sm:$0xff]  ;;  %v804_v44 = vadd.f32 %v1346_v19, %v781_v34  ;;  %v835_v51 = vadd.f32 %v819_v33, %v803_v39  ;;  %v763_v55 = vld [vmem:[#allocation2 + $0x20] sm:$0xff]  ;;  %v806_v58 = vadd.f32 %v1346_v19, %v783_v46  ;;  %v764_v60 = vld [vmem:[#allocation2 + $0x10] sm:$0xff]  ;;  %v785_v1 = vmul.f32 %v1341_v18, %v762_v48 }
 0x12b   : > { %v782_v41 = vmul.f32 %v1341_v18, %v759_v35  ;;  %v833_v43 = vadd.f32 %v817_v27, %v801_v32  ;;  %v848_v49 = vmax.f32 %v832_v37, 0.0  ;;  %v807_v59 = vadd.f32 %v1346_v19, %v784_v47  ;;  %v765_v61 = vld [vmem:[#allocation2 + $0x38] sm:$0xff]  ;;  %v766_v2 = vld [vmem:[#allocation2 + $0x60] sm:$0xff]  ;;  %v767_v8 = vld [vmem:[#allocation2 + $0x70] sm:$0xff] }
 0x12c   : > { %v836_v57 = vadd.f32 %v820_v40, %v804_v44  ;;  %v850_v62 = vmax.f32 %v834_v50, 0.0  ;;  %v851_v63 = vmax.f32 %v835_v51, 0.0  ;;  %v838_v4 = vadd.f32 %v822_v53, %v806_v58  ;;  %v824_v6 = vld [vmem:[%s1495_s4 + $0x40] sm:$0xff]  ;;  %v825_v11 = vld [vmem:[%s1495_s4 + $0x48] sm:$0xff]  ;;  %v768_v14 = vld [vmem:[#allocation2 + $0x78] sm:$0xff] }
 0x12d   : > { %v805_v52 = vadd.f32 %v1346_v19, %v782_v41  ;;  %v849_v56 = vmax.f32 %v833_v43, 0.0  ;;  %864 = vst [vmem:[%s1496_s5] sm:$0xff] %v848_v49  ;;  %v839_v5 = vadd.f32 %v823_v54, %v807_v59  ;;  %v786_v7 = vmul.f32 %v1341_v18, %v763_v55  ;;  %v769_v15 = vld [vmem:[#allocation2 + $0x28] sm:$0xff]  ;;  %v826_v21 = vld [vmem:[%s1495_s4 + $0x50] sm:$0xff]  ;;  %v827_v22 = vld [vmem:[%s1495_s4 + $0x58] sm:$0xff] }
 0x12e   : > { %v852_v3 = vmax.f32 %v836_v57, 0.0  ;;  %866 = vst [vmem:[%s1496_s5 + $0x10] sm:$0xff] %v850_v62  ;;  %867 = vst [vmem:[%s1496_s5 + $0x18] sm:$0xff] %v851_v63  ;;  %v808_v10 = vadd.f32 %v1346_v19, %v785_v1  ;;  %v787_v12 = vmul.f32 %v1341_v18, %v764_v60  ;;  %v788_v13 = vmul.f32 %v1341_v18, %v765_v61  ;;  %v828_v27 = vld [vmem:[%s1495_s4 + $0x60] sm:$0xff]  ;;  %v829_v31 = vld [vmem:[%s1495_s4 + $0x68] sm:$0xff] }
 0x12f   : > { %v837_v0 = vadd.f32 %v821_v45, %v805_v52  ;;  %865 = vst [vmem:[%s1496_s5 + $0x8] sm:$0xff] %v849_v56  ;;  %v854_v16 = vmax.f32 %v838_v4, 0.0  ;;  %v855_v17 = vmax.f32 %v839_v5, 0.0  ;;  %v809_v20 = vadd.f32 %v1346_v19, %v786_v7  ;;  %v830_v38 = vld [vmem:[%s1495_s4 + $0x70] sm:$0xff]  ;;  %v831_v39 = vld [vmem:[%s1495_s4 + $0x78] sm:$0xff] }
 0x130   : > { %868 = vst [vmem:[%s1496_s5 + $0x20] sm:$0xff] %v852_v3  ;;  %v789_v23 = vmul.f32 %v1341_v18, %v766_v2  ;;  %v840_v24 = vadd.f32 %v824_v6, %v808_v10  ;;  %v810_v25 = vadd.f32 %v1346_v19, %v787_v12  ;;  %v811_v26 = vadd.f32 %v1346_v19, %v788_v13 }
 0x131   : > { %v853_v9 = vmax.f32 %v837_v0, 0.0  ;;  %v790_v28 = vmul.f32 %v1341_v18, %v767_v8  ;;  %870 = vst [vmem:[%s1496_s5 + $0x30] sm:$0xff] %v854_v16  ;;  %871 = vst [vmem:[%s1496_s5 + $0x38] sm:$0xff] %v855_v17  ;;  %v841_v29 = vadd.f32 %v825_v11, %v809_v20  ;;  %v791_v32 = vmul.f32 %v1341_v18, %v768_v14 }
 0x132   : > { %v812_v30 = vadd.f32 %v1346_v19, %v789_v23  ;;  %v792_v33 = vmul.f32 %v1341_v18, %v769_v15  ;;  %v856_v34 = vmax.f32 %v840_v24, 0.0  ;;  %v842_v35 = vadd.f32 %v826_v21, %v810_v25 }
 0x133   : > { %869 = vst [vmem:[%s1496_s5 + $0x28] sm:$0xff] %v853_v9  ;;  %v843_v36 = vadd.f32 %v827_v22, %v811_v26  ;;  %v813_v37 = vadd.f32 %v1346_v19, %v790_v28  ;;  %v857_v40 = vmax.f32 %v841_v29, 0.0  ;;  %v814_v42 = vadd.f32 %v1346_v19, %v791_v32 }
 0x134   : > { %v844_v41 = vadd.f32 %v828_v27, %v812_v30  ;;  %v815_v43 = vadd.f32 %v1346_v19, %v792_v33  ;;  %872 = vst [vmem:[%s1496_s5 + $0x40] sm:$0xff] %v856_v34  ;;  %v858_v18 = vmax.f32 %v842_v35, 0.0 }
 0x135   : > { %v859_v44 = vmax.f32 %v843_v36, 0.0  ;;  %v845_v45 = vadd.f32 %v829_v31, %v813_v37  ;;  %873 = vst [vmem:[%s1496_s5 + $0x48] sm:$0xff] %v857_v40  ;;  %v846_v47 = vadd.f32 %v830_v38, %v814_v42 }
 0x136   : > { %v860_v46 = vmax.f32 %v844_v41, 0.0  ;;  %v847_v48 = vadd.f32 %v831_v39, %v815_v43  ;;  %874 = vst [vmem:[%s1496_s5 + $0x50] sm:$0xff] %v858_v18 }
 0x137   : > { %875 = vst [vmem:[%s1496_s5 + $0x58] sm:$0xff] %v859_v44  ;;  %v861_v19 = vmax.f32 %v845_v45, 0.0  ;;  %v862_v49 = vmax.f32 %v846_v47, 0.0 }
 0x138   : > { %876 = vst [vmem:[%s1496_s5 + $0x60] sm:$0xff] %v860_v46  ;;  %v863_v50 = vmax.f32 %v847_v48, 0.0 }
 0x139   : > { %877 = vst [vmem:[%s1496_s5 + $0x68] sm:$0xff] %v861_v19  ;;  %878 = vst [vmem:[%s1496_s5 + $0x70] sm:$0xff] %v862_v49 }
 0x13a   : > { %879 = vst [vmem:[%s1496_s5 + $0x78] sm:$0xff] %v863_v50 }
 0x13b PF: > { %s15_s22 = sadd.s32 1, %s1215_s22   ;;  %s1497_s18 = smov %s1203_s19 }
 0x13c   : > { %p12_p12 = scmp.ge.s32.totalorder %s15_s22, 7   ;;  %s1498_s19 = smov %s1283_s26 }
 0x13d   : > { %s1499_s20 = smov %s1211_s21  ;;  %s1500_s21 = smov %s1502_s23 }
 0x13e   :  { %14 = sbr.rel (!%p12_p12) target bundleno = 3 (0x3), region = 136 }

// kernel: resnet_encoder_forward.27
= control target key start
LH: loop header
LB: loop body
LE: loop exit
PB: predicated region body
PF: predicated region fallthrough
CT: control target
= control target key end

     0   :  { %s834_s15 = smov 0   ;;  %s836_s16 = smov 0   ;;  %s936_s0 = inlined_call_operand.vmem [shape: bf16[32,640], index: 0, kind: input, shape index: {}]   ;;  %s937_s1 = inlined_call_operand.vmem [shape: bf16[640,128], index: 1, kind: input, shape index: {}]   ;;  %s938_s2 = inlined_call_operand.vmem [shape: f32[1,128], index: 2, kind: input, shape index: {}]   ;;  %s939_s3 = inlined_call_operand.vmem [shape: f32[1,128], index: 3, kind: input, shape index: {}]   ;;  %s940_s4 = inlined_call_operand.vmem [shape: f32[32,128], index: 4, kind: output, shape index: {}]  }
   0x1   :  { %s838_s17 = smov 0   ;;  %s840_s18 = smov 0  }
   0x2   :  { %s842_s19 = smov 0  }
   0x3 LB: > { %s26_s20 = sadd.s32 1, %s802_s18  ;;  %p49_p1 = scmp.ne.s32.totalorder %s794_s16, %s790_s15  ;;  %s806_s19 = sphi %s842_s19, %s14_s19   ;;  %s802_s18 = sphi %s840_s18, %s944_s18   ;;  %s798_s17 = sphi %s838_s17, %s943_s17   ;;  %s794_s16 = sphi %s836_s16, %s942_s16   ;;  %s790_s15 = sphi %s834_s15, %s941_s15  }
   0x4   : > { %p27_p0 = scmp.ge.s32.totalorder %s26_s20, 5  ;;  %p50_p2 = scmp.eq.s32.totalorder %s806_s19, 0 }
   0x5   : > { %s42_s22 = sadd.s32 1, %s794_s16  ;;  %p662_p5 = scmp.ge.s32.totalorder %s806_s19, 5 }
   0x6   : > { %s946_s20 = smov (%p27_p0, %s26_s20), 0  ;;  %p51_p3 = por %p50_p2, %p49_p1 }
   0x7   : > { %s38_s21 = ssub.s32 %s802_s18, %s946_s20  ;;  %195 = sbr.rel (%p662_p5) target bundleno = 18 (0x12), region = 24 }
   0x8   : > { %p40_p4 = scmp.eq.s32.totalorder %s38_s21, 0 }
   0xa   : > { %s869_s23 = scalar_select %p40_p4, %s794_s16, %s42_s22  }
   0xc   : > { %198 = sbr.rel (!%p51_p3) target bundleno = 18 (0x12), region = 28  ;;  %s200_s24 = sand.u32 (%p51_p3), 1, %s794_s16  }
   0xd   : > { %s664_s25 = sshll.u32 (%p51_p3), %s802_s18, 2  ;;  %s663_s26 = sshll.u32 (%p51_p3), %s200_s24, 4 }
   0xe   : > { %s207_s29 = scalar_lea.vmem (%p51_p3), %s936_s0, %s664_s25  ;;  %s202_s30 = scalar_lea.vmem (%p51_p3), [#allocation3], %s663_s26 }
   0xf   : > { %v224_v0 = vld [vmem:[%s207_s29] sm:$0xf] (%p51_p3)  ;;  %v226_v1 = vld [vmem:[%s207_s29 + $0x14] sm:$0xf] (%p51_p3)  ;;  %v228_v2 = vld [vmem:[%s207_s29 + $0x28] sm:$0xf] (%p51_p3) }
  0x10   : > { %225 = vst [vmem:[%s202_s30] sm:$0xf] (%p51_p3), %v224_v0  ;;  %227 = vst [vmem:[%s202_s30 + $0x4] sm:$0xf] (%p51_p3), %v226_v1  ;;  %v230_v3 = vld [vmem:[%s207_s29 + $0x3c] sm:$0xf] (%p51_p3) }
  0x11   : > { %229 = vst [vmem:[%s202_s30 + $0x8] sm:$0xf] %v228_v2  ;;  %231 = vst [vmem:[%s202_s30 + $0xc] sm:$0xf] %v230_v3 }
  0x12 PF: > { %p665_p6 = scmp.ge.s32.totalorder %s806_s19, 1  ;;  %p274_p7 = scmp.lt.s32.totalorder %s806_s19, 6 }
  0x14   : > { %p275_p8 = pnand %p665_p6, %p274_p7 }
  0x15   : > { %s281_s5 = sand.u32 (!%p275_p8), 1, %s790_s15   ;;  %s667_s6 = sshll.u32 (!%p275_p8), %s798_s17, 4 }
  0x16   : > { %278 = sbr.rel (%p275_p8) target bundleno = 284 (0x11c), region = 73  ;;  %s881_s7 = sshll.u32 (!%p275_p8), %s281_s5, 4 }
  0x17   : > { %p325_p9 = scmp.lt.s32.totalorder (!%p275_p8), %s667_s6, 79  ;;  %s283_s12 = scalar_lea.vmem (!%p275_p8), [#allocation3], %s881_s7 }
  0x18   : > { %p669_p10 = scmp.ne.s32.totalorder (!%p275_p8), %s798_s17, 0 }
  0x1b   : > { %s948_s6 = smov (!%p325_p9, %s667_s6), 79  ;;  %352 = sbr.rel (%p669_p10) target bundleno = 35 (0x23), region = 81 }
  0x1c   : > { %s668_s8 = sshll.u32 %s948_s6, 2 }
  0x1d   : > { %s886_s11 = scalar_lea.vmem %s937_s1, %s668_s8 }
  0x20   : > { %v808_v4 = vmov 0.0  }
  0x21   : > { %353 = vst [vmem:[#allocation2 + $0x10] sm:$0xff] %v808_v4  ;;  %354 = vst [vmem:[#allocation2] sm:$0xff] %v808_v4 }
  0x22   : > { %355 = vst [vmem:[#allocation2 + $0x18] sm:$0xff] %v808_v4  ;;  %356 = vst [vmem:[#allocation2 + $0x8] sm:$0xff] %v808_v4 }
  0x23 PF: > { %v758_v5 = vld [vmem:[%s886_s11 + $0x38] sm:$0xff]   ;;  %v759_v6 = vld [vmem:[%s886_s11 + $0x30] sm:$0xff]   ;;  %v760_v7 = vld [vmem:[%s886_s11 + $0x28] sm:$0xff]   ;;  %p680_p11 = scmp.ne.s32.totalorder %s798_s17, 4 }
  0x24   : > { %697 = vmatprep.subr.bf16.mxu0 %v758_v5  ;;  %v761_v8 = vld [vmem:[%s886_s11 + $0x20] sm:$0xff]   ;;  %v762_v10 = vld [vmem:[%s886_s11 + $0x18] sm:$0xff]   ;;  %v763_v11 = vld [vmem:[%s886_s11 + $0x10] sm:$0xff]  }
  0x25   : > { %698 = vmatpush3.bf16.msra.mxu0 %v758_v5  ;;  %v766_v9 = vld [vmem:[%s283_s12] sm:$0xff]   ;;  %v764_v12 = vld [vmem:[%s886_s11 + $0x8] sm:$0xff]  }
  0x26   : > { %699 = vmatprep.subr.bf16.mxu0 %v759_v6  ;;  %713 = vmatprep.mubr.bf16.mxu0 %v766_v9  ;;  %v765_v13 = vld [vmem:[%s886_s11] sm:$0xff]   ;;  %v767_v14 = vld [vmem:[%s283_s12 + $0x8] sm:$0xff]  }
  0x28   : > { %v357_v17 = vld [vmem:[#allocation2 + $0x10] sm:$0xff]  ;;  %v358_v23 = vld [vmem:[#allocation2] sm:$0xff] }
  0x29   : > { %700 = vmatpush3.bf16.msra.mxu0 %v759_v6  ;;  %v359_v15 = vld [vmem:[#allocation2 + $0x18] sm:$0xff]  ;;  %v360_v20 = vld [vmem:[#allocation2 + $0x8] sm:$0xff] }
  0x2a   : > { %701 = vmatprep.subr.bf16.mxu0 %v760_v7 }
  0x2d   : > { %702 = vmatpush3.bf16.msra.mxu0 %v760_v7 }
  0x2e   : > { %703 = vmatprep.subr.bf16.mxu0 %v761_v8 }
  0x31   : > { %704 = vmatpush3.bf16.msra.mxu0 %v761_v8 }
  0x32   : > { %705 = vmatprep.subr.bf16.mxu0 %v762_v10 }
  0x35   : > { %706 = vmatpush3.bf16.msra.mxu0 %v762_v10 }
  0x36   : > { %707 = vmatprep.subr.bf16.mxu0 %v763_v11 }
  0x39   : > { %708 = vmatpush3.bf16.msra.mxu0 %v763_v11 }
  0x3a   : > { %709 = vmatprep.subr.bf16.mxu0 %v764_v12 }
  0x3d   : > { %710 = vmatpush3.bf16.msra.mxu0 %v764_v12 }
  0x3e   : > { %711 = vmatprep.subr.bf16.mxu0 %v765_v13 }
  0x41   : > { %712 = vmatpush3.bf16.msra.mxu0 %v765_v13 }
  0x44   : > { %714 = vmatmul.mubr.bf16.vlgmr.msra.gmra.mxu0 %v767_v14 }
 0x104   : > { %v715_v16 = vpop.f32.mrf.mxu0 }
 0x105   : > { %v492_v18 = vadd.f32 %v715_v16, %v359_v15 }
 0x106   : > { %v475_v19 = vpop.f32.mrf.mxu0 }
 0x107   : > { %496 = vst [vmem:[#allocation2 + $0x18] sm:$0xff] %v492_v18  ;;  %v490_v21 = vadd.f32 %v475_v19, %v357_v17 }
 0x108   : > { %v716_v22 = vpop.f32.mrf.mxu0 }
 0x109   : > { %494 = vst [vmem:[#allocation2 + $0x10] sm:$0xff] %v490_v21  ;;  %v493_v24 = vadd.f32 %v716_v22, %v360_v20  ;;  %501 = sbr.rel (%p680_p11) target bundleno = 284 (0x11c), region = 85 }
 0x10a   : > { %v478_v25 = vpop.f32.mrf.mxu0 }
 0x10b   : > { %497 = vst [vmem:[#allocation2 + $0x8] sm:$0xff] %v493_v24  ;;  %v491_v26 = vadd.f32 %v478_v25, %v358_v23 }
 0x10d   : > { %495 = vst [vmem:[#allocation2] sm:$0xff] %v491_v26 }
 0x10e   : > { %v681_v28 = vld [vmem:[%s938_s2] ss:$0 sm:$0xff]  ;;  %v504_v32 = vld [vmem:[#allocation2 + $0x18] sm:$0xff] }
 0x10f   : > { %v682_v29 = vld [vmem:[%s939_s3] ss:$0 sm:$0xff]  ;;  %v515_v35 = vmul.f32 %v681_v28, %v504_v32 }
 0x110   : > { %v502_v27 = vld [vmem:[#allocation2 + $0x10] sm:$0xff] }
 0x111   : > { %v513_v30 = vmul.f32 %v681_v28, %v502_v27  ;;  %v526_v39 = vadd.f32 %v682_v29, %v515_v35 }
 0x112   : > { %v505_v33 = vld [vmem:[#allocation2 + $0x8] sm:$0xff] }
 0x113   : > { %v516_v36 = vmul.f32 %v681_v28, %v505_v33  ;;  %v524_v37 = vadd.f32 %v682_v29, %v513_v30  ;;  %v530_v43 = vmax.f32 %v526_v39, 0.0 }
 0x114   : > { %v503_v31 = vld [vmem:[#allocation2] sm:$0xff] }
 0x115   : > { %v514_v34 = vmul.f32 %v681_v28, %v503_v31  ;;  %v527_v40 = vadd.f32 %v682_v29, %v516_v36  ;;  %v528_v41 = vmax.f32 %v524_v37, 0.0  ;;  %534 = vst [vmem:[%s940_s4 + $0x10] sm:$0xff] %v530_v43 }
 0x117   : > { %v525_v38 = vadd.f32 %v682_v29, %v514_v34  ;;  %v531_v44 = vmax.f32 %v527_v40, 0.0  ;;  %532 = vst [vmem:[%s940_s4] sm:$0xff] %v528_v41 }
 0x119   : > { %v529_v42 = vmax.f32 %v525_v38, 0.0  ;;  %535 = vst [vmem:[%s940_s4 + $0x18] sm:$0xff] %v531_v44 }
 0x11b   : > { %533 = vst [vmem:[%s940_s4 + $0x8] sm:$0xff] %v529_v42 }
 0x11c PF: > { %s14_s19 = sadd.s32 1, %s806_s19   ;;  %s941_s15 = smov %s794_s16 }
 0x11d   : > { %p11_p12 = scmp.ge.s32.totalorder %s14_s19, 7   ;;  %s942_s16 = smov %s869_s23 }
 0x11e   : > { %s943_s17 = smov %s802_s18  ;;  %s944_s18 = smov %s946_s20 }
 0x11f   :  { %13 = sbr.rel (!%p11_p12) target bundleno = 3 (0x3), region = 129 }

// kernel: resnet_encoder_forward.28
= control target key start
LH: loop header
LB: loop body
LE: loop exit
PB: predicated region body
PF: predicated region fallthrough
CT: control target
= control target key end

     0   :  { %s329_s1 = inlined_call_operand.vmem [shape: bf16[128,128], index: 1, kind: input, shape index: {}]   ;;  %s330_s0 = inlined_call_operand.vmem [shape: bf16[32,128], index: 0, kind: input, shape index: {}]   ;;  %s331_s2 = inlined_call_operand.vmem [shape: f32[1,128], index: 2, kind: input, shape index: {}]   ;;  %s332_s3 = inlined_call_operand.vmem [shape: f32[1,128], index: 3, kind: input, shape index: {}]   ;;  %s333_s4 = inlined_call_operand.vmem [shape: f32[32,128], index: 4, kind: output, shape index: {}]  }
   0x1   :  { %v246_v0 = vld [vmem:[%s329_s1 + $0x38] sm:$0xff]   ;;  %v247_v1 = vld [vmem:[%s329_s1 + $0x30] sm:$0xff]   ;;  %v248_v2 = vld [vmem:[%s329_s1 + $0x28] sm:$0xff]  }
   0x2   :  { %226 = vmatprep.subr.bf16.mxu0 %v246_v0  ;;  %v249_v3 = vld [vmem:[%s329_s1 + $0x20] sm:$0xff]   ;;  %v250_v5 = vld [vmem:[%s329_s1 + $0x18] sm:$0xff]   ;;  %v251_v6 = vld [vmem:[%s329_s1 + $0x10] sm:$0xff]  }
   0x3   :  { %227 = vmatpush3.bf16.msra.mxu0 %v246_v0  ;;  %v254_v4 = vld [vmem:[%s330_s0] sm:$0xff]   ;;  %v252_v7 = vld [vmem:[%s329_s1 + $0x8] sm:$0xff]  }
   0x4   :  { %228 = vmatprep.subr.bf16.mxu0 %v247_v1  ;;  %242 = vmatprep.mubr.bf16.mxu0 %v254_v4  ;;  %v253_v8 = vld [vmem:[%s329_s1] sm:$0xff]   ;;  %v255_v9 = vld [vmem:[%s330_s0 + $0x8] sm:$0xff]  }
   0x5   :  { %v214_v10 = vld [vmem:[%s331_s2] ss:$0 sm:$0xff] }
   0x6   :  { %v215_v12 = vld [vmem:[%s332_s3] ss:$0 sm:$0xff] }
   0x7   :  { %229 = vmatpush3.bf16.msra.mxu0 %v247_v1 }
   0x8   :  { %230 = vmatprep.subr.bf16.mxu0 %v248_v2 }
   0xb   :  { %231 = vmatpush3.bf16.msra.mxu0 %v248_v2 }
   0xc   :  { %232 = vmatprep.subr.bf16.mxu0 %v249_v3 }
   0xf   :  { %233 = vmatpush3.bf16.msra.mxu0 %v249_v3 }
  0x10   :  { %234 = vmatprep.subr.bf16.mxu0 %v250_v5 }
  0x13   :  { %235 = vmatpush3.bf16.msra.mxu0 %v250_v5 }
  0x14   :  { %236 = vmatprep.subr.bf16.mxu0 %v251_v6 }
  0x17   :  { %237 = vmatpush3.bf16.msra.mxu0 %v251_v6 }
  0x18   :  { %238 = vmatprep.subr.bf16.mxu0 %v252_v7 }
  0x1b   :  { %239 = vmatpush3.bf16.msra.mxu0 %v252_v7 }
  0x1c   :  { %240 = vmatprep.subr.bf16.mxu0 %v253_v8 }
  0x1f   :  { %241 = vmatpush3.bf16.msra.mxu0 %v253_v8 }
  0x22   :  { %243 = vmatmul.mubr.bf16.vlgmr.msra.gmra.mxu0 %v255_v9 }
  0xe2   :  { %v244_v11 = vpop.f32.mrf.mxu0 }
  0xe3   :  { %v183_v13 = vmul.f32 %v244_v11, %v214_v10 }
  0xe4   :  { %v144_v14 = vpop.f32.mrf.mxu0 }
  0xe5   :  { %v194_v15 = vadd.f32 %v215_v12, %v183_v13  ;;  %v181_v16 = vmul.f32 %v214_v10, %v144_v14 }
  0xe6   :  { %v245_v17 = vpop.f32.mrf.mxu0 }
  0xe7   :  { %198 = vst [vmem:[%s333_s4 + $0x10] sm:$0xff] %v194_v15  ;;  %v192_v18 = vadd.f32 %v215_v12, %v181_v16  ;;  %v184_v19 = vmul.f32 %v245_v17, %v214_v10 }
  0xe8   :  { %v147_v20 = vpop.f32.mrf.mxu0 }
  0xe9   :  { %196 = vst [vmem:[%s333_s4] sm:$0xff] %v192_v18  ;;  %v195_v21 = vadd.f32 %v215_v12, %v184_v19  ;;  %v182_v22 = vmul.f32 %v214_v10, %v147_v20 }
  0xeb   :  { %199 = vst [vmem:[%s333_s4 + $0x18] sm:$0xff] %v195_v21  ;;  %v193_v23 = vadd.f32 %v215_v12, %v182_v22 }
  0xed   :  { %197 = vst [vmem:[%s333_s4 + $0x8] sm:$0xff] %v193_v23 }

// kernel: resnet_encoder_forward.29
= control target key start
LH: loop header
LB: loop body
LE: loop exit
PB: predicated region body
PF: predicated region fallthrough
CT: control target
= control target key end

     0   :  { %s926_s18 = smov 0   ;;  %s928_s19 = smov 0   ;;  %s1040_s0 = inlined_call_operand.vmem [shape: bf16[32,1152], index: 0, kind: input, shape index: {}]   ;;  %s1041_s1 = inlined_call_operand.vmem [shape: bf16[1152,128], index: 1, kind: input, shape index: {}]   ;;  %s1042_s2 = inlined_call_operand.vmem [shape: f32[1,128], index: 2, kind: input, shape index: {}]   ;;  %s1043_s3 = inlined_call_operand.vmem [shape: f32[1,128], index: 3, kind: input, shape index: {}]   ;;  %s1044_s4 = inlined_call_operand.vmem [shape: f32[32,128], index: 4, kind: input, shape index: {}]   ;;  %s1045_s5 = inlined_call_operand.vmem [shape: f32[32,128], index: 5, kind: output, shape index: {}]  }
   0x1   :  { %s930_s20 = smov 0   ;;  %s932_s21 = smov 0  }
   0x2   :  { %s934_s22 = smov 0  }
   0x3 LB: > { %s27_s23 = sadd.s32 1, %s889_s21  ;;  %p50_p1 = scmp.ne.s32.totalorder %s881_s19, %s877_s18  ;;  %s893_s22 = sphi %s934_s22, %s15_s22   ;;  %s889_s21 = sphi %s932_s21, %s1049_s21   ;;  %s885_s20 = sphi %s930_s20, %s1048_s20   ;;  %s881_s19 = sphi %s928_s19, %s1047_s19   ;;  %s877_s18 = sphi %s926_s18, %s1046_s18  }
   0x4   : > { %p28_p0 = scmp.ge.s32.totalorder %s27_s23, 9  ;;  %p51_p2 = scmp.eq.s32.totalorder %s893_s22, 0 }
   0x5   : > { %s43_s25 = sadd.s32 1, %s881_s19  ;;  %p749_p5 = scmp.ge.s32.totalorder %s893_s22, 9 }
   0x6   : > { %s1051_s23 = smov (%p28_p0, %s27_s23), 0  ;;  %p52_p3 = por %p51_p2, %p50_p1 }
   0x7   : > { %s39_s24 = ssub.s32 %s889_s21, %s1051_s23  ;;  %236 = sbr.rel (%p749_p5) target bundleno = 18 (0x12), region = 28 }
   0x8   : > { %p41_p4 = scmp.eq.s32.totalorder %s39_s24, 0 }
   0xa   : > { %s961_s26 = scalar_select %p41_p4, %s881_s19, %s43_s25  }
   0xc   : > { %239 = sbr.rel (!%p52_p3) target bundleno = 18 (0x12), region = 32  ;;  %s241_s27 = sand.u32 (%p52_p3), 1, %s881_s19  }
   0xd   : > { %s751_s28 = sshll.u32 (%p52_p3), %s889_s21, 2  ;;  %s750_s29 = sshll.u32 (%p52_p3), %s241_s27, 4 }
   0xe   : > { %s248_s7 = scalar_lea.vmem (%p52_p3), %s1040_s0, %s751_s28  ;;  %s243_s8 = scalar_lea.vmem (%p52_p3), [#allocation3], %s750_s29 }
   0xf   : > { %v265_v0 = vld [vmem:[%s248_s7] sm:$0xf] (%p52_p3)  ;;  %v267_v1 = vld [vmem:[%s248_s7 + $0x24] sm:$0xf] (%p52_p3)  ;;  %v269_v2 = vld [vmem:[%s248_s7 + $0x48] sm:$0xf] (%p52_p3) }
  0x10   : > { %266 = vst [vmem:[%s243_s8] sm:$0xf] (%p52_p3), %v265_v0  ;;  %268 = vst [vmem:[%s243_s8 + $0x4] sm:$0xf] (%p52_p3), %v267_v1  ;;  %v271_v3 = vld [vmem:[%s248_s7 + $0x6c] sm:$0xf] (%p52_p3) }
  0x11   : > { %270 = vst [vmem:[%s243_s8 + $0x8] sm:$0xf] %v269_v2  ;;  %272 = vst [vmem:[%s243_s8 + $0xc] sm:$0xf] %v271_v3 }
  0x12 PF: > { %p752_p6 = scmp.ge.s32.totalorder %s893_s22, 1  ;;  %p315_p7 = scmp.lt.s32.totalorder %s893_s22, 10 }
  0x14   : > { %p316_p8 = pnand %p752_p6, %p315_p7 }
  0x15   : > { %s322_s9 = sand.u32 (!%p316_p8), 1, %s877_s18   ;;  %s754_s10 = sshll.u32 (!%p316_p8), %s885_s20, 4 }
  0x16   : > { %319 = sbr.rel (%p316_p8) target bundleno = 286 (0x11e), region = 77  ;;  %s973_s11 = sshll.u32 (!%p316_p8), %s322_s9, 4 }
  0x17   : > { %p376_p9 = scmp.lt.s32.totalorder (!%p316_p8), %s754_s10, 143  ;;  %s324_s16 = scalar_lea.vmem (!%p316_p8), [#allocation3], %s973_s11 }
  0x18   : > { %p756_p10 = scmp.ne.s32.totalorder (!%p316_p8), %s885_s20, 0 }
  0x1b   : > { %s1053_s10 = smov (!%p376_p9, %s754_s10), 143  ;;  %412 = sbr.rel (%p756_p10) target bundleno = 35 (0x23), region = 85 }
  0x1c   : > { %s755_s12 = sshll.u32 %s1053_s10, 2 }
  0x1d   : > { %s978_s15 = scalar_lea.vmem %s1041_s1, %s755_s12 }
  0x20   : > { %v895_v4 = vmov 0.0  }
  0x21   : > { %413 = vst [vmem:[#allocation2 + $0x10] sm:$0xff] %v895_v4  ;;  %414 = vst [vmem:[#allocation2] sm:$0xff] %v895_v4 }
  0x22   : > { %415 = vst [vmem:[#allocation2 + $0x18] sm:$0xff] %v895_v4  ;;  %416 = vst [vmem:[#allocation2 + $0x8] sm:$0xff] %v895_v4 }
  0x23 PF: > { %v845_v5 = vld [vmem:[%s978_s15 + $0x38] sm:$0xff]   ;;  %v846_v6 = vld [vmem:[%s978_s15 + $0x30] sm:$0xff]   ;;  %v847_v7 = vld [vmem:[%s978_s15 + $0x28] sm:$0xff]   ;;  %p767_p11 = scmp.ne.s32.totalorder %s885_s20, 8 }
  0x24   : > { %784 = vmatprep.subr.bf16.mxu0 %v845_v5  ;;  %v848_v8 = vld [vmem:[%s978_s15 + $0x20] sm:$0xff]   ;;  %v849_v10 = vld [vmem:[%s978_s15 + $0x18] sm:$0xff]   ;;  %v850_v11 = vld [vmem:[%s978_s15 + $0x10] sm:$0xff]  }
  0x25   : > { %785 = vmatpush3.bf16.msra.mxu0 %v845_v5  ;;  %v853_v9 = vld [vmem:[%s324_s16] sm:$0xff]   ;;  %v851_v12 = vld [vmem:[%s978_s15 + $0x8] sm:$0xff]  }
  0x26   : > { %786 = vmatprep.subr.bf16.mxu0 %v846_v6  ;;  %800 = vmatprep.mubr.bf16.mxu0 %v853_v9  ;;  %v852_v13 = vld [vmem:[%s978_s15] sm:$0xff]   ;;  %v854_v14 = vld [vmem:[%s324_s16 + $0x8] sm:$0xff]  }
  0x28   : > { %v417_v17 = vld [vmem:[#allocation2 + $0x10] sm:$0xff]  ;;  %v418_v23 = vld [vmem:[#allocation2] sm:$0xff] }
  0x29   : > { %787 = vmatpush3.bf16.msra.mxu0 %v846_v6  ;;  %v419_v15 = vld [vmem:[#allocation2 + $0x18] sm:$0xff]  ;;  %v420_v20 = vld [vmem:[#allocation2 + $0x8] sm:$0xff] }
  0x2a   : > { %788 = vmatprep.subr.bf16.mxu0 %v847_v7 }
  0x2d   : > { %789 = vmatpush3.bf16.msra.mxu0 %v847_v7 }
  0x2e   : > { %790 = vmatprep.subr.bf16.mxu0 %v848_v8 }
  0x31   : > { %791 = vmatpush3.bf16.msra.mxu0 %v848_v8 }
  0x32   : > { %792 = vmatprep.subr.bf16.mxu0 %v849_v10 }
  0x35   : > { %793 = vmatpush3.bf16.msra.mxu0 %v849_v10 }
  0x36   : > { %794 = vmatprep.subr.bf16.mxu0 %v850_v11 }
  0x39   : > { %795 = vmatpush3.bf16.msra.mxu0 %v850_v11 }
  0x3a   : > { %796 = vmatprep.subr.bf16.mxu0 %v851_v12 }
  0x3d   : > { %797 = vmatpush3.bf16.msra.mxu0 %v851_v12 }
  0x3e   : > { %798 = vmatprep.subr.bf16.mxu0 %v852_v13 }
  0x41   : > { %799 = vmatpush3.bf16.msra.mxu0 %v852_v13 }
  0x44   : > { %801 = vmatmul.mubr.bf16.vlgmr.msra.gmra.mxu0 %v854_v14 }
 0x104   : > { %v802_v16 = vpop.f32.mrf.mxu0 }
 0x105   : > { %v552_v18 = vadd.f32 %v802_v16, %v419_v15 }
 0x106   : > { %v535_v19 = vpop.f32.mrf.mxu0 }
 0x107   : > { %556 = vst [vmem:[#allocation2 + $0x18] sm:$0xff] %v552_v18  ;;  %v550_v21 = vadd.f32 %v535_v19, %v417_v17 }
 0x108   : > { %v803_v22 = vpop.f32.mrf.mxu0 }
 0x109   : > { %554 = vst [vmem:[#allocation2 + $0x10] sm:$0xff] %v550_v21  ;;  %v553_v24 = vadd.f32 %v803_v22, %v420_v20  ;;  %561 = sbr.rel (%p767_p11) target bundleno = 286 (0x11e), region = 89 }
 0x10a   : > { %v538_v25 = vpop.f32.mrf.mxu0 }
 0x10b   : > { %557 = vst [vmem:[#allocation2 + $0x8] sm:$0xff] %v553_v24  ;;  %v551_v26 = vadd.f32 %v538_v25, %v418_v23 }
 0x10d   : > { %555 = vst [vmem:[#allocation2] sm:$0xff] %v551_v26 }
 0x10e   : > { %v768_v28 = vld [vmem:[%s1042_s2] ss:$0 sm:$0xff]  ;;  %v564_v34 = vld [vmem:[#allocation2 + $0x18] sm:$0xff]  ;;  %v589_v37 = vld [vmem:[%s1044_s4 + $0x8] sm:$0xff] }
 0x10f   : > { %v769_v29 = vld [vmem:[%s1043_s3] ss:$0 sm:$0xff]  ;;  %v575_v38 = vmul.f32 %v768_v28, %v564_v34  ;;  %v590_v41 = vld [vmem:[%s1044_s4 + $0x10] sm:$0xff]  ;;  %v591_v42 = vld [vmem:[%s1044_s4 + $0x18] sm:$0xff] }
 0x110   : > { %v562_v27 = vld [vmem:[#allocation2 + $0x10] sm:$0xff]  ;;  %v588_v32 = vld [vmem:[%s1044_s4] sm:$0xff] }
 0x111   : > { %v573_v30 = vmul.f32 %v768_v28, %v562_v27  ;;  %v586_v44 = vadd.f32 %v769_v29, %v575_v38 }
 0x112   : > { %v565_v35 = vld [vmem:[#allocation2 + $0x8] sm:$0xff] }
 0x113   : > { %v584_v36 = vadd.f32 %v769_v29, %v573_v30  ;;  %v576_v39 = vmul.f32 %v768_v28, %v565_v35  ;;  %v594_v48 = vadd.f32 %v590_v41, %v586_v44 }
 0x114   : > { %v563_v31 = vld [vmem:[#allocation2] sm:$0xff] }
 0x115   : > { %v574_v33 = vmul.f32 %v768_v28, %v563_v31  ;;  %v592_v43 = vadd.f32 %v588_v32, %v584_v36  ;;  %v587_v45 = vadd.f32 %v769_v29, %v576_v39  ;;  %v598_v51 = vmax.f32 %v594_v48, 0.0 }
 0x117   : > { %v585_v40 = vadd.f32 %v769_v29, %v574_v33  ;;  %v596_v47 = vmax.f32 %v592_v43, 0.0  ;;  %v595_v49 = vadd.f32 %v591_v42, %v587_v45  ;;  %602 = vst [vmem:[%s1045_s5 + $0x10] sm:$0xff] %v598_v51 }
 0x119   : > { %v593_v46 = vadd.f32 %v589_v37, %v585_v40  ;;  %600 = vst [vmem:[%s1045_s5] sm:$0xff] %v596_v47  ;;  %v599_v52 = vmax.f32 %v595_v49, 0.0 }
 0x11b   : > { %v597_v50 = vmax.f32 %v593_v46, 0.0  ;;  %603 = vst [vmem:[%s1045_s5 + $0x18] sm:$0xff] %v599_v52 }
 0x11d   : > { %601 = vst [vmem:[%s1045_s5 + $0x8] sm:$0xff] %v597_v50 }
 0x11e PF: > { %s15_s22 = sadd.s32 1, %s893_s22   ;;  %s1046_s18 = smov %s881_s19 }
 0x11f   : > { %p12_p12 = scmp.ge.s32.totalorder %s15_s22, 11   ;;  %s1047_s19 = smov %s961_s26 }
 0x120   : > { %s1048_s20 = smov %s889_s21  ;;  %s1049_s21 = smov %s1051_s23 }
 0x121   :  { %14 = sbr.rel (!%p12_p12) target bundleno = 3 (0x3), region = 136 }

// kernel: resnet_encoder_forward.30
= control target key start
LH: loop header
LB: loop body
LE: loop exit
PB: predicated region body
PF: predicated region fallthrough
CT: control target
= control target key end

     0   :  { %s834_s15 = smov 0   ;;  %s836_s16 = smov 0   ;;  %s936_s0 = inlined_call_operand.vmem [shape: bf16[32,1152], index: 0, kind: input, shape index: {}]   ;;  %s937_s1 = inlined_call_operand.vmem [shape: bf16[1152,128], index: 1, kind: input, shape index: {}]   ;;  %s938_s2 = inlined_call_operand.vmem [shape: f32[1,128], index: 2, kind: input, shape index: {}]   ;;  %s939_s3 = inlined_call_operand.vmem [shape: f32[1,128], index: 3, kind: input, shape index: {}]   ;;  %s940_s4 = inlined_call_operand.vmem [shape: f32[32,128], index: 4, kind: output, shape index: {}]  }
   0x1   :  { %s838_s17 = smov 0   ;;  %s840_s18 = smov 0  }
   0x2   :  { %s842_s19 = smov 0  }
   0x3 LB: > { %s26_s20 = sadd.s32 1, %s802_s18  ;;  %p49_p1 = scmp.ne.s32.totalorder %s794_s16, %s790_s15  ;;  %s806_s19 = sphi %s842_s19, %s14_s19   ;;  %s802_s18 = sphi %s840_s18, %s944_s18   ;;  %s798_s17 = sphi %s838_s17, %s943_s17   ;;  %s794_s16 = sphi %s836_s16, %s942_s16   ;;  %s790_s15 = sphi %s834_s15, %s941_s15  }
   0x4   : > { %p27_p0 = scmp.ge.s32.totalorder %s26_s20, 9  ;;  %p50_p2 = scmp.eq.s32.totalorder %s806_s19, 0 }
   0x5   : > { %s42_s22 = sadd.s32 1, %s794_s16  ;;  %p662_p5 = scmp.ge.s32.totalorder %s806_s19, 9 }
   0x6   : > { %s946_s20 = smov (%p27_p0, %s26_s20), 0  ;;  %p51_p3 = por %p50_p2, %p49_p1 }
   0x7   : > { %s38_s21 = ssub.s32 %s802_s18, %s946_s20  ;;  %195 = sbr.rel (%p662_p5) target bundleno = 18 (0x12), region = 24 }
   0x8   : > { %p40_p4 = scmp.eq.s32.totalorder %s38_s21, 0 }
   0xa   : > { %s869_s23 = scalar_select %p40_p4, %s794_s16, %s42_s22  }
   0xc   : > { %198 = sbr.rel (!%p51_p3) target bundleno = 18 (0x12), region = 28  ;;  %s200_s24 = sand.u32 (%p51_p3), 1, %s794_s16  }
   0xd   : > { %s664_s25 = sshll.u32 (%p51_p3), %s802_s18, 2  ;;  %s663_s26 = sshll.u32 (%p51_p3), %s200_s24, 4 }
   0xe   : > { %s207_s29 = scalar_lea.vmem (%p51_p3), %s936_s0, %s664_s25  ;;  %s202_s30 = scalar_lea.vmem (%p51_p3), [#allocation3], %s663_s26 }
   0xf   : > { %v224_v0 = vld [vmem:[%s207_s29] sm:$0xf] (%p51_p3)  ;;  %v226_v1 = vld [vmem:[%s207_s29 + $0x24] sm:$0xf] (%p51_p3)  ;;  %v228_v2 = vld [vmem:[%s207_s29 + $0x48] sm:$0xf] (%p51_p3) }
  0x10   : > { %225 = vst [vmem:[%s202_s30] sm:$0xf] (%p51_p3), %v224_v0  ;;  %227 = vst [vmem:[%s202_s30 + $0x4] sm:$0xf] (%p51_p3), %v226_v1  ;;  %v230_v3 = vld [vmem:[%s207_s29 + $0x6c] sm:$0xf] (%p51_p3) }
  0x11   : > { %229 = vst [vmem:[%s202_s30 + $0x8] sm:$0xf] %v228_v2  ;;  %231 = vst [vmem:[%s202_s30 + $0xc] sm:$0xf] %v230_v3 }
  0x12 PF: > { %p665_p6 = scmp.ge.s32.totalorder %s806_s19, 1  ;;  %p274_p7 = scmp.lt.s32.totalorder %s806_s19, 10 }
  0x14   : > { %p275_p8 = pnand %p665_p6, %p274_p7 }
  0x15   : > { %s281_s5 = sand.u32 (!%p275_p8), 1, %s790_s15   ;;  %s667_s6 = sshll.u32 (!%p275_p8), %s798_s17, 4 }
  0x16   : > { %278 = sbr.rel (%p275_p8) target bundleno = 284 (0x11c), region = 73  ;;  %s881_s7 = sshll.u32 (!%p275_p8), %s281_s5, 4 }
  0x17   : > { %p325_p9 = scmp.lt.s32.totalorder (!%p275_p8), %s667_s6, 143  ;;  %s283_s12 = scalar_lea.vmem (!%p275_p8), [#allocation3], %s881_s7 }
  0x18   : > { %p669_p10 = scmp.ne.s32.totalorder (!%p275_p8), %s798_s17, 0 }
  0x1b   : > { %s948_s6 = smov (!%p325_p9, %s667_s6), 143  ;;  %352 = sbr.rel (%p669_p10) target bundleno = 35 (0x23), region = 81 }
  0x1c   : > { %s668_s8 = sshll.u32 %s948_s6, 2 }
  0x1d   : > { %s886_s11 = scalar_lea.vmem %s937_s1, %s668_s8 }
  0x20   : > { %v808_v4 = vmov 0.0  }
  0x21   : > { %353 = vst [vmem:[#allocation2 + $0x10] sm:$0xff] %v808_v4  ;;  %354 = vst [vmem:[#allocation2] sm:$0xff] %v808_v4 }
  0x22   : > { %355 = vst [vmem:[#allocation2 + $0x18] sm:$0xff] %v808_v4  ;;  %356 = vst [vmem:[#allocation2 + $0x8] sm:$0xff] %v808_v4 }
  0x23 PF: > { %v758_v5 = vld [vmem:[%s886_s11 + $0x38] sm:$0xff]   ;;  %v759_v6 = vld [vmem:[%s886_s11 + $0x30] sm:$0xff]   ;;  %v760_v7 = vld [vmem:[%s886_s11 + $0x28] sm:$0xff]   ;;  %p680_p11 = scmp.ne.s32.totalorder %s798_s17, 8 }
  0x24   : > { %697 = vmatprep.subr.bf16.mxu0 %v758_v5  ;;  %v761_v8 = vld [vmem:[%s886_s11 + $0x20] sm:$0xff]   ;;  %v762_v10 = vld [vmem:[%s886_s11 + $0x18] sm:$0xff]   ;;  %v763_v11 = vld [vmem:[%s886_s11 + $0x10] sm:$0xff]  }
  0x25   : > { %698 = vmatpush3.bf16.msra.mxu0 %v758_v5  ;;  %v766_v9 = vld [vmem:[%s283_s12] sm:$0xff]   ;;  %v764_v12 = vld [vmem:[%s886_s11 + $0x8] sm:$0xff]  }
  0x26   : > { %699 = vmatprep.subr.bf16.mxu0 %v759_v6  ;;  %713 = vmatprep.mubr.bf16.mxu0 %v766_v9  ;;  %v765_v13 = vld [vmem:[%s886_s11] sm:$0xff]   ;;  %v767_v14 = vld [vmem:[%s283_s12 + $0x8] sm:$0xff]  }
  0x28   : > { %v357_v17 = vld [vmem:[#allocation2 + $0x10] sm:$0xff]  ;;  %v358_v23 = vld [vmem:[#allocation2] sm:$0xff] }
  0x29   : > { %700 = vmatpush3.bf16.msra.mxu0 %v759_v6  ;;  %v359_v15 = vld [vmem:[#allocation2 + $0x18] sm:$0xff]  ;;  %v360_v20 = vld [vmem:[#allocation2 + $0x8] sm:$0xff] }
  0x2a   : > { %701 = vmatprep.subr.bf16.mxu0 %v760_v7 }
  0x2d   : > { %702 = vmatpush3.bf16.msra.mxu0 %v760_v7 }
  0x2e   : > { %703 = vmatprep.subr.bf16.mxu0 %v761_v8 }
  0x31   : > { %704 = vmatpush3.bf16.msra.mxu0 %v761_v8 }
  0x32   : > { %705 = vmatprep.subr.bf16.mxu0 %v762_v10 }
  0x35   : > { %706 = vmatpush3.bf16.msra.mxu0 %v762_v10 }
  0x36   : > { %707 = vmatprep.subr.bf16.mxu0 %v763_v11 }
  0x39   : > { %708 = vmatpush3.bf16.msra.mxu0 %v763_v11 }
  0x3a   : > { %709 = vmatprep.subr.bf16.mxu0 %v764_v12 }
  0x3d   : > { %710 = vmatpush3.bf16.msra.mxu0 %v764_v12 }
  0x3e   : > { %711 = vmatprep.subr.bf16.mxu0 %v765_v13 }
  0x41   : > { %712 = vmatpush3.bf16.msra.mxu0 %v765_v13 }
  0x44   : > { %714 = vmatmul.mubr.bf16.vlgmr.msra.gmra.mxu0 %v767_v14 }
 0x104   : > { %v715_v16 = vpop.f32.mrf.mxu0 }
 0x105   : > { %v492_v18 = vadd.f32 %v715_v16, %v359_v15 }
 0x106   : > { %v475_v19 = vpop.f32.mrf.mxu0 }
 0x107   : > { %496 = vst [vmem:[#allocation2 + $0x18] sm:$0xff] %v492_v18  ;;  %v490_v21 = vadd.f32 %v475_v19, %v357_v17 }
 0x108   : > { %v716_v22 = vpop.f32.mrf.mxu0 }
 0x109   : > { %494 = vst [vmem:[#allocation2 + $0x10] sm:$0xff] %v490_v21  ;;  %v493_v24 = vadd.f32 %v716_v22, %v360_v20  ;;  %501 = sbr.rel (%p680_p11) target bundleno = 284 (0x11c), region = 85 }
 0x10a   : > { %v478_v25 = vpop.f32.mrf.mxu0 }
 0x10b   : > { %497 = vst [vmem:[#allocation2 + $0x8] sm:$0xff] %v493_v24  ;;  %v491_v26 = vadd.f32 %v478_v25, %v358_v23 }
 0x10d   : > { %495 = vst [vmem:[#allocation2] sm:$0xff] %v491_v26 }
 0x10e   : > { %v681_v28 = vld [vmem:[%s938_s2] ss:$0 sm:$0xff]  ;;  %v504_v32 = vld [vmem:[#allocation2 + $0x18] sm:$0xff] }
 0x10f   : > { %v682_v29 = vld [vmem:[%s939_s3] ss:$0 sm:$0xff]  ;;  %v515_v35 = vmul.f32 %v681_v28, %v504_v32 }
 0x110   : > { %v502_v27 = vld [vmem:[#allocation2 + $0x10] sm:$0xff] }
 0x111   : > { %v513_v30 = vmul.f32 %v681_v28, %v502_v27  ;;  %v526_v39 = vadd.f32 %v682_v29, %v515_v35 }
 0x112   : > { %v505_v33 = vld [vmem:[#allocation2 + $0x8] sm:$0xff] }
 0x113   : > { %v516_v36 = vmul.f32 %v681_v28, %v505_v33  ;;  %v524_v37 = vadd.f32 %v682_v29, %v513_v30  ;;  %v530_v43 = vmax.f32 %v526_v39, 0.0 }
 0x114   : > { %v503_v31 = vld [vmem:[#allocation2] sm:$0xff] }
 0x115   : > { %v514_v34 = vmul.f32 %v681_v28, %v503_v31  ;;  %v527_v40 = vadd.f32 %v682_v29, %v516_v36  ;;  %v528_v41 = vmax.f32 %v524_v37, 0.0  ;;  %534 = vst [vmem:[%s940_s4 + $0x10] sm:$0xff] %v530_v43 }
 0x117   : > { %v525_v38 = vadd.f32 %v682_v29, %v514_v34  ;;  %v531_v44 = vmax.f32 %v527_v40, 0.0  ;;  %532 = vst [vmem:[%s940_s4] sm:$0xff] %v528_v41 }
 0x119   : > { %v529_v42 = vmax.f32 %v525_v38, 0.0  ;;  %535 = vst [vmem:[%s940_s4 + $0x18] sm:$0xff] %v531_v44 }
 0x11b   : > { %533 = vst [vmem:[%s940_s4 + $0x8] sm:$0xff] %v529_v42 }
 0x11c PF: > { %s14_s19 = sadd.s32 1, %s806_s19   ;;  %s941_s15 = smov %s794_s16 }
 0x11d   : > { %p11_p12 = scmp.ge.s32.totalorder %s14_s19, 11   ;;  %s942_s16 = smov %s869_s23 }
 0x11e   : > { %s943_s17 = smov %s802_s18  ;;  %s944_s18 = smov %s946_s20 }
 0x11f   :  { %13 = sbr.rel (!%p11_p12) target bundleno = 3 (0x3), region = 129 }

// kernel: resnet_encoder_forward.32
= control target key start
LH: loop header
LB: loop body
LE: loop exit
PB: predicated region body
PF: predicated region fallthrough
CT: control target
= control target key end

     0   :  { %s883_s15 = smov 0   ;;  %s885_s16 = smov 0   ;;  %s991_s0 = inlined_call_operand.vmem [shape: bf16[16,1152], index: 0, kind: input, shape index: {}]   ;;  %s992_s1 = inlined_call_operand.vmem [shape: bf16[1152,256], index: 1, kind: input, shape index: {}]   ;;  %s993_s2 = inlined_call_operand.vmem [shape: f32[1,256], index: 2, kind: input, shape index: {}]   ;;  %s994_s3 = inlined_call_operand.vmem [shape: f32[1,256], index: 3, kind: input, shape index: {}]   ;;  %s995_s4 = inlined_call_operand.vmem [shape: f32[16,256], index: 4, kind: output, shape index: {}]  }
   0x1   :  { %s887_s17 = smov 0   ;;  %s889_s18 = smov 0  }
   0x2   :  { %s891_s19 = smov 0  }
   0x3 LB: > { %s26_s20 = sadd.s32 1, %s850_s18  ;;  %p49_p1 = scmp.ne.s32.totalorder %s842_s16, %s838_s15  ;;  %s854_s19 = sphi %s891_s19, %s14_s19   ;;  %s850_s18 = sphi %s889_s18, %s999_s18   ;;  %s846_s17 = sphi %s887_s17, %s998_s17   ;;  %s842_s16 = sphi %s885_s16, %s997_s16   ;;  %s838_s15 = sphi %s883_s15, %s996_s15  }
   0x4   : > { %p27_p0 = scmp.ge.s32.totalorder %s26_s20, 9  ;;  %p50_p2 = scmp.eq.s32.totalorder %s854_s19, 0 }
   0x5   : > { %s42_s22 = sadd.s32 1, %s842_s16  ;;  %p717_p5 = scmp.ge.s32.totalorder %s854_s19, 9 }
   0x6   : > { %s1001_s20 = smov (%p27_p0, %s26_s20), 0  ;;  %p51_p3 = por %p50_p2, %p49_p1 }
   0x7   : > { %s38_s21 = ssub.s32 %s850_s18, %s1001_s20  ;;  %199 = sbr.rel (%p717_p5) target bundleno = 17 (0x11), region = 24 }
   0x8   : > { %p40_p4 = scmp.eq.s32.totalorder %s38_s21, 0 }
   0xa   : > { %s918_s23 = scalar_select %p40_p4, %s842_s16, %s42_s22  }
   0xc   : > { %202 = sbr.rel (!%p51_p3) target bundleno = 17 (0x11), region = 28  ;;  %s204_s24 = sand.u32 (%p51_p3), 1, %s842_s16  }
   0xd   : > { %s719_s25 = sshll.u32 (%p51_p3), %s850_s18, 2  ;;  %s718_s26 = sshll.u32 (%p51_p3), %s204_s24, 3 }
   0xe   : > { %s211_s29 = scalar_lea.vmem (%p51_p3), %s991_s0, %s719_s25  ;;  %s206_s30 = scalar_lea.vmem (%p51_p3), [#allocation3], %s718_s26 }
   0xf   : > { %v228_v0 = vld [vmem:[%s211_s29] sm:$0xf] (%p51_p3)  ;;  %v230_v1 = vld [vmem:[%s211_s29 + $0x24] sm:$0xf] (%p51_p3) }
  0x10   : > { %229 = vst [vmem:[%s206_s30] sm:$0xf] (%p51_p3), %v228_v0  ;;  %231 = vst [vmem:[%s206_s30 + $0x4] sm:$0xf] (%p51_p3), %v230_v1 }
  0x11 PF: > { %p720_p6 = scmp.ge.s32.totalorder %s854_s19, 1  ;;  %p273_p7 = scmp.lt.s32.totalorder %s854_s19, 10 }
  0x13   : > { %p274_p8 = pnand %p720_p6, %p273_p7 }
  0x14   : > { %s280_s5 = sand.u32 (!%p274_p8), 1, %s838_s15   ;;  %s722_s6 = sshll.u32 (!%p274_p8), %s846_s17, 4 }
  0x15   : > { %277 = sbr.rel (%p274_p8) target bundleno = 285 (0x11d), region = 73  ;;  %s930_s7 = sshll.u32 (!%p274_p8), %s280_s5, 3 }
  0x16   : > { %p331_p9 = scmp.lt.s32.totalorder (!%p274_p8), %s722_s6, 143  ;;  %s282_s12 = scalar_lea.vmem (!%p274_p8), [#allocation3], %s930_s7 }
  0x17   : > { %p725_p10 = scmp.ne.s32.totalorder (!%p274_p8), %s846_s17, 0 }
  0x1a   : > { %s1003_s6 = smov (!%p331_p9, %s722_s6), 143  ;;  %367 = sbr.rel (%p725_p10) target bundleno = 34 (0x22), region = 81 }
  0x1b   : > { %s748_s8 = sshll.u32 %s1003_s6, 3 }
  0x1c   : > { %s935_s11 = scalar_lea.vmem %s992_s1, %s748_s8 }
  0x1f   : > { %v856_v2 = vmov 0.0  }
  0x20   : > { %368 = vst [vmem:[#allocation2 + $0x10] sm:$0xff] %v856_v2  ;;  %369 = vst [vmem:[#allocation2] sm:$0xff] %v856_v2 }
  0x21   : > { %370 = vst [vmem:[#allocation2 + $0x18] sm:$0xff] %v856_v2  ;;  %371 = vst [vmem:[#allocation2 + $0x8] sm:$0xff] %v856_v2 }
  0x22 PF: > { %v791_v3 = vld [vmem:[%s935_s11 + $0x74] ss:$8 sps:$4 sm:$0xff]   ;;  %v793_v4 = vld [vmem:[%s935_s11 + $0x70] ss:$8 sps:$4 sm:$0xff]   ;;  %v857_v5 = vmov 0   ;;  %v815_v20 = vld [vmem:[%s282_s12] sm:$0xff]  }
  0x23   : > { %512 = vmatprep.mubr.bf16.mxu0 %v857_v5  ;;  %480 = vmatprep.subr.bf16.mxu0 %v791_v3  ;;  %v794_v6 = vld [vmem:[%s935_s11 + $0x64] ss:$8 sps:$4 sm:$0xff]   ;;  %v796_v7 = vld [vmem:[%s935_s11 + $0x60] ss:$8 sps:$4 sm:$0xff]   ;;  %v797_v8 = vld [vmem:[%s935_s11 + $0x54] ss:$8 sps:$4 sm:$0xff]  }
  0x24   : > { %481 = vmatpush1.bf16.msra.mxu0 %v793_v4  ;;  %v799_v9 = vld [vmem:[%s935_s11 + $0x50] ss:$8 sps:$4 sm:$0xff]   ;;  %v800_v10 = vld [vmem:[%s935_s11 + $0x44] ss:$8 sps:$4 sm:$0xff]   ;;  %v802_v11 = vld [vmem:[%s935_s11 + $0x40] ss:$8 sps:$4 sm:$0xff]  }
  0x25   : > { %482 = vmatprep.subr.bf16.mxu0 %v794_v6  ;;  %v803_v12 = vld [vmem:[%s935_s11 + $0x34] ss:$8 sps:$4 sm:$0xff]   ;;  %v805_v13 = vld [vmem:[%s935_s11 + $0x30] ss:$8 sps:$4 sm:$0xff]   ;;  %v806_v14 = vld [vmem:[%s935_s11 + $0x24] ss:$8 sps:$4 sm:$0xff]  }
  0x26   : > { %v808_v15 = vld [vmem:[%s935_s11 + $0x20] ss:$8 sps:$4 sm:$0xff]   ;;  %v809_v16 = vld [vmem:[%s935_s11 + $0x14] ss:$8 sps:$4 sm:$0xff]   ;;  %v811_v17 = vld [vmem:[%s935_s11 + $0x10] ss:$8 sps:$4 sm:$0xff]  }
  0x27   : > { %v812_v18 = vld [vmem:[%s935_s11 + $0x4] ss:$8 sps:$4 sm:$0xff]   ;;  %v814_v19 = vld [vmem:[%s935_s11] ss:$8 sps:$4 sm:$0xff]   ;;  %v372_v21 = vld [vmem:[#allocation2 + $0x10] sm:$0xff]  ;;  %p743_p11 = scmp.ne.s32.totalorder %s846_s17, 8 }
  0x28   : > { %483 = vmatpush1.bf16.msra.mxu0 %v796_v7  ;;  %v373_v23 = vld [vmem:[#allocation2] sm:$0xff]  ;;  %v374_v26 = vld [vmem:[#allocation2 + $0x18] sm:$0xff]  ;;  %v375_v29 = vld [vmem:[#allocation2 + $0x8] sm:$0xff] }
  0x29   : > { %484 = vmatprep.subr.bf16.mxu0 %v797_v8 }
  0x2c   : > { %485 = vmatpush1.bf16.msra.mxu0 %v799_v9 }
  0x2d   : > { %486 = vmatprep.subr.bf16.mxu0 %v800_v10 }
  0x30   : > { %487 = vmatpush1.bf16.msra.mxu0 %v802_v11 }
  0x31   : > { %488 = vmatprep.subr.bf16.mxu0 %v803_v12 }
  0x34   : > { %489 = vmatpush1.bf16.msra.mxu0 %v805_v13 }
  0x35   : > { %490 = vmatprep.subr.bf16.mxu0 %v806_v14 }
  0x38   : > { %491 = vmatpush1.bf16.msra.mxu0 %v808_v15 }
  0x39   : > { %492 = vmatprep.subr.bf16.mxu0 %v809_v16 }
  0x3c   : > { %493 = vmatpush1.bf16.msra.mxu0 %v811_v17 }
  0x3d   : > { %494 = vmatprep.subr.bf16.mxu0 %v812_v18 }
  0x40   : > { %495 = vmatpush1.bf16.msra.mxu0 %v814_v19 }
  0x43   : > { %513 = vmatmul.mubr.bf16.vlgmr.msra.gmra.mxu0 %v815_v20 }
 0x103   : > { %v514_v22 = vpop.f32.mrf.mxu0 }
 0x104   : > { %v523_v24 = vadd.f32 %v514_v22, %v372_v21 }
 0x105   : > { %v516_v25 = vpop.f32.mrf.mxu0 }
 0x106   : > { %527 = vst [vmem:[#allocation2 + $0x10] sm:$0xff] %v523_v24  ;;  %v524_v27 = vadd.f32 %v516_v25, %v373_v23 }
 0x107   : > { %v518_v28 = vpop.f32.mrf.mxu0 }
 0x108   : > { %528 = vst [vmem:[#allocation2] sm:$0xff] %v524_v27  ;;  %v525_v30 = vadd.f32 %v518_v28, %v374_v26  ;;  %534 = sbr.rel (%p743_p11) target bundleno = 285 (0x11d), region = 85 }
 0x109   : > { %v520_v31 = vpop.f32.mrf.mxu0 }
 0x10a   : > { %529 = vst [vmem:[#allocation2 + $0x18] sm:$0xff] %v525_v30  ;;  %v526_v32 = vadd.f32 %v520_v31, %v375_v29 }
 0x10c   : > { %530 = vst [vmem:[#allocation2 + $0x8] sm:$0xff] %v526_v32 }
 0x10d   : > { %v541_v33 = vlaneseq  ;;  %v539_v35 = vld [vmem:[%s993_s2] sm:$0x3]  ;;  %v535_v37 = vld [vmem:[#allocation2 + $0x10] sm:$0xff] }
 0x10e   : > { %v555_v36 = vld [vmem:[%s994_s3] sm:$0x3] }
 0x10f   : > { %v542_v34 = vshrl.u32 %v541_v33, 7  ;;  %v536_v40 = vld [vmem:[#allocation2] sm:$0xff] }
 0x111   : > { %v543_v38 = vsub.s32 0, %v542_v34  ;;  %v547_v39 = vsub.s32 1, %v542_v34  ;;  %v537_v41 = vld [vmem:[#allocation2 + $0x18] sm:$0xff] }
 0x113   : > { %v538_v42 = vld [vmem:[#allocation2 + $0x8] sm:$0xff]  ;;  %v544_v43 = vrot.slane %v539_v35, %v543_v38  ;;  %v560_v44 = vrot.slane %v555_v36, %v543_v38  ;;  %v548_v45 = vrot.slane %v539_v35, %v547_v39  ;;  %v564_v46 = vrot.slane %v555_v36, %v547_v39 }
 0x115   : > { %v551_v47 = vmul.f32 %v544_v43, %v535_v37  ;;  %v552_v48 = vmul.f32 %v548_v45, %v536_v40  ;;  %v553_v49 = vmul.f32 %v544_v43, %v537_v41  ;;  %v554_v50 = vmul.f32 %v548_v45, %v538_v42 }
 0x117   : > { %v567_v51 = vadd.f32 %v560_v44, %v551_v47  ;;  %v568_v52 = vadd.f32 %v564_v46, %v552_v48  ;;  %v569_v53 = vadd.f32 %v560_v44, %v553_v49  ;;  %v570_v54 = vadd.f32 %v564_v46, %v554_v50 }
 0x119   : > { %v571_v55 = vmax.f32 %v567_v51, 0.0  ;;  %v572_v56 = vmax.f32 %v568_v52, 0.0  ;;  %v573_v57 = vmax.f32 %v569_v53, 0.0  ;;  %v574_v58 = vmax.f32 %v570_v54, 0.0 }
 0x11b   : > { %575 = vst [vmem:[%s995_s4] sm:$0xff] %v571_v55  ;;  %576 = vst [vmem:[%s995_s4 + $0x8] sm:$0xff] %v572_v56 }
 0x11c   : > { %577 = vst [vmem:[%s995_s4 + $0x10] sm:$0xff] %v573_v57  ;;  %578 = vst [vmem:[%s995_s4 + $0x18] sm:$0xff] %v574_v58 }
 0x11d PF: > { %s14_s19 = sadd.s32 1, %s854_s19   ;;  %s996_s15 = smov %s842_s16 }
 0x11e   : > { %p11_p12 = scmp.ge.s32.totalorder %s14_s19, 11   ;;  %s997_s16 = smov %s918_s23 }
 0x11f   : > { %s998_s17 = smov %s850_s18  ;;  %s999_s18 = smov %s1001_s20 }
 0x120   :  { %13 = sbr.rel (!%p11_p12) target bundleno = 3 (0x3), region = 129 }

// kernel: resnet_encoder_forward.33
= control target key start
LH: loop header
LB: loop body
LE: loop exit
PB: predicated region body
PF: predicated region fallthrough
CT: control target
= control target key end

     0   :  { %v275_v1 = vmov 0   ;;  %v194_v18 = vlaneseq  ;;  %s370_s1 = inlined_call_operand.vmem [shape: bf16[128,256], index: 1, kind: input, shape index: {}]   ;;  %s371_s0 = inlined_call_operand.vmem [shape: bf16[16,128], index: 0, kind: input, shape index: {}]   ;;  %s372_s2 = inlined_call_operand.vmem [shape: f32[1,256], index: 2, kind: input, shape index: {}]   ;;  %s373_s3 = inlined_call_operand.vmem [shape: f32[1,256], index: 3, kind: input, shape index: {}]   ;;  %s374_s4 = inlined_call_operand.vmem [shape: f32[16,256], index: 4, kind: output, shape index: {}]  }
   0x1   :  { %v250_v0 = vld [vmem:[%s370_s1 + $0x74] ss:$8 sps:$4 sm:$0xff]   ;;  %166 = vmatprep.mubr.bf16.mxu0 %v275_v1  ;;  %v252_v2 = vld [vmem:[%s370_s1 + $0x70] ss:$8 sps:$4 sm:$0xff]   ;;  %v253_v3 = vld [vmem:[%s370_s1 + $0x64] ss:$8 sps:$4 sm:$0xff]  }
   0x2   :  { %134 = vmatprep.subr.bf16.mxu0 %v250_v0  ;;  %v255_v4 = vld [vmem:[%s370_s1 + $0x60] ss:$8 sps:$4 sm:$0xff]   ;;  %v256_v5 = vld [vmem:[%s370_s1 + $0x54] ss:$8 sps:$4 sm:$0xff]   ;;  %v258_v6 = vld [vmem:[%s370_s1 + $0x50] ss:$8 sps:$4 sm:$0xff]  }
   0x3   :  { %135 = vmatpush1.bf16.msra.mxu0 %v252_v2  ;;  %v259_v7 = vld [vmem:[%s370_s1 + $0x44] ss:$8 sps:$4 sm:$0xff]   ;;  %v261_v8 = vld [vmem:[%s370_s1 + $0x40] ss:$8 sps:$4 sm:$0xff]   ;;  %v262_v9 = vld [vmem:[%s370_s1 + $0x34] ss:$8 sps:$4 sm:$0xff]  }
   0x4   :  { %136 = vmatprep.subr.bf16.mxu0 %v253_v3  ;;  %v264_v10 = vld [vmem:[%s370_s1 + $0x30] ss:$8 sps:$4 sm:$0xff]   ;;  %v265_v11 = vld [vmem:[%s370_s1 + $0x24] ss:$8 sps:$4 sm:$0xff]   ;;  %v267_v12 = vld [vmem:[%s370_s1 + $0x20] ss:$8 sps:$4 sm:$0xff]  }
   0x5   :  { %v268_v13 = vld [vmem:[%s370_s1 + $0x14] ss:$8 sps:$4 sm:$0xff]   ;;  %v270_v14 = vld [vmem:[%s370_s1 + $0x10] ss:$8 sps:$4 sm:$0xff]   ;;  %v271_v15 = vld [vmem:[%s370_s1 + $0x4] ss:$8 sps:$4 sm:$0xff]  }
   0x6   :  { %v273_v16 = vld [vmem:[%s370_s1] ss:$8 sps:$4 sm:$0xff]   ;;  %v195_v19 = vshrl.u32 %v194_v18, 7 }
   0x7   :  { %137 = vmatpush1.bf16.msra.mxu0 %v255_v4  ;;  %v274_v17 = vld [vmem:[%s371_s0] sm:$0xff]  }
   0x8   :  { %138 = vmatprep.subr.bf16.mxu0 %v256_v5  ;;  %v196_v20 = vsub.s32 0, %v195_v19  ;;  %v192_v21 = vld [vmem:[%s372_s2] sm:$0x3]  ;;  %v200_v22 = vsub.s32 1, %v195_v19 }
   0x9   :  { %v208_v23 = vld [vmem:[%s373_s3] sm:$0x3] }
   0xa   :  { %v197_v24 = vrot.slane %v192_v21, %v196_v20  ;;  %v213_v25 = vrot.slane %v208_v23, %v196_v20  ;;  %v201_v26 = vrot.slane %v192_v21, %v200_v22  ;;  %v217_v29 = vrot.slane %v208_v23, %v200_v22 }
   0xb   :  { %139 = vmatpush1.bf16.msra.mxu0 %v258_v6 }
   0xc   :  { %140 = vmatprep.subr.bf16.mxu0 %v259_v7 }
   0xf   :  { %141 = vmatpush1.bf16.msra.mxu0 %v261_v8 }
  0x10   :  { %142 = vmatprep.subr.bf16.mxu0 %v262_v9 }
  0x13   :  { %143 = vmatpush1.bf16.msra.mxu0 %v264_v10 }
  0x14   :  { %144 = vmatprep.subr.bf16.mxu0 %v265_v11 }
  0x17   :  { %145 = vmatpush1.bf16.msra.mxu0 %v267_v12 }
  0x18   :  { %146 = vmatprep.subr.bf16.mxu0 %v268_v13 }
  0x1b   :  { %147 = vmatpush1.bf16.msra.mxu0 %v270_v14 }
  0x1c   :  { %148 = vmatprep.subr.bf16.mxu0 %v271_v15 }
  0x1f   :  { %149 = vmatpush1.bf16.msra.mxu0 %v273_v16 }
  0x22   :  { %167 = vmatmul.mubr.bf16.vlgmr.msra.gmra.mxu0 %v274_v17 }
  0xe2   :  { %v168_v27 = vpop.f32.mrf.mxu0 }
  0xe3   :  { %v204_v28 = vmul.f32 %v197_v24, %v168_v27 }
  0xe4   :  { %v170_v30 = vpop.f32.mrf.mxu0 }
  0xe5   :  { %v220_v31 = vadd.f32 %v213_v25, %v204_v28  ;;  %v205_v32 = vmul.f32 %v201_v26, %v170_v30 }
  0xe6   :  { %v172_v33 = vpop.f32.mrf.mxu0 }
  0xe7   :  { %224 = vst [vmem:[%s374_s4] sm:$0xff] %v220_v31  ;;  %v221_v34 = vadd.f32 %v217_v29, %v205_v32  ;;  %v206_v35 = vmul.f32 %v197_v24, %v172_v33 }
  0xe8   :  { %v174_v36 = vpop.f32.mrf.mxu0 }
  0xe9   :  { %225 = vst [vmem:[%s374_s4 + $0x8] sm:$0xff] %v221_v34  ;;  %v222_v37 = vadd.f32 %v213_v25, %v206_v35  ;;  %v207_v38 = vmul.f32 %v201_v26, %v174_v36 }
  0xeb   :  { %226 = vst [vmem:[%s374_s4 + $0x10] sm:$0xff] %v222_v37  ;;  %v223_v39 = vadd.f32 %v217_v29, %v207_v38 }
  0xed   :  { %227 = vst [vmem:[%s374_s4 + $0x18] sm:$0xff] %v223_v39 }

// kernel: resnet_encoder_forward.35
= control target key start
LH: loop header
LB: loop body
LE: loop exit
PB: predicated region body
PF: predicated region fallthrough
CT: control target
= control target key end

     0   :  { %s1020_s15 = smov 0   ;;  %s1022_s16 = smov 0   ;;  %s1146_s0 = inlined_call_operand.vmem [shape: bf16[16,2304], index: 0, kind: input, shape index: {}]   ;;  %s1147_s1 = inlined_call_operand.vmem [shape: bf16[2304,256], index: 1, kind: input, shape index: {}]   ;;  %s1148_s2 = inlined_call_operand.vmem [shape: f32[1,256], index: 2, kind: input, shape index: {}]   ;;  %s1149_s3 = inlined_call_operand.vmem [shape: f32[1,256], index: 3, kind: input, shape index: {}]   ;;  %s1150_s4 = inlined_call_operand.vmem [shape: f32[16,256], index: 4, kind: output, shape index: {}]  }
   0x1   :  { %s1024_s17 = smov 0   ;;  %s1026_s18 = smov 0  }
   0x2   :  { %s1028_s19 = smov 0  }
   0x3 LB: > { %s26_s20 = sadd.s32 1, %s988_s18  ;;  %p49_p1 = scmp.ne.s32.totalorder %s980_s16, %s976_s15  ;;  %s992_s19 = sphi %s1028_s19, %s14_s19   ;;  %s988_s18 = sphi %s1026_s18, %s1154_s18   ;;  %s984_s17 = sphi %s1024_s17, %s1153_s17   ;;  %s980_s16 = sphi %s1022_s16, %s1152_s16   ;;  %s976_s15 = sphi %s1020_s15, %s1151_s15  }
   0x4   : > { %p27_p0 = scmp.ge.s32.totalorder %s26_s20, 9  ;;  %p50_p2 = scmp.eq.s32.totalorder %s992_s19, 0 }
   0x5   : > { %s42_s22 = sadd.s32 1, %s980_s16  ;;  %p811_p5 = scmp.ge.s32.totalorder %s992_s19, 9 }
   0x6   : > { %s1156_s20 = smov (%p27_p0, %s26_s20), 0  ;;  %p51_p3 = por %p50_p2, %p49_p1 }
   0x7   : > { %s38_s21 = ssub.s32 %s988_s18, %s1156_s20  ;;  %199 = sbr.rel (%p811_p5) target bundleno = 17 (0x11), region = 24 }
   0x8   : > { %p40_p4 = scmp.eq.s32.totalorder %s38_s21, 0 }
   0xa   : > { %s1055_s23 = scalar_select %p40_p4, %s980_s16, %s42_s22  }
   0xc   : > { %202 = sbr.rel (!%p51_p3) target bundleno = 17 (0x11), region = 28  ;;  %s204_s24 = sand.u32 (%p51_p3), 1, %s980_s16  }
   0xd   : > { %s860_s25 = sshll.u32 (%p51_p3), %s988_s18, 3  ;;  %s812_s26 = sshll.u32 (%p51_p3), %s204_s24, 4 }
   0xe   : > { %s212_s29 = scalar_lea.vmem (%p51_p3), %s1146_s0, %s860_s25  ;;  %s206_s30 = scalar_lea.vmem (%p51_p3), [#allocation3], %s812_s26 }
   0xf   : > { %v243_v0 = vld [vmem:[%s212_s29] sm:$0xff] (%p51_p3)  ;;  %v245_v1 = vld [vmem:[%s212_s29 + $0x48] sm:$0xff] (%p51_p3) }
  0x10   : > { %244 = vst [vmem:[%s206_s30] sm:$0xff] (%p51_p3), %v243_v0  ;;  %246 = vst [vmem:[%s206_s30 + $0x8] sm:$0xff] (%p51_p3), %v245_v1 }
  0x11 PF: > { %p815_p6 = scmp.ge.s32.totalorder %s992_s19, 1  ;;  %p266_p7 = scmp.lt.s32.totalorder %s992_s19, 10 }
  0x13   : > { %p267_p8 = pnand %p815_p6, %p266_p7 }
  0x14   : > { %s273_s5 = sand.u32 (!%p267_p8), 1, %s976_s15   ;;  %s817_s6 = sshll.u32 (!%p267_p8), %s984_s17, 5 }
  0x15   : > { %270 = sbr.rel (%p267_p8) target bundleno = 317 (0x13d), region = 70  ;;  %s1067_s7 = sshll.u32 (!%p267_p8), %s273_s5, 4 }
  0x16   : > { %p325_p9 = scmp.lt.s32.totalorder (!%p267_p8), %s817_s6, 287  ;;  %s275_s12 = scalar_lea.vmem (!%p267_p8), [#allocation3], %s1067_s7 }
  0x17   : > { %p820_p10 = scmp.ne.s32.totalorder (!%p267_p8), %s984_s17, 0 }
  0x1a   : > { %s1158_s6 = smov (!%p325_p9, %s817_s6), 287  ;;  %360 = sbr.rel (%p820_p10) target bundleno = 34 (0x22), region = 78 }
  0x1b   : > { %s861_s8 = sshll.u32 %s1158_s6, 3 }
  0x1c   : > { %s1072_s11 = scalar_lea.vmem %s1147_s1, %s861_s8 }
  0x1f   : > { %v994_v2 = vmov 0.0  }
  0x20   : > { %361 = vst [vmem:[#allocation2 + $0x10] sm:$0xff] %v994_v2  ;;  %362 = vst [vmem:[#allocation2] sm:$0xff] %v994_v2 }
  0x21   : > { %363 = vst [vmem:[#allocation2 + $0x18] sm:$0xff] %v994_v2  ;;  %364 = vst [vmem:[#allocation2 + $0x8] sm:$0xff] %v994_v2 }
  0x22 PF: > { %v903_v3 = vld [vmem:[%s1072_s11 + $0x74] ss:$8 sps:$4 sm:$0xff]   ;;  %v905_v4 = vld [vmem:[%s1072_s11 + $0x70] ss:$8 sps:$4 sm:$0xff]   ;;  %v906_v5 = vld [vmem:[%s1072_s11 + $0x64] ss:$8 sps:$4 sm:$0xff]  }
  0x23   : > { %573 = vmatprep.subr.bf16.mxu0 %v903_v3  ;;  %v908_v6 = vld [vmem:[%s1072_s11 + $0x60] ss:$8 sps:$4 sm:$0xff]   ;;  %v909_v7 = vld [vmem:[%s1072_s11 + $0x54] ss:$8 sps:$4 sm:$0xff]   ;;  %v911_v8 = vld [vmem:[%s1072_s11 + $0x50] ss:$8 sps:$4 sm:$0xff]  }
  0x24   : > { %574 = vmatpush1.bf16.msra.mxu0 %v905_v4  ;;  %v912_v9 = vld [vmem:[%s1072_s11 + $0x44] ss:$8 sps:$4 sm:$0xff]   ;;  %v914_v10 = vld [vmem:[%s1072_s11 + $0x40] ss:$8 sps:$4 sm:$0xff]   ;;  %v915_v11 = vld [vmem:[%s1072_s11 + $0x34] ss:$8 sps:$4 sm:$0xff]  }
  0x25   : > { %575 = vmatprep.subr.bf16.mxu0 %v906_v5  ;;  %v917_v12 = vld [vmem:[%s1072_s11 + $0x30] ss:$8 sps:$4 sm:$0xff]   ;;  %v918_v13 = vld [vmem:[%s1072_s11 + $0x24] ss:$8 sps:$4 sm:$0xff]   ;;  %v920_v14 = vld [vmem:[%s1072_s11 + $0x20] ss:$8 sps:$4 sm:$0xff]  }
  0x26   : > { %v921_v15 = vld [vmem:[%s1072_s11 + $0x14] ss:$8 sps:$4 sm:$0xff]   ;;  %v923_v17 = vld [vmem:[%s1072_s11 + $0x10] ss:$8 sps:$4 sm:$0xff]   ;;  %v924_v18 = vld [vmem:[%s1072_s11 + $0x4] ss:$8 sps:$4 sm:$0xff]  }
  0x27   : > { %v953_v16 = vld [vmem:[%s275_s12 + $0x4] ss:$8 sps:$4 sm:$0xff]   ;;  %v926_v19 = vld [vmem:[%s1072_s11] ss:$8 sps:$4 sm:$0xff]   ;;  %v929_v21 = vld [vmem:[%s1072_s11 + $0xf0] ss:$8 sps:$4 sm:$0xff]  }
  0x28   : > { %576 = vmatpush1.bf16.msra.mxu0 %v908_v6  ;;  %605 = vmatprep.mubr.bf16.mxu0 %v953_v16  ;;  %v927_v20 = vld [vmem:[%s1072_s11 + $0xf4] ss:$8 sps:$4 sm:$0xff]   ;;  %v930_v22 = vld [vmem:[%s1072_s11 + $0xe4] ss:$8 sps:$4 sm:$0xff]   ;;  %v932_v23 = vld [vmem:[%s1072_s11 + $0xe0] ss:$8 sps:$4 sm:$0xff]  }
  0x29   : > { %577 = vmatprep.subr.bf16.mxu0 %v909_v7  ;;  %v933_v24 = vld [vmem:[%s1072_s11 + $0xd4] ss:$8 sps:$4 sm:$0xff]   ;;  %v935_v25 = vld [vmem:[%s1072_s11 + $0xd0] ss:$8 sps:$4 sm:$0xff]   ;;  %v936_v26 = vld [vmem:[%s1072_s11 + $0xc4] ss:$8 sps:$4 sm:$0xff]  }
  0x2a   : > { %v938_v27 = vld [vmem:[%s1072_s11 + $0xc0] ss:$8 sps:$4 sm:$0xff]   ;;  %v939_v28 = vld [vmem:[%s1072_s11 + $0xb4] ss:$8 sps:$4 sm:$0xff]   ;;  %v941_v29 = vld [vmem:[%s1072_s11 + $0xb0] ss:$8 sps:$4 sm:$0xff]  }
  0x2b   : > { %v942_v30 = vld [vmem:[%s1072_s11 + $0xa4] ss:$8 sps:$4 sm:$0xff]   ;;  %v944_v31 = vld [vmem:[%s1072_s11 + $0xa0] ss:$8 sps:$4 sm:$0xff]   ;;  %v945_v32 = vld [vmem:[%s1072_s11 + $0x94] ss:$8 sps:$4 sm:$0xff]  }
  0x2c   : > { %578 = vmatpush1.bf16.msra.mxu0 %v911_v8  ;;  %v947_v33 = vld [vmem:[%s1072_s11 + $0x90] ss:$8 sps:$4 sm:$0xff]   ;;  %v948_v34 = vld [vmem:[%s1072_s11 + $0x84] ss:$8 sps:$4 sm:$0xff]   ;;  %v950_v35 = vld [vmem:[%s1072_s11 + $0x80] ss:$8 sps:$4 sm:$0xff]  }
  0x2d   : > { %579 = vmatprep.subr.bf16.mxu0 %v912_v9  ;;  %v951_v36 = vld [vmem:[%s275_s12] ss:$8 sps:$4 sm:$0xff]   ;;  %p855_p11 = scmp.ne.s32.totalorder %s984_s17, 8 }
  0x2e   : > { %v365_v37 = vld [vmem:[#allocation2 + $0x10] sm:$0xff]  ;;  %v366_v39 = vld [vmem:[#allocation2] sm:$0xff]  ;;  %v367_v42 = vld [vmem:[#allocation2 + $0x18] sm:$0xff] }
  0x2f   : > { %v368_v45 = vld [vmem:[#allocation2 + $0x8] sm:$0xff] }
  0x30   : > { %580 = vmatpush1.bf16.msra.mxu0 %v914_v10 }
  0x31   : > { %581 = vmatprep.subr.bf16.mxu0 %v915_v11 }
  0x34   : > { %582 = vmatpush1.bf16.msra.mxu0 %v917_v12 }
  0x35   : > { %583 = vmatprep.subr.bf16.mxu0 %v918_v13 }
  0x38   : > { %584 = vmatpush1.bf16.msra.mxu0 %v920_v14 }
  0x39   : > { %585 = vmatprep.subr.bf16.mxu0 %v921_v15 }
  0x3c   : > { %586 = vmatpush1.bf16.msra.mxu0 %v923_v17 }
  0x3d   : > { %587 = vmatprep.subr.bf16.mxu0 %v924_v18 }
  0x40   : > { %588 = vmatpush1.bf16.msra.mxu0 %v926_v19 }
  0x41   : > { %589 = vmatprep.subr.bf16.mxu0 %v927_v20 }
  0x44   : > { %590 = vmatpush2.bf16.msra.mxu0 %v929_v21 }
  0x45   : > { %591 = vmatprep.subr.bf16.mxu0 %v930_v22 }
  0x48   : > { %592 = vmatpush2.bf16.msra.mxu0 %v932_v23 }
  0x49   : > { %593 = vmatprep.subr.bf16.mxu0 %v933_v24 }
  0x4c   : > { %594 = vmatpush2.bf16.msra.mxu0 %v935_v25 }
  0x4d   : > { %595 = vmatprep.subr.bf16.mxu0 %v936_v26 }
  0x50   : > { %596 = vmatpush2.bf16.msra.mxu0 %v938_v27 }
  0x51   : > { %597 = vmatprep.subr.bf16.mxu0 %v939_v28 }
  0x54   : > { %598 = vmatpush2.bf16.msra.mxu0 %v941_v29 }
  0x55   : > { %599 = vmatprep.subr.bf16.mxu0 %v942_v30 }
  0x58   : > { %600 = vmatpush2.bf16.msra.mxu0 %v944_v31 }
  0x59   : > { %601 = vmatprep.subr.bf16.mxu0 %v945_v32 }
  0x5c   : > { %602 = vmatpush2.bf16.msra.mxu0 %v947_v33 }
  0x5d   : > { %603 = vmatprep.subr.bf16.mxu0 %v948_v34 }
  0x60   : > { %604 = vmatpush2.bf16.msra.mxu0 %v950_v35 }
  0x63   : > { %606 = vmatmul.mubr.bf16.vlgmr.msra.gmra.mxu0 %v951_v36 }
 0x123   : > { %v607_v38 = vpop.f32.mrf.mxu0 }
 0x124   : > { %v616_v40 = vadd.f32 %v607_v38, %v365_v37 }
 0x125   : > { %v609_v41 = vpop.f32.mrf.mxu0 }
 0x126   : > { %620 = vst [vmem:[#allocation2 + $0x10] sm:$0xff] %v616_v40  ;;  %v617_v43 = vadd.f32 %v609_v41, %v366_v39 }
 0x127   : > { %v611_v44 = vpop.f32.mrf.mxu0 }
 0x128   : > { %621 = vst [vmem:[#allocation2] sm:$0xff] %v617_v43  ;;  %v618_v46 = vadd.f32 %v611_v44, %v367_v42  ;;  %627 = sbr.rel (%p855_p11) target bundleno = 317 (0x13d), region = 82 }
 0x129   : > { %v613_v47 = vpop.f32.mrf.mxu0 }
 0x12a   : > { %622 = vst [vmem:[#allocation2 + $0x18] sm:$0xff] %v618_v46  ;;  %v619_v48 = vadd.f32 %v613_v47, %v368_v45 }
 0x12c   : > { %623 = vst [vmem:[#allocation2 + $0x8] sm:$0xff] %v619_v48 }
 0x12d   : > { %v634_v49 = vlaneseq  ;;  %v632_v51 = vld [vmem:[%s1148_s2] sm:$0x3]  ;;  %v628_v53 = vld [vmem:[#allocation2 + $0x10] sm:$0xff] }
 0x12e   : > { %v648_v52 = vld [vmem:[%s1149_s3] sm:$0x3] }
 0x12f   : > { %v635_v50 = vshrl.u32 %v634_v49, 7  ;;  %v629_v56 = vld [vmem:[#allocation2] sm:$0xff] }
 0x131   : > { %v636_v54 = vsub.s32 0, %v635_v50  ;;  %v640_v55 = vsub.s32 1, %v635_v50  ;;  %v630_v57 = vld [vmem:[#allocation2 + $0x18] sm:$0xff] }
 0x133   : > { %v631_v58 = vld [vmem:[#allocation2 + $0x8] sm:$0xff]  ;;  %v637_v59 = vrot.slane %v632_v51, %v636_v54  ;;  %v653_v60 = vrot.slane %v648_v52, %v636_v54  ;;  %v641_v61 = vrot.slane %v632_v51, %v640_v55  ;;  %v657_v62 = vrot.slane %v648_v52, %v640_v55 }
 0x135   : > { %v644_v63 = vmul.f32 %v637_v59, %v628_v53  ;;  %v645_v0 = vmul.f32 %v641_v61, %v629_v56  ;;  %v646_v1 = vmul.f32 %v637_v59, %v630_v57  ;;  %v647_v2 = vmul.f32 %v641_v61, %v631_v58 }
 0x137   : > { %v660_v3 = vadd.f32 %v653_v60, %v644_v63  ;;  %v661_v4 = vadd.f32 %v657_v62, %v645_v0  ;;  %v662_v5 = vadd.f32 %v653_v60, %v646_v1  ;;  %v663_v6 = vadd.f32 %v657_v62, %v647_v2 }
 0x139   : > { %v664_v7 = vmax.f32 %v660_v3, 0.0  ;;  %v665_v8 = vmax.f32 %v661_v4, 0.0  ;;  %v666_v9 = vmax.f32 %v662_v5, 0.0  ;;  %v667_v10 = vmax.f32 %v663_v6, 0.0 }
 0x13b   : > { %668 = vst [vmem:[%s1150_s4] sm:$0xff] %v664_v7  ;;  %669 = vst [vmem:[%s1150_s4 + $0x8] sm:$0xff] %v665_v8 }
 0x13c   : > { %670 = vst [vmem:[%s1150_s4 + $0x10] sm:$0xff] %v666_v9  ;;  %671 = vst [vmem:[%s1150_s4 + $0x18] sm:$0xff] %v667_v10 }
 0x13d PF: > { %s14_s19 = sadd.s32 1, %s992_s19   ;;  %s1151_s15 = smov %s980_s16 }
 0x13e   : > { %p11_p12 = scmp.ge.s32.totalorder %s14_s19, 11   ;;  %s1152_s16 = smov %s1055_s23 }
 0x13f   : > { %s1153_s17 = smov %s988_s18  ;;  %s1154_s18 = smov %s1156_s20 }
 0x140   :  { %13 = sbr.rel (!%p11_p12) target bundleno = 3 (0x3), region = 126 }

// kernel: resnet_encoder_forward.34
= control target key start
LH: loop header
LB: loop body
LE: loop exit
PB: predicated region body
PF: predicated region fallthrough
CT: control target
= control target key end

     0   :  { %s1123_s18 = smov 0   ;;  %s1125_s19 = smov 0   ;;  %s1261_s0 = inlined_call_operand.vmem [shape: bf16[16,2304], index: 0, kind: input, shape index: {}]   ;;  %s1262_s1 = inlined_call_operand.vmem [shape: bf16[2304,256], index: 1, kind: input, shape index: {}]   ;;  %s1263_s2 = inlined_call_operand.vmem [shape: f32[1,256], index: 2, kind: input, shape index: {}]   ;;  %s1264_s3 = inlined_call_operand.vmem [shape: f32[1,256], index: 3, kind: input, shape index: {}]   ;;  %s1265_s4 = inlined_call_operand.vmem [shape: f32[16,256], index: 4, kind: input, shape index: {}]   ;;  %s1266_s5 = inlined_call_operand.vmem [shape: f32[16,256], index: 5, kind: output, shape index: {}]  }
   0x1   :  { %s1127_s20 = smov 0   ;;  %s1129_s21 = smov 0  }
   0x2   :  { %s1131_s22 = smov 0  }
   0x3 LB: > { %s27_s23 = sadd.s32 1, %s1086_s21  ;;  %p50_p1 = scmp.ne.s32.totalorder %s1078_s19, %s1074_s18  ;;  %s1090_s22 = sphi %s1131_s22, %s15_s22   ;;  %s1086_s21 = sphi %s1129_s21, %s1270_s21   ;;  %s1082_s20 = sphi %s1127_s20, %s1269_s20   ;;  %s1078_s19 = sphi %s1125_s19, %s1268_s19   ;;  %s1074_s18 = sphi %s1123_s18, %s1267_s18  }
   0x4   : > { %p28_p0 = scmp.ge.s32.totalorder %s27_s23, 9  ;;  %p51_p2 = scmp.eq.s32.totalorder %s1090_s22, 0 }
   0x5   : > { %s43_s25 = sadd.s32 1, %s1078_s19  ;;  %p909_p5 = scmp.ge.s32.totalorder %s1090_s22, 9 }
   0x6   : > { %s1272_s23 = smov (%p28_p0, %s27_s23), 0  ;;  %p52_p3 = por %p51_p2, %p50_p1 }
   0x7   : > { %s39_s24 = ssub.s32 %s1086_s21, %s1272_s23  ;;  %243 = sbr.rel (%p909_p5) target bundleno = 17 (0x11), region = 28 }
   0x8   : > { %p41_p4 = scmp.eq.s32.totalorder %s39_s24, 0 }
   0xa   : > { %s1158_s26 = scalar_select %p41_p4, %s1078_s19, %s43_s25  }
   0xc   : > { %246 = sbr.rel (!%p52_p3) target bundleno = 17 (0x11), region = 32  ;;  %s248_s27 = sand.u32 (%p52_p3), 1, %s1078_s19  }
   0xd   : > { %s958_s28 = sshll.u32 (%p52_p3), %s1086_s21, 3  ;;  %s910_s29 = sshll.u32 (%p52_p3), %s248_s27, 4 }
   0xe   : > { %s256_s7 = scalar_lea.vmem (%p52_p3), %s1261_s0, %s958_s28  ;;  %s250_s8 = scalar_lea.vmem (%p52_p3), [#allocation3], %s910_s29 }
   0xf   : > { %v287_v0 = vld [vmem:[%s256_s7] sm:$0xff] (%p52_p3)  ;;  %v289_v1 = vld [vmem:[%s256_s7 + $0x48] sm:$0xff] (%p52_p3) }
  0x10   : > { %288 = vst [vmem:[%s250_s8] sm:$0xff] (%p52_p3), %v287_v0  ;;  %290 = vst [vmem:[%s250_s8 + $0x8] sm:$0xff] (%p52_p3), %v289_v1 }
  0x11 PF: > { %p913_p6 = scmp.ge.s32.totalorder %s1090_s22, 1  ;;  %p310_p7 = scmp.lt.s32.totalorder %s1090_s22, 10 }
  0x13   : > { %p311_p8 = pnand %p913_p6, %p310_p7 }
  0x14   : > { %s317_s9 = sand.u32 (!%p311_p8), 1, %s1074_s18   ;;  %s915_s10 = sshll.u32 (!%p311_p8), %s1082_s20, 5 }
  0x15   : > { %314 = sbr.rel (%p311_p8) target bundleno = 319 (0x13f), region = 74  ;;  %s1170_s11 = sshll.u32 (!%p311_p8), %s317_s9, 4 }
  0x16   : > { %p381_p9 = scmp.lt.s32.totalorder (!%p311_p8), %s915_s10, 287  ;;  %s319_s16 = scalar_lea.vmem (!%p311_p8), [#allocation3], %s1170_s11 }
  0x17   : > { %p918_p10 = scmp.ne.s32.totalorder (!%p311_p8), %s1082_s20, 0 }
  0x1a   : > { %s1274_s10 = smov (!%p381_p9, %s915_s10), 287  ;;  %428 = sbr.rel (%p918_p10) target bundleno = 34 (0x22), region = 82 }
  0x1b   : > { %s959_s12 = sshll.u32 %s1274_s10, 3 }
  0x1c   : > { %s1175_s15 = scalar_lea.vmem %s1262_s1, %s959_s12 }
  0x1f   : > { %v1092_v2 = vmov 0.0  }
  0x20   : > { %429 = vst [vmem:[#allocation2 + $0x10] sm:$0xff] %v1092_v2  ;;  %430 = vst [vmem:[#allocation2] sm:$0xff] %v1092_v2 }
  0x21   : > { %431 = vst [vmem:[#allocation2 + $0x18] sm:$0xff] %v1092_v2  ;;  %432 = vst [vmem:[#allocation2 + $0x8] sm:$0xff] %v1092_v2 }
  0x22 PF: > { %v1001_v3 = vld [vmem:[%s1175_s15 + $0x74] ss:$8 sps:$4 sm:$0xff]   ;;  %v1003_v4 = vld [vmem:[%s1175_s15 + $0x70] ss:$8 sps:$4 sm:$0xff]   ;;  %v1004_v5 = vld [vmem:[%s1175_s15 + $0x64] ss:$8 sps:$4 sm:$0xff]  }
  0x23   : > { %641 = vmatprep.subr.bf16.mxu0 %v1001_v3  ;;  %v1006_v6 = vld [vmem:[%s1175_s15 + $0x60] ss:$8 sps:$4 sm:$0xff]   ;;  %v1007_v7 = vld [vmem:[%s1175_s15 + $0x54] ss:$8 sps:$4 sm:$0xff]   ;;  %v1009_v8 = vld [vmem:[%s1175_s15 + $0x50] ss:$8 sps:$4 sm:$0xff]  }
  0x24   : > { %642 = vmatpush1.bf16.msra.mxu0 %v1003_v4  ;;  %v1010_v9 = vld [vmem:[%s1175_s15 + $0x44] ss:$8 sps:$4 sm:$0xff]   ;;  %v1012_v10 = vld [vmem:[%s1175_s15 + $0x40] ss:$8 sps:$4 sm:$0xff]   ;;  %v1013_v11 = vld [vmem:[%s1175_s15 + $0x34] ss:$8 sps:$4 sm:$0xff]  }
  0x25   : > { %643 = vmatprep.subr.bf16.mxu0 %v1004_v5  ;;  %v1015_v12 = vld [vmem:[%s1175_s15 + $0x30] ss:$8 sps:$4 sm:$0xff]   ;;  %v1016_v13 = vld [vmem:[%s1175_s15 + $0x24] ss:$8 sps:$4 sm:$0xff]   ;;  %v1018_v14 = vld [vmem:[%s1175_s15 + $0x20] ss:$8 sps:$4 sm:$0xff]  }
  0x26   : > { %v1019_v15 = vld [vmem:[%s1175_s15 + $0x14] ss:$8 sps:$4 sm:$0xff]   ;;  %v1021_v17 = vld [vmem:[%s1175_s15 + $0x10] ss:$8 sps:$4 sm:$0xff]   ;;  %v1022_v18 = vld [vmem:[%s1175_s15 + $0x4] ss:$8 sps:$4 sm:$0xff]  }
  0x27   : > { %v1051_v16 = vld [vmem:[%s319_s16 + $0x4] ss:$8 sps:$4 sm:$0xff]   ;;  %v1024_v19 = vld [vmem:[%s1175_s15] ss:$8 sps:$4 sm:$0xff]   ;;  %v1027_v21 = vld [vmem:[%s1175_s15 + $0xf0] ss:$8 sps:$4 sm:$0xff]  }
  0x28   : > { %644 = vmatpush1.bf16.msra.mxu0 %v1006_v6  ;;  %673 = vmatprep.mubr.bf16.mxu0 %v1051_v16  ;;  %v1025_v20 = vld [vmem:[%s1175_s15 + $0xf4] ss:$8 sps:$4 sm:$0xff]   ;;  %v1028_v22 = vld [vmem:[%s1175_s15 + $0xe4] ss:$8 sps:$4 sm:$0xff]   ;;  %v1030_v23 = vld [vmem:[%s1175_s15 + $0xe0] ss:$8 sps:$4 sm:$0xff]  }
  0x29   : > { %645 = vmatprep.subr.bf16.mxu0 %v1007_v7  ;;  %v1031_v24 = vld [vmem:[%s1175_s15 + $0xd4] ss:$8 sps:$4 sm:$0xff]   ;;  %v1033_v25 = vld [vmem:[%s1175_s15 + $0xd0] ss:$8 sps:$4 sm:$0xff]   ;;  %v1034_v26 = vld [vmem:[%s1175_s15 + $0xc4] ss:$8 sps:$4 sm:$0xff]  }
  0x2a   : > { %v1036_v27 = vld [vmem:[%s1175_s15 + $0xc0] ss:$8 sps:$4 sm:$0xff]   ;;  %v1037_v28 = vld [vmem:[%s1175_s15 + $0xb4] ss:$8 sps:$4 sm:$0xff]   ;;  %v1039_v29 = vld [vmem:[%s1175_s15 + $0xb0] ss:$8 sps:$4 sm:$0xff]  }
  0x2b   : > { %v1040_v30 = vld [vmem:[%s1175_s15 + $0xa4] ss:$8 sps:$4 sm:$0xff]   ;;  %v1042_v31 = vld [vmem:[%s1175_s15 + $0xa0] ss:$8 sps:$4 sm:$0xff]   ;;  %v1043_v32 = vld [vmem:[%s1175_s15 + $0x94] ss:$8 sps:$4 sm:$0xff]  }
  0x2c   : > { %646 = vmatpush1.bf16.msra.mxu0 %v1009_v8  ;;  %v1045_v33 = vld [vmem:[%s1175_s15 + $0x90] ss:$8 sps:$4 sm:$0xff]   ;;  %v1046_v34 = vld [vmem:[%s1175_s15 + $0x84] ss:$8 sps:$4 sm:$0xff]   ;;  %v1048_v35 = vld [vmem:[%s1175_s15 + $0x80] ss:$8 sps:$4 sm:$0xff]  }
  0x2d   : > { %647 = vmatprep.subr.bf16.mxu0 %v1010_v9  ;;  %v1049_v36 = vld [vmem:[%s319_s16] ss:$8 sps:$4 sm:$0xff]   ;;  %p953_p11 = scmp.ne.s32.totalorder %s1082_s20, 8 }
  0x2e   : > { %v433_v37 = vld [vmem:[#allocation2 + $0x10] sm:$0xff]  ;;  %v434_v39 = vld [vmem:[#allocation2] sm:$0xff]  ;;  %v435_v42 = vld [vmem:[#allocation2 + $0x18] sm:$0xff] }
  0x2f   : > { %v436_v45 = vld [vmem:[#allocation2 + $0x8] sm:$0xff] }
  0x30   : > { %648 = vmatpush1.bf16.msra.mxu0 %v1012_v10 }
  0x31   : > { %649 = vmatprep.subr.bf16.mxu0 %v1013_v11 }
  0x34   : > { %650 = vmatpush1.bf16.msra.mxu0 %v1015_v12 }
  0x35   : > { %651 = vmatprep.subr.bf16.mxu0 %v1016_v13 }
  0x38   : > { %652 = vmatpush1.bf16.msra.mxu0 %v1018_v14 }
  0x39   : > { %653 = vmatprep.subr.bf16.mxu0 %v1019_v15 }
  0x3c   : > { %654 = vmatpush1.bf16.msra.mxu0 %v1021_v17 }
  0x3d   : > { %655 = vmatprep.subr.bf16.mxu0 %v1022_v18 }
  0x40   : > { %656 = vmatpush1.bf16.msra.mxu0 %v1024_v19 }
  0x41   : > { %657 = vmatprep.subr.bf16.mxu0 %v1025_v20 }
  0x44   : > { %658 = vmatpush2.bf16.msra.mxu0 %v1027_v21 }
  0x45   : > { %659 = vmatprep.subr.bf16.mxu0 %v1028_v22 }
  0x48   : > { %660 = vmatpush2.bf16.msra.mxu0 %v1030_v23 }
  0x49   : > { %661 = vmatprep.subr.bf16.mxu0 %v1031_v24 }
  0x4c   : > { %662 = vmatpush2.bf16.msra.mxu0 %v1033_v25 }
  0x4d   : > { %663 = vmatprep.subr.bf16.mxu0 %v1034_v26 }
  0x50   : > { %664 = vmatpush2.bf16.msra.mxu0 %v1036_v27 }
  0x51   : > { %665 = vmatprep.subr.bf16.mxu0 %v1037_v28 }
  0x54   : > { %666 = vmatpush2.bf16.msra.mxu0 %v1039_v29 }
  0x55   : > { %667 = vmatprep.subr.bf16.mxu0 %v1040_v30 }
  0x58   : > { %668 = vmatpush2.bf16.msra.mxu0 %v1042_v31 }
  0x59   : > { %669 = vmatprep.subr.bf16.mxu0 %v1043_v32 }
  0x5c   : > { %670 = vmatpush2.bf16.msra.mxu0 %v1045_v33 }
  0x5d   : > { %671 = vmatprep.subr.bf16.mxu0 %v1046_v34 }
  0x60   : > { %672 = vmatpush2.bf16.msra.mxu0 %v1048_v35 }
  0x63   : > { %674 = vmatmul.mubr.bf16.vlgmr.msra.gmra.mxu0 %v1049_v36 }
 0x123   : > { %v675_v38 = vpop.f32.mrf.mxu0 }
 0x124   : > { %v684_v40 = vadd.f32 %v675_v38, %v433_v37 }
 0x125   : > { %v677_v41 = vpop.f32.mrf.mxu0 }
 0x126   : > { %688 = vst [vmem:[#allocation2 + $0x10] sm:$0xff] %v684_v40  ;;  %v685_v43 = vadd.f32 %v677_v41, %v434_v39 }
 0x127   : > { %v679_v44 = vpop.f32.mrf.mxu0 }
 0x128   : > { %689 = vst [vmem:[#allocation2] sm:$0xff] %v685_v43  ;;  %v686_v46 = vadd.f32 %v679_v44, %v435_v42  ;;  %695 = sbr.rel (%p953_p11) target bundleno = 319 (0x13f), region = 86 }
 0x129   : > { %v681_v47 = vpop.f32.mrf.mxu0 }
 0x12a   : > { %690 = vst [vmem:[#allocation2 + $0x18] sm:$0xff] %v686_v46  ;;  %v687_v48 = vadd.f32 %v681_v47, %v436_v45 }
 0x12c   : > { %691 = vst [vmem:[#allocation2 + $0x8] sm:$0xff] %v687_v48 }
 0x12d   : > { %v702_v49 = vlaneseq  ;;  %v700_v51 = vld [vmem:[%s1263_s2] sm:$0x3]  ;;  %v696_v53 = vld [vmem:[#allocation2 + $0x10] sm:$0xff]  ;;  %v733_v4 = vld [vmem:[%s1265_s4 + $0x8] sm:$0xff] }
 0x12e   : > { %v716_v52 = vld [vmem:[%s1264_s3] sm:$0x3]  ;;  %v734_v5 = vld [vmem:[%s1265_s4 + $0x10] sm:$0xff]  ;;  %v735_v6 = vld [vmem:[%s1265_s4 + $0x18] sm:$0xff] }
 0x12f   : > { %v703_v50 = vshrl.u32 %v702_v49, 7  ;;  %v697_v56 = vld [vmem:[#allocation2] sm:$0xff] }
 0x130   : > { %v732_v0 = vld [vmem:[%s1265_s4] sm:$0xff] }
 0x131   : > { %v704_v54 = vsub.s32 0, %v703_v50  ;;  %v708_v55 = vsub.s32 1, %v703_v50  ;;  %v698_v57 = vld [vmem:[#allocation2 + $0x18] sm:$0xff] }
 0x133   : > { %v699_v58 = vld [vmem:[#allocation2 + $0x8] sm:$0xff]  ;;  %v705_v59 = vrot.slane %v700_v51, %v704_v54  ;;  %v721_v60 = vrot.slane %v716_v52, %v704_v54  ;;  %v709_v61 = vrot.slane %v700_v51, %v708_v55  ;;  %v725_v62 = vrot.slane %v716_v52, %v708_v55 }
 0x135   : > { %v712_v63 = vmul.f32 %v705_v59, %v696_v53  ;;  %v713_v1 = vmul.f32 %v709_v61, %v697_v56  ;;  %v714_v2 = vmul.f32 %v705_v59, %v698_v57  ;;  %v715_v3 = vmul.f32 %v709_v61, %v699_v58 }
 0x137   : > { %v728_v7 = vadd.f32 %v721_v60, %v712_v63  ;;  %v729_v8 = vadd.f32 %v725_v62, %v713_v1  ;;  %v730_v9 = vadd.f32 %v721_v60, %v714_v2  ;;  %v731_v10 = vadd.f32 %v725_v62, %v715_v3 }
 0x139   : > { %v736_v11 = vadd.f32 %v732_v0, %v728_v7  ;;  %v737_v12 = vadd.f32 %v733_v4, %v729_v8  ;;  %v738_v13 = vadd.f32 %v734_v5, %v730_v9  ;;  %v739_v14 = vadd.f32 %v735_v6, %v731_v10 }
 0x13b   : > { %v740_v15 = vmax.f32 %v736_v11, 0.0  ;;  %v741_v16 = vmax.f32 %v737_v12, 0.0  ;;  %v742_v17 = vmax.f32 %v738_v13, 0.0  ;;  %v743_v18 = vmax.f32 %v739_v14, 0.0 }
 0x13d   : > { %744 = vst [vmem:[%s1266_s5] sm:$0xff] %v740_v15  ;;  %745 = vst [vmem:[%s1266_s5 + $0x8] sm:$0xff] %v741_v16 }
 0x13e   : > { %746 = vst [vmem:[%s1266_s5 + $0x10] sm:$0xff] %v742_v17  ;;  %747 = vst [vmem:[%s1266_s5 + $0x18] sm:$0xff] %v743_v18 }
 0x13f PF: > { %s15_s22 = sadd.s32 1, %s1090_s22   ;;  %s1267_s18 = smov %s1078_s19 }
 0x140   : > { %p12_p12 = scmp.ge.s32.totalorder %s15_s22, 11   ;;  %s1268_s19 = smov %s1158_s26 }
 0x141   : > { %s1269_s20 = smov %s1086_s21  ;;  %s1270_s21 = smov %s1272_s23 }
 0x142   :  { %14 = sbr.rel (!%p12_p12) target bundleno = 3 (0x3), region = 133 }

// kernel: resnet_encoder_forward.37
= control target key start
LH: loop header
LB: loop body
LE: loop exit
PB: predicated region body
PF: predicated region fallthrough
CT: control target
= control target key end

     0   :  { %s1270_s15 = smov 0   ;;  %s1272_s16 = smov 0   ;;  %s1570_s0 = inlined_call_operand.vmem [shape: bf16[16,2304], index: 0, kind: input, shape index: {}]   ;;  %s1571_s1 = inlined_call_operand.vmem [shape: bf16[2304,512], index: 1, kind: input, shape index: {}]   ;;  %s1572_s2 = inlined_call_operand.vmem [shape: f32[1,512], index: 2, kind: input, shape index: {}]   ;;  %s1573_s3 = inlined_call_operand.vmem [shape: f32[1,512], index: 3, kind: input, shape index: {}]   ;;  %s1574_s4 = inlined_call_operand.vmem [shape: f32[16,512], index: 4, kind: output, shape index: {}]  }
   0x1   :  { %s1274_s17 = smov 0   ;;  %s1276_s18 = smov 0  }
   0x2   :  { %s1278_s19 = smov 0   ;;  %s1280_s20 = smov 0  }
   0x3   :  { %s1282_s21 = smov 0   ;;  %s1284_s22 = smov 0  }
   0x4   :  { %s1286_s23 = smov 0   ;;  %s1288_s24 = smov 0  }
   0x5   :  { %s1290_s25 = smov 0  }
   0x6 LB: > { %1578 = sst [smem:[#allocation6_spill]] %s1222_s20  ;;  %s954_s26 = sadd.s32 4294967295, %s1242_s25   ;;  %s1242_s25 = sphi %s1290_s25, %s14_s25   ;;  %s1238_s24 = sphi %s1288_s24, %s1596_s24   ;;  %s1234_s23 = sphi %s1286_s23, %s1595_s23   ;;  %s1230_s22 = sphi %s1284_s22, %s1594_s22   ;;  %s1226_s21 = sphi %s1282_s21, %s1593_s21   ;;  %s1222_s20 = sphi %s1280_s20, %s1586_s20   ;;  %s1218_s19 = sphi %s1278_s19, %s1585_s19   ;;  %s1214_s18 = sphi %s1276_s18, %s1592_s18   ;;  %s1210_s17 = sphi %s1274_s17, %s1591_s17   ;;  %s1206_s16 = sphi %s1272_s16, %s1590_s16   ;;  %s1202_s15 = sphi %s1270_s15, %s1589_s15  }
   0x7   : > { %s26_s27 = sadd.s32 1, %s1234_s23  ;;  %s29_s28 = sadd.s32 1, %s1238_s24 }
   0x8   : > { %p27_p0 = scmp.ge.s32.totalorder %s26_s27, 9  ;;  %s42_s29 = sadd.s32 1, %s1222_s20 }
   0x9   : > { %p49_p1 = scmp.ne.s32.totalorder %s1222_s20, %s1218_s19  ;;  %p50_p2 = scmp.eq.s32.totalorder %s1242_s25, 0 }
   0xa   : > { %s1598_s27 = smov (%p27_p0, %s26_s27), 0  ;;  %s1600_s28 = smov (!%p27_p0, %s29_s28), %s1238_s24 }
   0xb   : > { %1579 = sst [smem:[#allocation7_spill]] %s1598_s27  ;;  %s38_s30 = ssub.s32 %s1234_s23, %s1598_s27 }
   0xc   : > { %p31_p3 = scmp.ge.s32.totalorder %s1600_s28, 2  ;;  %p40_p4 = scmp.eq.s32.totalorder %s38_s30, 0 }
   0xd   : > { %p1337_p5 = por %p50_p2, %p49_p1  ;;  %s70_s6 = sadd.s32 1, %s1214_s18 }
   0xe   : > { %s1602_s28 = smov (%p31_p3, %s1600_s28), 0  ;;  %p77_p6 = scmp.ne.s32.totalorder %s1214_s18, %s1210_s17 }
   0xf   : > { %1581 = sst [smem:[#allocation8_spill]] %s1602_s28  ;;  %s66_s8 = ssub.s32 %s1238_s24, %s1602_s28 }
  0x10   : > { %s1345_s7 = scalar_select %p40_p4, %s1222_s20, %s42_s29  }
  0x11   : > { %s67_s9 = sor.u32 %s66_s8, %s38_s30  ;;  %p148_p7 = scmp.eq.s32.totalorder %s66_s8, 0 }
  0x12   : > { %1582 = sst [smem:[#allocation9_spill]] %s1345_s7  ;;  %p68_p8 = scmp.eq.s32.totalorder %s67_s9, 0 }
  0x13   : > { %p1351_p9 = por %p77_p6, %p50_p2  ;;  %s150_s11 = sadd.s32 1, %s1206_s16 }
  0x14   : > { %p160_p10 = scmp.ne.s32.totalorder %s1206_s16, %s1202_s15  ;;  %p161_p11 = scmp.eq.s32.totalorder %s954_s26, 17 }
  0x15   : > { %s1359_s12 = scalar_select %p68_p8, %s1214_s18, %s70_s6  }
  0x16   : > { %s1362_s13 = scalar_select %p148_p7, %s1206_s16, %s150_s11  }
  0x17   : > { %p1364_p12 = por %p161_p11, %p160_p10  ;;  %p957_p13 = scmp.ge.s32.totalorder %s1242_s25, 18 }
  0x19   : > { %183 = sbr.rel (%p957_p13) target bundleno = 58 (0x3a), region = 16 }
  0x1e   : > { %186 = sbr.rel (!%p1337_p5) target bundleno = 35 (0x23), region = 20  ;;  %s188_s29 = sand.u32 (%p1337_p5), 1, %s1222_s20  }
  0x1f   : > { %s1013_s30 = sshll.u32 (%p1337_p5), %s1234_s23, 3  ;;  %s958_s8 = sshll.u32 (%p1337_p5), %s188_s29, 4 }
  0x20   : > { %s196_s11 = scalar_lea.vmem (%p1337_p5), %s1570_s0, %s1013_s30  ;;  %s190_s26 = scalar_lea.vmem (%p1337_p5), [#allocation3], %s958_s8 }
  0x21   : > { %v227_v0 = vld [vmem:[%s196_s11] sm:$0xff] (%p1337_p5)  ;;  %v229_v1 = vld [vmem:[%s196_s11 + $0x48] sm:$0xff] (%p1337_p5) }
  0x22   : > { %228 = vst [vmem:[%s190_s26] sm:$0xff] (%p1337_p5), %v227_v0  ;;  %230 = vst [vmem:[%s190_s26 + $0x8] sm:$0xff] (%p1337_p5), %v229_v1 }
  0x23 PF: > { %236 = sbr.rel (!%p1351_p9) target bundleno = 58 (0x3a), region = 58  ;;  %s238_s5 = sand.u32 (%p1351_p9), 1, %s1214_s18  }
  0x24   : > { %s963_s28 = sshll.u32 (%p1351_p9), %s1238_s24, 1  ;;  %s961_s27 = sshll.u32 (%p1351_p9), %s238_s5, 8 }
  0x25   : > { %s1014_s29 = sshll.u32 (%p1351_p9), %s1234_s23, 7  ;;  %s1389_s10 = scalar_lea.vmem (%p1351_p9), [#allocation4], %s961_s27 }
  0x26   : > { %s244_s7 = sadd.s32 (%p1351_p9), %s1014_s29, %s963_s28 }
  0x27   : > { %s965_s20 = sshll.u32 (%p1351_p9), %s244_s7, 2 }
  0x28   : > { %s1384_s9 = scalar_lea.vmem %s1571_s1, %s965_s20 }
  0x29   : > { %v337_v2 = vld [vmem:[%s1384_s9] sm:$0xff]  ;;  %v339_v3 = vld [vmem:[%s1384_s9 + $0x10] sm:$0xff] }
  0x2a   : > { %v341_v4 = vld [vmem:[%s1384_s9 + $0x20] sm:$0xff]  ;;  %338 = vst [vmem:[%s1389_s10] sm:$0xff] %v337_v2  ;;  %340 = vst [vmem:[%s1389_s10 + $0x8] sm:$0xff] %v339_v3  ;;  %v343_v5 = vld [vmem:[%s1384_s9 + $0x30] sm:$0xff] }
  0x2b   : > { %342 = vst [vmem:[%s1389_s10 + $0x10] sm:$0xff] %v341_v4  ;;  %v345_v6 = vld [vmem:[%s1384_s9 + $0x40] sm:$0xff]  ;;  %v347_v7 = vld [vmem:[%s1384_s9 + $0x50] sm:$0xff]  ;;  %344 = vst [vmem:[%s1389_s10 + $0x18] sm:$0xff] %v343_v5 }
  0x2c   : > { %346 = vst [vmem:[%s1389_s10 + $0x20] sm:$0xff] %v345_v6  ;;  %348 = vst [vmem:[%s1389_s10 + $0x28] sm:$0xff] %v347_v7  ;;  %v349_v8 = vld [vmem:[%s1384_s9 + $0x60] sm:$0xff]  ;;  %v351_v9 = vld [vmem:[%s1384_s9 + $0x70] sm:$0xff] }
  0x2d   : > { %v353_v10 = vld [vmem:[%s1384_s9 + $0x80] sm:$0xff]  ;;  %350 = vst [vmem:[%s1389_s10 + $0x30] sm:$0xff] %v349_v8  ;;  %352 = vst [vmem:[%s1389_s10 + $0x38] sm:$0xff] %v351_v9  ;;  %v355_v11 = vld [vmem:[%s1384_s9 + $0x90] sm:$0xff] }
  0x2e   : > { %354 = vst [vmem:[%s1389_s10 + $0x40] sm:$0xff] %v353_v10  ;;  %v357_v12 = vld [vmem:[%s1384_s9 + $0xa0] sm:$0xff]  ;;  %v359_v13 = vld [vmem:[%s1384_s9 + $0xb0] sm:$0xff]  ;;  %356 = vst [vmem:[%s1389_s10 + $0x48] sm:$0xff] %v355_v11 }
  0x2f   : > { %358 = vst [vmem:[%s1389_s10 + $0x50] sm:$0xff] %v357_v12  ;;  %360 = vst [vmem:[%s1389_s10 + $0x58] sm:$0xff] %v359_v13  ;;  %v361_v14 = vld [vmem:[%s1384_s9 + $0xc0] sm:$0xff]  ;;  %v363_v15 = vld [vmem:[%s1384_s9 + $0xd0] sm:$0xff] }
  0x30   : > { %v365_v16 = vld [vmem:[%s1384_s9 + $0xe0] sm:$0xff]  ;;  %362 = vst [vmem:[%s1389_s10 + $0x60] sm:$0xff] %v361_v14  ;;  %364 = vst [vmem:[%s1389_s10 + $0x68] sm:$0xff] %v363_v15  ;;  %v367_v17 = vld [vmem:[%s1384_s9 + $0xf0] sm:$0xff] }
  0x31   : > { %366 = vst [vmem:[%s1389_s10 + $0x70] sm:$0xff] %v365_v16  ;;  %v369_v18 = vld [vmem:[%s1384_s9 + $0x100] sm:$0xff]  ;;  %v371_v19 = vld [vmem:[%s1384_s9 + $0x110] sm:$0xff]  ;;  %368 = vst [vmem:[%s1389_s10 + $0x78] sm:$0xff] %v367_v17 }
  0x32   : > { %370 = vst [vmem:[%s1389_s10 + $0x80] sm:$0xff] %v369_v18  ;;  %372 = vst [vmem:[%s1389_s10 + $0x88] sm:$0xff] %v371_v19  ;;  %v373_v20 = vld [vmem:[%s1384_s9 + $0x120] sm:$0xff]  ;;  %v375_v21 = vld [vmem:[%s1384_s9 + $0x130] sm:$0xff] }
  0x33   : > { %v377_v22 = vld [vmem:[%s1384_s9 + $0x140] sm:$0xff]  ;;  %374 = vst [vmem:[%s1389_s10 + $0x90] sm:$0xff] %v373_v20  ;;  %376 = vst [vmem:[%s1389_s10 + $0x98] sm:$0xff] %v375_v21  ;;  %v379_v23 = vld [vmem:[%s1384_s9 + $0x150] sm:$0xff] }
  0x34   : > { %378 = vst [vmem:[%s1389_s10 + $0xa0] sm:$0xff] %v377_v22  ;;  %v381_v24 = vld [vmem:[%s1384_s9 + $0x160] sm:$0xff]  ;;  %v383_v25 = vld [vmem:[%s1384_s9 + $0x170] sm:$0xff]  ;;  %380 = vst [vmem:[%s1389_s10 + $0xa8] sm:$0xff] %v379_v23 }
  0x35   : > { %382 = vst [vmem:[%s1389_s10 + $0xb0] sm:$0xff] %v381_v24  ;;  %384 = vst [vmem:[%s1389_s10 + $0xb8] sm:$0xff] %v383_v25  ;;  %v385_v26 = vld [vmem:[%s1384_s9 + $0x180] sm:$0xff]  ;;  %v387_v27 = vld [vmem:[%s1384_s9 + $0x190] sm:$0xff] }
  0x36   : > { %v389_v28 = vld [vmem:[%s1384_s9 + $0x1a0] sm:$0xff]  ;;  %386 = vst [vmem:[%s1389_s10 + $0xc0] sm:$0xff] %v385_v26  ;;  %388 = vst [vmem:[%s1389_s10 + $0xc8] sm:$0xff] %v387_v27  ;;  %v391_v29 = vld [vmem:[%s1384_s9 + $0x1b0] sm:$0xff] }
  0x37   : > { %390 = vst [vmem:[%s1389_s10 + $0xd0] sm:$0xff] %v389_v28  ;;  %v393_v30 = vld [vmem:[%s1384_s9 + $0x1c0] sm:$0xff]  ;;  %v395_v31 = vld [vmem:[%s1384_s9 + $0x1d0] sm:$0xff]  ;;  %392 = vst [vmem:[%s1389_s10 + $0xd8] sm:$0xff] %v391_v29 }
  0x38   : > { %394 = vst [vmem:[%s1389_s10 + $0xe0] sm:$0xff] %v393_v30  ;;  %396 = vst [vmem:[%s1389_s10 + $0xe8] sm:$0xff] %v395_v31  ;;  %v397_v32 = vld [vmem:[%s1384_s9 + $0x1e0] sm:$0xff]  ;;  %v399_v33 = vld [vmem:[%s1384_s9 + $0x1f0] sm:$0xff] }
  0x39   : > { %398 = vst [vmem:[%s1389_s10 + $0xf0] sm:$0xff] %v397_v32  ;;  %400 = vst [vmem:[%s1389_s10 + $0xf8] sm:$0xff] %v399_v33 }
  0x3a PF: > { %p966_p0 = scmp.ge.s32.totalorder %s1242_s25, 1  ;;  %p421_p1 = scmp.lt.s32.totalorder %s1242_s25, 19 }
  0x3c   : > { %p422_p2 = pnand %p966_p0, %p421_p1 }
  0x3d   : > { %s428_s20 = sand.u32 (!%p422_p2), 1, %s1218_s19   ;;  %s435_s27 = sand.u32 (!%p422_p2), 1, %s1210_s17  }
  0x3e   : > { %425 = sbr.rel (%p422_p2) target bundleno = 368 (0x170), region = 104  ;;  %s1456_s28 = sshll.u32 (!%p422_p2), %s428_s20, 4 }
  0x3f   : > { %s968_s7 = sshll.u32 (!%p422_p2), %s435_s27, 8  ;;  %s468_s8 = sand.u32 (!%p422_p2), 1, %s1202_s15  }
  0x40   : > { %s970_s11 = sshll.u32 (!%p422_p2), %s1230_s22, 1  ;;  %s969_s26 = sshll.u32 (!%p422_p2), %s468_s8, 5 }
  0x41   : > { %p476_p3 = scmp.lt.s32.totalorder (!%p422_p2), %s970_s11, 3  ;;  %s430_s19 = scalar_lea.vmem (!%p422_p2), [#allocation3], %s1456_s28 }
  0x42   : > { %s1471_s10 = scalar_lea.vmem (!%p422_p2), [#allocation4], %s968_s7  ;;  %s1473_s20 = scalar_lea.vmem (!%p422_p2), [#allocation5], %s969_s26 }
  0x43   : > { %s1604_s11 = smov (!%p476_p3, %s970_s11), 3  ;;  %p972_p4 = scmp.ne.s32.totalorder %s1226_s21, 0 }
  0x44   : > { %s478_s6 = scalar_lea.vmem %s1572_s2, %s1604_s11  ;;  %s483_s17 = scalar_lea.vmem %s1573_s3, %s1604_s11 }
  0x45   : > { %490 = sbr.rel (%p972_p4) target bundleno = 77 (0x4d), region = 116 }
  0x4a   : > { %v1244_v34 = vmov 0.0  }
  0x4b   : > { %491 = vst [vmem:[#allocation2 + $0x10] sm:$0xff] %v1244_v34  ;;  %492 = vst [vmem:[#allocation2] sm:$0xff] %v1244_v34 }
  0x4c   : > { %493 = vst [vmem:[#allocation2 + $0x18] sm:$0xff] %v1244_v34  ;;  %494 = vst [vmem:[#allocation2 + $0x8] sm:$0xff] %v1244_v34 }
  0x4d PF: > { %v1105_v35 = vld [vmem:[%s1471_s10 + $0x74] ss:$8 sps:$4 sm:$0xff]   ;;  %v1107_v36 = vld [vmem:[%s1471_s10 + $0x70] ss:$8 sps:$4 sm:$0xff]   ;;  %v1108_v37 = vld [vmem:[%s1471_s10 + $0x64] ss:$8 sps:$4 sm:$0xff]  }
  0x4e   : > { %703 = vmatprep.subr.bf16.mxu0 %v1105_v35  ;;  %v1110_v38 = vld [vmem:[%s1471_s10 + $0x60] ss:$8 sps:$4 sm:$0xff]   ;;  %v1111_v39 = vld [vmem:[%s1471_s10 + $0x54] ss:$8 sps:$4 sm:$0xff]   ;;  %v1113_v40 = vld [vmem:[%s1471_s10 + $0x50] ss:$8 sps:$4 sm:$0xff]  }
  0x4f   : > { %704 = vmatpush1.bf16.msra.mxu0 %v1107_v36  ;;  %v1114_v41 = vld [vmem:[%s1471_s10 + $0x44] ss:$8 sps:$4 sm:$0xff]   ;;  %v1116_v42 = vld [vmem:[%s1471_s10 + $0x40] ss:$8 sps:$4 sm:$0xff]   ;;  %v1117_v43 = vld [vmem:[%s1471_s10 + $0x34] ss:$8 sps:$4 sm:$0xff]  }
  0x50   : > { %705 = vmatprep.subr.bf16.mxu0 %v1108_v37  ;;  %v1119_v44 = vld [vmem:[%s1471_s10 + $0x30] ss:$8 sps:$4 sm:$0xff]   ;;  %v1120_v45 = vld [vmem:[%s1471_s10 + $0x24] ss:$8 sps:$4 sm:$0xff]   ;;  %v1122_v46 = vld [vmem:[%s1471_s10 + $0x20] ss:$8 sps:$4 sm:$0xff]  }
  0x51   : > { %v1123_v47 = vld [vmem:[%s1471_s10 + $0x14] ss:$8 sps:$4 sm:$0xff]   ;;  %v1125_v49 = vld [vmem:[%s1471_s10 + $0x10] ss:$8 sps:$4 sm:$0xff]   ;;  %v1126_v50 = vld [vmem:[%s1471_s10 + $0x4] ss:$8 sps:$4 sm:$0xff]  }
  0x52   : > { %v1155_v48 = vld [vmem:[%s430_s19 + $0x4] ss:$8 sps:$4 sm:$0xff]   ;;  %v1128_v51 = vld [vmem:[%s1471_s10] ss:$8 sps:$4 sm:$0xff]   ;;  %v1131_v53 = vld [vmem:[%s1471_s10 + $0xf0] ss:$8 sps:$4 sm:$0xff]  }
  0x53   : > { %706 = vmatpush1.bf16.msra.mxu0 %v1110_v38  ;;  %735 = vmatprep.mubr.bf16.mxu0 %v1155_v48  ;;  %v1129_v52 = vld [vmem:[%s1471_s10 + $0xf4] ss:$8 sps:$4 sm:$0xff]   ;;  %v1132_v54 = vld [vmem:[%s1471_s10 + $0xe4] ss:$8 sps:$4 sm:$0xff]   ;;  %v1134_v55 = vld [vmem:[%s1471_s10 + $0xe0] ss:$8 sps:$4 sm:$0xff]  }
  0x54   : > { %707 = vmatprep.subr.bf16.mxu0 %v1111_v39  ;;  %v1135_v56 = vld [vmem:[%s1471_s10 + $0xd4] ss:$8 sps:$4 sm:$0xff]   ;;  %v1137_v57 = vld [vmem:[%s1471_s10 + $0xd0] ss:$8 sps:$4 sm:$0xff]   ;;  %v1138_v58 = vld [vmem:[%s1471_s10 + $0xc4] ss:$8 sps:$4 sm:$0xff]  }
  0x55   : > { %v1140_v59 = vld [vmem:[%s1471_s10 + $0xc0] ss:$8 sps:$4 sm:$0xff]   ;;  %v1141_v60 = vld [vmem:[%s1471_s10 + $0xb4] ss:$8 sps:$4 sm:$0xff]   ;;  %v1143_v61 = vld [vmem:[%s1471_s10 + $0xb0] ss:$8 sps:$4 sm:$0xff]  }
  0x56   : > { %v1144_v62 = vld [vmem:[%s1471_s10 + $0xa4] ss:$8 sps:$4 sm:$0xff]   ;;  %v1146_v63 = vld [vmem:[%s1471_s10 + $0xa0] ss:$8 sps:$4 sm:$0xff]   ;;  %v1147_v0 = vld [vmem:[%s1471_s10 + $0x94] ss:$8 sps:$4 sm:$0xff]  }
  0x57   : > { %708 = vmatpush1.bf16.msra.mxu0 %v1113_v40  ;;  %v1149_v1 = vld [vmem:[%s1471_s10 + $0x90] ss:$8 sps:$4 sm:$0xff]   ;;  %v1150_v2 = vld [vmem:[%s1471_s10 + $0x84] ss:$8 sps:$4 sm:$0xff]   ;;  %v1152_v3 = vld [vmem:[%s1471_s10 + $0x80] ss:$8 sps:$4 sm:$0xff]  }
  0x58   : > { %709 = vmatprep.subr.bf16.mxu0 %v1114_v41  ;;  %v1153_v4 = vld [vmem:[%s430_s19] ss:$8 sps:$4 sm:$0xff]   ;;  %p1007_p5 = scmp.ne.s32.totalorder %s1226_s21, 8 }
  0x59   : > { %v495_v5 = vld [vmem:[#allocation2 + $0x10] sm:$0xff]  ;;  %v496_v7 = vld [vmem:[#allocation2] sm:$0xff]  ;;  %v497_v10 = vld [vmem:[#allocation2 + $0x18] sm:$0xff] }
  0x5a   : > { %v498_v13 = vld [vmem:[#allocation2 + $0x8] sm:$0xff] }
  0x5b   : > { %710 = vmatpush1.bf16.msra.mxu0 %v1116_v42 }
  0x5c   : > { %711 = vmatprep.subr.bf16.mxu0 %v1117_v43 }
  0x5f   : > { %712 = vmatpush1.bf16.msra.mxu0 %v1119_v44 }
  0x60   : > { %713 = vmatprep.subr.bf16.mxu0 %v1120_v45 }
  0x63   : > { %714 = vmatpush1.bf16.msra.mxu0 %v1122_v46 }
  0x64   : > { %715 = vmatprep.subr.bf16.mxu0 %v1123_v47 }
  0x67   : > { %716 = vmatpush1.bf16.msra.mxu0 %v1125_v49 }
  0x68   : > { %717 = vmatprep.subr.bf16.mxu0 %v1126_v50 }
  0x6b   : > { %718 = vmatpush1.bf16.msra.mxu0 %v1128_v51 }
  0x6c   : > { %719 = vmatprep.subr.bf16.mxu0 %v1129_v52 }
  0x6f   : > { %720 = vmatpush2.bf16.msra.mxu0 %v1131_v53 }
  0x70   : > { %721 = vmatprep.subr.bf16.mxu0 %v1132_v54 }
  0x73   : > { %722 = vmatpush2.bf16.msra.mxu0 %v1134_v55 }
  0x74   : > { %723 = vmatprep.subr.bf16.mxu0 %v1135_v56 }
  0x77   : > { %724 = vmatpush2.bf16.msra.mxu0 %v1137_v57 }
  0x78   : > { %725 = vmatprep.subr.bf16.mxu0 %v1138_v58 }
  0x7b   : > { %726 = vmatpush2.bf16.msra.mxu0 %v1140_v59 }
  0x7c   : > { %727 = vmatprep.subr.bf16.mxu0 %v1141_v60 }
  0x7f   : > { %728 = vmatpush2.bf16.msra.mxu0 %v1143_v61 }
  0x80   : > { %729 = vmatprep.subr.bf16.mxu0 %v1144_v62 }
  0x83   : > { %730 = vmatpush2.bf16.msra.mxu0 %v1146_v63 }
  0x84   : > { %731 = vmatprep.subr.bf16.mxu0 %v1147_v0 }
  0x87   : > { %732 = vmatpush2.bf16.msra.mxu0 %v1149_v1 }
  0x88   : > { %733 = vmatprep.subr.bf16.mxu0 %v1150_v2 }
  0x8b   : > { %734 = vmatpush2.bf16.msra.mxu0 %v1152_v3 }
  0x8e   : > { %736 = vmatmul.mubr.bf16.vlgmr.msra.gmra.mxu0 %v1153_v4 }
 0x14e   : > { %v737_v6 = vpop.f32.mrf.mxu0 }
 0x14f   : > { %v746_v8 = vadd.f32 %v737_v6, %v495_v5 }
 0x150   : > { %v739_v9 = vpop.f32.mrf.mxu0 }
 0x151   : > { %750 = vst [vmem:[#allocation2 + $0x10] sm:$0xff] %v746_v8  ;;  %v747_v11 = vadd.f32 %v739_v9, %v496_v7 }
 0x152   : > { %v741_v12 = vpop.f32.mrf.mxu0 }
 0x153   : > { %751 = vst [vmem:[#allocation2] sm:$0xff] %v747_v11  ;;  %v748_v14 = vadd.f32 %v741_v12, %v497_v10  ;;  %757 = sbr.rel (%p1007_p5) target bundleno = 360 (0x168), region = 120 }
 0x154   : > { %v743_v15 = vpop.f32.mrf.mxu0 }
 0x155   : > { %752 = vst [vmem:[#allocation2 + $0x18] sm:$0xff] %v748_v14  ;;  %v749_v16 = vadd.f32 %v743_v15, %v498_v13 }
 0x157   : > { %753 = vst [vmem:[#allocation2 + $0x8] sm:$0xff] %v749_v16 }
 0x158   : > { %v764_v17 = vlaneseq  ;;  %v762_v19 = vld [vmem:[%s478_s6] sm:$0x3]  ;;  %v758_v21 = vld [vmem:[#allocation2 + $0x10] sm:$0xff] }
 0x159   : > { %v778_v20 = vld [vmem:[%s483_s17] sm:$0x3] }
 0x15a   : > { %v765_v18 = vshrl.u32 %v764_v17, 7  ;;  %v759_v24 = vld [vmem:[#allocation2] sm:$0xff] }
 0x15c   : > { %v766_v22 = vsub.s32 0, %v765_v18  ;;  %v770_v23 = vsub.s32 1, %v765_v18  ;;  %v760_v25 = vld [vmem:[#allocation2 + $0x18] sm:$0xff] }
 0x15e   : > { %v761_v26 = vld [vmem:[#allocation2 + $0x8] sm:$0xff]  ;;  %v767_v27 = vrot.slane %v762_v19, %v766_v22  ;;  %v783_v28 = vrot.slane %v778_v20, %v766_v22  ;;  %v771_v29 = vrot.slane %v762_v19, %v770_v23  ;;  %v787_v30 = vrot.slane %v778_v20, %v770_v23 }
 0x160   : > { %v774_v31 = vmul.f32 %v767_v27, %v758_v21  ;;  %v775_v32 = vmul.f32 %v771_v29, %v759_v24  ;;  %v776_v33 = vmul.f32 %v767_v27, %v760_v25  ;;  %v777_v34 = vmul.f32 %v771_v29, %v761_v26 }
 0x162   : > { %v790_v35 = vadd.f32 %v783_v28, %v774_v31  ;;  %v791_v36 = vadd.f32 %v787_v30, %v775_v32  ;;  %v792_v37 = vadd.f32 %v783_v28, %v776_v33  ;;  %v793_v38 = vadd.f32 %v787_v30, %v777_v34 }
 0x164   : > { %v794_v39 = vmax.f32 %v790_v35, 0.0  ;;  %v795_v40 = vmax.f32 %v791_v36, 0.0  ;;  %v796_v41 = vmax.f32 %v792_v37, 0.0  ;;  %v797_v42 = vmax.f32 %v793_v38, 0.0 }
 0x166   : > { %798 = vst [vmem:[%s1473_s20] sm:$0xff] %v794_v39  ;;  %799 = vst [vmem:[%s1473_s20 + $0x8] sm:$0xff] %v795_v40 }
 0x167   : > { %800 = vst [vmem:[%s1473_s20 + $0x10] sm:$0xff] %v796_v41  ;;  %801 = vst [vmem:[%s1473_s20 + $0x18] sm:$0xff] %v797_v42 }
 0x168 PF: > { %808 = sbr.rel (!%p1364_p12) target bundleno = 368 (0x170), region = 124  ;;  %s1015_s21 = sshll.u32 (%p1364_p12), %s1230_s22, 4 }
 0x169   : > { %s814_s26 = scalar_lea.vmem (%p1364_p12), %s1574_s4, %s1015_s21 }
 0x16d   : > { %v827_v43 = vld [vmem:[%s1473_s20] sm:$0xff]  ;;  %v829_v44 = vld [vmem:[%s1473_s20 + $0x8] sm:$0xff] }
 0x16e   : > { %v831_v45 = vld [vmem:[%s1473_s20 + $0x10] sm:$0xff]  ;;  %v833_v46 = vld [vmem:[%s1473_s20 + $0x18] sm:$0xff]  ;;  %828 = vst [vmem:[%s814_s26] sm:$0xff] %v827_v43  ;;  %830 = vst [vmem:[%s814_s26 + $0x8] sm:$0xff] %v829_v44 }
 0x16f   : > { %832 = vst [vmem:[%s814_s26 + $0x20] sm:$0xff] %v831_v45  ;;  %834 = vst [vmem:[%s814_s26 + $0x28] sm:$0xff] %v833_v46 }
 0x170 PF: > { %s14_s25 = sadd.s32 1, %s1242_s25   ;;  %s1585_s19 = sld [smem:[#allocation6_spill]] }
 0x171   : > { %p11_p6 = scmp.ge.s32.totalorder %s14_s25, 20   ;;  %s1586_s20 = sld [smem:[#allocation9_spill]] }
 0x172   : > { %s1587_s14 = sld [smem:[#allocation7_spill]]  ;;  %s1589_s15 = smov %s1206_s16 }
 0x173   : > { %s1588_s5 = sld [smem:[#allocation8_spill]]  ;;  %s1590_s16 = smov %s1362_s13 }
 0x174   : > { %s1591_s17 = smov %s1214_s18  ;;  %s1592_s18 = smov %s1359_s12 }
 0x175   : > { %s1593_s21 = smov %s1234_s23  ;;  %s1594_s22 = smov %s1238_s24 }
 0x176   :  { %13 = sbr.rel (!%p11_p6) target bundleno = 6 (0x6), region = 192 }
 0x178   : > { %s1595_s23 = smov %s1587_s14 }
 0x179   : > { %s1596_s24 = smov %s1588_s5 }

// kernel: resnet_encoder_forward.38
= control target key start
LH: loop header
LB: loop body
LE: loop exit
PB: predicated region body
PF: predicated region fallthrough
CT: control target
= control target key end

     0   :  { %s1130_s15 = smov 0   ;;  %s1132_s16 = smov 0   ;;  %s1321_s0 = inlined_call_operand.vmem [shape: bf16[16,256], index: 0, kind: input, shape index: {}]   ;;  %s1322_s1 = inlined_call_operand.vmem [shape: bf16[256,512], index: 1, kind: input, shape index: {}]   ;;  %s1323_s2 = inlined_call_operand.vmem [shape: f32[1,512], index: 2, kind: input, shape index: {}]   ;;  %s1324_s3 = inlined_call_operand.vmem [shape: f32[1,512], index: 3, kind: input, shape index: {}]   ;;  %s1325_s4 = inlined_call_operand.vmem [shape: f32[16,512], index: 4, kind: output, shape index: {}]  }
   0x1   :  { %s1134_s17 = smov 0   ;;  %s1136_s18 = smov 0  }
   0x2   :  { %s1138_s19 = smov 0  }
   0x3 LB: > { %s29_s20 = sadd.s32 1, %s1099_s18  ;;  %s920_s21 = sadd.s32 4294967295, %s1103_s19   ;;  %s1103_s19 = sphi %s1138_s19, %s14_s19   ;;  %s1099_s18 = sphi %s1136_s18, %s1330_s18   ;;  %s1095_s17 = sphi %s1134_s17, %s1329_s17   ;;  %s1091_s16 = sphi %s1132_s16, %s1328_s16   ;;  %s1087_s15 = sphi %s1130_s15, %s1327_s15  }
   0x4   : > { %p31_p0 = scmp.ge.s32.totalorder %s29_s20, 2  ;;  %p77_p1 = scmp.ne.s32.totalorder %s1091_s16, %s1087_s15 }
   0x5   : > { %p78_p2 = scmp.eq.s32.totalorder %s1103_s19, 0  ;;  %p161_p4 = scmp.eq.s32.totalorder %s920_s21, 1 }
   0x6   : > { %s1332_s20 = smov (%p31_p0, %s29_s20), 0  ;;  %s70_s23 = sadd.s32 1, %s1091_s16 }
   0x7   : > { %p79_p3 = por %p78_p2, %p77_p1  ;;  %s66_s22 = ssub.s32 %s1099_s18, %s1332_s20 }
   0x8   : > { %p68_p5 = scmp.eq.s32.totalorder %s66_s22, 0  ;;  %p1165_p6 = por %p161_p4, %p77_p1 }
   0x9   : > { %p924_p7 = scmp.ge.s32.totalorder %s1103_s19, 2 }
   0xa   : > { %s1170_s25 = scalar_select %p68_p5, %s1091_s16, %s70_s23  }
   0xb   : > { %198 = sbr.rel (%p924_p7) target bundleno = 36 (0x24), region = 20 }
  0x10   : > { %201 = sbr.rel (!%p79_p3) target bundleno = 36 (0x24), region = 24  ;;  %s203_s26 = sand.u32 (%p79_p3), 1, %s1091_s16  }
  0x11   : > { %s972_s27 = sshll.u32 (%p79_p3), %s1099_s18, 3  ;;  %s925_s28 = sshll.u32 (%p79_p3), %s203_s26, 8 }
  0x12   : > { %s1178_s5 = scalar_lea.vmem (%p79_p3), %s1322_s1, %s972_s27  ;;  %s1183_s6 = scalar_lea.vmem (%p79_p3), [#allocation3], %s925_s28 }
  0x13   : > { %v302_v0 = vld [vmem:[%s1178_s5] sm:$0xff] (%p79_p3)  ;;  %v304_v1 = vld [vmem:[%s1178_s5 + $0x10] sm:$0xff] (%p79_p3) }
  0x14   : > { %v306_v2 = vld [vmem:[%s1178_s5 + $0x20] sm:$0xff] (%p79_p3)  ;;  %303 = vst [vmem:[%s1183_s6] sm:$0xff] (%p79_p3), %v302_v0  ;;  %305 = vst [vmem:[%s1183_s6 + $0x8] sm:$0xff] (%p79_p3), %v304_v1  ;;  %v308_v3 = vld [vmem:[%s1178_s5 + $0x30] sm:$0xff] (%p79_p3) }
  0x15   : > { %307 = vst [vmem:[%s1183_s6 + $0x10] sm:$0xff] %v306_v2  ;;  %v310_v4 = vld [vmem:[%s1178_s5 + $0x40] sm:$0xff]  ;;  %v312_v5 = vld [vmem:[%s1178_s5 + $0x50] sm:$0xff]  ;;  %309 = vst [vmem:[%s1183_s6 + $0x18] sm:$0xff] %v308_v3 }
  0x16   : > { %311 = vst [vmem:[%s1183_s6 + $0x20] sm:$0xff] %v310_v4  ;;  %313 = vst [vmem:[%s1183_s6 + $0x28] sm:$0xff] %v312_v5  ;;  %v314_v6 = vld [vmem:[%s1178_s5 + $0x60] sm:$0xff]  ;;  %v316_v7 = vld [vmem:[%s1178_s5 + $0x70] sm:$0xff] }
  0x17   : > { %v318_v8 = vld [vmem:[%s1178_s5 + $0x80] sm:$0xff]  ;;  %315 = vst [vmem:[%s1183_s6 + $0x30] sm:$0xff] %v314_v6  ;;  %317 = vst [vmem:[%s1183_s6 + $0x38] sm:$0xff] %v316_v7  ;;  %v320_v9 = vld [vmem:[%s1178_s5 + $0x90] sm:$0xff] }
  0x18   : > { %319 = vst [vmem:[%s1183_s6 + $0x40] sm:$0xff] %v318_v8  ;;  %v322_v10 = vld [vmem:[%s1178_s5 + $0xa0] sm:$0xff]  ;;  %v324_v11 = vld [vmem:[%s1178_s5 + $0xb0] sm:$0xff]  ;;  %321 = vst [vmem:[%s1183_s6 + $0x48] sm:$0xff] %v320_v9 }
  0x19   : > { %323 = vst [vmem:[%s1183_s6 + $0x50] sm:$0xff] %v322_v10  ;;  %325 = vst [vmem:[%s1183_s6 + $0x58] sm:$0xff] %v324_v11  ;;  %v326_v12 = vld [vmem:[%s1178_s5 + $0xc0] sm:$0xff]  ;;  %v328_v13 = vld [vmem:[%s1178_s5 + $0xd0] sm:$0xff] }
  0x1a   : > { %v330_v14 = vld [vmem:[%s1178_s5 + $0xe0] sm:$0xff]  ;;  %327 = vst [vmem:[%s1183_s6 + $0x60] sm:$0xff] %v326_v12  ;;  %329 = vst [vmem:[%s1183_s6 + $0x68] sm:$0xff] %v328_v13  ;;  %v332_v15 = vld [vmem:[%s1178_s5 + $0xf0] sm:$0xff] }
  0x1b   : > { %331 = vst [vmem:[%s1183_s6 + $0x70] sm:$0xff] %v330_v14  ;;  %v334_v16 = vld [vmem:[%s1178_s5 + $0x100] sm:$0xff]  ;;  %v336_v17 = vld [vmem:[%s1178_s5 + $0x110] sm:$0xff]  ;;  %333 = vst [vmem:[%s1183_s6 + $0x78] sm:$0xff] %v332_v15 }
  0x1c   : > { %335 = vst [vmem:[%s1183_s6 + $0x80] sm:$0xff] %v334_v16  ;;  %337 = vst [vmem:[%s1183_s6 + $0x88] sm:$0xff] %v336_v17  ;;  %v338_v18 = vld [vmem:[%s1178_s5 + $0x120] sm:$0xff]  ;;  %v340_v19 = vld [vmem:[%s1178_s5 + $0x130] sm:$0xff] }
  0x1d   : > { %v342_v20 = vld [vmem:[%s1178_s5 + $0x140] sm:$0xff]  ;;  %339 = vst [vmem:[%s1183_s6 + $0x90] sm:$0xff] %v338_v18  ;;  %341 = vst [vmem:[%s1183_s6 + $0x98] sm:$0xff] %v340_v19  ;;  %v344_v21 = vld [vmem:[%s1178_s5 + $0x150] sm:$0xff] }
  0x1e   : > { %343 = vst [vmem:[%s1183_s6 + $0xa0] sm:$0xff] %v342_v20  ;;  %v346_v22 = vld [vmem:[%s1178_s5 + $0x160] sm:$0xff]  ;;  %v348_v23 = vld [vmem:[%s1178_s5 + $0x170] sm:$0xff]  ;;  %345 = vst [vmem:[%s1183_s6 + $0xa8] sm:$0xff] %v344_v21 }
  0x1f   : > { %347 = vst [vmem:[%s1183_s6 + $0xb0] sm:$0xff] %v346_v22  ;;  %349 = vst [vmem:[%s1183_s6 + $0xb8] sm:$0xff] %v348_v23  ;;  %v350_v24 = vld [vmem:[%s1178_s5 + $0x180] sm:$0xff]  ;;  %v352_v25 = vld [vmem:[%s1178_s5 + $0x190] sm:$0xff] }
  0x20   : > { %v354_v26 = vld [vmem:[%s1178_s5 + $0x1a0] sm:$0xff]  ;;  %351 = vst [vmem:[%s1183_s6 + $0xc0] sm:$0xff] %v350_v24  ;;  %353 = vst [vmem:[%s1183_s6 + $0xc8] sm:$0xff] %v352_v25  ;;  %v356_v27 = vld [vmem:[%s1178_s5 + $0x1b0] sm:$0xff] }
  0x21   : > { %355 = vst [vmem:[%s1183_s6 + $0xd0] sm:$0xff] %v354_v26  ;;  %v358_v28 = vld [vmem:[%s1178_s5 + $0x1c0] sm:$0xff]  ;;  %v360_v29 = vld [vmem:[%s1178_s5 + $0x1d0] sm:$0xff]  ;;  %357 = vst [vmem:[%s1183_s6 + $0xd8] sm:$0xff] %v356_v27 }
  0x22   : > { %359 = vst [vmem:[%s1183_s6 + $0xe0] sm:$0xff] %v358_v28  ;;  %361 = vst [vmem:[%s1183_s6 + $0xe8] sm:$0xff] %v360_v29  ;;  %v362_v30 = vld [vmem:[%s1178_s5 + $0x1e0] sm:$0xff]  ;;  %v364_v31 = vld [vmem:[%s1178_s5 + $0x1f0] sm:$0xff] }
  0x23   : > { %363 = vst [vmem:[%s1183_s6 + $0xf0] sm:$0xff] %v362_v30  ;;  %365 = vst [vmem:[%s1183_s6 + $0xf8] sm:$0xff] %v364_v31 }
  0x24 PF: > { %p928_p8 = scmp.ge.s32.totalorder %s1103_s19, 1  ;;  %p386_p9 = scmp.lt.s32.totalorder %s1103_s19, 3 }
  0x26   : > { %p387_p10 = pnand %p928_p8, %p386_p9 }
  0x27   : > { %s393_s7 = sand.u32 (!%p387_p10), 1, %s1087_s15   ;;  %s931_s14 = sshll.u32 (!%p387_p10), %s1095_s17, 1 }
  0x28   : > { %390 = sbr.rel (%p387_p10) target bundleno = 322 (0x142), region = 70  ;;  %s929_s8 = sshll.u32 (!%p387_p10), %s393_s7, 8 }
  0x29   : > { %s1254_s11 = scalar_lea.vmem (!%p387_p10), [#allocation3], %s929_s8  ;;  %p450_p11 = scmp.lt.s32.totalorder (!%p387_p10), %s931_s14, 3 }
  0x2a   : > { %s930_s29 = sshll.u32 (!%p387_p10), %s393_s7, 5 }
  0x2b   : > { %s434_s30 = scalar_lea.vmem (!%p387_p10), [#allocation4], %s930_s29 }
  0x2d   : > { %v1064_v32 = vld [vmem:[%s1321_s0 + $0x4] ss:$8 sps:$4 sm:$0xff]   ;;  %v1014_v33 = vld [vmem:[%s1254_s11 + $0x74] ss:$8 sps:$4 sm:$0xff]   ;;  %v1016_v34 = vld [vmem:[%s1254_s11 + $0x70] ss:$8 sps:$4 sm:$0xff]   ;;  %v737_v2 = vlaneseq }
  0x2e   : > { %709 = vmatprep.mubr.bf16.mxu0 %v1064_v32  ;;  %677 = vmatprep.subr.bf16.mxu0 %v1014_v33  ;;  %v1017_v35 = vld [vmem:[%s1254_s11 + $0x64] ss:$8 sps:$4 sm:$0xff]   ;;  %v1019_v36 = vld [vmem:[%s1254_s11 + $0x60] ss:$8 sps:$4 sm:$0xff]   ;;  %v1020_v37 = vld [vmem:[%s1254_s11 + $0x54] ss:$8 sps:$4 sm:$0xff]  }
  0x2f   : > { %678 = vmatpush1.bf16.msra.mxu0 %v1016_v34  ;;  %v1022_v38 = vld [vmem:[%s1254_s11 + $0x50] ss:$8 sps:$4 sm:$0xff]   ;;  %v1023_v39 = vld [vmem:[%s1254_s11 + $0x44] ss:$8 sps:$4 sm:$0xff]   ;;  %v1025_v40 = vld [vmem:[%s1254_s11 + $0x40] ss:$8 sps:$4 sm:$0xff]  }
  0x30   : > { %679 = vmatprep.subr.bf16.mxu0 %v1017_v35  ;;  %v1026_v41 = vld [vmem:[%s1254_s11 + $0x34] ss:$8 sps:$4 sm:$0xff]   ;;  %v1028_v42 = vld [vmem:[%s1254_s11 + $0x30] ss:$8 sps:$4 sm:$0xff]   ;;  %v1029_v43 = vld [vmem:[%s1254_s11 + $0x24] ss:$8 sps:$4 sm:$0xff]  }
  0x31   : > { %v1031_v44 = vld [vmem:[%s1254_s11 + $0x20] ss:$8 sps:$4 sm:$0xff]   ;;  %v1032_v45 = vld [vmem:[%s1254_s11 + $0x14] ss:$8 sps:$4 sm:$0xff]   ;;  %v1034_v46 = vld [vmem:[%s1254_s11 + $0x10] ss:$8 sps:$4 sm:$0xff]  }
  0x32   : > { %v1035_v47 = vld [vmem:[%s1254_s11 + $0x4] ss:$8 sps:$4 sm:$0xff]   ;;  %v1037_v48 = vld [vmem:[%s1254_s11] ss:$8 sps:$4 sm:$0xff]   ;;  %v1038_v49 = vld [vmem:[%s1254_s11 + $0xf4] ss:$8 sps:$4 sm:$0xff]  }
  0x33   : > { %680 = vmatpush1.bf16.msra.mxu0 %v1019_v36  ;;  %v1040_v50 = vld [vmem:[%s1254_s11 + $0xf0] ss:$8 sps:$4 sm:$0xff]   ;;  %v1041_v51 = vld [vmem:[%s1254_s11 + $0xe4] ss:$8 sps:$4 sm:$0xff]   ;;  %v1043_v52 = vld [vmem:[%s1254_s11 + $0xe0] ss:$8 sps:$4 sm:$0xff]  }
  0x34   : > { %681 = vmatprep.subr.bf16.mxu0 %v1020_v37  ;;  %v1044_v53 = vld [vmem:[%s1254_s11 + $0xd4] ss:$8 sps:$4 sm:$0xff]   ;;  %v1046_v54 = vld [vmem:[%s1254_s11 + $0xd0] ss:$8 sps:$4 sm:$0xff]   ;;  %v1047_v55 = vld [vmem:[%s1254_s11 + $0xc4] ss:$8 sps:$4 sm:$0xff]  }
  0x35   : > { %v1049_v56 = vld [vmem:[%s1254_s11 + $0xc0] ss:$8 sps:$4 sm:$0xff]   ;;  %v1050_v57 = vld [vmem:[%s1254_s11 + $0xb4] ss:$8 sps:$4 sm:$0xff]   ;;  %v1052_v58 = vld [vmem:[%s1254_s11 + $0xb0] ss:$8 sps:$4 sm:$0xff]  }
  0x36   : > { %v1053_v59 = vld [vmem:[%s1254_s11 + $0xa4] ss:$8 sps:$4 sm:$0xff]   ;;  %v1055_v60 = vld [vmem:[%s1254_s11 + $0xa0] ss:$8 sps:$4 sm:$0xff]   ;;  %v1056_v61 = vld [vmem:[%s1254_s11 + $0x94] ss:$8 sps:$4 sm:$0xff]  }
  0x37   : > { %682 = vmatpush1.bf16.msra.mxu0 %v1022_v38  ;;  %v1058_v62 = vld [vmem:[%s1254_s11 + $0x90] ss:$8 sps:$4 sm:$0xff]   ;;  %v1059_v63 = vld [vmem:[%s1254_s11 + $0x84] ss:$8 sps:$4 sm:$0xff]   ;;  %v1061_v0 = vld [vmem:[%s1254_s11 + $0x80] ss:$8 sps:$4 sm:$0xff]  }
  0x38   : > { %683 = vmatprep.subr.bf16.mxu0 %v1023_v39  ;;  %v1062_v1 = vld [vmem:[%s1321_s0] ss:$8 sps:$4 sm:$0xff]   ;;  %s1334_s14 = smov (!%p450_p11, %s931_s14), 3  ;;  %v738_v3 = vshrl.u32 %v737_v2, 7  ;;  %s973_s15 = sshll.u32 (%p1165_p6), %s1095_s17, 4 }
  0x39   : > { %s452_s23 = scalar_lea.vmem %s1323_s2, %s1334_s14  ;;  %s457_s28 = scalar_lea.vmem %s1324_s3, %s1334_s14 }
  0x3a   : > { %v739_v4 = vsub.s32 0, %v738_v3  ;;  %v735_v5 = vld [vmem:[%s452_s23] sm:$0x3]  ;;  %v743_v6 = vsub.s32 1, %v738_v3  ;;  %s783_s7 = scalar_lea.vmem (%p1165_p6), %s1325_s4, %s973_s15 }
  0x3b   : > { %684 = vmatpush1.bf16.msra.mxu0 %v1025_v40  ;;  %v751_v7 = vld [vmem:[%s457_s28] sm:$0x3] }
  0x3c   : > { %685 = vmatprep.subr.bf16.mxu0 %v1026_v41  ;;  %v740_v8 = vrot.slane %v735_v5, %v739_v4  ;;  %v756_v9 = vrot.slane %v751_v7, %v739_v4  ;;  %v744_v10 = vrot.slane %v735_v5, %v743_v6  ;;  %v760_v13 = vrot.slane %v751_v7, %v743_v6 }
  0x3f   : > { %686 = vmatpush1.bf16.msra.mxu0 %v1028_v42 }
  0x40   : > { %687 = vmatprep.subr.bf16.mxu0 %v1029_v43 }
  0x43   : > { %688 = vmatpush1.bf16.msra.mxu0 %v1031_v44 }
  0x44   : > { %689 = vmatprep.subr.bf16.mxu0 %v1032_v45 }
  0x47   : > { %690 = vmatpush1.bf16.msra.mxu0 %v1034_v46 }
  0x48   : > { %691 = vmatprep.subr.bf16.mxu0 %v1035_v47 }
  0x4b   : > { %692 = vmatpush1.bf16.msra.mxu0 %v1037_v48 }
  0x4c   : > { %693 = vmatprep.subr.bf16.mxu0 %v1038_v49 }
  0x4f   : > { %694 = vmatpush2.bf16.msra.mxu0 %v1040_v50 }
  0x50   : > { %695 = vmatprep.subr.bf16.mxu0 %v1041_v51 }
  0x53   : > { %696 = vmatpush2.bf16.msra.mxu0 %v1043_v52 }
  0x54   : > { %697 = vmatprep.subr.bf16.mxu0 %v1044_v53 }
  0x57   : > { %698 = vmatpush2.bf16.msra.mxu0 %v1046_v54 }
  0x58   : > { %699 = vmatprep.subr.bf16.mxu0 %v1047_v55 }
  0x5b   : > { %700 = vmatpush2.bf16.msra.mxu0 %v1049_v56 }
  0x5c   : > { %701 = vmatprep.subr.bf16.mxu0 %v1050_v57 }
  0x5f   : > { %702 = vmatpush2.bf16.msra.mxu0 %v1052_v58 }
  0x60   : > { %703 = vmatprep.subr.bf16.mxu0 %v1053_v59 }
  0x63   : > { %704 = vmatpush2.bf16.msra.mxu0 %v1055_v60 }
  0x64   : > { %705 = vmatprep.subr.bf16.mxu0 %v1056_v61 }
  0x67   : > { %706 = vmatpush2.bf16.msra.mxu0 %v1058_v62 }
  0x68   : > { %707 = vmatprep.subr.bf16.mxu0 %v1059_v63 }
  0x6b   : > { %708 = vmatpush2.bf16.msra.mxu0 %v1061_v0 }
  0x6e   : > { %710 = vmatmul.mubr.bf16.vlgmr.msra.gmra.mxu0 %v1062_v1 }
 0x12e   : > { %v711_v11 = vpop.f32.mrf.mxu0 }
 0x12f   : > { %v747_v12 = vmul.f32 %v740_v8, %v711_v11 }
 0x130   : > { %v713_v14 = vpop.f32.mrf.mxu0 }
 0x131   : > { %v763_v15 = vadd.f32 %v756_v9, %v747_v12  ;;  %v748_v16 = vmul.f32 %v744_v10, %v713_v14 }
 0x132   : > { %v715_v17 = vpop.f32.mrf.mxu0 }
 0x133   : > { %767 = vst [vmem:[%s434_s30] sm:$0xff] %v763_v15  ;;  %v764_v18 = vadd.f32 %v760_v13, %v748_v16  ;;  %v749_v19 = vmul.f32 %v740_v8, %v715_v17 }
 0x134   : > { %v717_v20 = vpop.f32.mrf.mxu0 }
 0x135   : > { %768 = vst [vmem:[%s434_s30 + $0x8] sm:$0xff] %v764_v18  ;;  %v765_v21 = vadd.f32 %v756_v9, %v749_v19  ;;  %v750_v22 = vmul.f32 %v744_v10, %v717_v20  ;;  %777 = sbr.rel (!%p1165_p6) target bundleno = 322 (0x142), region = 86 }
 0x137   : > { %769 = vst [vmem:[%s434_s30 + $0x10] sm:$0xff] %v765_v21  ;;  %v766_v23 = vadd.f32 %v760_v13, %v750_v22 }
 0x139   : > { %770 = vst [vmem:[%s434_s30 + $0x18] sm:$0xff] %v766_v23 }
 0x13a   : > { %v796_v24 = vld [vmem:[%s434_s30] sm:$0xff] }
 0x13b   : > { %797 = vst [vmem:[%s783_s7] sm:$0xff] %v796_v24 }
 0x13c   : > { %v798_v25 = vld [vmem:[%s434_s30 + $0x8] sm:$0xff] }
 0x13d   : > { %799 = vst [vmem:[%s783_s7 + $0x8] sm:$0xff] %v798_v25 }
 0x13e   : > { %v800_v26 = vld [vmem:[%s434_s30 + $0x10] sm:$0xff] }
 0x13f   : > { %801 = vst [vmem:[%s783_s7 + $0x20] sm:$0xff] %v800_v26 }
 0x140   : > { %v802_v27 = vld [vmem:[%s434_s30 + $0x18] sm:$0xff] }
 0x141   : > { %803 = vst [vmem:[%s783_s7 + $0x28] sm:$0xff] %v802_v27 }
 0x142 PF: > { %s14_s19 = sadd.s32 1, %s1103_s19   ;;  %s1327_s15 = smov %s1091_s16 }
 0x143   : > { %p11_p12 = scmp.ge.s32.totalorder %s14_s19, 4   ;;  %s1328_s16 = smov %s1170_s25 }
 0x144   : > { %s1329_s17 = smov %s1099_s18  ;;  %s1330_s18 = smov %s1332_s20 }
 0x145   :  { %13 = sbr.rel (!%p11_p12) target bundleno = 3 (0x3), region = 149 }

// kernel: resnet_encoder_forward.39
= control target key start
LH: loop header
LB: loop body
LE: loop exit
PB: predicated region body
PF: predicated region fallthrough
CT: control target
= control target key end

     0   :  { %s2253_s0 = inlined_call_operand.vmem [shape: bf16[16,4608], index: 0, kind: input, shape index: {}]   ;;  %s2254_s1 = inlined_call_operand.vmem [shape: bf16[4608,512], index: 1, kind: input, shape index: {}]   ;;  %s2255_s2 = inlined_call_operand.vmem [shape: f32[1,512], index: 2, kind: input, shape index: {}]   ;;  %s2256_s3 = inlined_call_operand.vmem [shape: f32[1,512], index: 3, kind: input, shape index: {}]   ;;  %s2257_s4 = inlined_call_operand.vmem [shape: f32[16,512], index: 4, kind: input, shape index: {}]   ;;  %s2258_s5 = inlined_call_operand.vmem [shape: f32[16,512], index: 5, kind: output, shape index: {}]  }
   0x1   :  { %2262 = sst [smem:[#allocation11_spill]] %s2253_s0 }
   0x2   :  { %s1835_s18 = smov 0   ;;  %s1837_s19 = smov 0  }
   0x3   :  { %s1839_s20 = smov 0   ;;  %s1841_s21 = smov 0  }
   0x4   :  { %s1843_s22 = smov 0   ;;  %s1845_s23 = smov 0  }
   0x5   :  { %s1847_s24 = smov 0   ;;  %s1849_s25 = smov 0  }
   0x6   :  { %s1851_s26 = smov 0   ;;  %s1853_s27 = smov 0  }
   0x7   :  { %s1855_s28 = smov 0  }
   0x8 LB: > { %2263 = sst [smem:[#allocation7_spill]] %s1782_s23  ;;  %s1424_s29 = sadd.s32 4294967295, %s1802_s28   ;;  %s1802_s28 = sphi %s1855_s28, %s15_s28   ;;  %s1798_s27 = sphi %s1853_s27, %s2283_s27   ;;  %s1794_s26 = sphi %s1851_s26, %s2282_s26   ;;  %s1790_s25 = sphi %s1849_s25, %s2281_s25   ;;  %s1786_s24 = sphi %s1847_s24, %s2280_s24   ;;  %s1782_s23 = sphi %s1845_s23, %s2273_s23   ;;  %s1778_s22 = sphi %s1843_s22, %s2272_s22   ;;  %s1774_s21 = sphi %s1841_s21, %s2279_s21   ;;  %s1770_s20 = sphi %s1839_s20, %s2278_s20   ;;  %s1766_s19 = sphi %s1837_s19, %s2277_s19   ;;  %s1762_s18 = sphi %s1835_s18, %s2276_s18  }
   0x9   : > { %s27_s30 = sadd.s32 1, %s1794_s26  ;;  %s30_s6 = sadd.s32 1, %s1798_s27 }
   0xa   : > { %p28_p0 = scmp.ge.s32.totalorder %s27_s30, 9  ;;  %s43_s7 = sadd.s32 1, %s1782_s23 }
   0xb   : > { %p50_p1 = scmp.ne.s32.totalorder %s1782_s23, %s1778_s22  ;;  %p51_p2 = scmp.eq.s32.totalorder %s1802_s28, 0 }
   0xc   : > { %s2285_s30 = smov (%p28_p0, %s27_s30), 0  ;;  %s2287_s6 = smov (!%p28_p0, %s30_s6), %s1798_s27 }
   0xd   : > { %2264 = sst [smem:[#allocation8_spill]] %s2285_s30  ;;  %s39_s8 = ssub.s32 %s1794_s26, %s2285_s30 }
   0xe   : > { %p32_p3 = scmp.ge.s32.totalorder %s2287_s6, 2  ;;  %p41_p4 = scmp.eq.s32.totalorder %s39_s8, 0 }
   0xf   : > { %p1904_p5 = por %p51_p2, %p50_p1  ;;  %s71_s10 = sadd.s32 1, %s1774_s21 }
  0x10   : > { %s2289_s6 = smov (%p32_p3, %s2287_s6), 0  ;;  %p78_p6 = scmp.ne.s32.totalorder %s1774_s21, %s1770_s20 }
  0x11   : > { %2266 = sst [smem:[#allocation9_spill]] %s2289_s6  ;;  %s67_s12 = ssub.s32 %s1798_s27, %s2289_s6 }
  0x12   : > { %s1912_s11 = scalar_select %p41_p4, %s1782_s23, %s43_s7  }
  0x13   : > { %s68_s13 = sor.u32 %s67_s12, %s39_s8  ;;  %p149_p7 = scmp.eq.s32.totalorder %s67_s12, 0 }
  0x14   : > { %2267 = sst [smem:[#allocation10_spill]] %s1912_s11  ;;  %p69_p8 = scmp.eq.s32.totalorder %s68_s13, 0 }
  0x15   : > { %p1920_p9 = por %p78_p6, %p51_p2  ;;  %s151_s15 = sadd.s32 1, %s1766_s19 }
  0x16   : > { %p158_p10 = scmp.ne.s32.totalorder %s1766_s19, %s1762_s18  ;;  %p190_p12 = scmp.eq.s32.totalorder %s1424_s29, 17 }
  0x17   : > { %s1928_s16 = scalar_select %p69_p8, %s1774_s21, %s71_s10  }
  0x18   : > { %s1931_s17 = scalar_select %p149_p7, %s1766_s19, %s151_s15  }
  0x19   : > { %p1935_p11 = por %p158_p10, %p51_p2  ;;  %p1939_p13 = por %p190_p12, %p158_p10 }
  0x1a   : > { %p1427_p0 = scmp.ge.s32.totalorder %s1802_s28, 18 }
  0x1c   : > { %212 = sbr.rel (%p1427_p0) target bundleno = 90 (0x5a), region = 16 }
  0x21   : > { %215 = sbr.rel (!%p1904_p5) target bundleno = 45 (0x2d), region = 20  ;;  %s217_s10 = sand.u32 (%p1904_p5), 1, %s1782_s23  }
  0x22   : > { %s1521_s12 = sshll.u32 (%p1904_p5), %s1794_s26, 4  ;;  %s1428_s13 = sshll.u32 (%p1904_p5), %s217_s10, 5 }
  0x23   : > { %s2271_s0 = sld [smem:[#allocation11_spill]] (%p1904_p5)  ;;  %s219_s29 = scalar_lea.vmem (%p1904_p5), [#allocation3], %s1428_s13 }
  0x29   : > { %s225_s30 = scalar_lea.vmem %s2271_s0, %s1521_s12 }
  0x2a   : > { %v238_v0 = vld [vmem:[%s225_s30] sm:$0xff]  ;;  %v240_v1 = vld [vmem:[%s225_s30 + $0x8] sm:$0xff]  ;;  %v242_v2 = vld [vmem:[%s225_s30 + $0x90] sm:$0xff] }
  0x2b   : > { %239 = vst [vmem:[%s219_s29] sm:$0xff] %v238_v0  ;;  %241 = vst [vmem:[%s219_s29 + $0x8] sm:$0xff] %v240_v1  ;;  %v244_v3 = vld [vmem:[%s225_s30 + $0x98] sm:$0xff] }
  0x2c   : > { %243 = vst [vmem:[%s219_s29 + $0x10] sm:$0xff] %v242_v2  ;;  %245 = vst [vmem:[%s219_s29 + $0x18] sm:$0xff] %v244_v3 }
  0x2d PF: > { %251 = sbr.rel (!%p1920_p9) target bundleno = 84 (0x54), region = 43  ;;  %s253_s9 = sand.u32 (%p1920_p9), 1, %s1774_s21  }
  0x2e   : > { %s1433_s10 = sshll.u32 (%p1920_p9), %s1798_s27, 1  ;;  %s1431_s6 = sshll.u32 (%p1920_p9), %s253_s9, 9 }
  0x2f   : > { %s1522_s12 = sshll.u32 (%p1920_p9), %s1794_s26, 8  ;;  %s1964_s30 = scalar_lea.vmem (%p1920_p9), [#allocation4], %s1431_s6 }
  0x30   : > { %s259_s15 = sadd.s32 (%p1920_p9), %s1522_s12, %s1433_s10 }
  0x31   : > { %s1435_s0 = sshll.u32 (%p1920_p9), %s259_s15, 2 }
  0x32   : > { %s1959_s23 = scalar_lea.vmem %s2254_s1, %s1435_s0 }
  0x33   : > { %v416_v4 = vld [vmem:[%s1959_s23] sm:$0xff]  ;;  %v418_v5 = vld [vmem:[%s1959_s23 + $0x10] sm:$0xff] }
  0x34   : > { %v420_v6 = vld [vmem:[%s1959_s23 + $0x20] sm:$0xff]  ;;  %417 = vst [vmem:[%s1964_s30] sm:$0xff] %v416_v4  ;;  %419 = vst [vmem:[%s1964_s30 + $0x8] sm:$0xff] %v418_v5  ;;  %v422_v7 = vld [vmem:[%s1959_s23 + $0x30] sm:$0xff] }
  0x35   : > { %421 = vst [vmem:[%s1964_s30 + $0x10] sm:$0xff] %v420_v6  ;;  %v424_v8 = vld [vmem:[%s1959_s23 + $0x40] sm:$0xff]  ;;  %v426_v9 = vld [vmem:[%s1959_s23 + $0x50] sm:$0xff]  ;;  %423 = vst [vmem:[%s1964_s30 + $0x18] sm:$0xff] %v422_v7 }
  0x36   : > { %425 = vst [vmem:[%s1964_s30 + $0x20] sm:$0xff] %v424_v8  ;;  %427 = vst [vmem:[%s1964_s30 + $0x28] sm:$0xff] %v426_v9  ;;  %v428_v10 = vld [vmem:[%s1959_s23 + $0x60] sm:$0xff]  ;;  %v430_v11 = vld [vmem:[%s1959_s23 + $0x70] sm:$0xff] }
  0x37   : > { %v432_v12 = vld [vmem:[%s1959_s23 + $0x80] sm:$0xff]  ;;  %429 = vst [vmem:[%s1964_s30 + $0x30] sm:$0xff] %v428_v10  ;;  %431 = vst [vmem:[%s1964_s30 + $0x38] sm:$0xff] %v430_v11  ;;  %v434_v13 = vld [vmem:[%s1959_s23 + $0x90] sm:$0xff] }
  0x38   : > { %433 = vst [vmem:[%s1964_s30 + $0x40] sm:$0xff] %v432_v12  ;;  %v436_v14 = vld [vmem:[%s1959_s23 + $0xa0] sm:$0xff]  ;;  %v438_v15 = vld [vmem:[%s1959_s23 + $0xb0] sm:$0xff]  ;;  %435 = vst [vmem:[%s1964_s30 + $0x48] sm:$0xff] %v434_v13 }
  0x39   : > { %437 = vst [vmem:[%s1964_s30 + $0x50] sm:$0xff] %v436_v14  ;;  %439 = vst [vmem:[%s1964_s30 + $0x58] sm:$0xff] %v438_v15  ;;  %v440_v16 = vld [vmem:[%s1959_s23 + $0xc0] sm:$0xff]  ;;  %v442_v17 = vld [vmem:[%s1959_s23 + $0xd0] sm:$0xff] }
  0x3a   : > { %v444_v18 = vld [vmem:[%s1959_s23 + $0xe0] sm:$0xff]  ;;  %441 = vst [vmem:[%s1964_s30 + $0x60] sm:$0xff] %v440_v16  ;;  %443 = vst [vmem:[%s1964_s30 + $0x68] sm:$0xff] %v442_v17  ;;  %v446_v19 = vld [vmem:[%s1959_s23 + $0xf0] sm:$0xff] }
  0x3b   : > { %445 = vst [vmem:[%s1964_s30 + $0x70] sm:$0xff] %v444_v18  ;;  %v448_v20 = vld [vmem:[%s1959_s23 + $0x100] sm:$0xff]  ;;  %v450_v21 = vld [vmem:[%s1959_s23 + $0x110] sm:$0xff]  ;;  %447 = vst [vmem:[%s1964_s30 + $0x78] sm:$0xff] %v446_v19 }
  0x3c   : > { %449 = vst [vmem:[%s1964_s30 + $0x80] sm:$0xff] %v448_v20  ;;  %451 = vst [vmem:[%s1964_s30 + $0x88] sm:$0xff] %v450_v21  ;;  %v452_v22 = vld [vmem:[%s1959_s23 + $0x120] sm:$0xff]  ;;  %v454_v23 = vld [vmem:[%s1959_s23 + $0x130] sm:$0xff] }
  0x3d   : > { %v456_v24 = vld [vmem:[%s1959_s23 + $0x140] sm:$0xff]  ;;  %453 = vst [vmem:[%s1964_s30 + $0x90] sm:$0xff] %v452_v22  ;;  %455 = vst [vmem:[%s1964_s30 + $0x98] sm:$0xff] %v454_v23  ;;  %v458_v25 = vld [vmem:[%s1959_s23 + $0x150] sm:$0xff] }
  0x3e   : > { %457 = vst [vmem:[%s1964_s30 + $0xa0] sm:$0xff] %v456_v24  ;;  %v460_v26 = vld [vmem:[%s1959_s23 + $0x160] sm:$0xff]  ;;  %v462_v27 = vld [vmem:[%s1959_s23 + $0x170] sm:$0xff]  ;;  %459 = vst [vmem:[%s1964_s30 + $0xa8] sm:$0xff] %v458_v25 }
  0x3f   : > { %461 = vst [vmem:[%s1964_s30 + $0xb0] sm:$0xff] %v460_v26  ;;  %463 = vst [vmem:[%s1964_s30 + $0xb8] sm:$0xff] %v462_v27  ;;  %v464_v28 = vld [vmem:[%s1959_s23 + $0x180] sm:$0xff]  ;;  %v466_v29 = vld [vmem:[%s1959_s23 + $0x190] sm:$0xff] }
  0x40   : > { %v468_v30 = vld [vmem:[%s1959_s23 + $0x1a0] sm:$0xff]  ;;  %465 = vst [vmem:[%s1964_s30 + $0xc0] sm:$0xff] %v464_v28  ;;  %467 = vst [vmem:[%s1964_s30 + $0xc8] sm:$0xff] %v466_v29  ;;  %v470_v31 = vld [vmem:[%s1959_s23 + $0x1b0] sm:$0xff] }
  0x41   : > { %469 = vst [vmem:[%s1964_s30 + $0xd0] sm:$0xff] %v468_v30  ;;  %v472_v32 = vld [vmem:[%s1959_s23 + $0x1c0] sm:$0xff]  ;;  %v474_v33 = vld [vmem:[%s1959_s23 + $0x1d0] sm:$0xff]  ;;  %471 = vst [vmem:[%s1964_s30 + $0xd8] sm:$0xff] %v470_v31 }
  0x42   : > { %473 = vst [vmem:[%s1964_s30 + $0xe0] sm:$0xff] %v472_v32  ;;  %475 = vst [vmem:[%s1964_s30 + $0xe8] sm:$0xff] %v474_v33  ;;  %v476_v34 = vld [vmem:[%s1959_s23 + $0x1e0] sm:$0xff]  ;;  %v478_v35 = vld [vmem:[%s1959_s23 + $0x1f0] sm:$0xff] }
  0x43   : > { %v480_v36 = vld [vmem:[%s1959_s23 + $0x200] sm:$0xff]  ;;  %477 = vst [vmem:[%s1964_s30 + $0xf0] sm:$0xff] %v476_v34  ;;  %479 = vst [vmem:[%s1964_s30 + $0xf8] sm:$0xff] %v478_v35  ;;  %v482_v37 = vld [vmem:[%s1959_s23 + $0x210] sm:$0xff] }
  0x44   : > { %481 = vst [vmem:[%s1964_s30 + $0x100] sm:$0xff] %v480_v36  ;;  %v484_v38 = vld [vmem:[%s1959_s23 + $0x220] sm:$0xff]  ;;  %v486_v39 = vld [vmem:[%s1959_s23 + $0x230] sm:$0xff]  ;;  %483 = vst [vmem:[%s1964_s30 + $0x108] sm:$0xff] %v482_v37 }
  0x45   : > { %485 = vst [vmem:[%s1964_s30 + $0x110] sm:$0xff] %v484_v38  ;;  %487 = vst [vmem:[%s1964_s30 + $0x118] sm:$0xff] %v486_v39  ;;  %v488_v40 = vld [vmem:[%s1959_s23 + $0x240] sm:$0xff]  ;;  %v490_v41 = vld [vmem:[%s1959_s23 + $0x250] sm:$0xff] }
  0x46   : > { %v492_v42 = vld [vmem:[%s1959_s23 + $0x260] sm:$0xff]  ;;  %489 = vst [vmem:[%s1964_s30 + $0x120] sm:$0xff] %v488_v40  ;;  %491 = vst [vmem:[%s1964_s30 + $0x128] sm:$0xff] %v490_v41  ;;  %v494_v43 = vld [vmem:[%s1959_s23 + $0x270] sm:$0xff] }
  0x47   : > { %493 = vst [vmem:[%s1964_s30 + $0x130] sm:$0xff] %v492_v42  ;;  %v496_v44 = vld [vmem:[%s1959_s23 + $0x280] sm:$0xff]  ;;  %v498_v45 = vld [vmem:[%s1959_s23 + $0x290] sm:$0xff]  ;;  %495 = vst [vmem:[%s1964_s30 + $0x138] sm:$0xff] %v494_v43 }
  0x48   : > { %497 = vst [vmem:[%s1964_s30 + $0x140] sm:$0xff] %v496_v44  ;;  %499 = vst [vmem:[%s1964_s30 + $0x148] sm:$0xff] %v498_v45  ;;  %v500_v46 = vld [vmem:[%s1959_s23 + $0x2a0] sm:$0xff]  ;;  %v502_v47 = vld [vmem:[%s1959_s23 + $0x2b0] sm:$0xff] }
  0x49   : > { %v504_v48 = vld [vmem:[%s1959_s23 + $0x2c0] sm:$0xff]  ;;  %501 = vst [vmem:[%s1964_s30 + $0x150] sm:$0xff] %v500_v46  ;;  %503 = vst [vmem:[%s1964_s30 + $0x158] sm:$0xff] %v502_v47  ;;  %v506_v49 = vld [vmem:[%s1959_s23 + $0x2d0] sm:$0xff] }
  0x4a   : > { %505 = vst [vmem:[%s1964_s30 + $0x160] sm:$0xff] %v504_v48  ;;  %v508_v50 = vld [vmem:[%s1959_s23 + $0x2e0] sm:$0xff]  ;;  %v510_v51 = vld [vmem:[%s1959_s23 + $0x2f0] sm:$0xff]  ;;  %507 = vst [vmem:[%s1964_s30 + $0x168] sm:$0xff] %v506_v49 }
  0x4b   : > { %509 = vst [vmem:[%s1964_s30 + $0x170] sm:$0xff] %v508_v50  ;;  %511 = vst [vmem:[%s1964_s30 + $0x178] sm:$0xff] %v510_v51  ;;  %v512_v52 = vld [vmem:[%s1959_s23 + $0x300] sm:$0xff]  ;;  %v514_v53 = vld [vmem:[%s1959_s23 + $0x310] sm:$0xff] }
  0x4c   : > { %v516_v54 = vld [vmem:[%s1959_s23 + $0x320] sm:$0xff]  ;;  %513 = vst [vmem:[%s1964_s30 + $0x180] sm:$0xff] %v512_v52  ;;  %515 = vst [vmem:[%s1964_s30 + $0x188] sm:$0xff] %v514_v53  ;;  %v518_v55 = vld [vmem:[%s1959_s23 + $0x330] sm:$0xff] }
  0x4d   : > { %517 = vst [vmem:[%s1964_s30 + $0x190] sm:$0xff] %v516_v54  ;;  %v520_v56 = vld [vmem:[%s1959_s23 + $0x340] sm:$0xff]  ;;  %v522_v57 = vld [vmem:[%s1959_s23 + $0x350] sm:$0xff]  ;;  %519 = vst [vmem:[%s1964_s30 + $0x198] sm:$0xff] %v518_v55 }
  0x4e   : > { %521 = vst [vmem:[%s1964_s30 + $0x1a0] sm:$0xff] %v520_v56  ;;  %523 = vst [vmem:[%s1964_s30 + $0x1a8] sm:$0xff] %v522_v57  ;;  %v524_v58 = vld [vmem:[%s1959_s23 + $0x360] sm:$0xff]  ;;  %v526_v59 = vld [vmem:[%s1959_s23 + $0x370] sm:$0xff] }
  0x4f   : > { %v528_v60 = vld [vmem:[%s1959_s23 + $0x380] sm:$0xff]  ;;  %525 = vst [vmem:[%s1964_s30 + $0x1b0] sm:$0xff] %v524_v58  ;;  %527 = vst [vmem:[%s1964_s30 + $0x1b8] sm:$0xff] %v526_v59  ;;  %v530_v61 = vld [vmem:[%s1959_s23 + $0x390] sm:$0xff] }
  0x50   : > { %529 = vst [vmem:[%s1964_s30 + $0x1c0] sm:$0xff] %v528_v60  ;;  %v532_v62 = vld [vmem:[%s1959_s23 + $0x3a0] sm:$0xff]  ;;  %v534_v63 = vld [vmem:[%s1959_s23 + $0x3b0] sm:$0xff]  ;;  %531 = vst [vmem:[%s1964_s30 + $0x1c8] sm:$0xff] %v530_v61 }
  0x51   : > { %533 = vst [vmem:[%s1964_s30 + $0x1d0] sm:$0xff] %v532_v62  ;;  %535 = vst [vmem:[%s1964_s30 + $0x1d8] sm:$0xff] %v534_v63  ;;  %v536_v0 = vld [vmem:[%s1959_s23 + $0x3c0] sm:$0xff]  ;;  %v538_v1 = vld [vmem:[%s1959_s23 + $0x3d0] sm:$0xff] }
  0x52   : > { %v540_v2 = vld [vmem:[%s1959_s23 + $0x3e0] sm:$0xff]  ;;  %537 = vst [vmem:[%s1964_s30 + $0x1e0] sm:$0xff] %v536_v0  ;;  %539 = vst [vmem:[%s1964_s30 + $0x1e8] sm:$0xff] %v538_v1  ;;  %v542_v3 = vld [vmem:[%s1959_s23 + $0x3f0] sm:$0xff] }
  0x53   : > { %541 = vst [vmem:[%s1964_s30 + $0x1f0] sm:$0xff] %v540_v2  ;;  %543 = vst [vmem:[%s1964_s30 + $0x1f8] sm:$0xff] %v542_v3 }
  0x54 PF: > { %565 = sbr.rel (!%p1935_p11) target bundleno = 90 (0x5a), region = 89  ;;  %s567_s0 = sand.u32 (%p1935_p11), 1, %s1766_s19  }
  0x55   : > { %s1523_s11 = sshll.u32 (%p1935_p11), %s1798_s27, 4  ;;  %s1436_s14 = sshll.u32 (%p1935_p11), %s567_s0, 5 }
  0x56   : > { %s575_s10 = scalar_lea.vmem (%p1935_p11), %s2257_s4, %s1523_s11  ;;  %s569_s6 = scalar_lea.vmem (%p1935_p11), [#allocation5], %s1436_s14 }
  0x57   : > { %v588_v4 = vld [vmem:[%s575_s10] sm:$0xff] (%p1935_p11)  ;;  %v590_v5 = vld [vmem:[%s575_s10 + $0x8] sm:$0xff] (%p1935_p11) }
  0x58   : > { %v592_v6 = vld [vmem:[%s575_s10 + $0x20] sm:$0xff] (%p1935_p11)  ;;  %589 = vst [vmem:[%s569_s6] sm:$0xff] (%p1935_p11), %v588_v4  ;;  %591 = vst [vmem:[%s569_s6 + $0x8] sm:$0xff] (%p1935_p11), %v590_v5  ;;  %v594_v7 = vld [vmem:[%s575_s10 + $0x28] sm:$0xff] (%p1935_p11) }
  0x59   : > { %593 = vst [vmem:[%s569_s6 + $0x10] sm:$0xff] %v592_v6  ;;  %595 = vst [vmem:[%s569_s6 + $0x18] sm:$0xff] %v594_v7 }
  0x5a PF: > { %p1439_p1 = scmp.ge.s32.totalorder %s1802_s28, 1  ;;  %p600_p2 = scmp.lt.s32.totalorder %s1802_s28, 19 }
  0x5c   : > { %p601_p3 = pnand %p1439_p1, %p600_p2 }
  0x5d   : > { %s607_s23 = sand.u32 (!%p601_p3), 1, %s1778_s22   ;;  %s614_s7 = sand.u32 (!%p601_p3), 1, %s1770_s20  }
  0x5e   : > { %604 = sbr.rel (%p601_p3) target bundleno = 407 (0x197), region = 112  ;;  %s1440_s12 = sshll.u32 (!%p601_p3), %s607_s23, 5 }
  0x5f   : > { %s1441_s15 = sshll.u32 (!%p601_p3), %s614_s7, 9  ;;  %s621_s13 = sand.u32 (!%p601_p3), 1, %s1762_s18  }
  0x60   : > { %s1444_s30 = sshll.u32 (!%p601_p3), %s1790_s25, 1  ;;  %s1442_s0 = sshll.u32 (!%p601_p3), %s621_s13, 5 }
  0x61   : > { %p668_p4 = scmp.lt.s32.totalorder (!%p601_p3), %s1444_s30, 3  ;;  %s2114_s22 = scalar_lea.vmem (!%p601_p3), [#allocation3], %s1440_s12 }
  0x62   : > { %s2116_s20 = scalar_lea.vmem (!%p601_p3), [#allocation4], %s1441_s15  ;;  %s2118_s18 = scalar_lea.vmem (!%p601_p3), [#allocation5], %s1442_s0 }
  0x63   : > { %s2291_s30 = smov (!%p668_p4, %s1444_s30), 3  ;;  %s2120_s23 = scalar_lea.vmem [#allocation6], %s1442_s0 }
  0x64   : > { %s670_s29 = scalar_lea.vmem %s2255_s2, %s2291_s30  ;;  %s675_s6 = scalar_lea.vmem %s2256_s3, %s2291_s30 }
  0x65   : > { %p1446_p5 = scmp.ne.s32.totalorder %s1786_s24, 0 }
  0x67   : > { %684 = sbr.rel (%p1446_p5) target bundleno = 111 (0x6f), region = 128 }
  0x6c   : > { %v1804_v8 = vmov 0.0  }
  0x6d   : > { %685 = vst [vmem:[#allocation2 + $0x10] sm:$0xff] %v1804_v8  ;;  %686 = vst [vmem:[#allocation2] sm:$0xff] %v1804_v8 }
  0x6e   : > { %687 = vst [vmem:[#allocation2 + $0x18] sm:$0xff] %v1804_v8  ;;  %688 = vst [vmem:[#allocation2 + $0x8] sm:$0xff] %v1804_v8 }
  0x6f PF: > { %v1614_v9 = vld [vmem:[%s2116_s20 + $0x74] ss:$8 sps:$4 sm:$0xff]   ;;  %v1618_v11 = vld [vmem:[%s2116_s20 + $0x70] ss:$8 sps:$4 sm:$0xff]   ;;  %v1620_v13 = vld [vmem:[%s2116_s20 + $0x64] ss:$8 sps:$4 sm:$0xff]  }
  0x70   : > { %v1616_v10 = vld [vmem:[%s2116_s20 + $0x174] ss:$8 sps:$4 sm:$0xff]   ;;  %1101 = vmatprep.subr.bf16.mxu0 %v1614_v9  ;;  %v1619_v12 = vld [vmem:[%s2116_s20 + $0x170] ss:$8 sps:$4 sm:$0xff]   ;;  %v1622_v14 = vld [vmem:[%s2116_s20 + $0x164] ss:$8 sps:$4 sm:$0xff]  }
  0x71   : > { %1144 = vmatprep.subr.bf16.mxu1 %v1616_v10  ;;  %1102 = vmatpush1.bf16.msra.mxu0 %v1618_v11  ;;  %v1624_v15 = vld [vmem:[%s2116_s20 + $0x60] ss:$8 sps:$4 sm:$0xff]   ;;  %v1626_v17 = vld [vmem:[%s2116_s20 + $0x54] ss:$8 sps:$4 sm:$0xff]   ;;  %v1630_v19 = vld [vmem:[%s2116_s20 + $0x50] ss:$8 sps:$4 sm:$0xff]  }
  0x72   : > { %1145 = vmatpush1.bf16.msra.mxu1 %v1619_v12  ;;  %1103 = vmatprep.subr.bf16.mxu0 %v1620_v13  ;;  %v1625_v16 = vld [vmem:[%s2116_s20 + $0x160] ss:$8 sps:$4 sm:$0xff]   ;;  %v1628_v18 = vld [vmem:[%s2116_s20 + $0x154] ss:$8 sps:$4 sm:$0xff]   ;;  %v1631_v20 = vld [vmem:[%s2116_s20 + $0x150] ss:$8 sps:$4 sm:$0xff]  }
  0x73   : > { %1146 = vmatprep.subr.bf16.mxu1 %v1622_v14  ;;  %v1632_v21 = vld [vmem:[%s2116_s20 + $0x44] ss:$8 sps:$4 sm:$0xff]   ;;  %v1636_v23 = vld [vmem:[%s2116_s20 + $0x40] ss:$8 sps:$4 sm:$0xff]   ;;  %v1638_v25 = vld [vmem:[%s2116_s20 + $0x34] ss:$8 sps:$4 sm:$0xff]  }
  0x74   : > { %v1634_v22 = vld [vmem:[%s2116_s20 + $0x144] ss:$8 sps:$4 sm:$0xff]   ;;  %v1637_v24 = vld [vmem:[%s2116_s20 + $0x140] ss:$8 sps:$4 sm:$0xff]   ;;  %v1640_v26 = vld [vmem:[%s2116_s20 + $0x134] ss:$8 sps:$4 sm:$0xff]  }
  0x75   : > { %1104 = vmatpush1.bf16.msra.mxu0 %v1624_v15  ;;  %v1642_v27 = vld [vmem:[%s2116_s20 + $0x30] ss:$8 sps:$4 sm:$0xff]   ;;  %v1644_v29 = vld [vmem:[%s2116_s20 + $0x24] ss:$8 sps:$4 sm:$0xff]   ;;  %v1648_v31 = vld [vmem:[%s2116_s20 + $0x20] ss:$8 sps:$4 sm:$0xff]  }
  0x76   : > { %1147 = vmatpush1.bf16.msra.mxu1 %v1625_v16  ;;  %1105 = vmatprep.subr.bf16.mxu0 %v1626_v17  ;;  %v1643_v28 = vld [vmem:[%s2116_s20 + $0x130] ss:$8 sps:$4 sm:$0xff]   ;;  %v1646_v30 = vld [vmem:[%s2116_s20 + $0x124] ss:$8 sps:$4 sm:$0xff]   ;;  %v1649_v32 = vld [vmem:[%s2116_s20 + $0x120] ss:$8 sps:$4 sm:$0xff]  }
  0x77   : > { %1148 = vmatprep.subr.bf16.mxu1 %v1628_v18  ;;  %v1650_v33 = vld [vmem:[%s2116_s20 + $0x14] ss:$8 sps:$4 sm:$0xff]   ;;  %v1654_v35 = vld [vmem:[%s2116_s20 + $0x10] ss:$8 sps:$4 sm:$0xff]   ;;  %v1656_v37 = vld [vmem:[%s2116_s20 + $0x4] ss:$8 sps:$4 sm:$0xff]  }
  0x78   : > { %v1652_v34 = vld [vmem:[%s2116_s20 + $0x114] ss:$8 sps:$4 sm:$0xff]   ;;  %v1655_v36 = vld [vmem:[%s2116_s20 + $0x110] ss:$8 sps:$4 sm:$0xff]   ;;  %v1658_v38 = vld [vmem:[%s2116_s20 + $0x104] ss:$8 sps:$4 sm:$0xff]  }
  0x79   : > { %1106 = vmatpush1.bf16.msra.mxu0 %v1630_v19  ;;  %v1660_v39 = vld [vmem:[%s2116_s20] ss:$8 sps:$4 sm:$0xff]   ;;  %v1662_v41 = vld [vmem:[%s2116_s20 + $0xf4] ss:$8 sps:$4 sm:$0xff]   ;;  %v1666_v43 = vld [vmem:[%s2116_s20 + $0xf0] ss:$8 sps:$4 sm:$0xff]  }
  0x7a   : > { %1149 = vmatpush1.bf16.msra.mxu1 %v1631_v20  ;;  %1107 = vmatprep.subr.bf16.mxu0 %v1632_v21  ;;  %v1661_v40 = vld [vmem:[%s2116_s20 + $0x100] ss:$8 sps:$4 sm:$0xff]   ;;  %v1664_v42 = vld [vmem:[%s2116_s20 + $0x1f4] ss:$8 sps:$4 sm:$0xff]   ;;  %v1667_v44 = vld [vmem:[%s2116_s20 + $0x1f0] ss:$8 sps:$4 sm:$0xff]  }
  0x7b   : > { %1150 = vmatprep.subr.bf16.mxu1 %v1634_v22  ;;  %v1668_v45 = vld [vmem:[%s2116_s20 + $0xe4] ss:$8 sps:$4 sm:$0xff]   ;;  %v1672_v47 = vld [vmem:[%s2116_s20 + $0xe0] ss:$8 sps:$4 sm:$0xff]   ;;  %v1674_v49 = vld [vmem:[%s2116_s20 + $0xd4] ss:$8 sps:$4 sm:$0xff]  }
  0x7c   : > { %v1670_v46 = vld [vmem:[%s2116_s20 + $0x1e4] ss:$8 sps:$4 sm:$0xff]   ;;  %v1673_v48 = vld [vmem:[%s2116_s20 + $0x1e0] ss:$8 sps:$4 sm:$0xff]   ;;  %v1676_v50 = vld [vmem:[%s2116_s20 + $0x1d4] ss:$8 sps:$4 sm:$0xff]  }
  0x7d   : > { %1108 = vmatpush1.bf16.msra.mxu0 %v1636_v23  ;;  %v1678_v51 = vld [vmem:[%s2116_s20 + $0xd0] ss:$8 sps:$4 sm:$0xff]   ;;  %v1680_v53 = vld [vmem:[%s2116_s20 + $0xc4] ss:$8 sps:$4 sm:$0xff]   ;;  %v1684_v55 = vld [vmem:[%s2116_s20 + $0xc0] ss:$8 sps:$4 sm:$0xff]  }
  0x7e   : > { %1151 = vmatpush1.bf16.msra.mxu1 %v1637_v24  ;;  %1109 = vmatprep.subr.bf16.mxu0 %v1638_v25  ;;  %v1679_v52 = vld [vmem:[%s2116_s20 + $0x1d0] ss:$8 sps:$4 sm:$0xff]   ;;  %v1682_v54 = vld [vmem:[%s2116_s20 + $0x1c4] ss:$8 sps:$4 sm:$0xff]   ;;  %v1685_v57 = vld [vmem:[%s2116_s20 + $0x1c0] ss:$8 sps:$4 sm:$0xff]  }
  0x7f   : > { %1152 = vmatprep.subr.bf16.mxu1 %v1640_v26  ;;  %v1712_v56 = vld [vmem:[%s2114_s22 + $0x4] ss:$16 sps:$4 sm:$0xff]   ;;  %v1715_v60 = vld [vmem:[%s2114_s22 + $0xc] ss:$16 sps:$4 sm:$0xff]   ;;  %v1690_v61 = vld [vmem:[%s2116_s20 + $0xb0] ss:$8 sps:$4 sm:$0xff]  }
  0x80   : > { %v1686_v58 = vld [vmem:[%s2116_s20 + $0xb4] ss:$8 sps:$4 sm:$0xff]   ;;  %1133 = vmatprep.mubr.bf16.mxu0 %v1712_v56  ;;  %1176 = vmatprep.mubr.bf16.mxu1 %v1715_v60  ;;  %v1691_v62 = vld [vmem:[%s2116_s20 + $0x1b0] ss:$8 sps:$4 sm:$0xff]   ;;  %v1692_v63 = vld [vmem:[%s2116_s20 + $0xa4] ss:$8 sps:$4 sm:$0xff]  }
  0x81   : > { %1110 = vmatpush1.bf16.msra.mxu0 %v1642_v27  ;;  %v1688_v59 = vld [vmem:[%s2116_s20 + $0x1b4] ss:$8 sps:$4 sm:$0xff]   ;;  %v1694_v0 = vld [vmem:[%s2116_s20 + $0x1a4] ss:$8 sps:$4 sm:$0xff]   ;;  %v1696_v1 = vld [vmem:[%s2116_s20 + $0xa0] ss:$8 sps:$4 sm:$0xff]  }
  0x82   : > { %1153 = vmatpush1.bf16.msra.mxu1 %v1643_v28  ;;  %1111 = vmatprep.subr.bf16.mxu0 %v1644_v29  ;;  %v1697_v2 = vld [vmem:[%s2116_s20 + $0x1a0] ss:$8 sps:$4 sm:$0xff]   ;;  %v1698_v3 = vld [vmem:[%s2116_s20 + $0x94] ss:$8 sps:$4 sm:$0xff]   ;;  %v1702_v5 = vld [vmem:[%s2116_s20 + $0x90] ss:$8 sps:$4 sm:$0xff]  }
  0x83   : > { %1154 = vmatprep.subr.bf16.mxu1 %v1646_v30  ;;  %v1700_v4 = vld [vmem:[%s2116_s20 + $0x194] ss:$8 sps:$4 sm:$0xff]   ;;  %v1703_v6 = vld [vmem:[%s2116_s20 + $0x190] ss:$8 sps:$4 sm:$0xff]   ;;  %v1704_v7 = vld [vmem:[%s2116_s20 + $0x84] ss:$8 sps:$4 sm:$0xff]  }
  0x84   : > { %v1706_v8 = vld [vmem:[%s2116_s20 + $0x184] ss:$8 sps:$4 sm:$0xff]   ;;  %v1708_v9 = vld [vmem:[%s2116_s20 + $0x80] ss:$8 sps:$4 sm:$0xff]   ;;  %v689_v14 = vld [vmem:[#allocation2 + $0x10] sm:$0xff]  ;;  %p1515_p6 = scmp.ne.s32.totalorder %s1786_s24, 8 }
  0x85   : > { %1112 = vmatpush1.bf16.msra.mxu0 %v1648_v31  ;;  %v1709_v10 = vld [vmem:[%s2116_s20 + $0x180] ss:$8 sps:$4 sm:$0xff]   ;;  %v691_v23 = vld [vmem:[#allocation2 + $0x18] sm:$0xff] }
  0x86   : > { %1155 = vmatpush1.bf16.msra.mxu1 %v1649_v32  ;;  %1113 = vmatprep.subr.bf16.mxu0 %v1650_v33  ;;  %v1710_v11 = vld [vmem:[%s2114_s22] ss:$16 sps:$4 sm:$0xff]   ;;  %v1713_v12 = vld [vmem:[%s2114_s22 + $0x8] ss:$16 sps:$4 sm:$0xff]  }
  0x87   : > { %1156 = vmatprep.subr.bf16.mxu1 %v1652_v34  ;;  %v690_v18 = vld [vmem:[#allocation2] sm:$0xff]  ;;  %v692_v28 = vld [vmem:[#allocation2 + $0x8] sm:$0xff] }
  0x89   : > { %1114 = vmatpush1.bf16.msra.mxu0 %v1654_v35 }
  0x8a   : > { %1157 = vmatpush1.bf16.msra.mxu1 %v1655_v36  ;;  %1115 = vmatprep.subr.bf16.mxu0 %v1656_v37 }
  0x8b   : > { %1158 = vmatprep.subr.bf16.mxu1 %v1658_v38 }
  0x8d   : > { %1116 = vmatpush1.bf16.msra.mxu0 %v1660_v39 }
  0x8e   : > { %1159 = vmatpush1.bf16.msra.mxu1 %v1661_v40  ;;  %1117 = vmatprep.subr.bf16.mxu0 %v1662_v41 }
  0x8f   : > { %1160 = vmatprep.subr.bf16.mxu1 %v1664_v42 }
  0x91   : > { %1118 = vmatpush2.bf16.msra.mxu0 %v1666_v43 }
  0x92   : > { %1161 = vmatpush2.bf16.msra.mxu1 %v1667_v44  ;;  %1119 = vmatprep.subr.bf16.mxu0 %v1668_v45 }
  0x93   : > { %1162 = vmatprep.subr.bf16.mxu1 %v1670_v46 }
  0x95   : > { %1120 = vmatpush2.bf16.msra.mxu0 %v1672_v47 }
  0x96   : > { %1163 = vmatpush2.bf16.msra.mxu1 %v1673_v48  ;;  %1121 = vmatprep.subr.bf16.mxu0 %v1674_v49 }
  0x97   : > { %1164 = vmatprep.subr.bf16.mxu1 %v1676_v50 }
  0x99   : > { %1122 = vmatpush2.bf16.msra.mxu0 %v1678_v51 }
  0x9a   : > { %1165 = vmatpush2.bf16.msra.mxu1 %v1679_v52  ;;  %1123 = vmatprep.subr.bf16.mxu0 %v1680_v53 }
  0x9b   : > { %1166 = vmatprep.subr.bf16.mxu1 %v1682_v54 }
  0x9d   : > { %1124 = vmatpush2.bf16.msra.mxu0 %v1684_v55 }
  0x9e   : > { %1167 = vmatpush2.bf16.msra.mxu1 %v1685_v57  ;;  %1125 = vmatprep.subr.bf16.mxu0 %v1686_v58 }
  0x9f   : > { %1168 = vmatprep.subr.bf16.mxu1 %v1688_v59 }
  0xa1   : > { %1126 = vmatpush2.bf16.msra.mxu0 %v1690_v61 }
  0xa2   : > { %1169 = vmatpush2.bf16.msra.mxu1 %v1691_v62  ;;  %1127 = vmatprep.subr.bf16.mxu0 %v1692_v63 }
  0xa3   : > { %1170 = vmatprep.subr.bf16.mxu1 %v1694_v0 }
  0xa5   : > { %1128 = vmatpush2.bf16.msra.mxu0 %v1696_v1 }
  0xa6   : > { %1171 = vmatpush2.bf16.msra.mxu1 %v1697_v2  ;;  %1129 = vmatprep.subr.bf16.mxu0 %v1698_v3 }
  0xa7   : > { %1172 = vmatprep.subr.bf16.mxu1 %v1700_v4 }
  0xa9   : > { %1130 = vmatpush2.bf16.msra.mxu0 %v1702_v5 }
  0xaa   : > { %1173 = vmatpush2.bf16.msra.mxu1 %v1703_v6  ;;  %1131 = vmatprep.subr.bf16.mxu0 %v1704_v7 }
  0xab   : > { %1174 = vmatprep.subr.bf16.mxu1 %v1706_v8 }
  0xad   : > { %1132 = vmatpush2.bf16.msra.mxu0 %v1708_v9 }
  0xae   : > { %1175 = vmatpush2.bf16.msra.mxu1 %v1709_v10 }
  0xb0   : > { %1134 = vmatmul.mubr.bf16.vlgmr.msra.gmra.mxu0 %v1710_v11 }
  0xb1   : > { %1177 = vmatmul.mubr.bf16.vlgmr.msra.gmra.mxu1 %v1713_v12 }
 0x170   : > { %v1135_v13 = vpop.f32.mrf.mxu0 }
 0x171   : > { %v1178_v15 = vpop.f32.mrf.mxu1 }
 0x172   : > { %v1179_v16 = vadd.f32 %v1178_v15, %v1135_v13  ;;  %v1137_v17 = vpop.f32.mrf.mxu0 }
 0x173   : > { %v1180_v19 = vpop.f32.mrf.mxu1 }
 0x174   : > { %v1187_v20 = vadd.f32 %v1179_v16, %v689_v14  ;;  %v1181_v21 = vadd.f32 %v1180_v19, %v1137_v17  ;;  %v1139_v22 = vpop.f32.mrf.mxu0 }
 0x175   : > { %v1182_v24 = vpop.f32.mrf.mxu1 }
 0x176   : > { %1191 = vst [vmem:[#allocation2 + $0x10] sm:$0xff] %v1187_v20  ;;  %v1188_v25 = vadd.f32 %v1181_v21, %v690_v18  ;;  %v1183_v26 = vadd.f32 %v1182_v24, %v1139_v22  ;;  %v1141_v27 = vpop.f32.mrf.mxu0 }
 0x177   : > { %v1184_v29 = vpop.f32.mrf.mxu1 }
 0x178   : > { %1192 = vst [vmem:[#allocation2] sm:$0xff] %v1188_v25  ;;  %v1189_v30 = vadd.f32 %v1183_v26, %v691_v23  ;;  %v1185_v31 = vadd.f32 %v1184_v29, %v1141_v27  ;;  %1198 = sbr.rel (%p1515_p6) target bundleno = 399 (0x18f), region = 132 }
 0x17a   : > { %1193 = vst [vmem:[#allocation2 + $0x18] sm:$0xff] %v1189_v30  ;;  %v1190_v32 = vadd.f32 %v1185_v31, %v692_v28 }
 0x17c   : > { %1194 = vst [vmem:[#allocation2 + $0x8] sm:$0xff] %v1190_v32 }
 0x17d   : > { %v1205_v33 = vlaneseq  ;;  %v1203_v35 = vld [vmem:[%s670_s29] sm:$0x3]  ;;  %v1199_v37 = vld [vmem:[#allocation2 + $0x10] sm:$0xff]  ;;  %v1236_v52 = vld [vmem:[%s2118_s18 + $0x8] sm:$0xff] }
 0x17e   : > { %v1219_v36 = vld [vmem:[%s675_s6] sm:$0x3]  ;;  %v1237_v53 = vld [vmem:[%s2118_s18 + $0x10] sm:$0xff]  ;;  %v1238_v54 = vld [vmem:[%s2118_s18 + $0x18] sm:$0xff] }
 0x17f   : > { %v1206_v34 = vshrl.u32 %v1205_v33, 7  ;;  %v1200_v40 = vld [vmem:[#allocation2] sm:$0xff] }
 0x180   : > { %v1235_v48 = vld [vmem:[%s2118_s18] sm:$0xff] }
 0x181   : > { %v1207_v38 = vsub.s32 0, %v1206_v34  ;;  %v1211_v39 = vsub.s32 1, %v1206_v34  ;;  %v1201_v41 = vld [vmem:[#allocation2 + $0x18] sm:$0xff] }
 0x183   : > { %v1202_v42 = vld [vmem:[#allocation2 + $0x8] sm:$0xff]  ;;  %v1208_v43 = vrot.slane %v1203_v35, %v1207_v38  ;;  %v1224_v44 = vrot.slane %v1219_v36, %v1207_v38  ;;  %v1212_v45 = vrot.slane %v1203_v35, %v1211_v39  ;;  %v1228_v46 = vrot.slane %v1219_v36, %v1211_v39 }
 0x185   : > { %v1215_v47 = vmul.f32 %v1208_v43, %v1199_v37  ;;  %v1216_v49 = vmul.f32 %v1212_v45, %v1200_v40  ;;  %v1217_v50 = vmul.f32 %v1208_v43, %v1201_v41  ;;  %v1218_v51 = vmul.f32 %v1212_v45, %v1202_v42 }
 0x187   : > { %v1231_v55 = vadd.f32 %v1224_v44, %v1215_v47  ;;  %v1232_v56 = vadd.f32 %v1228_v46, %v1216_v49  ;;  %v1233_v57 = vadd.f32 %v1224_v44, %v1217_v50  ;;  %v1234_v58 = vadd.f32 %v1228_v46, %v1218_v51 }
 0x189   : > { %v1239_v59 = vadd.f32 %v1235_v48, %v1231_v55  ;;  %v1240_v60 = vadd.f32 %v1236_v52, %v1232_v56  ;;  %v1241_v61 = vadd.f32 %v1237_v53, %v1233_v57  ;;  %v1242_v62 = vadd.f32 %v1238_v54, %v1234_v58 }
 0x18b   : > { %v1243_v63 = vmax.f32 %v1239_v59, 0.0  ;;  %v1244_v0 = vmax.f32 %v1240_v60, 0.0  ;;  %v1245_v1 = vmax.f32 %v1241_v61, 0.0  ;;  %v1246_v2 = vmax.f32 %v1242_v62, 0.0 }
 0x18d   : > { %1247 = vst [vmem:[%s2120_s23] sm:$0xff] %v1243_v63  ;;  %1248 = vst [vmem:[%s2120_s23 + $0x8] sm:$0xff] %v1244_v0 }
 0x18e   : > { %1249 = vst [vmem:[%s2120_s23 + $0x10] sm:$0xff] %v1245_v1  ;;  %1250 = vst [vmem:[%s2120_s23 + $0x18] sm:$0xff] %v1246_v2 }
 0x18f PF: > { %1257 = sbr.rel (!%p1939_p13) target bundleno = 407 (0x197), region = 136  ;;  %s1524_s24 = sshll.u32 (%p1939_p13), %s1790_s25, 4 }
 0x190   : > { %s1263_s11 = scalar_lea.vmem (%p1939_p13), %s2258_s5, %s1524_s24 }
 0x194   : > { %v1276_v3 = vld [vmem:[%s2120_s23] sm:$0xff]  ;;  %v1278_v4 = vld [vmem:[%s2120_s23 + $0x8] sm:$0xff] }
 0x195   : > { %v1280_v5 = vld [vmem:[%s2120_s23 + $0x10] sm:$0xff]  ;;  %v1282_v6 = vld [vmem:[%s2120_s23 + $0x18] sm:$0xff]  ;;  %1277 = vst [vmem:[%s1263_s11] sm:$0xff] %v1276_v3  ;;  %1279 = vst [vmem:[%s1263_s11 + $0x8] sm:$0xff] %v1278_v4 }
 0x196   : > { %1281 = vst [vmem:[%s1263_s11 + $0x20] sm:$0xff] %v1280_v5  ;;  %1283 = vst [vmem:[%s1263_s11 + $0x28] sm:$0xff] %v1282_v6 }
 0x197 PF: > { %s15_s28 = sadd.s32 1, %s1802_s28   ;;  %s2272_s22 = sld [smem:[#allocation7_spill]] }
 0x198   : > { %p12_p7 = scmp.ge.s32.totalorder %s15_s28, 20   ;;  %s2273_s23 = sld [smem:[#allocation10_spill]] }
 0x199   : > { %s2274_s8 = sld [smem:[#allocation8_spill]]  ;;  %s2276_s18 = smov %s1766_s19 }
 0x19a   : > { %s2275_s14 = sld [smem:[#allocation9_spill]]  ;;  %s2277_s19 = smov %s1931_s17 }
 0x19b   : > { %s2278_s20 = smov %s1774_s21  ;;  %s2279_s21 = smov %s1928_s16 }
 0x19c   : > { %s2280_s24 = smov %s1794_s26  ;;  %s2281_s25 = smov %s1798_s27 }
 0x19d   :  { %14 = sbr.rel (!%p12_p7) target bundleno = 8 (0x8), region = 212 }
 0x19f   : > { %s2282_s26 = smov %s2274_s8 }
 0x1a0   : > { %s2283_s27 = smov %s2275_s14 }

// kernel: resnet_encoder_forward.40
= control target key start
LH: loop header
LB: loop body
LE: loop exit
PB: predicated region body
PF: predicated region fallthrough
CT: control target
= control target key end

     0   :  { %s2111_s0 = inlined_call_operand.vmem [shape: bf16[16,4608], index: 0, kind: input, shape index: {}]   ;;  %s2112_s1 = inlined_call_operand.vmem [shape: bf16[4608,512], index: 1, kind: input, shape index: {}]   ;;  %s2113_s2 = inlined_call_operand.vmem [shape: f32[1,512], index: 2, kind: input, shape index: {}]   ;;  %s2114_s3 = inlined_call_operand.vmem [shape: f32[1,512], index: 3, kind: input, shape index: {}]   ;;  %s2115_s4 = inlined_call_operand.vmem [shape: f32[16,512], index: 4, kind: output, shape index: {}]  }
   0x1   :  { %2118 = sst [smem:[#allocation8_spill]] %s2111_s0 }
   0x2   :  { %2119 = sst [smem:[#allocation9_spill]] %s2112_s1 }
   0x3   :  { %s1716_s15 = smov 0   ;;  %s1718_s16 = smov 0  }
   0x4   :  { %s1720_s17 = smov 0   ;;  %s1722_s18 = smov 0  }
   0x5   :  { %s1724_s19 = smov 0   ;;  %s1726_s20 = smov 0  }
   0x6   :  { %s1728_s21 = smov 0   ;;  %s1730_s22 = smov 0  }
   0x7   :  { %s1732_s23 = smov 0   ;;  %s1734_s24 = smov 0  }
   0x8   :  { %s1736_s25 = smov 0  }
   0x9 LB: > { %s1315_s26 = sadd.s32 4294967295, %s1688_s25   ;;  %s26_s27 = sadd.s32 1, %s1680_s23  ;;  %s1688_s25 = sphi %s1736_s25, %s14_s25   ;;  %s1684_s24 = sphi %s1734_s24, %s2138_s24   ;;  %s1680_s23 = sphi %s1732_s23, %s2137_s23   ;;  %s1676_s22 = sphi %s1730_s22, %s2136_s22   ;;  %s1672_s21 = sphi %s1728_s21, %s2135_s21   ;;  %s1668_s20 = sphi %s1726_s20, %s2134_s20   ;;  %s1664_s19 = sphi %s1724_s19, %s2133_s19   ;;  %s1660_s18 = sphi %s1722_s18, %s2132_s18   ;;  %s1656_s17 = sphi %s1720_s17, %s2131_s17   ;;  %s1652_s16 = sphi %s1718_s16, %s2130_s16   ;;  %s1648_s15 = sphi %s1716_s15, %s2129_s15  }
   0xa   : > { %p27_p0 = scmp.ge.s32.totalorder %s26_s27, 9  ;;  %s29_s28 = sadd.s32 1, %s1684_s24 }
   0xb   : > { %s42_s29 = sadd.s32 1, %s1668_s20  ;;  %p49_p1 = scmp.ne.s32.totalorder %s1668_s20, %s1664_s19 }
   0xc   : > { %s2140_s27 = smov (%p27_p0, %s26_s27), 0  ;;  %s2142_s28 = smov (!%p27_p0, %s29_s28), %s1684_s24 }
   0xd   : > { %2120 = sst [smem:[#allocation6_spill]] %s2140_s27  ;;  %s38_s30 = ssub.s32 %s1680_s23, %s2140_s27 }
   0xe   : > { %p50_p2 = scmp.eq.s32.totalorder %s1688_s25, 0  ;;  %p31_p3 = scmp.ge.s32.totalorder %s2142_s28, 2 }
   0xf   : > { %p40_p4 = scmp.eq.s32.totalorder %s38_s30, 0  ;;  %s70_s6 = sadd.s32 1, %s1660_s18 }
  0x10   : > { %p1783_p5 = por %p50_p2, %p49_p1  ;;  %s2144_s28 = smov (%p31_p3, %s2142_s28), 0 }
  0x11   : > { %2122 = sst [smem:[#allocation7_spill]] %s2144_s28  ;;  %s66_s8 = ssub.s32 %s1684_s24, %s2144_s28 }
  0x12   : > { %s1791_s7 = scalar_select %p40_p4, %s1668_s20, %s42_s29  }
  0x13   : > { %p77_p6 = scmp.ne.s32.totalorder %s1660_s18, %s1656_s17  ;;  %s67_s9 = sor.u32 %s66_s8, %s38_s30 }
  0x14   : > { %p148_p7 = scmp.eq.s32.totalorder %s66_s8, 0  ;;  %p68_p8 = scmp.eq.s32.totalorder %s67_s9, 0 }
  0x15   : > { %p1797_p9 = por %p77_p6, %p50_p2  ;;  %s150_s11 = sadd.s32 1, %s1652_s16 }
  0x16   : > { %p160_p10 = scmp.ne.s32.totalorder %s1652_s16, %s1648_s15  ;;  %p161_p11 = scmp.eq.s32.totalorder %s1315_s26, 17 }
  0x17   : > { %s1805_s12 = scalar_select %p68_p8, %s1660_s18, %s70_s6  }
  0x18   : > { %s1808_s13 = scalar_select %p148_p7, %s1652_s16, %s150_s11  }
  0x19   : > { %p1810_p12 = por %p161_p11, %p160_p10  ;;  %p1318_p13 = scmp.ge.s32.totalorder %s1688_s25, 18 }
  0x1b   : > { %183 = sbr.rel (%p1318_p13) target bundleno = 86 (0x56), region = 16 }
  0x20   : > { %186 = sbr.rel (!%p1783_p5) target bundleno = 44 (0x2c), region = 20  ;;  %s188_s29 = sand.u32 (%p1783_p5), 1, %s1668_s20  }
  0x21   : > { %s1408_s30 = sshll.u32 (%p1783_p5), %s1680_s23, 4  ;;  %s1319_s8 = sshll.u32 (%p1783_p5), %s188_s29, 5 }
  0x22   : > { %s2125_s0 = sld [smem:[#allocation8_spill]] (%p1783_p5)  ;;  %s190_s26 = scalar_lea.vmem (%p1783_p5), [#allocation3], %s1319_s8 }
  0x28   : > { %s196_s11 = scalar_lea.vmem %s2125_s0, %s1408_s30 }
  0x29   : > { %v209_v0 = vld [vmem:[%s196_s11] sm:$0xff]  ;;  %v211_v1 = vld [vmem:[%s196_s11 + $0x8] sm:$0xff]  ;;  %v213_v2 = vld [vmem:[%s196_s11 + $0x90] sm:$0xff] }
  0x2a   : > { %210 = vst [vmem:[%s190_s26] sm:$0xff] %v209_v0  ;;  %212 = vst [vmem:[%s190_s26 + $0x8] sm:$0xff] %v211_v1  ;;  %v215_v3 = vld [vmem:[%s196_s11 + $0x98] sm:$0xff] }
  0x2b   : > { %214 = vst [vmem:[%s190_s26 + $0x10] sm:$0xff] %v213_v2  ;;  %216 = vst [vmem:[%s190_s26 + $0x18] sm:$0xff] %v215_v3 }
  0x2c PF: > { %222 = sbr.rel (!%p1797_p9) target bundleno = 86 (0x56), region = 43  ;;  %s224_s5 = sand.u32 (%p1797_p9), 1, %s1660_s18  }
  0x2d   : > { %s1324_s29 = sshll.u32 (%p1797_p9), %s1684_s24, 1  ;;  %s1322_s6 = sshll.u32 (%p1797_p9), %s224_s5, 9 }
  0x2e   : > { %s1409_s30 = sshll.u32 (%p1797_p9), %s1680_s23, 8  ;;  %s2126_s1 = sld [smem:[#allocation9_spill]] (%p1797_p9) }
  0x2f   : > { %s230_s9 = sadd.s32 (%p1797_p9), %s1409_s30, %s1324_s29  ;;  %s1835_s10 = scalar_lea.vmem (%p1797_p9), [#allocation4], %s1322_s6 }
  0x30   : > { %s1326_s0 = sshll.u32 (%p1797_p9), %s230_s9, 2 }
  0x34   : > { %s1830_s27 = scalar_lea.vmem %s2126_s1, %s1326_s0 }
  0x35   : > { %v387_v4 = vld [vmem:[%s1830_s27] sm:$0xff]  ;;  %v389_v5 = vld [vmem:[%s1830_s27 + $0x10] sm:$0xff] }
  0x36   : > { %v391_v6 = vld [vmem:[%s1830_s27 + $0x20] sm:$0xff]  ;;  %388 = vst [vmem:[%s1835_s10] sm:$0xff] %v387_v4  ;;  %390 = vst [vmem:[%s1835_s10 + $0x8] sm:$0xff] %v389_v5  ;;  %v393_v7 = vld [vmem:[%s1830_s27 + $0x30] sm:$0xff] }
  0x37   : > { %392 = vst [vmem:[%s1835_s10 + $0x10] sm:$0xff] %v391_v6  ;;  %v395_v8 = vld [vmem:[%s1830_s27 + $0x40] sm:$0xff]  ;;  %v397_v9 = vld [vmem:[%s1830_s27 + $0x50] sm:$0xff]  ;;  %394 = vst [vmem:[%s1835_s10 + $0x18] sm:$0xff] %v393_v7 }
  0x38   : > { %396 = vst [vmem:[%s1835_s10 + $0x20] sm:$0xff] %v395_v8  ;;  %398 = vst [vmem:[%s1835_s10 + $0x28] sm:$0xff] %v397_v9  ;;  %v399_v10 = vld [vmem:[%s1830_s27 + $0x60] sm:$0xff]  ;;  %v401_v11 = vld [vmem:[%s1830_s27 + $0x70] sm:$0xff] }
  0x39   : > { %v403_v12 = vld [vmem:[%s1830_s27 + $0x80] sm:$0xff]  ;;  %400 = vst [vmem:[%s1835_s10 + $0x30] sm:$0xff] %v399_v10  ;;  %402 = vst [vmem:[%s1835_s10 + $0x38] sm:$0xff] %v401_v11  ;;  %v405_v13 = vld [vmem:[%s1830_s27 + $0x90] sm:$0xff] }
  0x3a   : > { %404 = vst [vmem:[%s1835_s10 + $0x40] sm:$0xff] %v403_v12  ;;  %v407_v14 = vld [vmem:[%s1830_s27 + $0xa0] sm:$0xff]  ;;  %v409_v15 = vld [vmem:[%s1830_s27 + $0xb0] sm:$0xff]  ;;  %406 = vst [vmem:[%s1835_s10 + $0x48] sm:$0xff] %v405_v13 }
  0x3b   : > { %408 = vst [vmem:[%s1835_s10 + $0x50] sm:$0xff] %v407_v14  ;;  %410 = vst [vmem:[%s1835_s10 + $0x58] sm:$0xff] %v409_v15  ;;  %v411_v16 = vld [vmem:[%s1830_s27 + $0xc0] sm:$0xff]  ;;  %v413_v17 = vld [vmem:[%s1830_s27 + $0xd0] sm:$0xff] }
  0x3c   : > { %v415_v18 = vld [vmem:[%s1830_s27 + $0xe0] sm:$0xff]  ;;  %412 = vst [vmem:[%s1835_s10 + $0x60] sm:$0xff] %v411_v16  ;;  %414 = vst [vmem:[%s1835_s10 + $0x68] sm:$0xff] %v413_v17  ;;  %v417_v19 = vld [vmem:[%s1830_s27 + $0xf0] sm:$0xff] }
  0x3d   : > { %416 = vst [vmem:[%s1835_s10 + $0x70] sm:$0xff] %v415_v18  ;;  %v419_v20 = vld [vmem:[%s1830_s27 + $0x100] sm:$0xff]  ;;  %v421_v21 = vld [vmem:[%s1830_s27 + $0x110] sm:$0xff]  ;;  %418 = vst [vmem:[%s1835_s10 + $0x78] sm:$0xff] %v417_v19 }
  0x3e   : > { %420 = vst [vmem:[%s1835_s10 + $0x80] sm:$0xff] %v419_v20  ;;  %422 = vst [vmem:[%s1835_s10 + $0x88] sm:$0xff] %v421_v21  ;;  %v423_v22 = vld [vmem:[%s1830_s27 + $0x120] sm:$0xff]  ;;  %v425_v23 = vld [vmem:[%s1830_s27 + $0x130] sm:$0xff] }
  0x3f   : > { %v427_v24 = vld [vmem:[%s1830_s27 + $0x140] sm:$0xff]  ;;  %424 = vst [vmem:[%s1835_s10 + $0x90] sm:$0xff] %v423_v22  ;;  %426 = vst [vmem:[%s1835_s10 + $0x98] sm:$0xff] %v425_v23  ;;  %v429_v25 = vld [vmem:[%s1830_s27 + $0x150] sm:$0xff] }
  0x40   : > { %428 = vst [vmem:[%s1835_s10 + $0xa0] sm:$0xff] %v427_v24  ;;  %v431_v26 = vld [vmem:[%s1830_s27 + $0x160] sm:$0xff]  ;;  %v433_v27 = vld [vmem:[%s1830_s27 + $0x170] sm:$0xff]  ;;  %430 = vst [vmem:[%s1835_s10 + $0xa8] sm:$0xff] %v429_v25 }
  0x41   : > { %432 = vst [vmem:[%s1835_s10 + $0xb0] sm:$0xff] %v431_v26  ;;  %434 = vst [vmem:[%s1835_s10 + $0xb8] sm:$0xff] %v433_v27  ;;  %v435_v28 = vld [vmem:[%s1830_s27 + $0x180] sm:$0xff]  ;;  %v437_v29 = vld [vmem:[%s1830_s27 + $0x190] sm:$0xff] }
  0x42   : > { %v439_v30 = vld [vmem:[%s1830_s27 + $0x1a0] sm:$0xff]  ;;  %436 = vst [vmem:[%s1835_s10 + $0xc0] sm:$0xff] %v435_v28  ;;  %438 = vst [vmem:[%s1835_s10 + $0xc8] sm:$0xff] %v437_v29  ;;  %v441_v31 = vld [vmem:[%s1830_s27 + $0x1b0] sm:$0xff] }
  0x43   : > { %440 = vst [vmem:[%s1835_s10 + $0xd0] sm:$0xff] %v439_v30  ;;  %v443_v32 = vld [vmem:[%s1830_s27 + $0x1c0] sm:$0xff]  ;;  %v445_v33 = vld [vmem:[%s1830_s27 + $0x1d0] sm:$0xff]  ;;  %442 = vst [vmem:[%s1835_s10 + $0xd8] sm:$0xff] %v441_v31 }
  0x44   : > { %444 = vst [vmem:[%s1835_s10 + $0xe0] sm:$0xff] %v443_v32  ;;  %446 = vst [vmem:[%s1835_s10 + $0xe8] sm:$0xff] %v445_v33  ;;  %v447_v34 = vld [vmem:[%s1830_s27 + $0x1e0] sm:$0xff]  ;;  %v449_v35 = vld [vmem:[%s1830_s27 + $0x1f0] sm:$0xff] }
  0x45   : > { %v451_v36 = vld [vmem:[%s1830_s27 + $0x200] sm:$0xff]  ;;  %448 = vst [vmem:[%s1835_s10 + $0xf0] sm:$0xff] %v447_v34  ;;  %450 = vst [vmem:[%s1835_s10 + $0xf8] sm:$0xff] %v449_v35  ;;  %v453_v37 = vld [vmem:[%s1830_s27 + $0x210] sm:$0xff] }
  0x46   : > { %452 = vst [vmem:[%s1835_s10 + $0x100] sm:$0xff] %v451_v36  ;;  %v455_v38 = vld [vmem:[%s1830_s27 + $0x220] sm:$0xff]  ;;  %v457_v39 = vld [vmem:[%s1830_s27 + $0x230] sm:$0xff]  ;;  %454 = vst [vmem:[%s1835_s10 + $0x108] sm:$0xff] %v453_v37 }
  0x47   : > { %456 = vst [vmem:[%s1835_s10 + $0x110] sm:$0xff] %v455_v38  ;;  %458 = vst [vmem:[%s1835_s10 + $0x118] sm:$0xff] %v457_v39  ;;  %v459_v40 = vld [vmem:[%s1830_s27 + $0x240] sm:$0xff]  ;;  %v461_v41 = vld [vmem:[%s1830_s27 + $0x250] sm:$0xff] }
  0x48   : > { %v463_v42 = vld [vmem:[%s1830_s27 + $0x260] sm:$0xff]  ;;  %460 = vst [vmem:[%s1835_s10 + $0x120] sm:$0xff] %v459_v40  ;;  %462 = vst [vmem:[%s1835_s10 + $0x128] sm:$0xff] %v461_v41  ;;  %v465_v43 = vld [vmem:[%s1830_s27 + $0x270] sm:$0xff] }
  0x49   : > { %464 = vst [vmem:[%s1835_s10 + $0x130] sm:$0xff] %v463_v42  ;;  %v467_v44 = vld [vmem:[%s1830_s27 + $0x280] sm:$0xff]  ;;  %v469_v45 = vld [vmem:[%s1830_s27 + $0x290] sm:$0xff]  ;;  %466 = vst [vmem:[%s1835_s10 + $0x138] sm:$0xff] %v465_v43 }
  0x4a   : > { %468 = vst [vmem:[%s1835_s10 + $0x140] sm:$0xff] %v467_v44  ;;  %470 = vst [vmem:[%s1835_s10 + $0x148] sm:$0xff] %v469_v45  ;;  %v471_v46 = vld [vmem:[%s1830_s27 + $0x2a0] sm:$0xff]  ;;  %v473_v47 = vld [vmem:[%s1830_s27 + $0x2b0] sm:$0xff] }
  0x4b   : > { %v475_v48 = vld [vmem:[%s1830_s27 + $0x2c0] sm:$0xff]  ;;  %472 = vst [vmem:[%s1835_s10 + $0x150] sm:$0xff] %v471_v46  ;;  %474 = vst [vmem:[%s1835_s10 + $0x158] sm:$0xff] %v473_v47  ;;  %v477_v49 = vld [vmem:[%s1830_s27 + $0x2d0] sm:$0xff] }
  0x4c   : > { %476 = vst [vmem:[%s1835_s10 + $0x160] sm:$0xff] %v475_v48  ;;  %v479_v50 = vld [vmem:[%s1830_s27 + $0x2e0] sm:$0xff]  ;;  %v481_v51 = vld [vmem:[%s1830_s27 + $0x2f0] sm:$0xff]  ;;  %478 = vst [vmem:[%s1835_s10 + $0x168] sm:$0xff] %v477_v49 }
  0x4d   : > { %480 = vst [vmem:[%s1835_s10 + $0x170] sm:$0xff] %v479_v50  ;;  %482 = vst [vmem:[%s1835_s10 + $0x178] sm:$0xff] %v481_v51  ;;  %v483_v52 = vld [vmem:[%s1830_s27 + $0x300] sm:$0xff]  ;;  %v485_v53 = vld [vmem:[%s1830_s27 + $0x310] sm:$0xff] }
  0x4e   : > { %v487_v54 = vld [vmem:[%s1830_s27 + $0x320] sm:$0xff]  ;;  %484 = vst [vmem:[%s1835_s10 + $0x180] sm:$0xff] %v483_v52  ;;  %486 = vst [vmem:[%s1835_s10 + $0x188] sm:$0xff] %v485_v53  ;;  %v489_v55 = vld [vmem:[%s1830_s27 + $0x330] sm:$0xff] }
  0x4f   : > { %488 = vst [vmem:[%s1835_s10 + $0x190] sm:$0xff] %v487_v54  ;;  %v491_v56 = vld [vmem:[%s1830_s27 + $0x340] sm:$0xff]  ;;  %v493_v57 = vld [vmem:[%s1830_s27 + $0x350] sm:$0xff]  ;;  %490 = vst [vmem:[%s1835_s10 + $0x198] sm:$0xff] %v489_v55 }
  0x50   : > { %492 = vst [vmem:[%s1835_s10 + $0x1a0] sm:$0xff] %v491_v56  ;;  %494 = vst [vmem:[%s1835_s10 + $0x1a8] sm:$0xff] %v493_v57  ;;  %v495_v58 = vld [vmem:[%s1830_s27 + $0x360] sm:$0xff]  ;;  %v497_v59 = vld [vmem:[%s1830_s27 + $0x370] sm:$0xff] }
  0x51   : > { %v499_v60 = vld [vmem:[%s1830_s27 + $0x380] sm:$0xff]  ;;  %496 = vst [vmem:[%s1835_s10 + $0x1b0] sm:$0xff] %v495_v58  ;;  %498 = vst [vmem:[%s1835_s10 + $0x1b8] sm:$0xff] %v497_v59  ;;  %v501_v61 = vld [vmem:[%s1830_s27 + $0x390] sm:$0xff] }
  0x52   : > { %500 = vst [vmem:[%s1835_s10 + $0x1c0] sm:$0xff] %v499_v60  ;;  %v503_v62 = vld [vmem:[%s1830_s27 + $0x3a0] sm:$0xff]  ;;  %v505_v63 = vld [vmem:[%s1830_s27 + $0x3b0] sm:$0xff]  ;;  %502 = vst [vmem:[%s1835_s10 + $0x1c8] sm:$0xff] %v501_v61 }
  0x53   : > { %504 = vst [vmem:[%s1835_s10 + $0x1d0] sm:$0xff] %v503_v62  ;;  %506 = vst [vmem:[%s1835_s10 + $0x1d8] sm:$0xff] %v505_v63  ;;  %v507_v0 = vld [vmem:[%s1830_s27 + $0x3c0] sm:$0xff]  ;;  %v509_v1 = vld [vmem:[%s1830_s27 + $0x3d0] sm:$0xff] }
  0x54   : > { %v511_v2 = vld [vmem:[%s1830_s27 + $0x3e0] sm:$0xff]  ;;  %508 = vst [vmem:[%s1835_s10 + $0x1e0] sm:$0xff] %v507_v0  ;;  %510 = vst [vmem:[%s1835_s10 + $0x1e8] sm:$0xff] %v509_v1  ;;  %v513_v3 = vld [vmem:[%s1830_s27 + $0x3f0] sm:$0xff] }
  0x55   : > { %512 = vst [vmem:[%s1835_s10 + $0x1f0] sm:$0xff] %v511_v2  ;;  %514 = vst [vmem:[%s1835_s10 + $0x1f8] sm:$0xff] %v513_v3 }
  0x56 PF: > { %p1327_p0 = scmp.ge.s32.totalorder %s1688_s25, 1  ;;  %p535_p1 = scmp.lt.s32.totalorder %s1688_s25, 19 }
  0x58   : > { %p536_p2 = pnand %p1327_p0, %p535_p1 }
  0x59   : > { %s542_s0 = sand.u32 (!%p536_p2), 1, %s1664_s19   ;;  %s549_s28 = sand.u32 (!%p536_p2), 1, %s1656_s17  }
  0x5a   : > { %539 = sbr.rel (%p536_p2) target bundleno = 399 (0x18f), region = 89  ;;  %s1328_s11 = sshll.u32 (!%p536_p2), %s542_s0, 5 }
  0x5b   : > { %s1329_s26 = sshll.u32 (!%p536_p2), %s549_s28, 9  ;;  %s582_s5 = sand.u32 (!%p536_p2), 1, %s1648_s15  }
  0x5c   : > { %s1331_s29 = sshll.u32 (!%p536_p2), %s1676_s22, 1  ;;  %s1330_s27 = sshll.u32 (!%p536_p2), %s582_s5, 5 }
  0x5d   : > { %p590_p3 = scmp.lt.s32.totalorder (!%p536_p2), %s1331_s29, 3  ;;  %s1978_s19 = scalar_lea.vmem (!%p536_p2), [#allocation3], %s1328_s11 }
  0x5e   : > { %s1980_s17 = scalar_lea.vmem (!%p536_p2), [#allocation4], %s1329_s26  ;;  %s1982_s15 = scalar_lea.vmem (!%p536_p2), [#allocation5], %s1330_s27 }
  0x5f   : > { %s2146_s29 = smov (!%p590_p3, %s1331_s29), 3  ;;  %p1333_p4 = scmp.ne.s32.totalorder %s1672_s21, 0 }
  0x60   : > { %s592_s9 = scalar_lea.vmem %s2113_s2, %s2146_s29  ;;  %s597_s1 = scalar_lea.vmem %s2114_s3, %s2146_s29 }
  0x61   : > { %604 = sbr.rel (%p1333_p4) target bundleno = 105 (0x69), region = 101 }
  0x66   : > { %v1690_v4 = vmov 0.0  }
  0x67   : > { %605 = vst [vmem:[#allocation2 + $0x10] sm:$0xff] %v1690_v4  ;;  %606 = vst [vmem:[#allocation2] sm:$0xff] %v1690_v4 }
  0x68   : > { %607 = vst [vmem:[#allocation2 + $0x18] sm:$0xff] %v1690_v4  ;;  %608 = vst [vmem:[#allocation2 + $0x8] sm:$0xff] %v1690_v4 }
  0x69 PF: > { %v1500_v5 = vld [vmem:[%s1980_s17 + $0x74] ss:$8 sps:$4 sm:$0xff]   ;;  %v1504_v7 = vld [vmem:[%s1980_s17 + $0x70] ss:$8 sps:$4 sm:$0xff]   ;;  %v1506_v9 = vld [vmem:[%s1980_s17 + $0x64] ss:$8 sps:$4 sm:$0xff]  }
  0x6a   : > { %v1502_v6 = vld [vmem:[%s1980_s17 + $0x174] ss:$8 sps:$4 sm:$0xff]   ;;  %1021 = vmatprep.subr.bf16.mxu0 %v1500_v5  ;;  %v1505_v8 = vld [vmem:[%s1980_s17 + $0x170] ss:$8 sps:$4 sm:$0xff]   ;;  %v1508_v10 = vld [vmem:[%s1980_s17 + $0x164] ss:$8 sps:$4 sm:$0xff]  }
  0x6b   : > { %1064 = vmatprep.subr.bf16.mxu1 %v1502_v6  ;;  %1022 = vmatpush1.bf16.msra.mxu0 %v1504_v7  ;;  %v1510_v11 = vld [vmem:[%s1980_s17 + $0x60] ss:$8 sps:$4 sm:$0xff]   ;;  %v1512_v13 = vld [vmem:[%s1980_s17 + $0x54] ss:$8 sps:$4 sm:$0xff]   ;;  %v1516_v15 = vld [vmem:[%s1980_s17 + $0x50] ss:$8 sps:$4 sm:$0xff]  }
  0x6c   : > { %1065 = vmatpush1.bf16.msra.mxu1 %v1505_v8  ;;  %1023 = vmatprep.subr.bf16.mxu0 %v1506_v9  ;;  %v1511_v12 = vld [vmem:[%s1980_s17 + $0x160] ss:$8 sps:$4 sm:$0xff]   ;;  %v1514_v14 = vld [vmem:[%s1980_s17 + $0x154] ss:$8 sps:$4 sm:$0xff]   ;;  %v1517_v16 = vld [vmem:[%s1980_s17 + $0x150] ss:$8 sps:$4 sm:$0xff]  }
  0x6d   : > { %1066 = vmatprep.subr.bf16.mxu1 %v1508_v10  ;;  %v1518_v17 = vld [vmem:[%s1980_s17 + $0x44] ss:$8 sps:$4 sm:$0xff]   ;;  %v1522_v19 = vld [vmem:[%s1980_s17 + $0x40] ss:$8 sps:$4 sm:$0xff]   ;;  %v1524_v21 = vld [vmem:[%s1980_s17 + $0x34] ss:$8 sps:$4 sm:$0xff]  }
  0x6e   : > { %v1520_v18 = vld [vmem:[%s1980_s17 + $0x144] ss:$8 sps:$4 sm:$0xff]   ;;  %v1523_v20 = vld [vmem:[%s1980_s17 + $0x140] ss:$8 sps:$4 sm:$0xff]   ;;  %v1526_v22 = vld [vmem:[%s1980_s17 + $0x134] ss:$8 sps:$4 sm:$0xff]  }
  0x6f   : > { %1024 = vmatpush1.bf16.msra.mxu0 %v1510_v11  ;;  %v1528_v23 = vld [vmem:[%s1980_s17 + $0x30] ss:$8 sps:$4 sm:$0xff]   ;;  %v1530_v25 = vld [vmem:[%s1980_s17 + $0x24] ss:$8 sps:$4 sm:$0xff]   ;;  %v1534_v27 = vld [vmem:[%s1980_s17 + $0x20] ss:$8 sps:$4 sm:$0xff]  }
  0x70   : > { %1067 = vmatpush1.bf16.msra.mxu1 %v1511_v12  ;;  %1025 = vmatprep.subr.bf16.mxu0 %v1512_v13  ;;  %v1529_v24 = vld [vmem:[%s1980_s17 + $0x130] ss:$8 sps:$4 sm:$0xff]   ;;  %v1532_v26 = vld [vmem:[%s1980_s17 + $0x124] ss:$8 sps:$4 sm:$0xff]   ;;  %v1535_v28 = vld [vmem:[%s1980_s17 + $0x120] ss:$8 sps:$4 sm:$0xff]  }
  0x71   : > { %1068 = vmatprep.subr.bf16.mxu1 %v1514_v14  ;;  %v1536_v29 = vld [vmem:[%s1980_s17 + $0x14] ss:$8 sps:$4 sm:$0xff]   ;;  %v1540_v31 = vld [vmem:[%s1980_s17 + $0x10] ss:$8 sps:$4 sm:$0xff]   ;;  %v1542_v33 = vld [vmem:[%s1980_s17 + $0x4] ss:$8 sps:$4 sm:$0xff]  }
  0x72   : > { %v1538_v30 = vld [vmem:[%s1980_s17 + $0x114] ss:$8 sps:$4 sm:$0xff]   ;;  %v1541_v32 = vld [vmem:[%s1980_s17 + $0x110] ss:$8 sps:$4 sm:$0xff]   ;;  %v1544_v34 = vld [vmem:[%s1980_s17 + $0x104] ss:$8 sps:$4 sm:$0xff]  }
  0x73   : > { %1026 = vmatpush1.bf16.msra.mxu0 %v1516_v15  ;;  %v1546_v35 = vld [vmem:[%s1980_s17] ss:$8 sps:$4 sm:$0xff]   ;;  %v1548_v37 = vld [vmem:[%s1980_s17 + $0xf4] ss:$8 sps:$4 sm:$0xff]   ;;  %v1552_v39 = vld [vmem:[%s1980_s17 + $0xf0] ss:$8 sps:$4 sm:$0xff]  }
  0x74   : > { %1069 = vmatpush1.bf16.msra.mxu1 %v1517_v16  ;;  %1027 = vmatprep.subr.bf16.mxu0 %v1518_v17  ;;  %v1547_v36 = vld [vmem:[%s1980_s17 + $0x100] ss:$8 sps:$4 sm:$0xff]   ;;  %v1550_v38 = vld [vmem:[%s1980_s17 + $0x1f4] ss:$8 sps:$4 sm:$0xff]   ;;  %v1553_v40 = vld [vmem:[%s1980_s17 + $0x1f0] ss:$8 sps:$4 sm:$0xff]  }
  0x75   : > { %1070 = vmatprep.subr.bf16.mxu1 %v1520_v18  ;;  %v1554_v41 = vld [vmem:[%s1980_s17 + $0xe4] ss:$8 sps:$4 sm:$0xff]   ;;  %v1558_v43 = vld [vmem:[%s1980_s17 + $0xe0] ss:$8 sps:$4 sm:$0xff]   ;;  %v1560_v45 = vld [vmem:[%s1980_s17 + $0xd4] ss:$8 sps:$4 sm:$0xff]  }
  0x76   : > { %v1556_v42 = vld [vmem:[%s1980_s17 + $0x1e4] ss:$8 sps:$4 sm:$0xff]   ;;  %v1559_v44 = vld [vmem:[%s1980_s17 + $0x1e0] ss:$8 sps:$4 sm:$0xff]   ;;  %v1562_v46 = vld [vmem:[%s1980_s17 + $0x1d4] ss:$8 sps:$4 sm:$0xff]  }
  0x77   : > { %1028 = vmatpush1.bf16.msra.mxu0 %v1522_v19  ;;  %v1564_v47 = vld [vmem:[%s1980_s17 + $0xd0] ss:$8 sps:$4 sm:$0xff]   ;;  %v1566_v49 = vld [vmem:[%s1980_s17 + $0xc4] ss:$8 sps:$4 sm:$0xff]   ;;  %v1570_v51 = vld [vmem:[%s1980_s17 + $0xc0] ss:$8 sps:$4 sm:$0xff]  }
  0x78   : > { %1071 = vmatpush1.bf16.msra.mxu1 %v1523_v20  ;;  %1029 = vmatprep.subr.bf16.mxu0 %v1524_v21  ;;  %v1565_v48 = vld [vmem:[%s1980_s17 + $0x1d0] ss:$8 sps:$4 sm:$0xff]   ;;  %v1568_v50 = vld [vmem:[%s1980_s17 + $0x1c4] ss:$8 sps:$4 sm:$0xff]   ;;  %v1571_v53 = vld [vmem:[%s1980_s17 + $0x1c0] ss:$8 sps:$4 sm:$0xff]  }
  0x79   : > { %1072 = vmatprep.subr.bf16.mxu1 %v1526_v22  ;;  %v1598_v52 = vld [vmem:[%s1978_s19 + $0x4] ss:$16 sps:$4 sm:$0xff]   ;;  %v1601_v56 = vld [vmem:[%s1978_s19 + $0xc] ss:$16 sps:$4 sm:$0xff]   ;;  %v1576_v57 = vld [vmem:[%s1980_s17 + $0xb0] ss:$8 sps:$4 sm:$0xff]  }
  0x7a   : > { %v1572_v54 = vld [vmem:[%s1980_s17 + $0xb4] ss:$8 sps:$4 sm:$0xff]   ;;  %1053 = vmatprep.mubr.bf16.mxu0 %v1598_v52  ;;  %1096 = vmatprep.mubr.bf16.mxu1 %v1601_v56  ;;  %v1577_v58 = vld [vmem:[%s1980_s17 + $0x1b0] ss:$8 sps:$4 sm:$0xff]   ;;  %v1578_v59 = vld [vmem:[%s1980_s17 + $0xa4] ss:$8 sps:$4 sm:$0xff]  }
  0x7b   : > { %1030 = vmatpush1.bf16.msra.mxu0 %v1528_v23  ;;  %v1574_v55 = vld [vmem:[%s1980_s17 + $0x1b4] ss:$8 sps:$4 sm:$0xff]   ;;  %v1580_v60 = vld [vmem:[%s1980_s17 + $0x1a4] ss:$8 sps:$4 sm:$0xff]   ;;  %v1582_v61 = vld [vmem:[%s1980_s17 + $0xa0] ss:$8 sps:$4 sm:$0xff]  }
  0x7c   : > { %1073 = vmatpush1.bf16.msra.mxu1 %v1529_v24  ;;  %1031 = vmatprep.subr.bf16.mxu0 %v1530_v25  ;;  %v1583_v62 = vld [vmem:[%s1980_s17 + $0x1a0] ss:$8 sps:$4 sm:$0xff]   ;;  %v1584_v63 = vld [vmem:[%s1980_s17 + $0x94] ss:$8 sps:$4 sm:$0xff]   ;;  %v1588_v1 = vld [vmem:[%s1980_s17 + $0x90] ss:$8 sps:$4 sm:$0xff]  }
  0x7d   : > { %1074 = vmatprep.subr.bf16.mxu1 %v1532_v26  ;;  %v1586_v0 = vld [vmem:[%s1980_s17 + $0x194] ss:$8 sps:$4 sm:$0xff]   ;;  %v1589_v2 = vld [vmem:[%s1980_s17 + $0x190] ss:$8 sps:$4 sm:$0xff]   ;;  %v1590_v3 = vld [vmem:[%s1980_s17 + $0x84] ss:$8 sps:$4 sm:$0xff]  }
  0x7e   : > { %v1592_v4 = vld [vmem:[%s1980_s17 + $0x184] ss:$8 sps:$4 sm:$0xff]   ;;  %v1594_v5 = vld [vmem:[%s1980_s17 + $0x80] ss:$8 sps:$4 sm:$0xff]   ;;  %v609_v10 = vld [vmem:[#allocation2 + $0x10] sm:$0xff]  ;;  %p1402_p5 = scmp.ne.s32.totalorder %s1672_s21, 8 }
  0x7f   : > { %1032 = vmatpush1.bf16.msra.mxu0 %v1534_v27  ;;  %v1595_v6 = vld [vmem:[%s1980_s17 + $0x180] ss:$8 sps:$4 sm:$0xff]   ;;  %v611_v19 = vld [vmem:[#allocation2 + $0x18] sm:$0xff] }
  0x80   : > { %1075 = vmatpush1.bf16.msra.mxu1 %v1535_v28  ;;  %1033 = vmatprep.subr.bf16.mxu0 %v1536_v29  ;;  %v1596_v7 = vld [vmem:[%s1978_s19] ss:$16 sps:$4 sm:$0xff]   ;;  %v1599_v8 = vld [vmem:[%s1978_s19 + $0x8] ss:$16 sps:$4 sm:$0xff]  }
  0x81   : > { %1076 = vmatprep.subr.bf16.mxu1 %v1538_v30  ;;  %v610_v14 = vld [vmem:[#allocation2] sm:$0xff]  ;;  %v612_v24 = vld [vmem:[#allocation2 + $0x8] sm:$0xff] }
  0x83   : > { %1034 = vmatpush1.bf16.msra.mxu0 %v1540_v31 }
  0x84   : > { %1077 = vmatpush1.bf16.msra.mxu1 %v1541_v32  ;;  %1035 = vmatprep.subr.bf16.mxu0 %v1542_v33 }
  0x85   : > { %1078 = vmatprep.subr.bf16.mxu1 %v1544_v34 }
  0x87   : > { %1036 = vmatpush1.bf16.msra.mxu0 %v1546_v35 }
  0x88   : > { %1079 = vmatpush1.bf16.msra.mxu1 %v1547_v36  ;;  %1037 = vmatprep.subr.bf16.mxu0 %v1548_v37 }
  0x89   : > { %1080 = vmatprep.subr.bf16.mxu1 %v1550_v38 }
  0x8b   : > { %1038 = vmatpush2.bf16.msra.mxu0 %v1552_v39 }
  0x8c   : > { %1081 = vmatpush2.bf16.msra.mxu1 %v1553_v40  ;;  %1039 = vmatprep.subr.bf16.mxu0 %v1554_v41 }
  0x8d   : > { %1082 = vmatprep.subr.bf16.mxu1 %v1556_v42 }
  0x8f   : > { %1040 = vmatpush2.bf16.msra.mxu0 %v1558_v43 }
  0x90   : > { %1083 = vmatpush2.bf16.msra.mxu1 %v1559_v44  ;;  %1041 = vmatprep.subr.bf16.mxu0 %v1560_v45 }
  0x91   : > { %1084 = vmatprep.subr.bf16.mxu1 %v1562_v46 }
  0x93   : > { %1042 = vmatpush2.bf16.msra.mxu0 %v1564_v47 }
  0x94   : > { %1085 = vmatpush2.bf16.msra.mxu1 %v1565_v48  ;;  %1043 = vmatprep.subr.bf16.mxu0 %v1566_v49 }
  0x95   : > { %1086 = vmatprep.subr.bf16.mxu1 %v1568_v50 }
  0x97   : > { %1044 = vmatpush2.bf16.msra.mxu0 %v1570_v51 }
  0x98   : > { %1087 = vmatpush2.bf16.msra.mxu1 %v1571_v53  ;;  %1045 = vmatprep.subr.bf16.mxu0 %v1572_v54 }
  0x99   : > { %1088 = vmatprep.subr.bf16.mxu1 %v1574_v55 }
  0x9b   : > { %1046 = vmatpush2.bf16.msra.mxu0 %v1576_v57 }
  0x9c   : > { %1089 = vmatpush2.bf16.msra.mxu1 %v1577_v58  ;;  %1047 = vmatprep.subr.bf16.mxu0 %v1578_v59 }
  0x9d   : > { %1090 = vmatprep.subr.bf16.mxu1 %v1580_v60 }
  0x9f   : > { %1048 = vmatpush2.bf16.msra.mxu0 %v1582_v61 }
  0xa0   : > { %1091 = vmatpush2.bf16.msra.mxu1 %v1583_v62  ;;  %1049 = vmatprep.subr.bf16.mxu0 %v1584_v63 }
  0xa1   : > { %1092 = vmatprep.subr.bf16.mxu1 %v1586_v0 }
  0xa3   : > { %1050 = vmatpush2.bf16.msra.mxu0 %v1588_v1 }
  0xa4   : > { %1093 = vmatpush2.bf16.msra.mxu1 %v1589_v2  ;;  %1051 = vmatprep.subr.bf16.mxu0 %v1590_v3 }
  0xa5   : > { %1094 = vmatprep.subr.bf16.mxu1 %v1592_v4 }
  0xa7   : > { %1052 = vmatpush2.bf16.msra.mxu0 %v1594_v5 }
  0xa8   : > { %1095 = vmatpush2.bf16.msra.mxu1 %v1595_v6 }
  0xaa   : > { %1054 = vmatmul.mubr.bf16.vlgmr.msra.gmra.mxu0 %v1596_v7 }
  0xab   : > { %1097 = vmatmul.mubr.bf16.vlgmr.msra.gmra.mxu1 %v1599_v8 }
 0x16a   : > { %v1055_v9 = vpop.f32.mrf.mxu0 }
 0x16b   : > { %v1098_v11 = vpop.f32.mrf.mxu1 }
 0x16c   : > { %v1099_v12 = vadd.f32 %v1098_v11, %v1055_v9  ;;  %v1057_v13 = vpop.f32.mrf.mxu0 }
 0x16d   : > { %v1100_v15 = vpop.f32.mrf.mxu1 }
 0x16e   : > { %v1107_v16 = vadd.f32 %v1099_v12, %v609_v10  ;;  %v1101_v17 = vadd.f32 %v1100_v15, %v1057_v13  ;;  %v1059_v18 = vpop.f32.mrf.mxu0 }
 0x16f   : > { %v1102_v20 = vpop.f32.mrf.mxu1 }
 0x170   : > { %1111 = vst [vmem:[#allocation2 + $0x10] sm:$0xff] %v1107_v16  ;;  %v1108_v21 = vadd.f32 %v1101_v17, %v610_v14  ;;  %v1103_v22 = vadd.f32 %v1102_v20, %v1059_v18  ;;  %v1061_v23 = vpop.f32.mrf.mxu0 }
 0x171   : > { %v1104_v25 = vpop.f32.mrf.mxu1 }
 0x172   : > { %1112 = vst [vmem:[#allocation2] sm:$0xff] %v1108_v21  ;;  %v1109_v26 = vadd.f32 %v1103_v22, %v611_v19  ;;  %v1105_v27 = vadd.f32 %v1104_v25, %v1061_v23  ;;  %1118 = sbr.rel (%p1402_p5) target bundleno = 391 (0x187), region = 105 }
 0x174   : > { %1113 = vst [vmem:[#allocation2 + $0x18] sm:$0xff] %v1109_v26  ;;  %v1110_v28 = vadd.f32 %v1105_v27, %v612_v24 }
 0x176   : > { %1114 = vst [vmem:[#allocation2 + $0x8] sm:$0xff] %v1110_v28 }
 0x177   : > { %v1125_v29 = vlaneseq  ;;  %v1123_v31 = vld [vmem:[%s592_s9] sm:$0x3]  ;;  %v1119_v33 = vld [vmem:[#allocation2 + $0x10] sm:$0xff] }
 0x178   : > { %v1139_v32 = vld [vmem:[%s597_s1] sm:$0x3] }
 0x179   : > { %v1126_v30 = vshrl.u32 %v1125_v29, 7  ;;  %v1120_v36 = vld [vmem:[#allocation2] sm:$0xff] }
 0x17b   : > { %v1127_v34 = vsub.s32 0, %v1126_v30  ;;  %v1131_v35 = vsub.s32 1, %v1126_v30  ;;  %v1121_v37 = vld [vmem:[#allocation2 + $0x18] sm:$0xff] }
 0x17d   : > { %v1122_v38 = vld [vmem:[#allocation2 + $0x8] sm:$0xff]  ;;  %v1128_v39 = vrot.slane %v1123_v31, %v1127_v34  ;;  %v1144_v40 = vrot.slane %v1139_v32, %v1127_v34  ;;  %v1132_v41 = vrot.slane %v1123_v31, %v1131_v35  ;;  %v1148_v42 = vrot.slane %v1139_v32, %v1131_v35 }
 0x17f   : > { %v1135_v43 = vmul.f32 %v1128_v39, %v1119_v33  ;;  %v1136_v44 = vmul.f32 %v1132_v41, %v1120_v36  ;;  %v1137_v45 = vmul.f32 %v1128_v39, %v1121_v37  ;;  %v1138_v46 = vmul.f32 %v1132_v41, %v1122_v38 }
 0x181   : > { %v1151_v47 = vadd.f32 %v1144_v40, %v1135_v43  ;;  %v1152_v48 = vadd.f32 %v1148_v42, %v1136_v44  ;;  %v1153_v49 = vadd.f32 %v1144_v40, %v1137_v45  ;;  %v1154_v50 = vadd.f32 %v1148_v42, %v1138_v46 }
 0x183   : > { %v1155_v51 = vmax.f32 %v1151_v47, 0.0  ;;  %v1156_v52 = vmax.f32 %v1152_v48, 0.0  ;;  %v1157_v53 = vmax.f32 %v1153_v49, 0.0  ;;  %v1158_v54 = vmax.f32 %v1154_v50, 0.0 }
 0x185   : > { %1159 = vst [vmem:[%s1982_s15] sm:$0xff] %v1155_v51  ;;  %1160 = vst [vmem:[%s1982_s15 + $0x8] sm:$0xff] %v1156_v52 }
 0x186   : > { %1161 = vst [vmem:[%s1982_s15 + $0x10] sm:$0xff] %v1157_v53  ;;  %1162 = vst [vmem:[%s1982_s15 + $0x18] sm:$0xff] %v1158_v54 }
 0x187 PF: > { %1169 = sbr.rel (!%p1810_p12) target bundleno = 399 (0x18f), region = 109  ;;  %s1410_s1 = sshll.u32 (%p1810_p12), %s1676_s22, 4 }
 0x188   : > { %s1175_s29 = scalar_lea.vmem (%p1810_p12), %s2115_s4, %s1410_s1 }
 0x18c   : > { %v1188_v55 = vld [vmem:[%s1982_s15] sm:$0xff]  ;;  %v1190_v56 = vld [vmem:[%s1982_s15 + $0x8] sm:$0xff] }
 0x18d   : > { %v1192_v57 = vld [vmem:[%s1982_s15 + $0x10] sm:$0xff]  ;;  %v1194_v58 = vld [vmem:[%s1982_s15 + $0x18] sm:$0xff]  ;;  %1189 = vst [vmem:[%s1175_s29] sm:$0xff] %v1188_v55  ;;  %1191 = vst [vmem:[%s1175_s29 + $0x8] sm:$0xff] %v1190_v56 }
 0x18e   : > { %1193 = vst [vmem:[%s1175_s29 + $0x20] sm:$0xff] %v1192_v57  ;;  %1195 = vst [vmem:[%s1175_s29 + $0x28] sm:$0xff] %v1194_v58 }
 0x18f PF: > { %s14_s25 = sadd.s32 1, %s1688_s25   ;;  %s2127_s14 = sld [smem:[#allocation6_spill]] }
 0x190   : > { %p11_p6 = scmp.ge.s32.totalorder %s14_s25, 20   ;;  %s2128_s27 = sld [smem:[#allocation7_spill]] }
 0x191   : > { %s2129_s15 = smov %s1652_s16  ;;  %s2130_s16 = smov %s1808_s13 }
 0x192   : > { %s2131_s17 = smov %s1660_s18  ;;  %s2132_s18 = smov %s1805_s12 }
 0x193   : > { %s2133_s19 = smov %s1668_s20  ;;  %s2134_s20 = smov %s1791_s7 }
 0x194   : > { %s2135_s21 = smov %s1680_s23  ;;  %s2136_s22 = smov %s1684_s24 }
 0x195   : > { %s2137_s23 = smov %s2127_s14  ;;  %13 = sbr.rel (!%p11_p6) target bundleno = 9 (0x9), region = 177 }
 0x196   : > { %s2138_s24 = smov %s2128_s27 }

</bundles_post_ra>
